<compile_context>
chip_gen: v7x
topology: tpu7x:2x2x1
jax: 0.10.0
libtpu: 0.0.40
codegen_flags: <defaults>
</compile_context>

<pallas_src>
import jax
import jax.numpy as jnp
from jax import lax
from jax.experimental import pallas as pl
from jax.experimental.pallas import tpu as pltpu

LN_EPS = 1e-5  # torch.nn.LayerNorm default


def _layernorm(h, g, b):
    mu = jnp.mean(h, axis=-1, keepdims=True)
    var = jnp.mean((h - mu) ** 2, axis=-1, keepdims=True)
    return (h - mu) * lax.rsqrt(var + LN_EPS) * g + b


def mlm_kernel(
    tok_ref,              # (Bb, T, E) f32  gathered token embeddings
    pos_ref,              # (T, E)     f32  positional embeddings (rows 0..T-1)
    wqkv_ref,             # (E, 3E)    bf16 fused q|k|v projection
    wproj_ref,            # (E, E)     bf16
    bproj_ref,            # (1, E)     f32
    ln1g_ref, ln1b_ref,   # (1, E)     f32
    ln2g_ref, ln2b_ref,   # (1, E)     f32
    w1_ref, b1_ref,       # (E, 4E) bf16, (1, 4E) f32
    w2_ref, b2_ref,       # (4E, E) bf16, (1, E)  f32
    lnfg_ref, lnfb_ref,   # (1, E)     f32
    whead_ref,            # (E, Vt)    bf16 vocab tile of the LM head
    logits_ref,           # (Bb, T, Vt) bf16 output tile
    h_ref,                # (Bb*T, E)  bf16 VMEM scratch: ln_f(x), reused per V tile
):
    vi = pl.program_id(1)
    Bb, T, E = tok_ref.shape

    # ---- encoder: run once per batch block (first vocab tile only) ----
    @pl.when(vi == 0)
    def _encoder():
        scale = float(E) ** -0.5  # PyTorch: C ** (-0.5), C = n_embd (n_head = 1)

        x = tok_ref[...] + pos_ref[...][None, :, :]          # (Bb, T, E) f32 residual

        # x = x + sa(ln1(x))
        h = _layernorm(x, ln1g_ref[0], ln1b_ref[0])
        h2d = h.reshape(Bb * T, E).astype(jnp.bfloat16)
        qkv = jnp.dot(h2d, wqkv_ref[...],
                      preferred_element_type=jnp.float32)    # (Bb*T, 3E) f32
        qkv = qkv.reshape(Bb, T, 3 * E)
        q = qkv[:, :, :E].astype(jnp.bfloat16)
        k = qkv[:, :, E:2 * E].astype(jnp.bfloat16)
        v = qkv[:, :, 2 * E:].astype(jnp.bfloat16)

        # scores: batched q @ k^T without an explicit transpose
        wei = lax.dot_general(q, k, (((2,), (2,)), ((0,), (0,))),
                              preferred_element_type=jnp.float32) * scale  # (Bb,T,T)
        wei = wei - jnp.max(wei, axis=-1, keepdims=True)     # encoder: no causal mask
        p = jnp.exp(wei)
        # approx reciprocal (EUP slot): ~1e-3 relative error vs exact softmax,
        # well inside the bf16-matmul tolerance.
        p = p * pl.reciprocal(jnp.sum(p, axis=-1, keepdims=True), approx=True)

        attn = lax.dot_general(p.astype(jnp.bfloat16), v,
                               (((2,), (1,)), ((0,), (0,))),
                               preferred_element_type=jnp.float32)         # (Bb,T,E)
        sa = jnp.dot(attn.reshape(Bb * T, E).astype(jnp.bfloat16),
                     wproj_ref[...],
                     preferred_element_type=jnp.float32) + bproj_ref[0]
        x2d = x.reshape(Bb * T, E) + sa

        # x = x + ffwd(ln2(x))
        h = _layernorm(x2d, ln2g_ref[0], ln2b_ref[0])
        f = jnp.dot(h.astype(jnp.bfloat16), w1_ref[...],
                    preferred_element_type=jnp.float32) + b1_ref[0]
        f = jnp.maximum(f, 0.0)                               # ReLU
        f = jnp.dot(f.astype(jnp.bfloat16), w2_ref[...],
                    preferred_element_type=jnp.float32) + b2_ref[0]
        x2d = x2d + f

        # ln_f, stashed for every vocab tile of this batch block
        h = _layernorm(x2d, lnfg_ref[0], lnfb_ref[0])
        h_ref[...] = h.astype(jnp.bfloat16)

    # ---- LM head: one vocab tile per grid step, bf16 logits out ----
    Vt = whead_ref.shape[1]
    logits = jnp.dot(h_ref[...], whead_ref[...],
                     preferred_element_type=jnp.float32)      # (Bb*T, Vt) f32
    logits_ref[...] = logits.reshape(Bb, T, Vt).astype(logits_ref.dtype)


def init_params(key, vocab_size, block_size, n_embd):
    """Deterministic synthetic parameters (shapes match the PyTorch module)."""
    ks = jax.random.split(key, 10)
    E = n_embd
    return {
        "tok_emb": jax.random.normal(ks[0], (vocab_size, E), jnp.float32) * 0.02,
        "pos_emb": jax.random.normal(ks[1], (block_size, E), jnp.float32) * 0.02,
        # attention (n_head = 1, head_size = n_embd); stored as (in, out)
        "wq": jax.random.normal(ks[2], (E, E), jnp.float32) * 0.02,
        "wk": jax.random.normal(ks[3], (E, E), jnp.float32) * 0.02,
        "wv": jax.random.normal(ks[4], (E, E), jnp.float32) * 0.02,
        "wproj": jax.random.normal(ks[5], (E, E), jnp.float32) * 0.02,
        "bproj": jnp.zeros((1, E), jnp.float32),
        "ln1_g": jnp.ones((1, E), jnp.float32),
        "ln1_b": jnp.zeros((1, E), jnp.float32),
        "ln2_g": jnp.ones((1, E), jnp.float32),
        "ln2_b": jnp.zeros((1, E), jnp.float32),
        # feedforward
        "w1": jax.random.normal(ks[6], (E, 4 * E), jnp.float32) * 0.02,
        "b1": jnp.zeros((1, 4 * E), jnp.float32),
        "w2": jax.random.normal(ks[7], (4 * E, E), jnp.float32) * 0.02,
        "b2": jnp.zeros((1, E), jnp.float32),
        "lnf_g": jnp.ones((1, E), jnp.float32),
        "lnf_b": jnp.zeros((1, E), jnp.float32),
        # LM head (bias=False), stored as (in, out) = (E, V)
        "whead": jax.random.normal(ks[8], (E, vocab_size), jnp.float32) * 0.02,
    }


def prepare_params(params):
    """One-time weight prep (run once, outside the per-call forward):
    fuse q|k|v, cast MXU weights to bf16, pad the LM head so the vocab
    dimension is a multiple of 128."""
    bf16 = jnp.bfloat16
    V = params["whead"].shape[1]
    Vpad = ((V + 127) // 128) * 128
    whead = params["whead"].astype(bf16)
    if Vpad != V:
        whead = jnp.pad(whead, ((0, 0), (0, Vpad - V)))   # zero cols, sliced off later
    return {
        "tok_emb": params["tok_emb"],
        "pos_emb": params["pos_emb"],
        "wqkv": jnp.concatenate([params["wq"], params["wk"], params["wv"]],
                                axis=1).astype(bf16),
        "wproj": params["wproj"].astype(bf16),
        "bproj": params["bproj"],
        "ln1_g": params["ln1_g"], "ln1_b": params["ln1_b"],
        "ln2_g": params["ln2_g"], "ln2_b": params["ln2_b"],
        "w1": params["w1"].astype(bf16), "b1": params["b1"],
        "w2": params["w2"].astype(bf16), "b2": params["b2"],
        "lnf_g": params["lnf_g"], "lnf_b": params["lnf_b"],
        "whead": whead,
    }


def _pick_block(total, target):
    """Largest divisor of `total` that is <= target (and >= 1)."""
    d = int(min(max(target, 1), total))
    while total % d:
        d -= 1
    return d


_VMEM_BUDGET = 40 * 2**20     # stay comfortably under v7x's 64 MiB physical VMEM


def _vmem_estimate(Bb, T, E, Vt, inv_weight_bytes):
    """Rough VMEM footprint with default double-buffering on every BlockSpec."""
    buf = 2
    tok = Bb * T * E * 4 * buf
    pos = T * E * 4 * buf
    inv = inv_weight_bytes * buf      # grid-invariant weights still get 2 buffers
    whead = E * Vt * 2 * buf
    logits = Bb * T * Vt * 2 * buf    # bf16 output tile
    scratch = Bb * T * E * 2
    return tok + pos + inv + whead + logits + scratch


def _pick_vocab_tile(Vpad, target, fits):
    """Largest divisor of Vpad that is a multiple of 128, <= target, and fits."""
    n = Vpad // 128
    for m in range(n, 0, -1):
        if n % m:
            continue
        vt = m * 128
        if vt <= target and fits(vt):
            return vt
    return 128


@jax.jit
def masked_lm_forward(prep, input_ids):
    B, T = input_ids.shape
    V = prep["tok_emb"].shape[0]          # true vocab size (static)
    E = prep["tok_emb"].shape[1]
    Vpad = prep["whead"].shape[1]         # padded to a multiple of 128

    # Fold batch elements into the MXU M dimension (target ~512 rows per step),
    # but keep >= 2 batch blocks so the "parallel" axis can feed both v7x cores.
    Bb = _pick_block(B, max(1, 512 // T))
    if B >= 2:
        Bb = min(Bb, _pick_block(B, B // 2))

    weights = [
        prep["wqkv"], prep["wproj"], prep["bproj"],
        prep["ln1_g"], prep["ln1_b"], prep["ln2_g"], prep["ln2_b"],
        prep["w1"], prep["b1"], prep["w2"], prep["b2"],
        prep["lnf_g"], prep["lnf_b"],
    ]
    inv_bytes = sum(int(w.size) * w.dtype.itemsize for w in weights)

    # Large vocab tiles (<= 2048 cols) amortize per-grid-step overhead while
    # staying inside the VMEM budget.
    Vt = _pick_vocab_tile(
        Vpad, 2048,
        lambda vt: _vmem_estimate(Bb, T, E, vt, inv_bytes) <= _VMEM_BUDGET)
    vmem_limit = int(min(
        max(1.3 * _vmem_estimate(Bb, T, E, Vt, inv_bytes), 32 * 2**20),
        60 * 2**20))

    # TODO(synk): move this gather into the kernel (scalar-prefetched ids +
    # manual DMA from an HBM-resident tok_emb) to save one (B,T,E) round trip.
    tok_x = jnp.take(prep["tok_emb"], input_ids, axis=0)      # (B, T, E) f32
    pos_e = prep["pos_emb"][:T]                               # (T, E)    f32

    def _full(arr):
        return pl.BlockSpec(arr.shape, lambda bi, vi, n=arr.ndim: (0,) * n)

    # TODO(synk): grid-invariant weights could use pl.Buffered(1) (or a one-shot
    # manual DMA) to drop their second buffer on v7x at large E; at these shapes
    # the explicit vmem_limit budget above already covers double-buffering.
    in_specs = (
        [pl.BlockSpec((Bb, T, E), lambda bi, vi: (bi, 0, 0)),   # tok_x: per batch block
         pl.BlockSpec((T, E), lambda bi, vi: (0, 0))]           # pos_e: shared
        + [_full(w) for w in weights]                           # invariant weights
        + [pl.BlockSpec((E, Vt), lambda bi, vi: (0, vi))]       # whead: vocab tile
    )

    logits = pl.pallas_call(
        mlm_kernel,
        out_shape=jax.ShapeDtypeStruct((B, T, Vpad), jnp.bfloat16),
        grid=(B // Bb, Vpad // Vt),
        in_specs=in_specs,
        out_specs=pl.BlockSpec((Bb, T, Vt), lambda bi, vi: (bi, 0, vi)),
        scratch_shapes=[pltpu.VMEM((Bb * T, E), jnp.bfloat16)],
        compiler_params=pltpu.CompilerParams(
            dimension_semantics=("parallel", "arbitrary"),
            vmem_limit_bytes=vmem_limit),
    )(tok_x, pos_e, *weights, prep["whead"])

    if Vpad != V:
        logits = logits[..., :V]                              # drop padded vocab cols
    return logits


def masked_lm(prep, input_ids, labels=None):
    """Mirrors MaskedLanguageModel.forward: returns (logits, loss)."""
    logits = masked_lm_forward(prep, input_ids)
    loss = None
    if labels is not None:
        # TODO(synk): fuse CE (online logsumexp over vocab tiles + label gather)
        # into the kernel to skip the (B,T,V) logits store when only loss is needed.
        logp = jax.nn.log_softmax(logits.astype(jnp.float32), axis=-1)
        valid = labels != -100
        safe = jnp.where(valid, labels, 0)
        nll = -jnp.take_along_axis(logp, safe[..., None], axis=-1)[..., 0]
        loss = jnp.sum(jnp.where(valid, nll, 0.0)) / jnp.maximum(
            jnp.sum(valid.astype(jnp.float32)), 1.0)
    return logits, loss


def masked_lm_reference(params, input_ids):
    """Pure-JAX f32 reference mirroring the PyTorch forward (for validation)."""
    E = params["tok_emb"].shape[1]
    T = input_ids.shape[1]

    x = jnp.take(params["tok_emb"], input_ids, axis=0) + params["pos_emb"][:T][None]
    h = _layernorm(x, params["ln1_g"][0], params["ln1_b"][0])
    q = h @ params["wq"]
    k = h @ params["wk"]
    v = h @ params["wv"]
    wei = jnp.einsum("btd,bsd->bts", q, k) * float(E) ** -0.5
    p = jax.nn.softmax(wei, axis=-1)
    attn = jnp.einsum("bts,bsd->btd", p, v)
    x = x + (attn @ params["wproj"] + params["bproj"][0])
    h = _layernorm(x, params["ln2_g"][0], params["ln2_b"][0])
    f = jnp.maximum(h @ params["w1"] + params["b1"][0], 0.0)
    x = x + (f @ params["w2"] + params["b2"][0])
    h = _layernorm(x, params["lnf_g"][0], params["lnf_b"][0])
    return h @ params["whead"]


if __name__ == "__main__":
    # Small, MXU-friendly shapes consistent with the module (n_layer=1, n_head=1).
    B, T = 8, 64
    N_EMBD = 128
    BLOCK_SIZE = 64
    VOCAB = 2048           # multiple of 128, like the real 50304

    key = jax.random.PRNGKey(0)
    pkey, dkey, lkey = jax.random.split(key, 3)

    params = init_params(pkey, VOCAB, BLOCK_SIZE, N_EMBD)
    prep = prepare_params(params)   # one-time bf16 / fusion / padding prep
    input_ids = jax.random.randint(dkey, (B, T), 0, VOCAB, dtype=jnp.int32)
    labels = jax.random.randint(lkey, (B, T), 0, VOCAB, dtype=jnp.int32)
    labels = labels.at[:, 0].set(-100)  # exercise ignore_index

    logits, loss = masked_lm(prep, input_ids, labels)
    jax.block_until_ready(logits)
    jax.block_until_ready(loss)

    assert logits.shape == (B, T, VOCAB)
    logits_f32 = logits.astype(jnp.float32)
    assert bool(jnp.isfinite(logits_f32).all())
    assert bool(jnp.isfinite(loss))

    # Validate against the f32 reference (bf16 MXU inputs + bf16 logits -> loose tol).
    ref = masked_lm_reference(params, input_ids)
    max_err = float(jnp.max(jnp.abs(logits_f32 - ref)))
    assert max_err < 5e-2, f"max abs error vs reference: {max_err}"

    print("KERNEL_OK")
</pallas_src>

<mosaic_0001>
module attributes {stable_mosaic.version = 11 : i64} {
  func.func @mlm_kernel(%arg0: i32, %arg1: i32, %arg2: memref<4x64x128xf32, #tpu.memory_space<vmem>>, %arg3: memref<64x128xf32, #tpu.memory_space<vmem>>, %arg4: memref<128x384xbf16, #tpu.memory_space<vmem>>, %arg5: memref<128x128xbf16, #tpu.memory_space<vmem>>, %arg6: memref<1x128xf32, #tpu.memory_space<vmem>>, %arg7: memref<1x128xf32, #tpu.memory_space<vmem>>, %arg8: memref<1x128xf32, #tpu.memory_space<vmem>>, %arg9: memref<1x128xf32, #tpu.memory_space<vmem>>, %arg10: memref<1x128xf32, #tpu.memory_space<vmem>>, %arg11: memref<128x512xbf16, #tpu.memory_space<vmem>>, %arg12: memref<1x512xf32, #tpu.memory_space<vmem>>, %arg13: memref<512x128xbf16, #tpu.memory_space<vmem>>, %arg14: memref<1x128xf32, #tpu.memory_space<vmem>>, %arg15: memref<1x128xf32, #tpu.memory_space<vmem>>, %arg16: memref<1x128xf32, #tpu.memory_space<vmem>>, %arg17: memref<128x2048xbf16, #tpu.memory_space<vmem>>, %arg18: memref<4x64x2048xbf16, #tpu.memory_space<vmem>>, %arg19: memref<256x128xbf16, #tpu.memory_space<vmem>>) attributes {dimension_semantics = [#tpu.dimension_semantics<parallel>, #tpu.dimension_semantics<arbitrary>], iteration_bounds = array<i64: 2, 1>, scalar_prefetch = 0 : i64, scratch_operands = 1 : i64, tpu.core_type = #tpu.core_type<tc>, window_params = [{transform_indices = @transform_0, window_bounds = array<i64: 4, 64, 128>}, {pipeline_mode = #tpu.pipeline_mode<synchronous>, transform_indices = @transform_1, window_bounds = array<i64: 64, 128>}, {pipeline_mode = #tpu.pipeline_mode<synchronous>, transform_indices = @transform_2, window_bounds = array<i64: 128, 384>}, {pipeline_mode = #tpu.pipeline_mode<synchronous>, transform_indices = @transform_3, window_bounds = array<i64: 128, 128>}, {pipeline_mode = #tpu.pipeline_mode<synchronous>, transform_indices = @transform_4, window_bounds = array<i64: 1, 128>}, {pipeline_mode = #tpu.pipeline_mode<synchronous>, transform_indices = @transform_5, window_bounds = array<i64: 1, 128>}, {pipeline_mode = #tpu.pipeline_mode<synchronous>, transform_indices = @transform_6, window_bounds = array<i64: 1, 128>}, {pipeline_mode = #tpu.pipeline_mode<synchronous>, transform_indices = @transform_7, window_bounds = array<i64: 1, 128>}, {pipeline_mode = #tpu.pipeline_mode<synchronous>, transform_indices = @transform_8, window_bounds = array<i64: 1, 128>}, {pipeline_mode = #tpu.pipeline_mode<synchronous>, transform_indices = @transform_9, window_bounds = array<i64: 128, 512>}, {pipeline_mode = #tpu.pipeline_mode<synchronous>, transform_indices = @transform_10, window_bounds = array<i64: 1, 512>}, {pipeline_mode = #tpu.pipeline_mode<synchronous>, transform_indices = @transform_11, window_bounds = array<i64: 512, 128>}, {pipeline_mode = #tpu.pipeline_mode<synchronous>, transform_indices = @transform_12, window_bounds = array<i64: 1, 128>}, {pipeline_mode = #tpu.pipeline_mode<synchronous>, transform_indices = @transform_13, window_bounds = array<i64: 1, 128>}, {pipeline_mode = #tpu.pipeline_mode<synchronous>, transform_indices = @transform_14, window_bounds = array<i64: 1, 128>}, {transform_indices = @transform_15, window_bounds = array<i64: 128, 2048>}, {transform_indices = @transform_16, window_bounds = array<i64: 4, 64, 2048>}]} {
    %c0_i32 = arith.constant 0 : i32
    %0 = arith.cmpi eq, %arg1, %c0_i32 : i32
    %1 = arith.extui %0 : i1 to i32
    %c0_i32_0 = arith.constant 0 : i32
    %2 = arith.cmpi ne, %1, %c0_i32_0 : i32
    scf.if %2 {
      %c0_7 = arith.constant 0 : index
      %c0_8 = arith.constant 0 : index
      %c0_9 = arith.constant 0 : index
      %9 = vector.load %arg2[%c0_7, %c0_8, %c0_9] : memref<4x64x128xf32, #tpu.memory_space<vmem>>, vector<4x64x128xf32>
      %c0_10 = arith.constant 0 : index
      %c0_11 = arith.constant 0 : index
      %10 = vector.load %arg3[%c0_10, %c0_11] : memref<64x128xf32, #tpu.memory_space<vmem>>, vector<64x128xf32>
      %11 = vector.shape_cast %10 : vector<64x128xf32> to vector<1x64x128xf32>
      %12 = vector.broadcast %11 : vector<1x64x128xf32> to vector<4x64x128xf32>
      %13 = arith.addf %9, %12 : vector<4x64x128xf32>
      %c0_12 = arith.constant 0 : index
      %c0_13 = arith.constant 0 : index
      %14 = vector.load %arg7[%c0_12, %c0_13] : memref<1x128xf32, #tpu.memory_space<vmem>>, vector<1x128xf32>
      %15 = vector.shape_cast %14 : vector<1x128xf32> to vector<128xf32>
      %c0_14 = arith.constant 0 : index
      %c0_15 = arith.constant 0 : index
      %16 = vector.load %arg8[%c0_14, %c0_15] : memref<1x128xf32, #tpu.memory_space<vmem>>, vector<1x128xf32>
      %17 = vector.shape_cast %16 : vector<1x128xf32> to vector<128xf32>
      %cst_16 = arith.constant dense<0.000000e+00> : vector<4x64xf32>
      %18 = vector.multi_reduction <add>, %13, %cst_16 [2] : vector<4x64x128xf32> to vector<4x64xf32>
      %19 = vector.shape_cast %18 : vector<4x64xf32> to vector<4x64x1xf32>
      %cst_17 = arith.constant 1.280000e+02 : f32
      %20 = vector.broadcast %cst_17 : f32 to vector<4x64x1xf32>
      %21 = arith.divf %19, %20 : vector<4x64x1xf32>
      %22 = vector.broadcast %21 : vector<4x64x1xf32> to vector<4x64x128xf32>
      %23 = arith.subf %13, %22 : vector<4x64x128xf32>
      %24 = arith.mulf %23, %23 : vector<4x64x128xf32>
      %cst_18 = arith.constant dense<0.000000e+00> : vector<4x64xf32>
      %25 = vector.multi_reduction <add>, %24, %cst_18 [2] : vector<4x64x128xf32> to vector<4x64xf32>
      %26 = vector.shape_cast %25 : vector<4x64xf32> to vector<4x64x1xf32>
      %cst_19 = arith.constant 1.280000e+02 : f32
      %27 = vector.broadcast %cst_19 : f32 to vector<4x64x1xf32>
      %28 = arith.divf %26, %27 : vector<4x64x1xf32>
      %29 = vector.broadcast %21 : vector<4x64x1xf32> to vector<4x64x128xf32>
      %30 = arith.subf %13, %29 : vector<4x64x128xf32>
      %cst_20 = arith.constant 9.99999974E-6 : f32
      %31 = vector.broadcast %cst_20 : f32 to vector<4x64x1xf32>
      %32 = arith.addf %28, %31 : vector<4x64x1xf32>
      %33 = math.rsqrt %32 : vector<4x64x1xf32>
      %34 = vector.broadcast %33 : vector<4x64x1xf32> to vector<4x64x128xf32>
      %35 = arith.mulf %30, %34 : vector<4x64x128xf32>
      %36 = vector.shape_cast %15 : vector<128xf32> to vector<1x1x128xf32>
      %37 = vector.broadcast %36 : vector<1x1x128xf32> to vector<4x64x128xf32>
      %38 = arith.mulf %35, %37 : vector<4x64x128xf32>
      %39 = vector.shape_cast %17 : vector<128xf32> to vector<1x1x128xf32>
      %40 = vector.broadcast %39 : vector<1x1x128xf32> to vector<4x64x128xf32>
      %41 = arith.addf %38, %40 : vector<4x64x128xf32>
      %42 = vector.shape_cast %41 : vector<4x64x128xf32> to vector<256x128xf32>
      %43 = arith.truncf %42 : vector<256x128xf32> to vector<256x128xbf16>
      %c0_21 = arith.constant 0 : index
      %c0_22 = arith.constant 0 : index
      %44 = vector.load %arg4[%c0_21, %c0_22] : memref<128x384xbf16, #tpu.memory_space<vmem>>, vector<128x384xbf16>
      %cst_23 = arith.constant dense<0.000000e+00> : vector<256x384xf32>
      %45 = tpu.matmul %43, %44, %cst_23 {dimension_numbers = #tpu.dot_dimension_numbers<[1], [0], [0], [1], [0, 0, 1, 1], [], []>} : vector<256x128xbf16>, vector<128x384xbf16>, vector<256x384xf32> -> vector<256x384xf32>
      %46 = vector.shape_cast %45 : vector<256x384xf32> to vector<4x64x384xf32>
      %47 = vector.extract_strided_slice %46 {offsets = [0, 0, 0], sizes = [4, 64, 128], strides = [1, 1, 1]} : vector<4x64x384xf32> to vector<4x64x128xf32>
      %48 = arith.truncf %47 : vector<4x64x128xf32> to vector<4x64x128xbf16>
      %49 = vector.extract_strided_slice %46 {offsets = [0, 0, 128], sizes = [4, 64, 128], strides = [1, 1, 1]} : vector<4x64x384xf32> to vector<4x64x128xf32>
      %50 = arith.truncf %49 : vector<4x64x128xf32> to vector<4x64x128xbf16>
      %51 = vector.extract_strided_slice %46 {offsets = [0, 0, 256], sizes = [4, 64, 128], strides = [1, 1, 1]} : vector<4x64x384xf32> to vector<4x64x128xf32>
      %52 = arith.truncf %51 : vector<4x64x128xf32> to vector<4x64x128xbf16>
      %cst_24 = arith.constant dense<0.000000e+00> : vector<4x64x64xf32>
      %53 = tpu.matmul %48, %50, %cst_24 {dimension_numbers = #tpu.dot_dimension_numbers<[2], [2], [1], [1], [0, 0, 0, 1, 1, 1], [0], [0]>} : vector<4x64x128xbf16>, vector<4x64x128xbf16>, vector<4x64x64xf32> -> vector<4x64x64xf32>
      %cst_25 = arith.constant 0.0883883461 : f32
      %54 = vector.broadcast %cst_25 : f32 to vector<4x64x64xf32>
      %55 = arith.mulf %53, %54 : vector<4x64x64xf32>
      %cst_26 = arith.constant dense<0xFF800000> : vector<4x64xf32>
      %56 = vector.multi_reduction <maximumf>, %55, %cst_26 [2] : vector<4x64x64xf32> to vector<4x64xf32>
      %57 = vector.shape_cast %56 : vector<4x64xf32> to vector<4x64x1xf32>
      %58 = vector.broadcast %57 : vector<4x64x1xf32> to vector<4x64x64xf32>
      %59 = arith.subf %55, %58 : vector<4x64x64xf32>
      %60 = math.exp %59 : vector<4x64x64xf32>
      %cst_27 = arith.constant dense<0.000000e+00> : vector<4x64xf32>
      %61 = vector.multi_reduction <add>, %60, %cst_27 [2] : vector<4x64x64xf32> to vector<4x64xf32>
      %62 = vector.shape_cast %61 : vector<4x64xf32> to vector<4x64x1xf32>
      %63 = tpu.reciprocal %62 {approx = true} : vector<4x64x1xf32> -> vector<4x64x1xf32>
      %64 = vector.broadcast %63 : vector<4x64x1xf32> to vector<4x64x64xf32>
      %65 = arith.mulf %60, %64 : vector<4x64x64xf32>
      %66 = arith.truncf %65 : vector<4x64x64xf32> to vector<4x64x64xbf16>
      %cst_28 = arith.constant dense<0.000000e+00> : vector<4x64x128xf32>
      %67 = tpu.matmul %66, %52, %cst_28 {dimension_numbers = #tpu.dot_dimension_numbers<[2], [1], [1], [2], [0, 0, 0, 1, 1, 2], [0], [0]>} : vector<4x64x64xbf16>, vector<4x64x128xbf16>, vector<4x64x128xf32> -> vector<4x64x128xf32>
      %68 = vector.shape_cast %67 : vector<4x64x128xf32> to vector<256x128xf32>
      %69 = arith.truncf %68 : vector<256x128xf32> to vector<256x128xbf16>
      %c0_29 = arith.constant 0 : index
      %c0_30 = arith.constant 0 : index
      %70 = vector.load %arg5[%c0_29, %c0_30] : memref<128x128xbf16, #tpu.memory_space<vmem>>, vector<128x128xbf16>
      %cst_31 = arith.constant dense<0.000000e+00> : vector<256x128xf32>
      %71 = tpu.matmul %69, %70, %cst_31 {dimension_numbers = #tpu.dot_dimension_numbers<[1], [0], [0], [1], [0, 0, 1, 1], [], []>} : vector<256x128xbf16>, vector<128x128xbf16>, vector<256x128xf32> -> vector<256x128xf32>
      %c0_32 = arith.constant 0 : index
      %c0_33 = arith.constant 0 : index
      %72 = vector.load %arg6[%c0_32, %c0_33] : memref<1x128xf32, #tpu.memory_space<vmem>>, vector<1x128xf32>
      %73 = vector.shape_cast %72 : vector<1x128xf32> to vector<128xf32>
      %74 = vector.shape_cast %73 : vector<128xf32> to vector<1x128xf32>
      %75 = vector.broadcast %74 : vector<1x128xf32> to vector<256x128xf32>
      %76 = arith.addf %71, %75 : vector<256x128xf32>
      %77 = vector.shape_cast %13 : vector<4x64x128xf32> to vector<256x128xf32>
      %78 = arith.addf %77, %76 : vector<256x128xf32>
      %c0_34 = arith.constant 0 : index
      %c0_35 = arith.constant 0 : index
      %79 = vector.load %arg9[%c0_34, %c0_35] : memref<1x128xf32, #tpu.memory_space<vmem>>, vector<1x128xf32>
      %80 = vector.shape_cast %79 : vector<1x128xf32> to vector<128xf32>
      %c0_36 = arith.constant 0 : index
      %c0_37 = arith.constant 0 : index
      %81 = vector.load %arg10[%c0_36, %c0_37] : memref<1x128xf32, #tpu.memory_space<vmem>>, vector<1x128xf32>
      %82 = vector.shape_cast %81 : vector<1x128xf32> to vector<128xf32>
      %cst_38 = arith.constant dense<0.000000e+00> : vector<256xf32>
      %83 = vector.multi_reduction <add>, %78, %cst_38 [1] : vector<256x128xf32> to vector<256xf32>
      %84 = vector.shape_cast %83 : vector<256xf32> to vector<256x1xf32>
      %cst_39 = arith.constant 1.280000e+02 : f32
      %85 = vector.broadcast %cst_39 : f32 to vector<256x1xf32>
      %86 = arith.divf %84, %85 : vector<256x1xf32>
      %87 = vector.broadcast %86 : vector<256x1xf32> to vector<256x128xf32>
      %88 = arith.subf %78, %87 : vector<256x128xf32>
      %89 = arith.mulf %88, %88 : vector<256x128xf32>
      %cst_40 = arith.constant dense<0.000000e+00> : vector<256xf32>
      %90 = vector.multi_reduction <add>, %89, %cst_40 [1] : vector<256x128xf32> to vector<256xf32>
      %91 = vector.shape_cast %90 : vector<256xf32> to vector<256x1xf32>
      %cst_41 = arith.constant 1.280000e+02 : f32
      %92 = vector.broadcast %cst_41 : f32 to vector<256x1xf32>
      %93 = arith.divf %91, %92 : vector<256x1xf32>
      %94 = vector.broadcast %86 : vector<256x1xf32> to vector<256x128xf32>
      %95 = arith.subf %78, %94 : vector<256x128xf32>
      %cst_42 = arith.constant 9.99999974E-6 : f32
      %96 = vector.broadcast %cst_42 : f32 to vector<256x1xf32>
      %97 = arith.addf %93, %96 : vector<256x1xf32>
      %98 = math.rsqrt %97 : vector<256x1xf32>
      %99 = vector.broadcast %98 : vector<256x1xf32> to vector<256x128xf32>
      %100 = arith.mulf %95, %99 : vector<256x128xf32>
      %101 = vector.shape_cast %80 : vector<128xf32> to vector<1x128xf32>
      %102 = vector.broadcast %101 : vector<1x128xf32> to vector<256x128xf32>
      %103 = arith.mulf %100, %102 : vector<256x128xf32>
      %104 = vector.shape_cast %82 : vector<128xf32> to vector<1x128xf32>
      %105 = vector.broadcast %104 : vector<1x128xf32> to vector<256x128xf32>
      %106 = arith.addf %103, %105 : vector<256x128xf32>
      %107 = arith.truncf %106 : vector<256x128xf32> to vector<256x128xbf16>
      %c0_43 = arith.constant 0 : index
      %c0_44 = arith.constant 0 : index
      %108 = vector.load %arg11[%c0_43, %c0_44] : memref<128x512xbf16, #tpu.memory_space<vmem>>, vector<128x512xbf16>
      %cst_45 = arith.constant dense<0.000000e+00> : vector<256x512xf32>
      %109 = tpu.matmul %107, %108, %cst_45 {dimension_numbers = #tpu.dot_dimension_numbers<[1], [0], [0], [1], [0, 0, 1, 1], [], []>} : vector<256x128xbf16>, vector<128x512xbf16>, vector<256x512xf32> -> vector<256x512xf32>
      %c0_46 = arith.constant 0 : index
      %c0_47 = arith.constant 0 : index
      %110 = vector.load %arg12[%c0_46, %c0_47] : memref<1x512xf32, #tpu.memory_space<vmem>>, vector<1x512xf32>
      %111 = vector.shape_cast %110 : vector<1x512xf32> to vector<512xf32>
      %112 = vector.shape_cast %111 : vector<512xf32> to vector<1x512xf32>
      %113 = vector.broadcast %112 : vector<1x512xf32> to vector<256x512xf32>
      %114 = arith.addf %109, %113 : vector<256x512xf32>
      %cst_48 = arith.constant 0.000000e+00 : f32
      %115 = vector.broadcast %cst_48 : f32 to vector<256x512xf32>
      %116 = arith.maximumf %114, %115 : vector<256x512xf32>
      %117 = arith.truncf %116 : vector<256x512xf32> to vector<256x512xbf16>
      %c0_49 = arith.constant 0 : index
      %c0_50 = arith.constant 0 : index
      %118 = vector.load %arg13[%c0_49, %c0_50] : memref<512x128xbf16, #tpu.memory_space<vmem>>, vector<512x128xbf16>
      %cst_51 = arith.constant dense<0.000000e+00> : vector<256x128xf32>
      %119 = tpu.matmul %117, %118, %cst_51 {dimension_numbers = #tpu.dot_dimension_numbers<[1], [0], [0], [1], [0, 0, 1, 1], [], []>} : vector<256x512xbf16>, vector<512x128xbf16>, vector<256x128xf32> -> vector<256x128xf32>
      %c0_52 = arith.constant 0 : index
      %c0_53 = arith.constant 0 : index
      %120 = vector.load %arg14[%c0_52, %c0_53] : memref<1x128xf32, #tpu.memory_space<vmem>>, vector<1x128xf32>
      %121 = vector.shape_cast %120 : vector<1x128xf32> to vector<128xf32>
      %122 = vector.shape_cast %121 : vector<128xf32> to vector<1x128xf32>
      %123 = vector.broadcast %122 : vector<1x128xf32> to vector<256x128xf32>
      %124 = arith.addf %119, %123 : vector<256x128xf32>
      %125 = arith.addf %78, %124 : vector<256x128xf32>
      %c0_54 = arith.constant 0 : index
      %c0_55 = arith.constant 0 : index
      %126 = vector.load %arg15[%c0_54, %c0_55] : memref<1x128xf32, #tpu.memory_space<vmem>>, vector<1x128xf32>
      %127 = vector.shape_cast %126 : vector<1x128xf32> to vector<128xf32>
      %c0_56 = arith.constant 0 : index
      %c0_57 = arith.constant 0 : index
      %128 = vector.load %arg16[%c0_56, %c0_57] : memref<1x128xf32, #tpu.memory_space<vmem>>, vector<1x128xf32>
      %129 = vector.shape_cast %128 : vector<1x128xf32> to vector<128xf32>
      %cst_58 = arith.constant dense<0.000000e+00> : vector<256xf32>
      %130 = vector.multi_reduction <add>, %125, %cst_58 [1] : vector<256x128xf32> to vector<256xf32>
      %131 = vector.shape_cast %130 : vector<256xf32> to vector<256x1xf32>
      %cst_59 = arith.constant 1.280000e+02 : f32
      %132 = vector.broadcast %cst_59 : f32 to vector<256x1xf32>
      %133 = arith.divf %131, %132 : vector<256x1xf32>
      %134 = vector.broadcast %133 : vector<256x1xf32> to vector<256x128xf32>
      %135 = arith.subf %125, %134 : vector<256x128xf32>
      %136 = arith.mulf %135, %135 : vector<256x128xf32>
      %cst_60 = arith.constant dense<0.000000e+00> : vector<256xf32>
      %137 = vector.multi_reduction <add>, %136, %cst_60 [1] : vector<256x128xf32> to vector<256xf32>
      %138 = vector.shape_cast %137 : vector<256xf32> to vector<256x1xf32>
      %cst_61 = arith.constant 1.280000e+02 : f32
      %139 = vector.broadcast %cst_61 : f32 to vector<256x1xf32>
      %140 = arith.divf %138, %139 : vector<256x1xf32>
      %141 = vector.broadcast %133 : vector<256x1xf32> to vector<256x128xf32>
      %142 = arith.subf %125, %141 : vector<256x128xf32>
      %cst_62 = arith.constant 9.99999974E-6 : f32
      %143 = vector.broadcast %cst_62 : f32 to vector<256x1xf32>
      %144 = arith.addf %140, %143 : vector<256x1xf32>
      %145 = math.rsqrt %144 : vector<256x1xf32>
      %146 = vector.broadcast %145 : vector<256x1xf32> to vector<256x128xf32>
      %147 = arith.mulf %142, %146 : vector<256x128xf32>
      %148 = vector.shape_cast %127 : vector<128xf32> to vector<1x128xf32>
      %149 = vector.broadcast %148 : vector<1x128xf32> to vector<256x128xf32>
      %150 = arith.mulf %147, %149 : vector<256x128xf32>
      %151 = vector.shape_cast %129 : vector<128xf32> to vector<1x128xf32>
      %152 = vector.broadcast %151 : vector<1x128xf32> to vector<256x128xf32>
      %153 = arith.addf %150, %152 : vector<256x128xf32>
      %154 = arith.truncf %153 : vector<256x128xf32> to vector<256x128xbf16>
      %c0_63 = arith.constant 0 : index
      %c0_64 = arith.constant 0 : index
      %155 = vector.load %arg19[%c0_63, %c0_64] : memref<256x128xbf16, #tpu.memory_space<vmem>>, vector<256x128xbf16>
      tpu.vector_store %arg19[%c0_63, %c0_64], %154 {strides = array<i32>} : memref<256x128xbf16, #tpu.memory_space<vmem>>, vector<256x128xbf16>,
    } else {
    }
    %c0 = arith.constant 0 : index
    %c0_1 = arith.constant 0 : index
    %3 = vector.load %arg19[%c0, %c0_1] : memref<256x128xbf16, #tpu.memory_space<vmem>>, vector<256x128xbf16>
    %c0_2 = arith.constant 0 : index
    %c0_3 = arith.constant 0 : index
    %4 = vector.load %arg17[%c0_2, %c0_3] : memref<128x2048xbf16, #tpu.memory_space<vmem>>, vector<128x2048xbf16>
    %cst = arith.constant dense<0.000000e+00> : vector<256x2048xf32>
    %5 = tpu.matmul %3, %4, %cst {dimension_numbers = #tpu.dot_dimension_numbers<[1], [0], [0], [1], [0, 0, 1, 1], [], []>} : vector<256x128xbf16>, vector<128x2048xbf16>, vector<256x2048xf32> -> vector<256x2048xf32>
    %6 = vector.shape_cast %5 : vector<256x2048xf32> to vector<4x64x2048xf32>
    %7 = arith.truncf %6 : vector<4x64x2048xf32> to vector<4x64x2048xbf16>
    %c0_4 = arith.constant 0 : index
    %c0_5 = arith.constant 0 : index
    %c0_6 = arith.constant 0 : index
    %8 = vector.load %arg18[%c0_4, %c0_5, %c0_6] : memref<4x64x2048xbf16, #tpu.memory_space<vmem>>, vector<4x64x2048xbf16>
    tpu.vector_store %arg18[%c0_4, %c0_5, %c0_6], %7 {strides = array<i32>} : memref<4x64x2048xbf16, #tpu.memory_space<vmem>>, vector<4x64x2048xbf16>,
    return
  }
  func.func @transform_0(%arg0: i32, %arg1: i32) -> (i32, i32, i32) {
    %c0_i32 = arith.constant 0 : i32
    %c0_i32_0 = arith.constant 0 : i32
    %c0_i32_1 = arith.constant 0 : i32
    return %arg0, %c0_i32, %c0_i32_0 : i32, i32, i32
  }
  func.func @transform_1(%arg0: i32, %arg1: i32) -> (i32, i32) {
    %c0_i32 = arith.constant 0 : i32
    %c0_i32_0 = arith.constant 0 : i32
    %c0_i32_1 = arith.constant 0 : i32
    return %c0_i32, %c0_i32_0 : i32, i32
  }
  func.func @transform_2(%arg0: i32, %arg1: i32) -> (i32, i32) {
    %c0_i32 = arith.constant 0 : i32
    %c0_i32_0 = arith.constant 0 : i32
    %c0_i32_1 = arith.constant 0 : i32
    return %c0_i32, %c0_i32_0 : i32, i32
  }
  func.func @transform_3(%arg0: i32, %arg1: i32) -> (i32, i32) {
    %c0_i32 = arith.constant 0 : i32
    %c0_i32_0 = arith.constant 0 : i32
    %c0_i32_1 = arith.constant 0 : i32
    return %c0_i32, %c0_i32_0 : i32, i32
  }
  func.func @transform_4(%arg0: i32, %arg1: i32) -> (i32, i32) {
    %c0_i32 = arith.constant 0 : i32
    %c0_i32_0 = arith.constant 0 : i32
    %c0_i32_1 = arith.constant 0 : i32
    return %c0_i32, %c0_i32_0 : i32, i32
  }
  func.func @transform_5(%arg0: i32, %arg1: i32) -> (i32, i32) {
    %c0_i32 = arith.constant 0 : i32
    %c0_i32_0 = arith.constant 0 : i32
    %c0_i32_1 = arith.constant 0 : i32
    return %c0_i32, %c0_i32_0 : i32, i32
  }
  func.func @transform_6(%arg0: i32, %arg1: i32) -> (i32, i32) {
    %c0_i32 = arith.constant 0 : i32
    %c0_i32_0 = arith.constant 0 : i32
    %c0_i32_1 = arith.constant 0 : i32
    return %c0_i32, %c0_i32_0 : i32, i32
  }
  func.func @transform_7(%arg0: i32, %arg1: i32) -> (i32, i32) {
    %c0_i32 = arith.constant 0 : i32
    %c0_i32_0 = arith.constant 0 : i32
    %c0_i32_1 = arith.constant 0 : i32
    return %c0_i32, %c0_i32_0 : i32, i32
  }
  func.func @transform_8(%arg0: i32, %arg1: i32) -> (i32, i32) {
    %c0_i32 = arith.constant 0 : i32
    %c0_i32_0 = arith.constant 0 : i32
    %c0_i32_1 = arith.constant 0 : i32
    return %c0_i32, %c0_i32_0 : i32, i32
  }
  func.func @transform_9(%arg0: i32, %arg1: i32) -> (i32, i32) {
    %c0_i32 = arith.constant 0 : i32
    %c0_i32_0 = arith.constant 0 : i32
    %c0_i32_1 = arith.constant 0 : i32
    return %c0_i32, %c0_i32_0 : i32, i32
  }
  func.func @transform_10(%arg0: i32, %arg1: i32) -> (i32, i32) {
    %c0_i32 = arith.constant 0 : i32
    %c0_i32_0 = arith.constant 0 : i32
    %c0_i32_1 = arith.constant 0 : i32
    return %c0_i32, %c0_i32_0 : i32, i32
  }
  func.func @transform_11(%arg0: i32, %arg1: i32) -> (i32, i32) {
    %c0_i32 = arith.constant 0 : i32
    %c0_i32_0 = arith.constant 0 : i32
    %c0_i32_1 = arith.constant 0 : i32
    return %c0_i32, %c0_i32_0 : i32, i32
  }
  func.func @transform_12(%arg0: i32, %arg1: i32) -> (i32, i32) {
    %c0_i32 = arith.constant 0 : i32
    %c0_i32_0 = arith.constant 0 : i32
    %c0_i32_1 = arith.constant 0 : i32
    return %c0_i32, %c0_i32_0 : i32, i32
  }
  func.func @transform_13(%arg0: i32, %arg1: i32) -> (i32, i32) {
    %c0_i32 = arith.constant 0 : i32
    %c0_i32_0 = arith.constant 0 : i32
    %c0_i32_1 = arith.constant 0 : i32
    return %c0_i32, %c0_i32_0 : i32, i32
  }
  func.func @transform_14(%arg0: i32, %arg1: i32) -> (i32, i32) {
    %c0_i32 = arith.constant 0 : i32
    %c0_i32_0 = arith.constant 0 : i32
    %c0_i32_1 = arith.constant 0 : i32
    return %c0_i32, %c0_i32_0 : i32, i32
  }
  func.func @transform_15(%arg0: i32, %arg1: i32) -> (i32, i32) {
    %c0_i32 = arith.constant 0 : i32
    %c0_i32_0 = arith.constant 0 : i32
    return %c0_i32, %arg1 : i32, i32
  }
  func.func @transform_16(%arg0: i32, %arg1: i32) -> (i32, i32, i32) {
    %c0_i32 = arith.constant 0 : i32
    %c0_i32_0 = arith.constant 0 : i32
    return %arg0, %c0_i32, %arg1 : i32, i32, i32
  }
}

</mosaic_0001>

<bundles_post_ra>
// kernel: masked_lm_forward.1
= control target key start
LH: loop header
LB: loop body
LE: loop exit
PB: predicated region body
PF: predicated region fallthrough
CT: control target
= control target key end

     0   :  { %s14822_s0 = inlined_call_operand.vmem [shape: f32[8,64,128], index: 0, kind: input, shape index: {}]   ;;  %s14823_s1 = inlined_call_operand.vmem [shape: f32[64,128], index: 1, kind: input, shape index: {}]   ;;  %s14824_s2 = inlined_call_operand.vmem [shape: bf16[128,384], index: 2, kind: input, shape index: {}]   ;;  %s14825_s3 = inlined_call_operand.vmem [shape: bf16[128,128], index: 3, kind: input, shape index: {}]   ;;  %s14826_s4 = inlined_call_operand.vmem [shape: f32[1,128], index: 4, kind: input, shape index: {}]   ;;  %s14827_s5 = inlined_call_operand.vmem [shape: f32[1,128], index: 5, kind: input, shape index: {}]   ;;  %s14828_s6 = inlined_call_operand.vmem [shape: f32[1,128], index: 6, kind: input, shape index: {}]   ;;  %s14829_s7 = inlined_call_operand.vmem [shape: f32[1,128], index: 7, kind: input, shape index: {}]   ;;  %s14830_s8 = inlined_call_operand.vmem [shape: f32[1,128], index: 8, kind: input, shape index: {}]   ;;  %s14831_s9 = inlined_call_operand.vmem [shape: bf16[128,512], index: 9, kind: input, shape index: {}]   ;;  %s14832_s10 = inlined_call_operand.vmem [shape: f32[1,512], index: 10, kind: input, shape index: {}]   ;;  %s14833_s11 = inlined_call_operand.vmem [shape: bf16[512,128], index: 11, kind: input, shape index: {}]   ;;  %s14834_s12 = inlined_call_operand.vmem [shape: f32[1,128], index: 12, kind: input, shape index: {}]   ;;  %s14835_s13 = inlined_call_operand.vmem [shape: f32[1,128], index: 13, kind: input, shape index: {}]   ;;  %s14836_s14 = inlined_call_operand.vmem [shape: f32[1,128], index: 14, kind: input, shape index: {}]   ;;  %s14837_s15 = inlined_call_operand.vmem [shape: bf16[128,2048], index: 15, kind: input, shape index: {}]   ;;  %s14838_s16 = inlined_call_operand.hbm [shape: bf16[8,64,2048], index: 16, kind: output, shape index: {}]  }
   0x1   :  { %14885 = sst [smem:[#allocation38_spill]] %s14822_s0 }
   0x2   :  { %21 = vsyncpa [#allocation4], 0 }
   0x3   :  { %23 = vsyncpa [#allocation4 + $0x1], 0  ;;  %s11462_s21 = smov 0   ;;  %s11464_s22 = smov 0  }
   0x4   :  { %s11466_s23 = smov 0   ;;  %s11468_s24 = smov 0  }
   0x5   :  { %s11470_s25 = smov 0   ;;  %s11472_s26 = smov 0  }
   0x6 LB: > { %14886 = sst [smem:[#allocation6_spill]] %s11351_s21  ;;  %s9440_s27 = sadd.s32 4294967295, %s11371_s26   ;;  %s11371_s26 = sphi %s11472_s26, %s29_s26   ;;  %s11367_s25 = sphi %s11470_s25, %s14977_s25   ;;  %s11363_s24 = sphi %s11468_s24, %s14976_s24   ;;  %s11359_s23 = sphi %s11466_s23, %s14975_s23   ;;  %s11355_s22 = sphi %s11464_s22, %s14979_s22   ;;  %s11351_s21 = sphi %s11462_s21, %s14978_s21  }
   0x7   : > { %14887 = sst [smem:[#allocation7_spill]] %s11359_s23  ;;  %s9441_s28 = sadd.s32 4294967294, %s11371_s26  }
   0x8   : > { %14888 = sst [smem:[#allocation8_spill]] %s11367_s25  ;;  %s41_s29 = sadd.s32 1, %s11367_s25 }
   0x9   : > { %14889 = sst [smem:[#allocation9_spill]] %s11371_s26  ;;  %s396_s30 = sadd.s32 1, %s11359_s23 }
   0xa   : > { %p43_p0 = scmp.ge.s32.totalorder %s41_s29, 2  ;;  %p406_p1 = scmp.ne.s32.totalorder %s11359_s23, %s11355_s22 }
   0xb   : > { %p407_p2 = scmp.eq.s32.totalorder %s9440_s27, 1  ;;  %p412_p3 = scmp.ne.s32.totalorder %s11355_s22, %s11351_s21 }
   0xc   : > { %s14981_s29 = smov (%p43_p0, %s41_s29), 0  ;;  %p413_p5 = scmp.eq.s32.totalorder %s9441_s28, 1 }
   0xd   : > { %14890 = sst [smem:[#allocation10_spill]] %s14981_s29  ;;  %p11502_p4 = por %p407_p2, %p406_p1 }
   0xe   : > { %s391_s17 = ssub.s32 %s11367_s25, %s14981_s29  ;;  %p9445_p6 = scmp.ge.s32.totalorder %s11371_s26, 1 }
   0xf   : > { %p394_p7 = scmp.eq.s32.totalorder %s391_s17, 0  ;;  %p11509_p8 = por %p413_p5, %p412_p3 }
  0x10   : > { %p492_p9 = scmp.lt.s32.totalorder %s11371_s26, 3 }
  0x11   : > { %s14892_s18 = scalar_select %p11509_p8, 1, 0 }
  0x12   : > { %s11515_s19 = scalar_select %p394_p7, %s11359_s23, %s396_s30  }
  0x13   : > { %14893 = sst [smem:[#allocation11_spill]] %s14892_s18  ;;  %p493_p10 = pnand %p9445_p6, %p492_p9 }
  0x14   : > { %14894 = sst [smem:[#allocation12_spill]] %s11515_s19 }
  0x15   : > { %496 = sbr.rel (%p493_p10) target bundleno = 3473 (0xd91), region = 84 }
  0x1c   : > { %s9447_s20 = sshll.u32 %s11363_s24, 2  ;;  %v11521_v0 = vld [vmem:[%s14823_s1] sm:$0xff]  ;;  %v11526_v1 = vld [vmem:[%s14823_s1 + $0x10] sm:$0xff]  ;;  %v11531_v2 = vld [vmem:[%s14823_s1 + $0x8] sm:$0xff]  ;;  %s14895_s27 = sld [smem:[#allocation38_spill]]  ;;  %vm1941_vm0 = vcmask 523264  }
  0x1d   : > { %p549_p11 = scmp.lt.s32.totalorder %s9447_s20, 7  ;;  %v11536_v3 = vld [vmem:[%s14823_s1 + $0x18] sm:$0xff]  ;;  %v11564_v12 = vld [vmem:[%s14823_s1 + $0x20] sm:$0xff]  ;;  %v11571_v15 = vld [vmem:[%s14823_s1 + $0x28] sm:$0xff]  ;;  %s545_s30 = sand.u32 1, %s11355_s22  }
  0x1e   : > { %v11577_v17 = vld [vmem:[%s14823_s1 + $0x30] sm:$0xff]  ;;  %v11583_v19 = vld [vmem:[%s14823_s1 + $0x38] sm:$0xff]  ;;  %v10855_v49 = vld [vmem:[%s14824_s2] ss:$12 sps:$4 sm:$0xff]   ;;  %s9446_s28 = sshll.u32 %s545_s30, 11  ;;  %s11374_s23 = smov [#allocation3]  }
  0x1f   : > { %s14983_s20 = smov (!%p549_p11, %s9447_s20), 7  ;;  %v10853_v48 = vld [vmem:[%s14824_s2 + $0x4] ss:$12 sps:$4 sm:$0xff]   ;;  %v10856_v50 = vld [vmem:[%s14824_s2 + $0x1c] ss:$12 sps:$4 sm:$0xff]   ;;  %s14182_s19 = scalar_lea.vmem [#allocation3], %s9446_s28 }
  0x20   : > { %s9960_s29 = sshll.u32 %s14983_s20, 6  ;;  %1247 = vmatprep.subr.bf16.mxu0 %v10853_v48  ;;  %10779 = vmatprep.subr.bf16.mxu1 %v10853_v48  ;;  %v10858_v48 = vld [vmem:[%s14824_s2 + $0x18] ss:$12 sps:$4 sm:$0xff]   ;;  %s10218_s20 = sshll.u32 %s11363_s24, 15 }
  0x21   : > { %1248 = vmatpush1.bf16.msra.mxu0 %v10855_v49  ;;  %10787 = vmatpush1.bf16.msra.mxu1 %v10855_v49  ;;  %s14766_s21 = scalar_lea.hbm %s14838_s16, %s10218_s20  ;;  %s14776_s24 = scalar_lea.sflag [#allocation4], %s545_s30 }
  0x22   : > { %s11541_s26 = scalar_lea.vmem %s14895_s27, %s9960_s29  ;;  %1249 = vmatprep.subr.bf16.mxu0 %v10856_v50  ;;  %10780 = vmatprep.subr.bf16.mxu1 %v10856_v50  ;;  %s11297_s25 = sshll.u32 %s11374_s23, 4  ;;  %s11298_s25 = int_to_ptr.vmem [resolvable:$false] %s11297_s25 }
  0x23   : > { %v568_v4 = vld [vmem:[%s11541_s26] sm:$0xff]  ;;  %v569_v5 = vld [vmem:[%s11541_s26 + $0x8] sm:$0xff]  ;;  %v570_v6 = vld [vmem:[%s11541_s26 + $0x10] sm:$0xff]  ;;  %s11299_s29 = scalar_lea.vmem %s11298_s25, 65536 }
  0x24   : > { %v11547_v7 = vadd.f32 %v11521_v0, %v568_v4  ;;  %v11550_v8 = vadd.f32 %v11526_v1, %v570_v6  ;;  %v571_v9 = vld [vmem:[%s11541_s26 + $0x18] sm:$0xff]  ;;  %v11555_v10 = vadd.f32 %v11531_v2, %v569_v5  ;;  %v572_v13 = vld [vmem:[%s11541_s26 + $0x20] sm:$0xff]  ;;  %v573_v14 = vld [vmem:[%s11541_s26 + $0x28] sm:$0xff] }
  0x25   : > { %v11559_v11 = vadd.f32 %v11536_v3, %v571_v9  ;;  %v574_v16 = vld [vmem:[%s11541_s26 + $0x30] sm:$0xff]  ;;  %v575_v18 = vld [vmem:[%s11541_s26 + $0x38] sm:$0xff]  ;;  %v11588_v20 = vadd.f32 %v11564_v12, %v572_v13  ;;  %v11591_v21 = vadd.f32 %v11571_v15, %v573_v14  ;;  %v576_v22 = vld [vmem:[%s11541_s26 + $0x40] sm:$0xff]  ;;  %1250 = vmatpush1.bf16.msra.mxu0 %v10858_v48  ;;  %10788 = vmatpush1.bf16.msra.mxu1 %v10858_v48 }
  0x26   : > { %642 = vadd.xlane.f32.xlu0 %v11547_v7  ;;  %646 = vadd.xlane.f32.xlu1 %v11550_v8  ;;  %v577_v23 = vld [vmem:[%s11541_s26 + $0x48] sm:$0xff]  ;;  %v11598_v24 = vadd.f32 %v11577_v17, %v574_v16  ;;  %v11601_v25 = vadd.f32 %v11583_v19, %v575_v18  ;;  %v578_v26 = vld [vmem:[%s11541_s26 + $0x50] sm:$0xff]  ;;  %v579_v27 = vld [vmem:[%s11541_s26 + $0x58] sm:$0xff]  ;;  %v11608_v28 = vadd.f32 %v11521_v0, %v576_v22 }
  0x27   : > { %v11611_v29 = vadd.f32 %v11531_v2, %v577_v23  ;;  %v580_v30 = vld [vmem:[%s11541_s26 + $0x60] sm:$0xff]  ;;  %v581_v31 = vld [vmem:[%s11541_s26 + $0x68] sm:$0xff]  ;;  %v11618_v32 = vadd.f32 %v11526_v1, %v578_v26  ;;  %v11621_v33 = vadd.f32 %v11536_v3, %v579_v27  ;;  %v582_v34 = vld [vmem:[%s11541_s26 + $0x70] sm:$0xff] }
  0x28   : > { %14896 = vst [vmem:[#allocation13_spill] sm:$0xff] %v11601_v25  ;;  %14897 = vst [vmem:[#allocation14_spill] sm:$0xff] %v11608_v28  ;;  %v11627_v35 = vadd.f32 %v11564_v12, %v580_v30  ;;  %v11630_v36 = vadd.f32 %v11571_v15, %v581_v31  ;;  %v583_v37 = vld [vmem:[%s11541_s26 + $0x78] sm:$0xff]  ;;  %v584_v38 = vld [vmem:[%s11541_s26 + $0x80] sm:$0xff]  ;;  %v11637_v39 = vadd.f32 %v11577_v17, %v582_v34 }
  0x29   : > { %14898 = vst [vmem:[#allocation15_spill] sm:$0xff] %v11611_v29  ;;  %14899 = vst [vmem:[#allocation16_spill] sm:$0xff] %v11618_v32  ;;  %v11640_v40 = vadd.f32 %v11583_v19, %v583_v37  ;;  %v585_v41 = vld [vmem:[%s11541_s26 + $0x88] sm:$0xff]  ;;  %v586_v42 = vld [vmem:[%s11541_s26 + $0x90] sm:$0xff]  ;;  %v11647_v43 = vadd.f32 %v11521_v0, %v584_v38 }
  0x2a   : > { %644 = vadd.xlane.f32.xlu0 %v11555_v10  ;;  %648 = vadd.xlane.f32.xlu1 %v11559_v11  ;;  %14900 = vst [vmem:[#allocation17_spill] sm:$0xff] %v11621_v33  ;;  %14901 = vst [vmem:[#allocation18_spill] sm:$0xff] %v11627_v35  ;;  %v11650_v44 = vadd.f32 %v11531_v2, %v585_v41  ;;  %v587_v45 = vld [vmem:[%s11541_s26 + $0x98] sm:$0xff]  ;;  %v11656_v46 = vadd.f32 %v11526_v1, %v586_v42  ;;  %v588_v57 = vld [vmem:[%s11541_s26 + $0xa0] sm:$0xff] }
  0x2b   : > { %14902 = vst [vmem:[#allocation19_spill] sm:$0xff] %v11630_v36  ;;  %14903 = vst [vmem:[#allocation20_spill] sm:$0xff] %v11637_v39  ;;  %v11659_v47 = vadd.f32 %v11536_v3, %v587_v45  ;;  %v11679_v61 = vadd.f32 %v11564_v12, %v588_v57  ;;  %v589_v5 = vld [vmem:[%s11541_s26 + $0xa8] sm:$0xff]  ;;  %v590_v22 = vld [vmem:[%s11541_s26 + $0xb0] sm:$0xff] }
  0x2c   : > { %14904 = vst [vmem:[#allocation21_spill] sm:$0xff] %v11640_v40  ;;  %14905 = vst [vmem:[#allocation22_spill] sm:$0xff] %v11647_v43  ;;  %v11694_v14 = vadd.f32 %v11571_v15, %v589_v5  ;;  %v11702_v26 = vadd.f32 %v11577_v17, %v590_v22  ;;  %v591_v34 = vld [vmem:[%s11541_s26 + $0xb8] sm:$0xff]  ;;  %v592_v49 = vld [vmem:[%s11541_s26 + $0xc0] sm:$0xff] }
  0x2d   : > { %14906 = vst [vmem:[#allocation23_spill] sm:$0xff] %v11650_v44  ;;  %14907 = vst [vmem:[#allocation24_spill] sm:$0xff] %v11656_v46  ;;  %v11712_v38 = vadd.f32 %v11583_v19, %v591_v34  ;;  %v10861_v57 = vld [vmem:[%s14824_s2 + $0x30] ss:$12 sps:$4 sm:$0xff]  }
  0x2e   : > { %650 = vadd.xlane.f32.xlu0 %v11588_v20  ;;  %652 = vadd.xlane.f32.xlu1 %v11591_v21  ;;  %14908 = vst [vmem:[#allocation25_spill] sm:$0xff] %v11659_v47  ;;  %14909 = vst [vmem:[#allocation26_spill] sm:$0xff] %v11679_v61  ;;  %v10865_v22 = vld [vmem:[%s14824_s2 + $0x64] ss:$12 sps:$4 sm:$0xff]  }
  0x2f   : > { %14910 = vst [vmem:[#allocation27_spill] sm:$0xff] %v11694_v14  ;;  %14911 = vst [vmem:[#allocation28_spill] sm:$0xff] %v11702_v26 }
  0x30   : > { %14912 = vst [vmem:[#allocation29_spill] sm:$0xff] %v11712_v38 }
  0x32   : > { %654 = vadd.xlane.f32.xlu0 %v11598_v24  ;;  %656 = vadd.xlane.f32.xlu1 %v11601_v25 }
  0x36   : > { %658 = vadd.xlane.f32.xlu0 %v11608_v28  ;;  %660 = vadd.xlane.f32.xlu1 %v11611_v29 }
  0x3a   : > { %662 = vadd.xlane.f32.xlu0 %v11618_v32  ;;  %664 = vadd.xlane.f32.xlu1 %v11621_v33 }
  0x3e   : > { %666 = vadd.xlane.f32.xlu0 %v11627_v35  ;;  %668 = vadd.xlane.f32.xlu1 %v11630_v36 }
  0x42   : > { %670 = vadd.xlane.f32.xlu0 %v11637_v39  ;;  %672 = vadd.xlane.f32.xlu1 %v11640_v40 }
  0x46   : > { %674 = vadd.xlane.f32.xlu0 %v11647_v43  ;;  %676 = vadd.xlane.f32.xlu1 %v11650_v44 }
  0x4a   : > { %678 = vadd.xlane.f32.xlu0 %v11656_v46  ;;  %680 = vadd.xlane.f32.xlu1 %v11659_v47 }
  0xb3   : > { %v643_v51 = vpop.xlane.xlu0 %642  ;;  %v647_v52 = vpop.xlane.xlu1 %646 }
  0xb4   : > { %v707_v53 = vmul.f32 0.0078125, %v643_v51  ;;  %v709_v55 = vmul.f32 0.0078125, %v647_v52  ;;  %v10859_v51 = vld [vmem:[%s14824_s2 + $0x34] ss:$12 sps:$4 sm:$0xff]  }
  0xb5   : > { %1251 = vmatprep.subr.bf16.mxu0 %v10859_v51  ;;  %10781 = vmatprep.subr.bf16.mxu1 %v10859_v51 }
  0xb6   : > { %v11673_v54 = vsub.f32 %v11547_v7, %v707_v53  ;;  %v11685_v4 = vsub.f32 %v11550_v8, %v709_v55  ;;  %v11730_v53 = vadd.f32 %v11521_v0, %v592_v49  ;;  %1252 = vmatpush1.bf16.msra.mxu0 %v10861_v57  ;;  %10789 = vmatpush1.bf16.msra.mxu1 %v10861_v57  ;;  %v10862_v0 = vld [vmem:[%s14824_s2 + $0x4c] ss:$12 sps:$4 sm:$0xff]   ;;  %v596_v57 = vld [vmem:[%s11541_s26 + $0xe0] sm:$0xff] }
  0xb7   : > { %v645_v56 = vpop.xlane.xlu0 %644  ;;  %v649_v58 = vpop.xlane.xlu1 %648  ;;  %1253 = vmatprep.subr.bf16.mxu0 %v10862_v0  ;;  %10782 = vmatprep.subr.bf16.mxu1 %v10862_v0  ;;  %v11794_v0 = vadd.f32 %v11564_v12, %v596_v57  ;;  %v10874_v12 = vld [vmem:[%s14824_s2 + $0xac] ss:$12 sps:$4 sm:$0xff]  }
  0xb8   : > { %v708_v59 = vmul.f32 0.0078125, %v645_v56  ;;  %v771_v60 = vmul.f32 %v11673_v54, %v11673_v54  ;;  %v710_v63 = vmul.f32 0.0078125, %v649_v58  ;;  %v773_v13 = vmul.f32 %v11685_v4, %v11685_v4  ;;  %14913 = vst [vmem:[#allocation30_spill] sm:$0xff] %v11730_v53  ;;  %v593_v58 = vld [vmem:[%s11541_s26 + $0xc8] sm:$0xff]  ;;  %v599_v57 = vld [vmem:[%s11541_s26 + $0xf8] sm:$0xff] }
  0xb9   : > { %14917 = vst [vmem:[#allocation34_spill] sm:$0xff] %v11794_v0 }
  0xba   : > { %803 = vadd.xlane.f32.xlu0 %v771_v60  ;;  %v11682_v62 = vsub.f32 %v11555_v10, %v708_v59  ;;  %v11697_v18 = vsub.f32 %v11559_v11, %v710_v63  ;;  %v11744_v60 = vadd.f32 %v11531_v2, %v593_v58 }
  0xbb   : > { %v651_v6 = vpop.xlane.xlu0 %650  ;;  %v653_v23 = vpop.xlane.xlu1 %652 }
  0xbc   : > { %v772_v9 = vmul.f32 %v11682_v62, %v11682_v62  ;;  %v711_v16 = vmul.f32 0.0078125, %v651_v6  ;;  %v774_v27 = vmul.f32 %v11697_v18, %v11697_v18  ;;  %v712_v30 = vmul.f32 0.0078125, %v653_v23  ;;  %14914 = vst [vmem:[#allocation31_spill] sm:$0xff] %v11744_v60 }
  0xbe   : > { %682 = vadd.xlane.f32.xlu0 %v11679_v61  ;;  %805 = vadd.xlane.f32.xlu1 %v772_v9  ;;  %v11707_v31 = vsub.f32 %v11588_v20, %v711_v16  ;;  %v11717_v45 = vsub.f32 %v11591_v21, %v712_v30  ;;  %v10864_v9 = vld [vmem:[%s14824_s2 + $0x48] ss:$12 sps:$4 sm:$0xff]  }
  0xbf   : > { %v655_v37 = vpop.xlane.xlu0 %654  ;;  %v657_v50 = vpop.xlane.xlu1 %656  ;;  %1254 = vmatpush1.bf16.msra.mxu0 %v10864_v9  ;;  %10790 = vmatpush1.bf16.msra.mxu1 %v10864_v9  ;;  %v10873_v9 = vld [vmem:[%s14824_s2 + $0x90] ss:$12 sps:$4 sm:$0xff]  }
  0xc0   : > { %v775_v41 = vmul.f32 %v11707_v31, %v11707_v31  ;;  %v713_v42 = vmul.f32 0.0078125, %v655_v37  ;;  %v776_v52 = vmul.f32 %v11717_v45, %v11717_v45  ;;  %v714_v55 = vmul.f32 0.0078125, %v657_v50  ;;  %v10867_v37 = vld [vmem:[%s14824_s2 + $0x60] ss:$12 sps:$4 sm:$0xff]   ;;  %1255 = vmatprep.subr.bf16.mxu0 %v10865_v22  ;;  %10783 = vmatprep.subr.bf16.mxu1 %v10865_v22 }
  0xc2   : > { %807 = vadd.xlane.f32.xlu0 %v773_v13  ;;  %684 = vadd.xlane.f32.xlu1 %v11694_v14  ;;  %v11733_v56 = vsub.f32 %v11598_v24, %v713_v42  ;;  %v11749_v6 = vsub.f32 %v11601_v25, %v714_v55  ;;  %v594_v13 = vld [vmem:[%s11541_s26 + $0xd0] sm:$0xff]  ;;  %v10870_v55 = vld [vmem:[%s14824_s2 + $0x78] ss:$12 sps:$4 sm:$0xff]  }
  0xc3   : > { %v659_v59 = vpop.xlane.xlu0 %658  ;;  %v661_v16 = vpop.xlane.xlu1 %660  ;;  %1256 = vmatpush1.bf16.msra.mxu0 %v10867_v37  ;;  %10791 = vmatpush1.bf16.msra.mxu1 %v10867_v37  ;;  %v10876_v37 = vld [vmem:[%s14824_s2 + $0xa8] ss:$12 sps:$4 sm:$0xff]  }
  0xc4   : > { %v777_v63 = vmul.f32 %v11733_v56, %v11733_v56  ;;  %v715_v5 = vmul.f32 0.0078125, %v659_v59  ;;  %v778_v23 = vmul.f32 %v11749_v6, %v11749_v6  ;;  %v716_v30 = vmul.f32 0.0078125, %v661_v16 }
  0xc6   : > { %686 = vadd.xlane.f32.xlu0 %v11702_v26  ;;  %809 = vadd.xlane.f32.xlu1 %v774_v27  ;;  %v11762_v27 = vadd.f32 %v11526_v1, %v594_v13  ;;  %v11765_v34 = vsub.f32 %v11608_v28, %v715_v5  ;;  %v10868_v1 = vld [vmem:[%s14824_s2 + $0x7c] ss:$12 sps:$4 sm:$0xff]  }
  0xc7   : > { %v663_v2 = vpop.xlane.xlu0 %662  ;;  %v665_v42 = vpop.xlane.xlu1 %664  ;;  %1257 = vmatprep.subr.bf16.mxu0 %v10868_v1  ;;  %10784 = vmatprep.subr.bf16.mxu1 %v10868_v1  ;;  %v597_v13 = vld [vmem:[%s11541_s26 + $0xe8] sm:$0xff] }
  0xc8   : > { %14915 = vst [vmem:[#allocation32_spill] sm:$0xff] %v11762_v27  ;;  %v779_v50 = vmul.f32 %v11765_v34, %v11765_v34  ;;  %v717_v51 = vmul.f32 0.0078125, %v663_v2  ;;  %1258 = vmatpush1.bf16.msra.mxu0 %v10870_v55  ;;  %10792 = vmatpush1.bf16.msra.mxu1 %v10870_v55  ;;  %v11808_v2 = vadd.f32 %v11571_v15, %v597_v13 }
  0xca   : > { %688 = vadd.xlane.f32.xlu1 %v11712_v38  ;;  %811 = vadd.xlane.f32.xlu0 %v775_v41  ;;  %v595_v41 = vld [vmem:[%s11541_s26 + $0xd8] sm:$0xff]  ;;  %v11797_v5 = vsub.f32 %v11618_v32, %v717_v51  ;;  %14918 = vst [vmem:[#allocation35_spill] sm:$0xff] %v11808_v2 }
  0xcb   : > { %v667_v48 = vpop.xlane.xlu0 %666  ;;  %v11776_v49 = vadd.f32 %v11536_v3, %v595_v41  ;;  %v669_v58 = vpop.xlane.xlu1 %668  ;;  %v10871_v3 = vld [vmem:[%s14824_s2 + $0x94] ss:$12 sps:$4 sm:$0xff]  }
  0xcc   : > { %1259 = vmatprep.subr.bf16.mxu0 %v10871_v3  ;;  %10785 = vmatprep.subr.bf16.mxu1 %v10871_v3  ;;  %v781_v22 = vmul.f32 %v11797_v5, %v11797_v5  ;;  %v598_v41 = vld [vmem:[%s11541_s26 + $0xf0] sm:$0xff]  ;;  %v720_v15 = vmul.f32 0.0078125, %v669_v58  ;;  %v14846_v3 = vmov 0   ;;  %s9352_s26 = sshll.u32 %s14182_s19, 4  ;;  %s14768_s26 = int_to_ptr.vmem [resolvable:$true] %s9352_s26 }
  0xcd   : > { %14916 = vst [vmem:[#allocation33_spill] sm:$0xff] %v11776_v49  ;;  %1260 = vmatpush1.bf16.msra.mxu0 %v10873_v9  ;;  %10793 = vmatpush1.bf16.msra.mxu1 %v10873_v9  ;;  %s11293_s27 = scalar_lea.vmem %s14768_s26, 32768  ;;  %p11300_p1 = scmp.lt.s32.totalorder %s14768_s26, %s11298_s25 }
  0xce   : > { %813 = vadd.xlane.f32.xlu1 %v776_v52  ;;  %690 = vadd.xlane.f32.xlu0 %v11730_v53  ;;  %v11781_v52 = vsub.f32 %v11611_v29, %v716_v30  ;;  %p11294_p12 = scmp.ne.s32.totalorder %s14768_s26, %s11293_s27  ;;  %p11301_p2 = scmp.lt.s32.totalorder %s11299_s29, %s11293_s27 }
  0xcf   : > { %v671_v16 = vpop.xlane.xlu0 %670  ;;  %1261 = vmatprep.subr.bf16.mxu0 %v10874_v12  ;;  %10786 = vmatprep.subr.bf16.mxu1 %v10874_v12 }
  0xd0   : > { %v780_v59 = vmul.f32 %v11781_v52, %v11781_v52  ;;  %v721_v51 = vmul.f32 0.0078125, %v671_v16  ;;  %1279 = vmatprep.mubr.bf16.mxu0 %v14846_v3  ;;  %1399 = vmatprep.mubr.bf16.mxu1 %v14846_v3  ;;  %p11295_p13 = pnand %p11294_p12, %p11502_p4  ;;  %p11302_p3 = por %p11301_p2, %p11300_p1 }
  0xd1   : > { %1262 = vmatpush1.bf16.msra.mxu0 %v10876_v37  ;;  %10794 = vmatpush1.bf16.msra.mxu1 %v10876_v37 }
  0xd2   : > { %692 = vadd.xlane.f32.xlu1 %v11744_v60  ;;  %815 = vadd.xlane.f32.xlu0 %v777_v63  ;;  %v718_v63 = vmul.f32 0.0078125, %v665_v42  ;;  %v673_v42 = vpop.xlane.xlu1 %672  ;;  %v11841_v16 = vsub.f32 %v11637_v39, %v721_v51  ;;  %p11296_p0 = pneg %p11295_p13 }
  0xd3   : > { %v675_v1 = vpop.xlane.xlu0 %674  ;;  %v722_v58 = vmul.f32 0.0078125, %v673_v42 }
  0xd4   : > { %v11813_v30 = vsub.f32 %v11621_v33, %v718_v63  ;;  %v723_v13 = vmul.f32 0.0078125, %v675_v1  ;;  %p11303_p5 = pnand %p11302_p3, %p11296_p0 }
  0xd6   : > { %817 = vadd.xlane.f32.xlu1 %v778_v23  ;;  %694 = vadd.xlane.f32.xlu0 %v11762_v27  ;;  %v719_v23 = vmul.f32 0.0078125, %v667_v48  ;;  %v782_v48 = vmul.f32 %v11813_v30, %v11813_v30  ;;  %v677_v63 = vpop.xlane.xlu1 %676  ;;  %v11852_v42 = vsub.f32 %v11647_v43, %v723_v13 }
  0xd7   : > { %v679_v12 = vpop.xlane.xlu0 %678  ;;  %v724_v37 = vmul.f32 0.0078125, %v677_v63 }
  0xd8   : > { %v11826_v55 = vsub.f32 %v11627_v35, %v719_v23  ;;  %v11846_v23 = vsub.f32 %v11640_v40, %v722_v58 }
  0xda   : > { %696 = vadd.xlane.f32.xlu1 %v11776_v49  ;;  %819 = vadd.xlane.f32.xlu0 %v779_v50  ;;  %v11823_v50 = vadd.f32 %v11577_v17, %v598_v41  ;;  %v11836_v17 = vadd.f32 %v11583_v19, %v599_v57  ;;  %v783_v9 = vmul.f32 %v11826_v55, %v11826_v55  ;;  %v725_v41 = vmul.f32 0.0078125, %v679_v12 }
  0xdb   : > { %v785_v19 = vmul.f32 %v11841_v16, %v11841_v16  ;;  %v786_v1 = vmul.f32 %v11846_v23, %v11846_v23  ;;  %v11859_v57 = vsub.f32 %v11650_v44, %v724_v37 }
  0xdc   : > { %14919 = vst [vmem:[#allocation36_spill] sm:$0xff] %v11823_v50  ;;  %14920 = vst [vmem:[#allocation37_spill] sm:$0xff] %v11836_v17  ;;  %v11862_v58 = vsub.f32 %v11656_v46, %v725_v41 }
  0xdd   : > { %v788_v63 = vmul.f32 %v11859_v57, %v11859_v57 }
  0xde   : > { %821 = vadd.xlane.f32.xlu1 %v780_v59  ;;  %698 = vadd.xlane.f32.xlu0 %v11794_v0  ;;  %v11832_v59 = vsub.f32 %v11630_v36, %v720_v15  ;;  %v681_v15 = vpop.xlane.xlu1 %680 }
  0xdf   : > { %v726_v51 = vmul.f32 0.0078125, %v681_v15 }
  0xe1   : > { %v11869_v13 = vsub.f32 %v11659_v47, %v726_v51 }
  0xe2   : > { %700 = vadd.xlane.f32.xlu1 %v11808_v2  ;;  %823 = vadd.xlane.f32.xlu0 %v781_v22  ;;  %v784_v22 = vmul.f32 %v11832_v59, %v11832_v59 }
  0xe3   : > { %v790_v12 = vmul.f32 %v11869_v13, %v11869_v13 }
  0xe6   : > { %825 = vadd.xlane.f32.xlu1 %v782_v48  ;;  %702 = vadd.xlane.f32.xlu0 %v11823_v50  ;;  %v787_v48 = vmul.f32 %v11852_v42, %v11852_v42 }
  0xea   : > { %704 = vadd.xlane.f32.xlu1 %v11836_v17  ;;  %827 = vadd.xlane.f32.xlu0 %v783_v9  ;;  %v789_v9 = vmul.f32 %v11862_v58, %v11862_v58 }
  0xee   : > { %829 = vadd.xlane.f32.xlu1 %v784_v22  ;;  %831 = vadd.xlane.f32.xlu0 %v785_v19 }
  0xf2   : > { %833 = vadd.xlane.f32.xlu1 %v786_v1  ;;  %835 = vadd.xlane.f32.xlu0 %v787_v48 }
  0xf6   : > { %837 = vadd.xlane.f32.xlu1 %v788_v63  ;;  %839 = vadd.xlane.f32.xlu0 %v789_v9 }
  0xfa   : > { %841 = vadd.xlane.f32.xlu1 %v790_v12 }
 0x147   : > { %v804_v22 = vpop.xlane.xlu0 %803 }
 0x148   : > { %v867_v19 = vmul.f32 0.0078125, %v804_v22 }
 0x14a   : > { %v899_v37 = vadd.f32 1e-05, %v867_v19 }
 0x14b   : > { %v806_v41 = vpop.xlane.xlu1 %805  ;;  %v683_v15 = vpop.xlane.xlu0 %682 }
 0x14c   : > { %10973 = vrsqrt.f32 %v899_v37  ;;  %v868_v1 = vmul.f32 0.0078125, %v806_v41  ;;  %v727_v48 = vmul.f32 0.0078125, %v683_v15 }
 0x14e   : > { %v900_v3 = vadd.f32 1e-05, %v868_v1  ;;  %v11874_v46 = vsub.f32 %v11679_v61, %v727_v48 }
 0x14f   : > { %v685_v51 = vpop.xlane.xlu1 %684  ;;  %v808_v47 = vpop.xlane.xlu0 %807 }
 0x150   : > { %10975 = vrsqrt.f32 %v900_v3  ;;  %v728_v63 = vmul.f32 0.0078125, %v685_v51  ;;  %v869_v9 = vmul.f32 0.0078125, %v808_v47  ;;  %v791_v12 = vmul.f32 %v11874_v46, %v11874_v46 }
 0x152   : > { %v901_v44 = vadd.f32 1e-05, %v869_v9  ;;  %843 = vadd.xlane.f32.xlu0 %v791_v12  ;;  %v11879_v22 = vsub.f32 %v11694_v14, %v728_v63 }
 0x153   : > { %v810_v19 = vpop.xlane.xlu1 %809  ;;  %v687_v37 = vpop.xlane.xlu0 %686 }
 0x154   : > { %10977 = vrsqrt.f32 %v901_v44  ;;  %v870_v41 = vmul.f32 0.0078125, %v810_v19  ;;  %v729_v15 = vmul.f32 0.0078125, %v687_v37  ;;  %v792_v1 = vmul.f32 %v11879_v22, %v11879_v22  ;;  %v11892_v19 = vld [vmem:[%s14827_s5] ss:$0 sm:$0xff] }
 0x156   : > { %v10974_v48 = vpop.eup %10973  ;;  %v902_v3 = vadd.f32 1e-05, %v870_v41  ;;  %845 = vadd.xlane.f32.xlu1 %v792_v1  ;;  %v11884_v47 = vsub.f32 %v11702_v26, %v729_v15 }
 0x157   : > { %v689_v51 = vpop.xlane.xlu1 %688  ;;  %v812_v9 = vpop.xlane.xlu0 %811  ;;  %v963_v12 = vmul.f32 %v10974_v48, %v11673_v54 }
 0x158   : > { %10979 = vrsqrt.f32 %v902_v3  ;;  %v730_v63 = vmul.f32 0.0078125, %v689_v51  ;;  %v871_v14 = vmul.f32 0.0078125, %v812_v9  ;;  %v793_v44 = vmul.f32 %v11884_v47, %v11884_v47 }
 0x159   : > { %v1001_v48 = vmul.f32 %v11892_v19, %v963_v12 }
 0x15a   : > { %v10976_v37 = vpop.eup %10975  ;;  %v903_v41 = vadd.f32 1e-05, %v871_v14  ;;  %847 = vadd.xlane.f32.xlu0 %v793_v44  ;;  %v11895_v15 = vsub.f32 %v11712_v38, %v730_v63  ;;  %v11904_v14 = vld [vmem:[%s14828_s6] ss:$0 sm:$0xff] }
 0x15b   : > { %v814_v1 = vpop.xlane.xlu1 %813  ;;  %v691_v26 = vpop.xlane.xlu0 %690  ;;  %v964_v54 = vmul.f32 %v10976_v37, %v11682_v62 }
 0x15c   : > { %10981 = vrsqrt.f32 %v903_v41  ;;  %v872_v3 = vmul.f32 0.0078125, %v814_v1  ;;  %v731_v51 = vmul.f32 0.0078125, %v691_v26  ;;  %v794_v9 = vmul.f32 %v11895_v15, %v11895_v15 }
 0x15d   : > { %v1002_v63 = vmul.f32 %v11892_v19, %v964_v54  ;;  %v1039_v26 = vadd.f32 %v11904_v14, %v1001_v48 }
 0x15e   : > { %v10978_v44 = vpop.eup %10977  ;;  %v904_v38 = vadd.f32 1e-05, %v872_v3  ;;  %849 = vadd.xlane.f32.xlu1 %v794_v9  ;;  %v11908_v62 = vsub.f32 %v11730_v53, %v731_v51 }
 0x15f   : > { %v693_v12 = vpop.xlane.xlu1 %692  ;;  %v816_v37 = vpop.xlane.xlu0 %815  ;;  %v1040_v41 = vadd.f32 %v11904_v14, %v1002_v63  ;;  %v965_v1 = vmul.f32 %v10978_v44, %v11685_v4 }
 0x160   : > { %10983 = vrsqrt.f32 %v904_v38  ;;  %v732_v61 = vmul.f32 0.0078125, %v693_v12  ;;  %v873_v43 = vmul.f32 0.0078125, %v816_v37  ;;  %v795_v54 = vmul.f32 %v11908_v62, %v11908_v62 }
 0x161   : > { %v11915_v40 = vpack.c.bf16 %v1040_v41, %v1039_v26  ;;  %v1003_v38 = vmul.f32 %v11892_v19, %v965_v1  ;;  %v14921_v37 = vmov 0  }
 0x162   : > { %v10980_v3 = vpop.eup %10979  ;;  %v905_v9 = vadd.f32 1e-05, %v873_v43  ;;  %851 = vadd.xlane.f32.xlu0 %v795_v54  ;;  %v11918_v51 = vsub.f32 %v11744_v60, %v732_v61 }
 0x163   : > { %v818_v53 = vpop.xlane.xlu1 %817  ;;  %1280 = vmatmul.mubr.bf16.vlgmr.msra.gmra.mrb[0].mxu0 %v11915_v40  ;;  %v695_v48 = vpop.xlane.xlu0 %694  ;;  %v966_v4 = vmul.f32 %v10980_v3, %v11697_v18  ;;  %v1041_v1 = vadd.f32 %v11904_v14, %v1003_v38 }
 0x164   : > { %10985 = vrsqrt.f32 %v905_v9  ;;  %v874_v63 = vmul.f32 0.0078125, %v818_v53  ;;  %v733_v44 = vmul.f32 0.0078125, %v695_v48  ;;  %v796_v12 = vmul.f32 %v11918_v51, %v11918_v51  ;;  %1289 = vmatprep.mubr.bf16.mxu0 %v14921_v37 }
 0x165   : > { %v1004_v43 = vmul.f32 %v11892_v19, %v966_v4 }
 0x166   : > { %v10982_v61 = vpop.eup %10981  ;;  %v906_v26 = vadd.f32 1e-05, %v874_v63  ;;  %853 = vadd.xlane.f32.xlu1 %v796_v12  ;;  %v11928_v41 = vsub.f32 %v11762_v27, %v733_v44 }
 0x167   : > { %v697_v54 = vpop.xlane.xlu1 %696  ;;  %v820_v18 = vpop.xlane.xlu0 %819  ;;  %v1042_v53 = vadd.f32 %v11904_v14, %v1004_v43  ;;  %v967_v3 = vmul.f32 %v10982_v61, %v11707_v31 }
 0x168   : > { %10987 = vrsqrt.f32 %v906_v26  ;;  %v734_v9 = vmul.f32 0.0078125, %v697_v54  ;;  %v875_v48 = vmul.f32 0.0078125, %v820_v18  ;;  %v797_v4 = vmul.f32 %v11928_v41, %v11928_v41 }
 0x169   : > { %v11935_v60 = vpack.c.bf16 %v1042_v53, %v1041_v1  ;;  %v1005_v43 = vmul.f32 %v11892_v19, %v967_v3 }
 0x16a   : > { %v10984_v63 = vpop.eup %10983  ;;  %v907_v12 = vadd.f32 1e-05, %v875_v48  ;;  %855 = vadd.xlane.f32.xlu0 %v797_v4  ;;  %v11938_v44 = vsub.f32 %v11776_v49, %v734_v9 }
 0x16b   : > { %v822_v27 = vpop.xlane.xlu1 %821  ;;  %1290 = vmatmul.mubr.bf16.gmra.mrb[4].mxu0 %v11935_v60  ;;  %v699_v38 = vpop.xlane.xlu0 %698  ;;  %v968_v31 = vmul.f32 %v10984_v63, %v11717_v45  ;;  %v1043_v3 = vadd.f32 %v11904_v14, %v1005_v43 }
 0x16c   : > { %10989 = vrsqrt.f32 %v907_v12  ;;  %v876_v61 = vmul.f32 0.0078125, %v822_v27  ;;  %v735_v26 = vmul.f32 0.0078125, %v699_v38  ;;  %v798_v54 = vmul.f32 %v11938_v44, %v11938_v44  ;;  %1299 = vmatprep.mubr.bf16.mxu0 %v14921_v37 }
 0x16d   : > { %v1006_v18 = vmul.f32 %v11892_v19, %v968_v31 }
 0x16e   : > { %v10986_v1 = vpop.eup %10985  ;;  %v908_v53 = vadd.f32 1e-05, %v876_v61  ;;  %857 = vadd.xlane.f32.xlu1 %v798_v54  ;;  %v11948_v9 = vsub.f32 %v11794_v0, %v735_v26 }
 0x16f   : > { %v701_v48 = vpop.xlane.xlu1 %700  ;;  %v824_v45 = vpop.xlane.xlu0 %823  ;;  %v1044_v27 = vadd.f32 %v11904_v14, %v1006_v18  ;;  %v969_v4 = vmul.f32 %v10986_v1, %v11733_v56 }
 0x170   : > { %10991 = vrsqrt.f32 %v908_v53  ;;  %v736_v63 = vmul.f32 0.0078125, %v701_v48  ;;  %v877_v12 = vmul.f32 0.0078125, %v824_v45  ;;  %v799_v38 = vmul.f32 %v11948_v9, %v11948_v9 }
 0x171   : > { %v11955_v31 = vpack.c.bf16 %v1044_v27, %v1043_v3  ;;  %v1007_v18 = vmul.f32 %v11892_v19, %v969_v4 }
 0x172   : > { %v10988_v61 = vpop.eup %10987  ;;  %v909_v54 = vadd.f32 1e-05, %v877_v12  ;;  %859 = vadd.xlane.f32.xlu0 %v799_v38  ;;  %v11958_v26 = vsub.f32 %v11808_v2, %v736_v63 }
 0x173   : > { %v826_v0 = vpop.xlane.xlu1 %825  ;;  %1300 = vmatmul.mubr.bf16.gmra.mrb[8].mxu0 %v11955_v31  ;;  %v703_v43 = vpop.xlane.xlu0 %702  ;;  %v970_v56 = vmul.f32 %v10988_v61, %v11749_v6  ;;  %v1045_v4 = vadd.f32 %v11904_v14, %v1007_v18 }
 0x174   : > { %10993 = vrsqrt.f32 %v909_v54  ;;  %v878_v1 = vmul.f32 0.0078125, %v826_v0  ;;  %v737_v53 = vmul.f32 0.0078125, %v703_v43  ;;  %v800_v48 = vmul.f32 %v11958_v26, %v11958_v26  ;;  %1309 = vmatprep.mubr.bf16.mxu0 %v14921_v37 }
 0x175   : > { %v1008_v45 = vmul.f32 %v11892_v19, %v970_v56 }
 0x176   : > { %v10990_v3 = vpop.eup %10989  ;;  %v910_v27 = vadd.f32 1e-05, %v878_v1  ;;  %861 = vadd.xlane.f32.xlu1 %v800_v48  ;;  %v11968_v63 = vsub.f32 %v11823_v50, %v737_v53 }
 0x177   : > { %v705_v12 = vpop.xlane.xlu1 %704  ;;  %v828_v6 = vpop.xlane.xlu0 %827  ;;  %v1046_v0 = vadd.f32 %v11904_v14, %v1008_v45  ;;  %v971_v38 = vmul.f32 %v10990_v3, %v11765_v34 }
 0x178   : > { %10995 = vrsqrt.f32 %v910_v27  ;;  %v738_v61 = vmul.f32 0.0078125, %v705_v12  ;;  %v879_v54 = vmul.f32 0.0078125, %v828_v6  ;;  %v801_v43 = vmul.f32 %v11968_v63, %v11968_v63 }
 0x179   : > { %v11975_v56 = vpack.c.bf16 %v1046_v0, %v1045_v4  ;;  %v1009_v45 = vmul.f32 %v11892_v19, %v971_v38 }
 0x17a   : > { %v10992_v1 = vpop.eup %10991  ;;  %v911_v48 = vadd.f32 1e-05, %v879_v54  ;;  %863 = vadd.xlane.f32.xlu0 %v801_v43  ;;  %v11978_v53 = vsub.f32 %v11836_v17, %v738_v61 }
 0x17b   : > { %v830_v50 = vpop.xlane.xlu1 %829  ;;  %1310 = vmatmul.mubr.bf16.gmra.mrb[12].mxu0 %v11975_v56  ;;  %v832_v18 = vpop.xlane.xlu0 %831  ;;  %v972_v34 = vmul.f32 %v10992_v1, %v11781_v52  ;;  %v1047_v52 = vadd.f32 %v11904_v14, %v1009_v45 }
 0x17c   : > { %10997 = vrsqrt.f32 %v911_v48  ;;  %v880_v3 = vmul.f32 0.0078125, %v830_v50  ;;  %v881_v27 = vmul.f32 0.0078125, %v832_v18  ;;  %v802_v12 = vmul.f32 %v11978_v53, %v11978_v53  ;;  %1319 = vmatprep.mubr.bf16.mxu0 %v14921_v37 }
 0x17d   : > { %v1010_v6 = vmul.f32 %v11892_v19, %v972_v34 }
 0x17e   : > { %v10994_v4 = vpop.eup %10993  ;;  %v912_v0 = vadd.f32 1e-05, %v880_v3  ;;  %v913_v61 = vadd.f32 1e-05, %v881_v27  ;;  %865 = vadd.xlane.f32.xlu1 %v802_v12 }
 0x17f   : > { %v834_v54 = vpop.xlane.xlu1 %833  ;;  %v836_v43 = vpop.xlane.xlu0 %835  ;;  %v1048_v38 = vadd.f32 %v11904_v14, %v1010_v6  ;;  %v973_v50 = vmul.f32 %v10994_v4, %v11797_v5 }
 0x180   : > { %10999 = vrsqrt.f32 %v912_v0  ;;  %v882_v1 = vmul.f32 0.0078125, %v834_v54  ;;  %v883_v34 = vmul.f32 0.0078125, %v836_v43 }
 0x181   : > { %v11990_v48 = vpack.c.bf16 %v1048_v38, %v1047_v52  ;;  %11001 = vrsqrt.f32 %v913_v61  ;;  %v1011_v27 = vmul.f32 %v11892_v19, %v973_v50  ;;  %v12005_v50 = vld [vmem:[%s14824_s2 + $0x8] ss:$12 sps:$4 sm:$0xff]  }
 0x182   : > { %v10996_v18 = vpop.eup %10995  ;;  %v914_v17 = vadd.f32 1e-05, %v882_v1  ;;  %v915_v6 = vadd.f32 1e-05, %v883_v34  ;;  %10555 = vmatprep.subr.bf16.mxu1 %v12005_v50 }
 0x183   : > { %v838_v2 = vpop.xlane.xlu1 %837  ;;  %1320 = vmatmul.mubr.bf16.gmra.mrb[16].mxu0 %v11990_v48  ;;  %v974_v3 = vmul.f32 %v10996_v18, %v11813_v30  ;;  %v840_v0 = vpop.xlane.xlu0 %839  ;;  %v1049_v54 = vadd.f32 %v11904_v14, %v1011_v27 }
 0x184   : > { %11003 = vrsqrt.f32 %v914_v17  ;;  %v884_v45 = vmul.f32 0.0078125, %v838_v2  ;;  %1329 = vmatprep.mubr.bf16.mxu0 %v14921_v37  ;;  %v885_v17 = vmul.f32 0.0078125, %v840_v0 }
 0x185   : > { %v1012_v5 = vmul.f32 %v11892_v19, %v974_v3 }
 0x186   : > { %v10998_v12 = vpop.eup %10997  ;;  %v916_v4 = vadd.f32 1e-05, %v884_v45  ;;  %v917_v45 = vadd.f32 1e-05, %v885_v17 }
 0x187   : > { %v842_v61 = vpop.xlane.xlu1 %841  ;;  %v1050_v43 = vadd.f32 %v11904_v14, %v1012_v5  ;;  %v975_v52 = vmul.f32 %v10998_v12, %v11826_v55 }
 0x188   : > { %11005 = vrsqrt.f32 %v916_v4  ;;  %v886_v30 = vmul.f32 0.0078125, %v842_v61 }
 0x189   : > { %v12000_v38 = vpack.c.bf16 %v1050_v43, %v1049_v54  ;;  %11007 = vrsqrt.f32 %v915_v6  ;;  %v1013_v18 = vmul.f32 %v11892_v19, %v975_v52 }
 0x18a   : > { %v11000_v2 = vpop.eup %10999  ;;  %v918_v55 = vadd.f32 1e-05, %v886_v30 }
 0x18b   : > { %1330 = vmatmul.mubr.bf16.gmra.mrb[20].mxu0 %v12000_v38  ;;  %v976_v1 = vmul.f32 %v11000_v2, %v11832_v59  ;;  %v11002_v34 = vpop.eup %11001  ;;  %v1051_v5 = vadd.f32 %v11904_v14, %v1013_v18 }
 0x18c   : > { %1339 = vmatprep.mubr.bf16.mxu0 %v14921_v37  ;;  %v977_v6 = vmul.f32 %v11002_v34, %v11841_v16  ;;  %11009 = vrsqrt.f32 %v918_v55 }
 0x18d   : > { %v1014_v3 = vmul.f32 %v11892_v19, %v976_v1  ;;  %11011 = vrsqrt.f32 %v917_v45 }
 0x18e   : > { %v11004_v27 = vpop.eup %11003  ;;  %v1015_v54 = vmul.f32 %v11892_v19, %v977_v6 }
 0x18f   : > { %v1052_v12 = vadd.f32 %v11904_v14, %v1014_v3  ;;  %v978_v59 = vmul.f32 %v11004_v27, %v11846_v23 }
 0x190   : > { %v1053_v23 = vadd.f32 %v11904_v14, %v1015_v54 }
 0x191   : > { %v12017_v4 = vpack.c.bf16 %v1052_v12, %v1051_v5  ;;  %v1016_v0 = vmul.f32 %v11892_v19, %v978_v59 }
 0x192   : > { %v11006_v61 = vpop.eup %11005 }
 0x193   : > { %1340 = vmatmul.mubr.bf16.gmra.mrb[24].mxu0 %v12017_v4  ;;  %v11008_v43 = vpop.eup %11007  ;;  %v1054_v52 = vadd.f32 %v11904_v14, %v1016_v0  ;;  %v980_v16 = vmul.f32 %v11006_v61, %v11859_v57 }
 0x194   : > { %1349 = vmatprep.mubr.bf16.mxu0 %v14921_v37  ;;  %v979_v30 = vmul.f32 %v11008_v43, %v11852_v42 }
 0x195   : > { %v12027_v2 = vpack.c.bf16 %v1054_v52, %v1053_v23  ;;  %v1018_v17 = vmul.f32 %v11892_v19, %v980_v16 }
 0x196   : > { %v11010_v1 = vpop.eup %11009  ;;  %v1017_v18 = vmul.f32 %v11892_v19, %v979_v30 }
 0x197   : > { %v11012_v34 = vpop.eup %11011  ;;  %v1056_v55 = vadd.f32 %v11904_v14, %v1018_v17  ;;  %v982_v57 = vmul.f32 %v11010_v1, %v11869_v13 }
 0x198   : > { %v1055_v3 = vadd.f32 %v11904_v14, %v1017_v18  ;;  %v981_v42 = vmul.f32 %v11012_v34, %v11862_v58 }
 0x199   : > { %v1020_v45 = vmul.f32 %v11892_v19, %v982_v57 }
 0x19a   : > { %v12037_v27 = vpack.c.bf16 %v1056_v55, %v1055_v3  ;;  %v1019_v5 = vmul.f32 %v11892_v19, %v981_v42 }
 0x19b   : > { %1350 = vmatmul.mubr.bf16.gmra.mrb[28].mxu0 %v12027_v2  ;;  %v1058_v12 = vadd.f32 %v11904_v14, %v1020_v45 }
 0x19c   : > { %1359 = vmatprep.mubr.bf16.mxu0 %v14921_v37  ;;  %v1057_v6 = vadd.f32 %v11904_v14, %v1019_v5 }
 0x19e   : > { %v12045_v59 = vpack.c.bf16 %v1058_v12, %v1057_v6 }
 0x1a3   : > { %1360 = vmatmul.mubr.bf16.gmra.mrb[32].mxu0 %v12037_v27 }
 0x1a4   : > { %1369 = vmatprep.mubr.bf16.mxu0 %v14921_v37 }
 0x1ab   : > { %1370 = vmatmul.mubr.bf16.gmra.mrb[36].mxu0 %v12045_v59 }
 0x1ac   : > { %1379 = vmatprep.mubr.bf16.mxu0 %v14921_v37 }
 0x1df   : > { %v844_v58 = vpop.xlane.xlu0 %843 }
 0x1e0   : > { %v887_v13 = vmul.f32 0.0078125, %v844_v58 }
 0x1e2   : > { %v919_v0 = vadd.f32 1e-05, %v887_v13 }
 0x1e3   : > { %v846_v61 = vpop.xlane.xlu1 %845 }
 0x1e4   : > { %11013 = vrsqrt.f32 %v919_v0  ;;  %v888_v54 = vmul.f32 0.0078125, %v846_v61 }
 0x1e6   : > { %v920_v43 = vadd.f32 1e-05, %v888_v54 }
 0x1e7   : > { %v848_v52 = vpop.xlane.xlu0 %847 }
 0x1e8   : > { %11015 = vrsqrt.f32 %v920_v43  ;;  %v889_v16 = vmul.f32 0.0078125, %v848_v52 }
 0x1ea   : > { %v921_v23 = vadd.f32 1e-05, %v889_v16 }
 0x1eb   : > { %v850_v30 = vpop.xlane.xlu1 %849 }
 0x1ec   : > { %11017 = vrsqrt.f32 %v921_v23  ;;  %v890_v17 = vmul.f32 0.0078125, %v850_v30 }
 0x1ee   : > { %v11014_v1 = vpop.eup %11013  ;;  %v922_v18 = vadd.f32 1e-05, %v890_v17 }
 0x1ef   : > { %v852_v34 = vpop.xlane.xlu0 %851  ;;  %v983_v55 = vmul.f32 %v11014_v1, %v11874_v46 }
 0x1f0   : > { %11019 = vrsqrt.f32 %v922_v18  ;;  %v891_v57 = vmul.f32 0.0078125, %v852_v34 }
 0x1f1   : > { %v1021_v12 = vmul.f32 %v11892_v19, %v983_v55 }
 0x1f2   : > { %v11016_v3 = vpop.eup %11015  ;;  %v923_v42 = vadd.f32 1e-05, %v891_v57 }
 0x1f3   : > { %v854_v45 = vpop.xlane.xlu1 %853  ;;  %v984_v5 = vmul.f32 %v11016_v3, %v11879_v22  ;;  %v1059_v54 = vadd.f32 %v11904_v14, %v1021_v12 }
 0x1f4   : > { %11021 = vrsqrt.f32 %v923_v42  ;;  %v892_v6 = vmul.f32 0.0078125, %v854_v45 }
 0x1f5   : > { %v1022_v58 = vmul.f32 %v11892_v19, %v984_v5 }
 0x1f6   : > { %v11018_v13 = vpop.eup %11017  ;;  %v924_v0 = vadd.f32 1e-05, %v892_v6 }
 0x1f7   : > { %v856_v61 = vpop.xlane.xlu0 %855  ;;  %v1060_v46 = vadd.f32 %v11904_v14, %v1022_v58  ;;  %v985_v43 = vmul.f32 %v11018_v13, %v11884_v47 }
 0x1f8   : > { %11023 = vrsqrt.f32 %v924_v0  ;;  %v893_v52 = vmul.f32 0.0078125, %v856_v61 }
 0x1f9   : > { %v12056_v16 = vpack.c.bf16 %v1060_v46, %v1059_v54  ;;  %v1023_v1 = vmul.f32 %v11892_v19, %v985_v43 }
 0x1fa   : > { %v11020_v22 = vpop.eup %11019  ;;  %v925_v23 = vadd.f32 1e-05, %v893_v52 }
 0x1fb   : > { %v858_v30 = vpop.xlane.xlu1 %857  ;;  %1380 = vmatmul.mubr.bf16.gmra.mrb[40].mxu0 %v12056_v16  ;;  %v986_v17 = vmul.f32 %v11020_v22, %v11895_v15  ;;  %v1061_v3 = vadd.f32 %v11904_v14, %v1023_v1 }
 0x1fc   : > { %11025 = vrsqrt.f32 %v925_v23  ;;  %v894_v18 = vmul.f32 0.0078125, %v858_v30  ;;  %1389 = vmatprep.mubr.bf16.mxu0 %v14921_v37 }
 0x1fd   : > { %v1024_v34 = vmul.f32 %v11892_v19, %v986_v17 }
 0x1fe   : > { %v11022_v47 = vpop.eup %11021  ;;  %v926_v55 = vadd.f32 1e-05, %v894_v18 }
 0x1ff   : > { %v860_v57 = vpop.xlane.xlu0 %859  ;;  %v1062_v42 = vadd.f32 %v11904_v14, %v1024_v34  ;;  %v987_v45 = vmul.f32 %v11022_v47, %v11908_v62 }
 0x200   : > { %11027 = vrsqrt.f32 %v926_v55  ;;  %v895_v5 = vmul.f32 0.0078125, %v860_v57 }
 0x201   : > { %v12066_v15 = vpack.c.bf16 %v1062_v42, %v1061_v3  ;;  %v1025_v0 = vmul.f32 %v11892_v19, %v987_v45  ;;  %v10879_v3 = vld [vmem:[%s14824_s2 + $0x38] ss:$12 sps:$4 sm:$0xff]  }
 0x202   : > { %v11024_v12 = vpop.eup %11023  ;;  %v927_v6 = vadd.f32 1e-05, %v895_v5 }
 0x203   : > { %v862_v58 = vpop.xlane.xlu1 %861  ;;  %1390 = vmatmul.mubr.bf16.gmra.mrb[44].mxu0 %v12066_v15  ;;  %v988_v13 = vmul.f32 %v11024_v12, %v11918_v51  ;;  %v1063_v52 = vadd.f32 %v11904_v14, %v1025_v0  ;;  %v10878_v51 = vld [vmem:[%s14824_s2 + $0x20] ss:$12 sps:$4 sm:$0xff]  }
 0x204   : > { %11029 = vrsqrt.f32 %v927_v6  ;;  %v896_v61 = vmul.f32 0.0078125, %v862_v58  ;;  %v10880_v6 = vld [vmem:[%s14824_s2 + $0x50] ss:$12 sps:$4 sm:$0xff]  }
 0x205   : > { %v1026_v54 = vmul.f32 %v11892_v19, %v988_v13 }
 0x206   : > { %v11026_v46 = vpop.eup %11025  ;;  %v928_v43 = vadd.f32 1e-05, %v896_v61  ;;  %v10881_v61 = vld [vmem:[%s14824_s2 + $0x68] ss:$12 sps:$4 sm:$0xff]  }
 0x207   : > { %v864_v62 = vpop.xlane.xlu0 %863  ;;  %v1064_v22 = vadd.f32 %v11904_v14, %v1026_v54  ;;  %v989_v23 = vmul.f32 %v11026_v46, %v11928_v41 }
 0x208   : > { %11031 = vrsqrt.f32 %v928_v43  ;;  %v897_v30 = vmul.f32 0.0078125, %v864_v62 }
 0x209   : > { %v12075_v17 = vpack.c.bf16 %v1064_v22, %v1063_v52  ;;  %v1027_v55 = vmul.f32 %v11892_v19, %v989_v23  ;;  %v10882_v52 = vld [vmem:[%s14824_s2 + $0x80] ss:$12 sps:$4 sm:$0xff]  }
 0x20a   : > { %v11028_v1 = vpop.eup %11027  ;;  %v929_v18 = vadd.f32 1e-05, %v897_v30 }
 0x20b   : > { %v866_v34 = vpop.xlane.xlu1 %865  ;;  %1400 = vmatmul.mubr.bf16.vlgmr.msra.gmra.mrb[0].mxu1 %v12075_v17  ;;  %v990_v47 = vmul.f32 %v11028_v1, %v11938_v44  ;;  %v1065_v5 = vadd.f32 %v11904_v14, %v1027_v55 }
 0x20c   : > { %11033 = vrsqrt.f32 %v929_v18  ;;  %v898_v57 = vmul.f32 0.0078125, %v866_v34  ;;  %10556 = vmatpush3.bf16.msra.mxu1 %v12005_v50  ;;  %1409 = vmatprep.mubr.bf16.mxu1 %v14921_v37 }
 0x20d   : > { %10557 = vmatprep.subr.bf16.mxu1 %v10878_v51  ;;  %v1028_v41 = vmul.f32 %v11892_v19, %v990_v47 }
 0x20e   : > { %v11030_v42 = vpop.eup %11029  ;;  %v930_v45 = vadd.f32 1e-05, %v898_v57 }
 0x20f   : > { %v1066_v44 = vadd.f32 %v11904_v14, %v1028_v41  ;;  %v991_v12 = vmul.f32 %v11030_v42, %v11948_v9 }
 0x210   : > { %11035 = vrsqrt.f32 %v930_v45  ;;  %10558 = vmatpush3.bf16.msra.mxu1 %v10878_v51  ;;  %v10883_v51 = vld [vmem:[%s14824_s2 + $0x98] ss:$12 sps:$4 sm:$0xff]  }
 0x211   : > { %v12092_v50 = vpack.c.bf16 %v1066_v44, %v1065_v5  ;;  %10559 = vmatprep.subr.bf16.mxu1 %v10879_v3  ;;  %v1029_v0 = vmul.f32 %v11892_v19, %v991_v12 }
 0x212   : > { %v11032_v58 = vpop.eup %11031 }
 0x213   : > { %1410 = vmatmul.mubr.bf16.gmra.mrb[4].mxu1 %v12092_v50  ;;  %v992_v13 = vmul.f32 %v11032_v58, %v11958_v26  ;;  %v1067_v46 = vadd.f32 %v11904_v14, %v1029_v0 }
 0x214   : > { %10560 = vmatpush3.bf16.msra.mxu1 %v10879_v3  ;;  %1419 = vmatprep.mubr.bf16.mxu1 %v14921_v37 }
 0x215   : > { %10561 = vmatprep.subr.bf16.mxu1 %v10880_v6  ;;  %v1030_v9 = vmul.f32 %v11892_v19, %v992_v13 }
 0x216   : > { %v11034_v54 = vpop.eup %11033 }
 0x217   : > { %v1068_v43 = vadd.f32 %v11904_v14, %v1030_v9  ;;  %v993_v62 = vmul.f32 %v11034_v54, %v11968_v63 }
 0x218   : > { %10562 = vmatpush3.bf16.msra.mxu1 %v10880_v6 }
 0x219   : > { %v12108_v26 = vpack.c.bf16 %v1068_v43, %v1067_v46  ;;  %10563 = vmatprep.subr.bf16.mxu1 %v10881_v61  ;;  %v1031_v30 = vmul.f32 %v11892_v19, %v993_v62 }
 0x21a   : > { %v11036_v22 = vpop.eup %11035 }
 0x21b   : > { %1420 = vmatmul.mubr.bf16.gmra.mrb[8].mxu1 %v12108_v26  ;;  %v994_v23 = vmul.f32 %v11036_v22, %v11978_v53  ;;  %v1069_v1 = vadd.f32 %v11904_v14, %v1031_v30  ;;  %v10884_v53 = vld [vmem:[%s14824_s2 + $0xb0] ss:$12 sps:$4 sm:$0xff]  }
 0x21c   : > { %10564 = vmatpush3.bf16.msra.mxu1 %v10881_v61  ;;  %1429 = vmatprep.mubr.bf16.mxu1 %v14921_v37 }
 0x21d   : > { %10565 = vmatprep.subr.bf16.mxu1 %v10882_v52  ;;  %v1032_v63 = vmul.f32 %v11892_v19, %v994_v23 }
 0x21f   : > { %v1070_v18 = vadd.f32 %v11904_v14, %v1032_v63 }
 0x220   : > { %10566 = vmatpush3.bf16.msra.mxu1 %v10882_v52 }
 0x221   : > { %v12123_v34 = vpack.c.bf16 %v1070_v18, %v1069_v1  ;;  %10567 = vmatprep.subr.bf16.mxu1 %v10883_v51 }
 0x223   : > { %1430 = vmatmul.mubr.bf16.gmra.mrb[12].mxu1 %v12123_v34 }
 0x224   : > { %10568 = vmatpush3.bf16.msra.mxu1 %v10883_v51  ;;  %10571 = vmatprep.mubr.bf16.mxu1 %v11915_v40 }
 0x225   : > { %10569 = vmatprep.subr.bf16.mxu1 %v10884_v53 }
 0x228   : > { %10570 = vmatpush3.bf16.msra.mxu1 %v10884_v53 }
 0x22b   : > { %10572 = vmatmul.mubr.bf16.vlgmr.msra.gmra.mrb[16].mxu1 %v11935_v60 }
 0x22c   : > { %10575 = vmatprep.mubr.bf16.mxu1 %v11955_v31 }
 0x233   : > { %10576 = vmatmul.mubr.bf16.gmra.mrb[20].mxu1 %v11975_v56 }
 0x234   : > { %10579 = vmatprep.mubr.bf16.mxu1 %v11990_v48 }
 0x236   : > { %v1281_v19 = vpop.f32.mrb[0].mxu0 }
 0x237   : > { %v1283_v14 = vpop.f32.mrb[1].mxu0 }
 0x238   : > { %v1285_v47 = vpop.f32.mrb[2].mxu0 }
 0x239   : > { %v1601_v55 = vpack.c.bf16 %v1285_v47, %v1281_v19  ;;  %v1287_v57 = vpop.f32.mrb[3].mxu0 }
 0x23a   : > { %v1617_v41 = vpack.c.bf16 %v1287_v57, %v1283_v14 }
 0x23b   : > { %10580 = vmatmul.mubr.bf16.gmra.mrb[24].mxu1 %v12000_v38 }
 0x23c   : > { %10583 = vmatprep.mubr.bf16.mxu1 %v12017_v4  ;;  %10603 = vmatprep.subr.bf16.mxu1 %v1617_v41 }
 0x23d   : > { %10604 = vmatpush3.bf16.xpose.msra.mxu1 %v1617_v41 }
 0x23e   : > { %v1291_v40 = vpop.f32.mrb[4].mxu0 }
 0x23f   : > { %v1293_v60 = vpop.f32.mrb[5].mxu0 }
 0x240   : > { %v1295_v3 = vpop.f32.mrb[6].mxu0 }
 0x241   : > { %v1602_v31 = vpack.c.bf16 %v1295_v3, %v1291_v40  ;;  %v1297_v42 = vpop.f32.mrb[7].mxu0 }
 0x242   : > { %v1618_v56 = vpack.c.bf16 %v1297_v42, %v1293_v60 }
 0x243   : > { %10584 = vmatmul.mubr.bf16.gmra.mrb[28].mxu1 %v12027_v2 }
 0x244   : > { %10587 = vmatprep.mubr.bf16.mxu1 %v12037_v27  ;;  %10605 = vmatprep.subr.bf16.mxu1 %v1618_v56 }
 0x245   : > { %10606 = vmatpush3.bf16.xpose.msra.mxu1 %v1618_v56 }
 0x246   : > { %v1301_v48 = vpop.f32.mrb[8].mxu0 }
 0x247   : > { %v1303_v45 = vpop.f32.mrb[9].mxu0 }
 0x248   : > { %v1305_v5 = vpop.f32.mrb[10].mxu0 }
 0x249   : > { %v1603_v38 = vpack.c.bf16 %v1305_v5, %v1301_v48  ;;  %v1307_v44 = vpop.f32.mrb[11].mxu0 }
 0x24a   : > { %v1619_v4 = vpack.c.bf16 %v1307_v44, %v1303_v45 }
 0x24b   : > { %10588 = vmatmul.mubr.bf16.gmra.mrb[32].mxu1 %v12045_v59 }
 0x24c   : > { %10591 = vmatprep.mubr.bf16.mxu1 %v12056_v16  ;;  %10607 = vmatprep.subr.bf16.mxu1 %v1619_v4 }
 0x24d   : > { %10608 = vmatpush3.bf16.xpose.msra.mxu1 %v1619_v4 }
 0x24e   : > { %v1311_v12 = vpop.f32.mrb[12].mxu0 }
 0x24f   : > { %v1313_v6 = vpop.f32.mrb[13].mxu0 }
 0x250   : > { %v1315_v58 = vpop.f32.mrb[14].mxu0 }
 0x251   : > { %v1604_v2 = vpack.c.bf16 %v1315_v58, %v1311_v12  ;;  %v1317_v13 = vpop.f32.mrb[15].mxu0 }
 0x252   : > { %v1620_v27 = vpack.c.bf16 %v1317_v13, %v1313_v6 }
 0x253   : > { %10592 = vmatmul.mubr.bf16.gmra.mrb[36].mxu1 %v12066_v15 }
 0x254   : > { %10595 = vmatprep.mubr.bf16.mxu1 %v12075_v17  ;;  %10609 = vmatprep.subr.bf16.mxu1 %v1620_v27 }
 0x255   : > { %10610 = vmatpush3.bf16.xpose.msra.mxu1 %v1620_v27 }
 0x256   : > { %v1321_v0 = vpop.f32.mrb[16].mxu0 }
 0x257   : > { %v1323_v9 = vpop.f32.mrb[17].mxu0 }
 0x258   : > { %v1325_v61 = vpop.f32.mrb[18].mxu0 }
 0x259   : > { %v1605_v59 = vpack.c.bf16 %v1325_v61, %v1321_v0  ;;  %v1327_v54 = vpop.f32.mrb[19].mxu0 }
 0x25a   : > { %v1621_v16 = vpack.c.bf16 %v1327_v54, %v1323_v9 }
 0x25b   : > { %10596 = vmatmul.mubr.bf16.gmra.mrb[40].mxu1 %v12092_v50 }
 0x25c   : > { %10599 = vmatprep.mubr.bf16.mxu1 %v12108_v26  ;;  %10619 = vmatprep.subr.bf16.mxu1 %v1621_v16 }
 0x25e   : > { %v1331_v46 = vpop.f32.mrb[20].mxu0 }
 0x25f   : > { %v1333_v43 = vpop.f32.mrb[21].mxu0 }
 0x260   : > { %v1335_v62 = vpop.f32.mrb[22].mxu0 }
 0x261   : > { %v1606_v52 = vpack.c.bf16 %v1335_v62, %v1331_v46  ;;  %v1337_v15 = vpop.f32.mrb[23].mxu0 }
 0x262   : > { %v1622_v22 = vpack.c.bf16 %v1337_v15, %v1333_v43 }
 0x263   : > { %10600 = vmatmul.mubr.bf16.gmra.mrb[44].mxu1 %v12123_v34 }
 0x264   : > { %10611 = vmatprep.mubr.bf16.mxu1 %v1601_v55 }
 0x266   : > { %v1341_v17 = vpop.f32.mrb[24].mxu0 }
 0x267   : > { %v1343_v23 = vpop.f32.mrb[25].mxu0 }
 0x268   : > { %v1345_v30 = vpop.f32.mrb[26].mxu0 }
 0x269   : > { %v1607_v63 = vpack.c.bf16 %v1345_v30, %v1341_v17  ;;  %v1347_v51 = vpop.f32.mrb[27].mxu0 }
 0x26a   : > { %v1623_v1 = vpack.c.bf16 %v1347_v51, %v1343_v23 }
 0x26b   : > { %10612 = vmatmul.mubr.bf16.vlgmr.msra.gmra.mrb[48].mxu1 %v1602_v31 }
 0x26c   : > { %10620 = vmatpush3.bf16.xpose.msra.mxu1 %v1621_v16  ;;  %10615 = vmatprep.mubr.bf16.mxu1 %v1603_v38 }
 0x26d   : > { %10621 = vmatprep.subr.bf16.mxu1 %v1622_v22 }
 0x26e   : > { %v1351_v50 = vpop.f32.mrb[28].mxu0 }
 0x26f   : > { %v1353_v26 = vpop.f32.mrb[29].mxu0 }
 0x270   : > { %v1355_v18 = vpop.f32.mrb[30].mxu0 }
 0x271   : > { %v1608_v53 = vpack.c.bf16 %v1355_v18, %v1351_v50  ;;  %v1357_v19 = vpop.f32.mrb[31].mxu0 }
 0x272   : > { %v1624_v14 = vpack.c.bf16 %v1357_v19, %v1353_v26 }
 0x273   : > { %10616 = vmatmul.mubr.bf16.gmra.mrb[52].mxu1 %v1604_v2 }
 0x274   : > { %10622 = vmatpush3.bf16.xpose.msra.mxu1 %v1622_v22  ;;  %10627 = vmatprep.mubr.bf16.mxu1 %v1605_v59 }
 0x275   : > { %10623 = vmatprep.subr.bf16.mxu1 %v1623_v1 }
 0x276   : > { %v1361_v34 = vpop.f32.mrb[32].mxu0 }
 0x277   : > { %v1363_v47 = vpop.f32.mrb[33].mxu0 }
 0x278   : > { %v1365_v55 = vpop.f32.mrb[34].mxu0 }
 0x279   : > { %v1609_v57 = vpack.c.bf16 %v1365_v55, %v1361_v34  ;;  %v1367_v41 = vpop.f32.mrb[35].mxu0 }
 0x27a   : > { %v1625_v40 = vpack.c.bf16 %v1367_v41, %v1363_v47 }
 0x27b   : > { %10643 = vmatprep.mubr.bf16.mxu0 %v1609_v57 }
 0x27c   : > { %10624 = vmatpush3.bf16.xpose.msra.mxu1 %v1623_v1  ;;  %10635 = vmatprep.subr.bf16.mxu0 %v1625_v40 }
 0x27d   : > { %10625 = vmatprep.subr.bf16.mxu1 %v1624_v14  ;;  %10636 = vmatpush3.bf16.xpose.msra.mxu0 %v1625_v40 }
 0x27e   : > { %v1371_v60 = vpop.f32.mrb[36].mxu0 }
 0x27f   : > { %v1373_v3 = vpop.f32.mrb[37].mxu0 }
 0x280   : > { %v1375_v31 = vpop.f32.mrb[38].mxu0 }
 0x281   : > { %v1610_v42 = vpack.c.bf16 %v1375_v31, %v1371_v60  ;;  %v1377_v56 = vpop.f32.mrb[39].mxu0 }
 0x282   : > { %v1626_v48 = vpack.c.bf16 %v1377_v56, %v1373_v3 }
 0x284   : > { %10626 = vmatpush3.bf16.xpose.msra.mxu1 %v1624_v14  ;;  %10637 = vmatprep.subr.bf16.mxu0 %v1626_v48 }
 0x285   : > { %10638 = vmatpush3.bf16.xpose.msra.mxu0 %v1626_v48 }
 0x28b   : > { %10628 = vmatmul.mubr.bf16.vlgmr.msra.gmra.mrb[56].mxu1 %v1606_v52 }
 0x28c   : > { %10631 = vmatprep.mubr.bf16.mxu1 %v1607_v63 }
 0x293   : > { %10632 = vmatmul.mubr.bf16.gmra.mrb[60].mxu1 %v1608_v53 }
 0x2ce   : > { %v1381_v45 = vpop.f32.mrb[40].mxu0 }
 0x2cf   : > { %v1383_v5 = vpop.f32.mrb[41].mxu0 }
 0x2d0   : > { %v1385_v38 = vpop.f32.mrb[42].mxu0 }
 0x2d1   : > { %v1611_v44 = vpack.c.bf16 %v1385_v38, %v1381_v45  ;;  %v1387_v4 = vpop.f32.mrb[43].mxu0 }
 0x2d2   : > { %v1627_v12 = vpack.c.bf16 %v1387_v4, %v1383_v5 }
 0x2d4   : > { %10639 = vmatprep.subr.bf16.mxu0 %v1627_v12 }
 0x2d5   : > { %10640 = vmatpush3.bf16.xpose.msra.mxu0 %v1627_v12 }
 0x2d6   : > { %v1391_v6 = vpop.f32.mrb[44].mxu0 }
 0x2d7   : > { %v1393_v58 = vpop.f32.mrb[45].mxu0 }
 0x2d8   : > { %v1395_v2 = vpop.f32.mrb[46].mxu0 }
 0x2d9   : > { %v1612_v13 = vpack.c.bf16 %v1395_v2, %v1391_v6  ;;  %v1397_v27 = vpop.f32.mrb[47].mxu0 }
 0x2da   : > { %v1628_v0 = vpack.c.bf16 %v1397_v27, %v1393_v58 }
 0x2dc   : > { %10641 = vmatprep.subr.bf16.mxu0 %v1628_v0 }
 0x2dd   : > { %10642 = vmatpush3.bf16.xpose.msra.mxu0 %v1628_v0 }
 0x2de   : > { %v1401_v9 = vpop.f32.mrb[0].mxu1 }
 0x2df   : > { %v1403_v61 = vpop.f32.mrb[1].mxu1 }
 0x2e0   : > { %v1405_v59 = vpop.f32.mrb[2].mxu1 }
 0x2e1   : > { %v1613_v54 = vpack.c.bf16 %v1405_v59, %v1401_v9  ;;  %v1407_v16 = vpop.f32.mrb[3].mxu1 }
 0x2e2   : > { %v1629_v46 = vpack.c.bf16 %v1407_v16, %v1403_v61 }
 0x2e3   : > { %10659 = vmatprep.mubr.bf16.mxu1 %v1613_v54 }
 0x2e4   : > { %10644 = vmatmul.mubr.bf16.vlgmr.msra.gmra.mrb[48].mxu0 %v1610_v42  ;;  %10651 = vmatprep.subr.bf16.mxu1 %v1629_v46 }
 0x2e5   : > { %10647 = vmatprep.mubr.bf16.mxu0 %v1611_v44  ;;  %10652 = vmatpush3.bf16.xpose.msra.mxu1 %v1629_v46 }
 0x2e6   : > { %v1411_v43 = vpop.f32.mrb[4].mxu1 }
 0x2e7   : > { %v1413_v62 = vpop.f32.mrb[5].mxu1 }
 0x2e8   : > { %v1415_v52 = vpop.f32.mrb[6].mxu1 }
 0x2e9   : > { %v1614_v15 = vpack.c.bf16 %v1415_v52, %v1411_v43  ;;  %v1417_v22 = vpop.f32.mrb[7].mxu1 }
 0x2ea   : > { %v1630_v17 = vpack.c.bf16 %v1417_v22, %v1413_v62 }
 0x2ec   : > { %10648 = vmatmul.mubr.bf16.gmra.mrb[52].mxu0 %v1612_v13  ;;  %10653 = vmatprep.subr.bf16.mxu1 %v1630_v17 }
 0x2ed   : > { %10654 = vmatpush3.bf16.xpose.msra.mxu1 %v1630_v17 }
 0x2ee   : > { %v1421_v23 = vpop.f32.mrb[8].mxu1 }
 0x2ef   : > { %v1423_v30 = vpop.f32.mrb[9].mxu1 }
 0x2f0   : > { %v1425_v63 = vpop.f32.mrb[10].mxu1 }
 0x2f1   : > { %v1615_v51 = vpack.c.bf16 %v1425_v63, %v1421_v23  ;;  %v1427_v1 = vpop.f32.mrb[11].mxu1 }
 0x2f2   : > { %v1631_v50 = vpack.c.bf16 %v1427_v1, %v1423_v30 }
 0x2f4   : > { %10655 = vmatprep.subr.bf16.mxu1 %v1631_v50 }
 0x2f5   : > { %10656 = vmatpush3.bf16.xpose.msra.mxu1 %v1631_v50 }
 0x2f6   : > { %v1431_v26 = vpop.f32.mrb[12].mxu1 }
 0x2f7   : > { %v1433_v18 = vpop.f32.mrb[13].mxu1 }
 0x2f8   : > { %v1435_v53 = vpop.f32.mrb[14].mxu1 }
 0x2f9   : > { %v1616_v19 = vpack.c.bf16 %v1435_v53, %v1431_v26  ;;  %v1437_v14 = vpop.f32.mrb[15].mxu1 }
 0x2fa   : > { %v1632_v34 = vpack.c.bf16 %v1437_v14, %v1433_v18 }
 0x2fc   : > { %10657 = vmatprep.subr.bf16.mxu1 %v1632_v34 }
 0x2fd   : > { %10658 = vmatpush3.bf16.xpose.msra.mxu1 %v1632_v34 }
 0x2fe   : > { %v10573_v47 = vpop.f32.mrb[16].mxu1 }
 0x2ff   : > { %v1474_v55 = vpop.f32.mrb[17].mxu1 }
 0x300   : > { %v10574_v57 = vpop.f32.mrb[18].mxu1 }
 0x301   : > { %v1634_v41 = vpack.c.bf16 %v10574_v57, %v10573_v47  ;;  %v1477_v40 = vpop.f32.mrb[19].mxu1 }
 0x302   : > { %v1633_v60 = vpack.c.bf16 %v1477_v40, %v1474_v55 }
 0x304   : > { %10660 = vmatmul.mubr.bf16.vlgmr.msra.gmra.mrb[64].mxu1 %v1614_v15  ;;  %10667 = vmatprep.subr.bf16.mxu0 %v1633_v60 }
 0x305   : > { %10663 = vmatprep.mubr.bf16.mxu1 %v1615_v51  ;;  %10668 = vmatpush3.bf16.msra.mxu0 %v1633_v60 }
 0x306   : > { %v10577_v3 = vpop.f32.mrb[20].mxu1  ;;  %10669 = vmatprep.subr.bf16.mxu0 %v1634_v41 }
 0x307   : > { %v1490_v31 = vpop.f32.mrb[21].mxu1 }
 0x308   : > { %v10578_v42 = vpop.f32.mrb[22].mxu1 }
 0x309   : > { %v1636_v56 = vpack.c.bf16 %v10578_v42, %v10577_v3  ;;  %v1493_v48 = vpop.f32.mrb[23].mxu1  ;;  %10670 = vmatpush3.bf16.msra.mxu0 %v1634_v41 }
 0x30a   : > { %v1635_v45 = vpack.c.bf16 %v1493_v48, %v1490_v31 }
 0x30c   : > { %10664 = vmatmul.mubr.bf16.gmra.mrb[68].mxu1 %v1616_v19  ;;  %10671 = vmatprep.subr.bf16.mxu0 %v1635_v45 }
 0x30d   : > { %10672 = vmatpush3.bf16.msra.mxu0 %v1635_v45 }
 0x30e   : > { %v10581_v5 = vpop.f32.mrb[24].mxu1  ;;  %10673 = vmatprep.subr.bf16.mxu0 %v1636_v56 }
 0x30f   : > { %v1506_v38 = vpop.f32.mrb[25].mxu1 }
 0x310   : > { %v10582_v44 = vpop.f32.mrb[26].mxu1 }
 0x311   : > { %v1638_v4 = vpack.c.bf16 %v10582_v44, %v10581_v5  ;;  %v1509_v12 = vpop.f32.mrb[27].mxu1  ;;  %10674 = vmatpush3.bf16.msra.mxu0 %v1636_v56 }
 0x312   : > { %v1637_v6 = vpack.c.bf16 %v1509_v12, %v1506_v38 }
 0x314   : > { %10683 = vmatprep.subr.bf16.mxu1 %v1637_v6 }
 0x315   : > { %10684 = vmatpush3.bf16.msra.mxu1 %v1637_v6 }
 0x316   : > { %v10585_v58 = vpop.f32.mrb[28].mxu1  ;;  %10685 = vmatprep.subr.bf16.mxu1 %v1638_v4 }
 0x317   : > { %v1522_v2 = vpop.f32.mrb[29].mxu1 }
 0x318   : > { %v10586_v13 = vpop.f32.mrb[30].mxu1 }
 0x319   : > { %v1640_v27 = vpack.c.bf16 %v10586_v13, %v10585_v58  ;;  %v1525_v0 = vpop.f32.mrb[31].mxu1  ;;  %10686 = vmatpush3.bf16.msra.mxu1 %v1638_v4 }
 0x31a   : > { %v1639_v9 = vpack.c.bf16 %v1525_v0, %v1522_v2 }
 0x31c   : > { %10687 = vmatprep.subr.bf16.mxu1 %v1639_v9 }
 0x31d   : > { %10688 = vmatpush3.bf16.msra.mxu1 %v1639_v9 }
 0x31e   : > { %v10589_v61 = vpop.f32.mrb[32].mxu1  ;;  %10689 = vmatprep.subr.bf16.mxu1 %v1640_v27 }
 0x31f   : > { %v1538_v59 = vpop.f32.mrb[33].mxu1 }
 0x320   : > { %v10590_v54 = vpop.f32.mrb[34].mxu1 }
 0x321   : > { %v12145_v16 = vpack.c.bf16 %v10590_v54, %v10589_v61  ;;  %v1541_v46 = vpop.f32.mrb[35].mxu1  ;;  %10690 = vmatpush3.bf16.msra.mxu1 %v1640_v27 }
 0x322   : > { %v12147_v43 = vpack.c.bf16 %v1541_v46, %v1538_v59 }
 0x324   : > { %10699 = vmatprep.subr.bf16.mxu0 %v12147_v43 }
 0x326   : > { %v10593_v62 = vpop.f32.mrb[36].mxu1 }
 0x327   : > { %v1554_v52 = vpop.f32.mrb[37].mxu1 }
 0x328   : > { %v10594_v15 = vpop.f32.mrb[38].mxu1 }
 0x329   : > { %v12150_v22 = vpack.c.bf16 %v10594_v15, %v10593_v62  ;;  %v1557_v17 = vpop.f32.mrb[39].mxu1 }
 0x32a   : > { %v12152_v23 = vpack.c.bf16 %v1557_v17, %v1554_v52 }
 0x32e   : > { %v10597_v30 = vpop.f32.mrb[40].mxu1 }
 0x32f   : > { %v1570_v63 = vpop.f32.mrb[41].mxu1 }
 0x330   : > { %v10598_v51 = vpop.f32.mrb[42].mxu1 }
 0x331   : > { %v12154_v1 = vpack.c.bf16 %v10598_v51, %v10597_v30  ;;  %v1573_v50 = vpop.f32.mrb[43].mxu1 }
 0x332   : > { %v12156_v26 = vpack.c.bf16 %v1573_v50, %v1570_v63 }
 0x334   : > { %10715 = vmatprep.subr.bf16.mxu1 %v12156_v26 }
 0x336   : > { %v10601_v18 = vpop.f32.mrb[44].mxu1 }
 0x337   : > { %v1586_v53 = vpop.f32.mrb[45].mxu1 }
 0x338   : > { %v10602_v19 = vpop.f32.mrb[46].mxu1 }
 0x339   : > { %v12159_v14 = vpack.c.bf16 %v10602_v19, %v10601_v18  ;;  %v1589_v34 = vpop.f32.mrb[47].mxu1 }
 0x33a   : > { %v12161_v47 = vpack.c.bf16 %v1589_v34, %v1586_v53 }
 0x33e   : > { %v10613_v55 = vpop.f32.mrb[48].mxu1 }
 0x33f   : > { %v1683_v57 = vpop.f32.mrb[49].mxu1  ;;  %v12169_v42 = vmul.f32 0.088388346, %v10613_v55 }
 0x340   : > { %v10614_v41 = vpop.f32.mrb[50].mxu1  ;;  %v12163_v40 = vmul.f32 0.088388346, %v1683_v57 }
 0x341   : > { %v1686_v60 = vpop.f32.mrb[51].mxu1  ;;  %v12173_v48 = vmul.f32 0.088388346, %v10614_v41  ;;  %v1948_v5 = vsel %vm1941_vm0, %v12169_v42, -inf }
 0x342   : > { %v1942_v3 = vsel %vm1941_vm0, %v12163_v40, -inf  ;;  %v12167_v31 = vmul.f32 0.088388346, %v1686_v60 }
 0x343   : > { %1943 = vmax.xlane.f32.xlu0 %v1942_v3  ;;  %v1951_v4 = vsel %vm1941_vm0, %v12173_v48, -inf }
 0x344   : > { %v1945_v56 = vsel %vm1941_vm0, %v12167_v31, -inf }
 0x345   : > { %1946 = vmax.xlane.f32.xlu1 %v1945_v56 }
 0x346   : > { %v10617_v45 = vpop.f32.mrb[52].mxu1 }
 0x347   : > { %1949 = vmax.xlane.f32.xlu0 %v1948_v5  ;;  %v1699_v38 = vpop.f32.mrb[53].mxu1  ;;  %v12185_v13 = vmul.f32 0.088388346, %v10617_v45 }
 0x348   : > { %v10618_v44 = vpop.f32.mrb[54].mxu1  ;;  %v12179_v12 = vmul.f32 0.088388346, %v1699_v38 }
 0x349   : > { %1952 = vmax.xlane.f32.xlu1 %v1951_v4  ;;  %v1702_v6 = vpop.f32.mrb[55].mxu1  ;;  %v12189_v0 = vmul.f32 0.088388346, %v10618_v44  ;;  %v1960_v9 = vsel %vm1941_vm0, %v12185_v13, -inf }
 0x34a   : > { %v1954_v58 = vsel %vm1941_vm0, %v12179_v12, -inf  ;;  %v12183_v2 = vmul.f32 0.088388346, %v1702_v6 }
 0x34b   : > { %1955 = vmax.xlane.f32.xlu0 %v1954_v58  ;;  %v1963_v61 = vsel %vm1941_vm0, %v12189_v0, -inf }
 0x34c   : > { %v1957_v27 = vsel %vm1941_vm0, %v12183_v2, -inf }
 0x34d   : > { %1958 = vmax.xlane.f32.xlu1 %v1957_v27 }
 0x34f   : > { %1961 = vmax.xlane.f32.xlu0 %v1960_v9 }
 0x351   : > { %1964 = vmax.xlane.f32.xlu1 %v1963_v61 }
 0x35e   : > { %v10629_v59 = vpop.f32.mrb[56].mxu1 }
 0x35f   : > { %v1748_v54 = vpop.f32.mrb[57].mxu1  ;;  %v12201_v30 = vmul.f32 0.088388346, %v10629_v59 }
 0x360   : > { %v10630_v46 = vpop.f32.mrb[58].mxu1  ;;  %v12195_v62 = vmul.f32 0.088388346, %v1748_v54 }
 0x361   : > { %v1751_v52 = vpop.f32.mrb[59].mxu1  ;;  %v12205_v51 = vmul.f32 0.088388346, %v10630_v46  ;;  %v1972_v18 = vsel %vm1941_vm0, %v12201_v30, -inf }
 0x362   : > { %v1966_v15 = vsel %vm1941_vm0, %v12195_v62, -inf  ;;  %v12199_v17 = vmul.f32 0.088388346, %v1751_v52 }
 0x363   : > { %1967 = vmax.xlane.f32.xlu0 %v1966_v15  ;;  %v1975_v34 = vsel %vm1941_vm0, %v12205_v51, -inf }
 0x364   : > { %v1969_v63 = vsel %vm1941_vm0, %v12199_v17, -inf }
 0x365   : > { %1970 = vmax.xlane.f32.xlu1 %v1969_v63 }
 0x366   : > { %v10633_v50 = vpop.f32.mrb[60].mxu1 }
 0x367   : > { %1973 = vmax.xlane.f32.xlu0 %v1972_v18  ;;  %v1764_v53 = vpop.f32.mrb[61].mxu1  ;;  %v12217_v3 = vmul.f32 0.088388346, %v10633_v50 }
 0x368   : > { %v10634_v19 = vpop.f32.mrb[62].mxu1  ;;  %v12211_v55 = vmul.f32 0.088388346, %v1764_v53 }
 0x369   : > { %1976 = vmax.xlane.f32.xlu1 %v1975_v34  ;;  %v1767_v57 = vpop.f32.mrb[63].mxu1  ;;  %v12221_v45 = vmul.f32 0.088388346, %v10634_v19  ;;  %v1984_v5 = vsel %vm1941_vm0, %v12217_v3, -inf }
 0x36a   : > { %v1978_v41 = vsel %vm1941_vm0, %v12211_v55, -inf  ;;  %v12215_v60 = vmul.f32 0.088388346, %v1767_v57 }
 0x36b   : > { %1979 = vmax.xlane.f32.xlu0 %v1978_v41  ;;  %v1987_v38 = vsel %vm1941_vm0, %v12221_v45, -inf }
 0x36c   : > { %v1981_v56 = vsel %vm1941_vm0, %v12215_v60, -inf }
 0x36d   : > { %1982 = vmax.xlane.f32.xlu1 %v1981_v56 }
 0x36f   : > { %1985 = vmax.xlane.f32.xlu0 %v1984_v5 }
 0x371   : > { %1988 = vmax.xlane.f32.xlu1 %v1987_v38 }
 0x3b7   : > { %v10645_v44 = vpop.f32.mrb[48].mxu0 }
 0x3b8   : > { %v1813_v4 = vpop.f32.mrb[49].mxu0  ;;  %v12233_v59 = vmul.f32 0.088388346, %v10645_v44 }
 0x3b9   : > { %v10646_v6 = vpop.f32.mrb[50].mxu0  ;;  %v12227_v58 = vmul.f32 0.088388346, %v1813_v4 }
 0x3ba   : > { %v1816_v27 = vpop.f32.mrb[51].mxu0  ;;  %v12237_v46 = vmul.f32 0.088388346, %v10646_v6  ;;  %v1996_v15 = vsel %vm1941_vm0, %v12233_v59, -inf }
 0x3bb   : > { %v1990_v9 = vsel %vm1941_vm0, %v12227_v58, -inf  ;;  %v12231_v61 = vmul.f32 0.088388346, %v1816_v27 }
 0x3bc   : > { %1991 = vmax.xlane.f32.xlu0 %v1990_v9  ;;  %v1999_v18 = vsel %vm1941_vm0, %v12237_v46, -inf }
 0x3bd   : > { %v1993_v54 = vsel %vm1941_vm0, %v12231_v61, -inf }
 0x3be   : > { %1994 = vmax.xlane.f32.xlu1 %v1993_v54 }
 0x3bf   : > { %v10649_v52 = vpop.f32.mrb[52].mxu0 }
 0x3c0   : > { %v1829_v63 = vpop.f32.mrb[53].mxu0  ;;  %1997 = vmax.xlane.f32.xlu0 %v1996_v15  ;;  %v12249_v41 = vmul.f32 0.088388346, %v10649_v52 }
 0x3c1   : > { %v10650_v50 = vpop.f32.mrb[54].mxu0  ;;  %v12243_v53 = vmul.f32 0.088388346, %v1829_v63 }
 0x3c2   : > { %v1832_v19 = vpop.f32.mrb[55].mxu0  ;;  %2000 = vmax.xlane.f32.xlu1 %v1999_v18  ;;  %v12253_v5 = vmul.f32 0.088388346, %v10650_v50  ;;  %v2008_v38 = vsel %vm1941_vm0, %v12249_v41, -inf }
 0x3c3   : > { %v2002_v34 = vsel %vm1941_vm0, %v12243_v53, -inf  ;;  %v12247_v57 = vmul.f32 0.088388346, %v1832_v19 }
 0x3c4   : > { %2003 = vmax.xlane.f32.xlu0 %v2002_v34  ;;  %v2011_v44 = vsel %vm1941_vm0, %v12253_v5, -inf }
 0x3c5   : > { %v2005_v56 = vsel %vm1941_vm0, %v12247_v57, -inf }
 0x3c6   : > { %2006 = vmax.xlane.f32.xlu1 %v2005_v56 }
 0x3c8   : > { %2009 = vmax.xlane.f32.xlu0 %v2008_v38 }
 0x3ca   : > { %2012 = vmax.xlane.f32.xlu1 %v2011_v44 }
 0x3d0   : > { %v1944_v4 = vpop.xlane.xlu0 %1943 }
 0x3d1   : > { %v2038_v6 = vsub.f32 %v12163_v40, %v1944_v4 }
 0x3d2   : > { %v1947_v27 = vpop.xlane.xlu1 %1946 }
 0x3d3   : > { %v2070_v9 = vmul.f32 1.442695, %v2038_v6  ;;  %v2039_v54 = vsub.f32 %v12167_v31, %v1947_v27 }
 0x3d4   : > { %v1950_v52 = vpop.xlane.xlu0 %1949 }
 0x3d5   : > { %11037 = vpow2.f32 %v2070_v9  ;;  %v2072_v15 = vmul.f32 1.442695, %v2039_v54  ;;  %v2040_v63 = vsub.f32 %v12169_v42, %v1950_v52 }
 0x3d6   : > { %v1953_v50 = vpop.xlane.xlu1 %1952 }
 0x3d7   : > { %11039 = vpow2.f32 %v2072_v15  ;;  %v2074_v18 = vmul.f32 1.442695, %v2040_v63  ;;  %v2041_v19 = vsub.f32 %v12173_v48, %v1953_v50  ;;  %v10661_v34 = vpop.f32.mrb[64].mxu1 }
 0x3d8   : > { %v1956_v56 = vpop.xlane.xlu0 %1955  ;;  %v1878_v38 = vpop.f32.mrb[65].mxu1 }
 0x3d9   : > { %11041 = vpow2.f32 %v2074_v18  ;;  %v2076_v44 = vmul.f32 1.442695, %v2041_v19  ;;  %v10662_v40 = vpop.f32.mrb[66].mxu1  ;;  %v2042_v31 = vsub.f32 %v12179_v12, %v1956_v56 }
 0x3da   : > { %v1959_v4 = vpop.xlane.xlu1 %1958  ;;  %v1881_v6 = vpop.f32.mrb[67].mxu1 }
 0x3db   : > { %11043 = vpow2.f32 %v2076_v44  ;;  %v2043_v9 = vsub.f32 %v12183_v2, %v1959_v4  ;;  %v2078_v52 = vmul.f32 1.442695, %v2042_v31 }
 0x3dc   : > { %v1962_v27 = vpop.xlane.xlu0 %1961 }
 0x3dd   : > { %v2044_v48 = vsub.f32 %v12185_v13, %v1962_v27  ;;  %v2080_v19 = vmul.f32 1.442695, %v2043_v9  ;;  %11045 = vpow2.f32 %v2078_v52  ;;  %v12279_v27 = vmul.f32 0.088388346, %v1878_v38 }
 0x3de   : > { %v1965_v42 = vpop.xlane.xlu1 %1964 }
 0x3df   : > { %v12265_v54 = vpop.eup %11037  ;;  %v10665_v15 = vpop.f32.mrb[68].mxu1  ;;  %v2045_v44 = vsub.f32 %v12189_v0, %v1965_v42  ;;  %v2082_v13 = vmul.f32 1.442695, %v2044_v48  ;;  %11047 = vpow2.f32 %v2080_v19  ;;  %v12285_v42 = vmul.f32 0.088388346, %v1881_v6 }
 0x3e0   : > { %v1894_v63 = vpop.f32.mrb[69].mxu1  ;;  %v2134_v50 = vsel %vm1941_vm0, %v12265_v54, 0.0  ;;  %v2014_v52 = vsel %vm1941_vm0, %v12279_v27, -inf  ;;  %v12289_v48 = vmul.f32 0.088388346, %v10661_v34 }
 0x3e1   : > { %v12270_v18 = vpop.eup %11039  ;;  %2135 = vadd.xlane.f32.xlu0 %v2134_v50  ;;  %v10666_v12 = vpop.f32.mrb[70].mxu1  ;;  %v2084_v0 = vmul.f32 1.442695, %v2045_v44  ;;  %11049 = vpow2.f32 %v2082_v13  ;;  %v2017_v38 = vsel %vm1941_vm0, %v12285_v42, -inf  ;;  %v12293_v50 = vmul.f32 0.088388346, %v10662_v40 }
 0x3e2   : > { %v1897_v56 = vpop.f32.mrb[71].mxu1  ;;  %v2137_v2 = vsel %vm1941_vm0, %v12270_v18, 0.0  ;;  %v2020_v19 = vsel %vm1941_vm0, %v12289_v48, -inf }
 0x3e3   : > { %v12275_v4 = vpop.eup %11041  ;;  %2138 = vadd.xlane.f32.xlu1 %v2137_v2  ;;  %11051 = vpow2.f32 %v2084_v0  ;;  %v2023_v44 = vsel %vm1941_vm0, %v12293_v50, -inf }
 0x3e4   : > { %v2140_v31 = vsel %vm1941_vm0, %v12275_v4, 0.0 }
 0x3e5   : > { %v12281_v49 = vpop.eup %11043  ;;  %2141 = vadd.xlane.f32.xlu0 %v2140_v31 }
 0x3e6   : > { %v2143_v9 = vsel %vm1941_vm0, %v12281_v49, 0.0 }
 0x3e7   : > { %2144 = vadd.xlane.f32.xlu1 %v2143_v9  ;;  %v12297_v6 = vpop.eup %11045 }
 0x3e8   : > { %v2146_v13 = vsel %vm1941_vm0, %v12297_v6, 0.0 }
 0x3e9   : > { %2015 = vmax.xlane.f32.xlu0 %v2014_v52  ;;  %v12301_v2 = vpop.eup %11047 }
 0x3ea   : > { %v2149_v9 = vsel %vm1941_vm0, %v12301_v2, 0.0 }
 0x3eb   : > { %2018 = vmax.xlane.f32.xlu1 %v2017_v38  ;;  %v12305_v31 = vpop.eup %11049 }
 0x3ec   : > { %v2152_v36 = vsel %vm1941_vm0, %v12305_v31, 0.0 }
 0x3ed   : > { %2021 = vmax.xlane.f32.xlu0 %v2020_v19  ;;  %v12310_v52 = vpop.eup %11051 }
 0x3ef   : > { %2024 = vmax.xlane.f32.xlu1 %v2023_v44  ;;  %v12313_v44 = vmul.f32 0.088388346, %v1894_v63 }
 0x3f0   : > { %v1968_v34 = vpop.xlane.xlu0 %1967 }
 0x3f1   : > { %v2046_v40 = vsub.f32 %v12195_v62, %v1968_v34  ;;  %2147 = vadd.xlane.f32.xlu0 %v2146_v13  ;;  %v12318_v34 = vmul.f32 0.088388346, %v1897_v56 }
 0x3f2   : > { %v1971_v0 = vpop.xlane.xlu1 %1970 }
 0x3f3   : > { %v2086_v38 = vmul.f32 1.442695, %v2046_v40  ;;  %v2047_v19 = vsub.f32 %v12199_v17, %v1971_v0  ;;  %2150 = vadd.xlane.f32.xlu1 %v2149_v9  ;;  %v2155_v40 = vsel %vm1941_vm0, %v12310_v52, 0.0  ;;  %v12323_v0 = vmul.f32 0.088388346, %v10665_v15 }
 0x3f4   : > { %v1974_v39 = vpop.xlane.xlu0 %1973 }
 0x3f5   : > { %11053 = vpow2.f32 %v2086_v38  ;;  %v2088_v35 = vmul.f32 1.442695, %v2047_v19  ;;  %v2048_v62 = vsub.f32 %v12201_v30, %v1974_v39  ;;  %2153 = vadd.xlane.f32.xlu0 %v2152_v36  ;;  %v2026_v38 = vsel %vm1941_vm0, %v12313_v44, -inf }
 0x3f6   : > { %v1977_v13 = vpop.xlane.xlu1 %1976  ;;  %v12328_v30 = vmul.f32 0.088388346, %v10666_v12 }
 0x3f7   : > { %11055 = vpow2.f32 %v2088_v35  ;;  %v2090_v17 = vmul.f32 1.442695, %v2048_v62  ;;  %v2049_v63 = vsub.f32 %v12205_v51, %v1977_v13  ;;  %2156 = vadd.xlane.f32.xlu1 %v2155_v40  ;;  %v2029_v35 = vsel %vm1941_vm0, %v12318_v34, -inf }
 0x3f8   : > { %v1980_v9 = vpop.xlane.xlu0 %1979  ;;  %v2032_v62 = vsel %vm1941_vm0, %v12323_v0, -inf  ;;  %v2035_v40 = vsel %vm1941_vm0, %v12328_v30, -inf }
 0x3f9   : > { %11057 = vpow2.f32 %v2090_v17  ;;  %v2092_v39 = vmul.f32 1.442695, %v2049_v63  ;;  %v2050_v36 = vsub.f32 %v12211_v55, %v1980_v9  ;;  %2027 = vmax.xlane.f32.xlu0 %v2026_v38 }
 0x3fa   : > { %v1983_v56 = vpop.xlane.xlu1 %1982 }
 0x3fb   : > { %11059 = vpow2.f32 %v2092_v39  ;;  %v2094_v51 = vmul.f32 1.442695, %v2050_v36  ;;  %v2051_v15 = vsub.f32 %v12215_v60, %v1983_v56  ;;  %2030 = vmax.xlane.f32.xlu1 %v2029_v35 }
 0x3fc   : > { %v1986_v19 = vpop.xlane.xlu0 %1985 }
 0x3fd   : > { %11061 = vpow2.f32 %v2094_v51  ;;  %v2096_v13 = vmul.f32 1.442695, %v2051_v15  ;;  %v2052_v55 = vsub.f32 %v12217_v3, %v1986_v19  ;;  %2033 = vmax.xlane.f32.xlu0 %v2032_v62 }
 0x3fe   : > { %v1989_v12 = vpop.xlane.xlu1 %1988 }
 0x3ff   : > { %v12338_v17 = vpop.eup %11053  ;;  %11063 = vpow2.f32 %v2096_v13  ;;  %v2098_v63 = vmul.f32 1.442695, %v2052_v55  ;;  %v2053_v60 = vsub.f32 %v12221_v45, %v1989_v12  ;;  %2036 = vmax.xlane.f32.xlu1 %v2035_v40 }
 0x400   : > { %v2158_v9 = vsel %vm1941_vm0, %v12338_v17, 0.0 }
 0x401   : > { %v12343_v38 = vpop.eup %11055  ;;  %11065 = vpow2.f32 %v2098_v63  ;;  %v2100_v39 = vmul.f32 1.442695, %v2053_v60  ;;  %2159 = vadd.xlane.f32.xlu0 %v2158_v9 }
 0x402   : > { %v2161_v3 = vsel %vm1941_vm0, %v12343_v38, 0.0 }
 0x403   : > { %v12347_v36 = vpop.eup %11057  ;;  %11067 = vpow2.f32 %v2100_v39  ;;  %2162 = vadd.xlane.f32.xlu1 %v2161_v3 }
 0x404   : > { %v2164_v56 = vsel %vm1941_vm0, %v12347_v36, 0.0 }
 0x405   : > { %v12351_v45 = vpop.eup %11059  ;;  %2165 = vadd.xlane.f32.xlu0 %v2164_v56 }
 0x406   : > { %v2167_v35 = vsel %vm1941_vm0, %v12351_v45, 0.0 }
 0x407   : > { %v12355_v51 = vpop.eup %11061  ;;  %2168 = vadd.xlane.f32.xlu1 %v2167_v35 }
 0x408   : > { %v2170_v15 = vsel %vm1941_vm0, %v12355_v51, 0.0 }
 0x409   : > { %v12359_v19 = vpop.eup %11063  ;;  %2171 = vadd.xlane.f32.xlu0 %v2170_v15 }
 0x40a   : > { %v2173_v62 = vsel %vm1941_vm0, %v12359_v19, 0.0 }
 0x40b   : > { %v12363_v13 = vpop.eup %11065  ;;  %2174 = vadd.xlane.f32.xlu1 %v2173_v62 }
 0x40c   : > { %v2176_v55 = vsel %vm1941_vm0, %v12363_v13, 0.0 }
 0x40d   : > { %v12367_v12 = vpop.eup %11067  ;;  %2177 = vadd.xlane.f32.xlu0 %v2176_v55 }
 0x40e   : > { %v2179_v40 = vsel %vm1941_vm0, %v12367_v12, 0.0 }
 0x40f   : > { %2180 = vadd.xlane.f32.xlu1 %v2179_v40 }
 0x449   : > { %v1992_v63 = vpop.xlane.xlu0 %1991 }
 0x44a   : > { %v2054_v60 = vsub.f32 %v12227_v58, %v1992_v63 }
 0x44b   : > { %v1995_v9 = vpop.xlane.xlu1 %1994 }
 0x44c   : > { %v2102_v39 = vmul.f32 1.442695, %v2054_v60  ;;  %v2055_v3 = vsub.f32 %v12231_v61, %v1995_v9 }
 0x44d   : > { %v1998_v56 = vpop.xlane.xlu0 %1997 }
 0x44e   : > { %11069 = vpow2.f32 %v2102_v39  ;;  %v2104_v35 = vmul.f32 1.442695, %v2055_v3  ;;  %v2056_v15 = vsub.f32 %v12233_v59, %v1998_v56 }
 0x44f   : > { %v2001_v62 = vpop.xlane.xlu1 %2000 }
 0x450   : > { %11071 = vpow2.f32 %v2104_v35  ;;  %v2106_v33 = vmul.f32 1.442695, %v2056_v15  ;;  %v2057_v55 = vsub.f32 %v12237_v46, %v2001_v62 }
 0x451   : > { %v2004_v32 = vpop.xlane.xlu0 %2003 }
 0x452   : > { %11073 = vpow2.f32 %v2106_v33  ;;  %v2108_v40 = vmul.f32 1.442695, %v2057_v55  ;;  %v2058_v29 = vsub.f32 %v12243_v53, %v2004_v32 }
 0x453   : > { %v2007_v58 = vpop.xlane.xlu1 %2006 }
 0x454   : > { %11075 = vpow2.f32 %v2108_v40  ;;  %v2110_v63 = vmul.f32 1.442695, %v2058_v29  ;;  %v2059_v61 = vsub.f32 %v12247_v57, %v2007_v58 }
 0x455   : > { %v2010_v60 = vpop.xlane.xlu0 %2009 }
 0x456   : > { %11077 = vpow2.f32 %v2110_v63  ;;  %v2112_v9 = vmul.f32 1.442695, %v2059_v61  ;;  %v2060_v59 = vsub.f32 %v12249_v41, %v2010_v60 }
 0x457   : > { %v2013_v39 = vpop.xlane.xlu1 %2012 }
 0x458   : > { %v12378_v3 = vpop.eup %11069  ;;  %11079 = vpow2.f32 %v2112_v9  ;;  %v2114_v46 = vmul.f32 1.442695, %v2060_v59  ;;  %v2061_v33 = vsub.f32 %v12253_v5, %v2013_v39 }
 0x459   : > { %v2182_v32 = vsel %vm1941_vm0, %v12378_v3, 0.0 }
 0x45a   : > { %v12383_v53 = vpop.eup %11071  ;;  %11081 = vpow2.f32 %v2114_v46  ;;  %v2116_v29 = vmul.f32 1.442695, %v2061_v33  ;;  %2183 = vadd.xlane.f32.xlu0 %v2182_v32 }
 0x45b   : > { %v2185_v57 = vsel %vm1941_vm0, %v12383_v53, 0.0 }
 0x45c   : > { %v12387_v56 = vpop.eup %11073  ;;  %11083 = vpow2.f32 %v2116_v29  ;;  %2186 = vadd.xlane.f32.xlu1 %v2185_v57 }
 0x45d   : > { %v2188_v41 = vsel %vm1941_vm0, %v12387_v56, 0.0 }
 0x45e   : > { %v12391_v35 = vpop.eup %11075  ;;  %2189 = vadd.xlane.f32.xlu0 %v2188_v41 }
 0x45f   : > { %v2191_v5 = vsel %vm1941_vm0, %v12391_v35, 0.0 }
 0x460   : > { %v12395_v15 = vpop.eup %11077  ;;  %2192 = vadd.xlane.f32.xlu1 %v2191_v5 }
 0x461   : > { %v2194_v62 = vsel %vm1941_vm0, %v12395_v15, 0.0 }
 0x462   : > { %v12399_v55 = vpop.eup %11079  ;;  %2195 = vadd.xlane.f32.xlu0 %v2194_v62 }
 0x463   : > { %v2197_v40 = vsel %vm1941_vm0, %v12399_v55, 0.0 }
 0x464   : > { %v12403_v58 = vpop.eup %11081  ;;  %2198 = vadd.xlane.f32.xlu1 %v2197_v40 }
 0x465   : > { %v2200_v63 = vsel %vm1941_vm0, %v12403_v58, 0.0 }
 0x466   : > { %v12407_v61 = vpop.eup %11083  ;;  %2201 = vadd.xlane.f32.xlu0 %v2200_v63 }
 0x467   : > { %v2203_v60 = vsel %vm1941_vm0, %v12407_v61, 0.0 }
 0x468   : > { %2204 = vadd.xlane.f32.xlu1 %v2203_v60 }
 0x46e   : > { %v2136_v9 = vpop.xlane.xlu0 %2135 }
 0x46f   : > { %11085 = vrcp.f32 %v2136_v9 }
 0x470   : > { %v2139_v59 = vpop.xlane.xlu1 %2138 }
 0x471   : > { %11087 = vrcp.f32 %v2139_v59 }
 0x472   : > { %v2142_v39 = vpop.xlane.xlu0 %2141 }
 0x473   : > { %11089 = vrcp.f32 %v2142_v39 }
 0x474   : > { %v2145_v46 = vpop.xlane.xlu1 %2144 }
 0x475   : > { %11091 = vrcp.f32 %v2145_v46 }
 0x476   : > { %v2016_v33 = vpop.xlane.xlu0 %2015 }
 0x477   : > { %v2062_v32 = vsub.f32 %v12279_v27, %v2016_v33 }
 0x478   : > { %v2019_v29 = vpop.xlane.xlu1 %2018 }
 0x479   : > { %v11086_v57 = vpop.eup %11085  ;;  %v2118_v41 = vmul.f32 1.442695, %v2062_v32  ;;  %v2063_v5 = vsub.f32 %v12285_v42, %v2019_v29 }
 0x47a   : > { %v2022_v62 = vpop.xlane.xlu0 %2021  ;;  %v2262_v59 = vmul.f32 %v11086_v57, %v12265_v54 }
 0x47b   : > { %v11088_v40 = vpop.eup %11087  ;;  %11093 = vpow2.f32 %v2118_v41  ;;  %v2120_v63 = vmul.f32 1.442695, %v2063_v5  ;;  %v2064_v60 = vsub.f32 %v12289_v48, %v2022_v62 }
 0x47c   : > { %v2025_v9 = vpop.xlane.xlu1 %2024  ;;  %v2263_v39 = vmul.f32 %v11088_v40, %v12270_v18 }
 0x47d   : > { %v11090_v46 = vpop.eup %11089  ;;  %11095 = vpow2.f32 %v2120_v63  ;;  %v2122_v28 = vmul.f32 1.442695, %v2064_v60  ;;  %v2065_v27 = vsub.f32 %v12293_v50, %v2025_v9 }
 0x47e   : > { %v2148_v33 = vpop.xlane.xlu0 %2147  ;;  %v2294_v32 = vpack.c.bf16 %v2263_v39, %v2262_v59  ;;  %v2264_v29 = vmul.f32 %v11090_v46, %v12275_v4 }
 0x47f   : > { %v11092_v25 = vpop.eup %11091  ;;  %11097 = vpow2.f32 %v2122_v28  ;;  %v2124_v42 = vmul.f32 1.442695, %v2065_v27 }
 0x480   : > { %v2265_v41 = vmul.f32 %v11092_v25, %v12281_v49  ;;  %11099 = vrcp.f32 %v2148_v33  ;;  %10675 = vmatprep.mubr.msk.bf16.mxu0 %vm1941_vm0, %v2294_v32  ;;  %v2151_v54 = vpop.xlane.xlu1 %2150 }
 0x481   : > { %11101 = vpow2.f32 %v2124_v42 }
 0x482   : > { %v2295_v18 = vpack.c.bf16 %v2265_v41, %v2264_v29  ;;  %11103 = vrcp.f32 %v2151_v54  ;;  %v2154_v48 = vpop.xlane.xlu0 %2153 }
 0x483   : > { %11105 = vrcp.f32 %v2154_v48 }
 0x484   : > { %10676 = vmatmul.mubr.msk.bf16.vlgmr.msra.gmra.mrb[56].mxu0 %vm1941_vm0, %v2295_v18  ;;  %v2157_v50 = vpop.xlane.xlu1 %2156 }
 0x485   : > { %v12421_v57 = vpop.eup %11093  ;;  %10700 = vmatpush3.bf16.msra.mxu0 %v12147_v43  ;;  %11107 = vrcp.f32 %v2157_v50 }
 0x486   : > { %10701 = vmatprep.subr.bf16.mxu0 %v12145_v16  ;;  %v2028_v25 = vpop.xlane.xlu0 %2027  ;;  %v2206_v28 = vsel %vm1941_vm0, %v12421_v57, 0.0 }
 0x487   : > { %v12427_v49 = vpop.eup %11095  ;;  %v2066_v4 = vsub.f32 %v12313_v44, %v2028_v25  ;;  %2207 = vadd.xlane.f32.xlu0 %v2206_v28 }
 0x488   : > { %v2031_v5 = vpop.xlane.xlu1 %2030  ;;  %v2209_v62 = vsel %vm1941_vm0, %v12427_v49, 0.0 }
 0x489   : > { %v12432_v40 = vpop.eup %11097  ;;  %v2126_v63 = vmul.f32 1.442695, %v2066_v4  ;;  %10702 = vmatpush3.bf16.msra.mxu0 %v12145_v16  ;;  %v2067_v43 = vsub.f32 %v12318_v34, %v2031_v5  ;;  %2210 = vadd.xlane.f32.xlu1 %v2209_v62 }
 0x48a   : > { %v11100_v60 = vpop.eup %11099  ;;  %10703 = vmatprep.subr.bf16.mxu0 %v12152_v23  ;;  %v2034_v9 = vpop.xlane.xlu0 %2033  ;;  %v2212_v44 = vsel %vm1941_vm0, %v12432_v40, 0.0 }
 0x48b   : > { %v12439_v59 = vpop.eup %11101  ;;  %11109 = vpow2.f32 %v2126_v63  ;;  %v2128_v39 = vmul.f32 1.442695, %v2067_v43  ;;  %v2068_v46 = vsub.f32 %v12323_v0, %v2034_v9  ;;  %2213 = vadd.xlane.f32.xlu0 %v2212_v44  ;;  %v2266_v34 = vmul.f32 %v11100_v60, %v12297_v6 }
 0x48c   : > { %v11104_v27 = vpop.eup %11103  ;;  %v2037_v33 = vpop.xlane.xlu1 %2036  ;;  %v2215_v16 = vsel %vm1941_vm0, %v12439_v59, 0.0 }
 0x48d   : > { %v11106_v32 = vpop.eup %11105  ;;  %11111 = vpow2.f32 %v2128_v39  ;;  %v2130_v42 = vmul.f32 1.442695, %v2068_v46  ;;  %10704 = vmatpush3.bf16.msra.mxu0 %v12152_v23  ;;  %v2069_v29 = vsub.f32 %v12328_v30, %v2037_v33  ;;  %2216 = vadd.xlane.f32.xlu1 %v2215_v16  ;;  %v2267_v41 = vmul.f32 %v11104_v27, %v12301_v2 }
 0x48e   : > { %10705 = vmatprep.subr.bf16.mxu0 %v12150_v22  ;;  %v2160_v0 = vpop.xlane.xlu0 %2159  ;;  %v2268_v6 = vmul.f32 %v11106_v32, %v12305_v31 }
 0x48f   : > { %v11108_v54 = vpop.eup %11107  ;;  %11113 = vpow2.f32 %v2130_v42  ;;  %v2132_v18 = vmul.f32 1.442695, %v2069_v29  ;;  %v2296_v48 = vpack.c.bf16 %v2267_v41, %v2266_v34 }
 0x490   : > { %11115 = vrcp.f32 %v2160_v0  ;;  %v2163_v50 = vpop.xlane.xlu1 %2162  ;;  %v2269_v25 = vmul.f32 %v11108_v54, %v12310_v52 }
 0x491   : > { %11117 = vpow2.f32 %v2132_v18  ;;  %10679 = vmatprep.mubr.msk.bf16.mxu0 %vm1941_vm0, %v2296_v48  ;;  %10706 = vmatpush3.bf16.msra.mxu0 %v12150_v22 }
 0x492   : > { %11119 = vrcp.f32 %v2163_v50  ;;  %v2166_v23 = vpop.xlane.xlu0 %2165  ;;  %v2297_v2 = vpack.c.bf16 %v2269_v25, %v2268_v6 }
 0x493   : > { %11121 = vrcp.f32 %v2166_v23 }
 0x494   : > { %10680 = vmatmul.mubr.msk.bf16.gmra.mrb[60].mxu0 %vm1941_vm0, %v2297_v2  ;;  %v2169_v30 = vpop.xlane.xlu1 %2168 }
 0x495   : > { %v12454_v28 = vpop.eup %11109  ;;  %11123 = vrcp.f32 %v2169_v30 }
 0x496   : > { %v2172_v4 = vpop.xlane.xlu0 %2171  ;;  %v2218_v31 = vsel %vm1941_vm0, %v12454_v28, 0.0 }
 0x497   : > { %v12458_v52 = vpop.eup %11111  ;;  %11125 = vrcp.f32 %v2172_v4  ;;  %2219 = vadd.xlane.f32.xlu0 %v2218_v31 }
 0x498   : > { %v2175_v5 = vpop.xlane.xlu1 %2174  ;;  %v2221_v22 = vsel %vm1941_vm0, %v12458_v52, 0.0 }
 0x499   : > { %v12462_v62 = vpop.eup %11113  ;;  %11127 = vrcp.f32 %v2175_v5  ;;  %2222 = vadd.xlane.f32.xlu1 %v2221_v22 }
 0x49a   : > { %v11116_v63 = vpop.eup %11115  ;;  %v2178_v43 = vpop.xlane.xlu0 %2177  ;;  %v2224_v60 = vsel %vm1941_vm0, %v12462_v62, 0.0 }
 0x49b   : > { %v12466_v9 = vpop.eup %11117  ;;  %11129 = vrcp.f32 %v2178_v43  ;;  %2225 = vadd.xlane.f32.xlu0 %v2224_v60  ;;  %v2270_v33 = vmul.f32 %v11116_v63, %v12338_v17 }
 0x49c   : > { %v11120_v44 = vpop.eup %11119  ;;  %v2181_v39 = vpop.xlane.xlu1 %2180  ;;  %v2227_v46 = vsel %vm1941_vm0, %v12466_v9, 0.0 }
 0x49d   : > { %v11122_v27 = vpop.eup %11121  ;;  %11131 = vrcp.f32 %v2181_v39  ;;  %2228 = vadd.xlane.f32.xlu1 %v2227_v46  ;;  %v2271_v16 = vmul.f32 %v11120_v44, %v12343_v38  ;;  %v10886_v39 = vld [vmem:[%s14825_s3 + $0x8] sm:$0xff]  }
 0x49e   : > { %v2272_v42 = vmul.f32 %v11122_v27, %v12347_v36 }
 0x49f   : > { %v11124_v34 = vpop.eup %11123  ;;  %v2298_v32 = vpack.c.bf16 %v2271_v16, %v2270_v33 }
 0x4a0   : > { %v2273_v29 = vmul.f32 %v11124_v34, %v12351_v45 }
 0x4a1   : > { %v11126_v41 = vpop.eup %11125  ;;  %10691 = vmatprep.mubr.msk.bf16.mxu1 %vm1941_vm0, %v2298_v32 }
 0x4a2   : > { %v2299_v0 = vpack.c.bf16 %v2273_v29, %v2272_v42  ;;  %v2274_v18 = vmul.f32 %v11126_v41, %v12355_v51  ;;  %v10892_v42 = vld [vmem:[%s14825_s3 + $0x38] sm:$0xff]  }
 0x4a3   : > { %v11128_v54 = vpop.eup %11127 }
 0x4a4   : > { %10692 = vmatmul.mubr.msk.bf16.vlgmr.msra.gmra.mrb[72].mxu1 %vm1941_vm0, %v2299_v0  ;;  %v2275_v48 = vmul.f32 %v11128_v54, %v12359_v19 }
 0x4a5   : > { %v11130_v17 = vpop.eup %11129  ;;  %10716 = vmatpush3.bf16.msra.mxu1 %v12156_v26  ;;  %v10885_v26 = vld [vmem:[%s14825_s3] sm:$0xff]  }
 0x4a6   : > { %10717 = vmatprep.subr.bf16.mxu1 %v12154_v1  ;;  %v2300_v38 = vpack.c.bf16 %v2275_v48, %v2274_v18  ;;  %v2276_v45 = vmul.f32 %v11130_v17, %v12363_v13  ;;  %10731 = vmatprep.subr.bf16.mxu0 %v10885_v26 }
 0x4a7   : > { %v11132_v36 = vpop.eup %11131 }
 0x4a8   : > { %10695 = vmatprep.mubr.msk.bf16.mxu1 %vm1941_vm0, %v2300_v38  ;;  %v2277_v50 = vmul.f32 %v11132_v36, %v12367_v12 }
 0x4a9   : > { %10718 = vmatpush3.bf16.msra.mxu1 %v12154_v1 }
 0x4aa   : > { %10719 = vmatprep.subr.bf16.mxu1 %v12161_v47  ;;  %v2301_v51 = vpack.c.bf16 %v2277_v50, %v2276_v45 }
 0x4ac   : > { %10696 = vmatmul.mubr.msk.bf16.gmra.mrb[76].mxu1 %vm1941_vm0, %v2301_v51 }
 0x4ad   : > { %10720 = vmatpush3.bf16.msra.mxu1 %v12161_v47 }
 0x4ae   : > { %10721 = vmatprep.subr.bf16.mxu1 %v12159_v14 }
 0x4b1   : > { %10722 = vmatpush3.bf16.msra.mxu1 %v12159_v14 }
 0x4e7   : > { %v2184_v19 = vpop.xlane.xlu0 %2183 }
 0x4e8   : > { %11133 = vrcp.f32 %v2184_v19 }
 0x4e9   : > { %v2187_v13 = vpop.xlane.xlu1 %2186 }
 0x4ea   : > { %11135 = vrcp.f32 %v2187_v13 }
 0x4eb   : > { %v2190_v1 = vpop.xlane.xlu0 %2189 }
 0x4ec   : > { %11137 = vrcp.f32 %v2190_v1 }
 0x4ed   : > { %v2193_v12 = vpop.xlane.xlu1 %2192 }
 0x4ee   : > { %11139 = vrcp.f32 %v2193_v12 }
 0x4ef   : > { %v2196_v6 = vpop.xlane.xlu0 %2195 }
 0x4f0   : > { %11141 = vrcp.f32 %v2196_v6 }
 0x4f1   : > { %v2199_v47 = vpop.xlane.xlu1 %2198 }
 0x4f2   : > { %v11134_v25 = vpop.eup %11133  ;;  %11143 = vrcp.f32 %v2199_v47 }
 0x4f3   : > { %v2202_v23 = vpop.xlane.xlu0 %2201  ;;  %v2278_v30 = vmul.f32 %v11134_v25, %v12378_v3 }
 0x4f4   : > { %v11136_v14 = vpop.eup %11135  ;;  %11145 = vrcp.f32 %v2202_v23 }
 0x4f5   : > { %v2205_v2 = vpop.xlane.xlu1 %2204  ;;  %v2279_v4 = vmul.f32 %v11136_v14, %v12383_v53 }
 0x4f6   : > { %v11138_v31 = vpop.eup %11137  ;;  %11147 = vrcp.f32 %v2205_v2 }
 0x4f7   : > { %v2302_v5 = vpack.c.bf16 %v2279_v4, %v2278_v30  ;;  %v2280_v63 = vmul.f32 %v11138_v31, %v12387_v56 }
 0x4f8   : > { %v11140_v22 = vpop.eup %11139 }
 0x4f9   : > { %v2281_v43 = vmul.f32 %v11140_v22, %v12391_v35  ;;  %10707 = vmatprep.mubr.msk.bf16.mxu0 %vm1941_vm0, %v2302_v5  ;;  %v10887_v35 = vld [vmem:[%s14825_s3 + $0x10] sm:$0xff]  }
 0x4fa   : > { %v11142_v60 = vpop.eup %11141 }
 0x4fb   : > { %v2303_v44 = vpack.c.bf16 %v2281_v43, %v2280_v63  ;;  %v2282_v3 = vmul.f32 %v11142_v60, %v12395_v15  ;;  %v10888_v15 = vld [vmem:[%s14825_s3 + $0x18] sm:$0xff]  }
 0x4fc   : > { %v11144_v46 = vpop.eup %11143 }
 0x4fd   : > { %10708 = vmatmul.mubr.msk.bf16.vlgmr.msra.gmra.mrb[64].mxu0 %vm1941_vm0, %v2303_v44  ;;  %v2283_v53 = vmul.f32 %v11144_v46, %v12399_v55  ;;  %v10889_v55 = vld [vmem:[%s14825_s3 + $0x20] sm:$0xff]  }
 0x4fe   : > { %v11146_v27 = vpop.eup %11145  ;;  %10732 = vmatpush3.bf16.msra.mxu0 %v10885_v26 }
 0x4ff   : > { %v2304_v56 = vpack.c.bf16 %v2283_v53, %v2282_v3  ;;  %10733 = vmatprep.subr.bf16.mxu0 %v10886_v39  ;;  %v2284_v16 = vmul.f32 %v11146_v27, %v12403_v58  ;;  %v10890_v58 = vld [vmem:[%s14825_s3 + $0x28] sm:$0xff]  }
 0x500   : > { %v11148_v33 = vpop.eup %11147 }
 0x501   : > { %10711 = vmatprep.mubr.msk.bf16.mxu0 %vm1941_vm0, %v2304_v56  ;;  %v2285_v34 = vmul.f32 %v11148_v33, %v12407_v61  ;;  %v10891_v61 = vld [vmem:[%s14825_s3 + $0x30] sm:$0xff]  }
 0x502   : > { %10734 = vmatpush3.bf16.msra.mxu0 %v10886_v39 }
 0x503   : > { %v2305_v32 = vpack.c.bf16 %v2285_v34, %v2284_v16  ;;  %10735 = vmatprep.subr.bf16.mxu0 %v10887_v35 }
 0x505   : > { %10712 = vmatmul.mubr.msk.bf16.gmra.mrb[68].mxu0 %vm1941_vm0, %v2305_v32 }
 0x506   : > { %10736 = vmatpush3.bf16.msra.mxu0 %v10887_v35 }
 0x507   : > { %10737 = vmatprep.subr.bf16.mxu0 %v10888_v15 }
 0x50a   : > { %10738 = vmatpush3.bf16.msra.mxu0 %v10888_v15 }
 0x50b   : > { %10739 = vmatprep.subr.bf16.mxu0 %v10889_v55 }
 0x50e   : > { %10740 = vmatpush3.bf16.msra.mxu0 %v10889_v55 }
 0x50f   : > { %10741 = vmatprep.subr.bf16.mxu0 %v10890_v58 }
 0x512   : > { %10742 = vmatpush3.bf16.msra.mxu0 %v10890_v58 }
 0x513   : > { %10743 = vmatprep.subr.bf16.mxu0 %v10891_v61 }
 0x514   : > { %v2208_v29 = vpop.xlane.xlu0 %2207 }
 0x515   : > { %11149 = vrcp.f32 %v2208_v29 }
 0x516   : > { %v2211_v41 = vpop.xlane.xlu1 %2210  ;;  %10744 = vmatpush3.bf16.msra.mxu0 %v10891_v61 }
 0x517   : > { %11151 = vrcp.f32 %v2211_v41  ;;  %10745 = vmatprep.subr.bf16.mxu0 %v10892_v42 }
 0x518   : > { %v2214_v0 = vpop.xlane.xlu0 %2213 }
 0x519   : > { %11153 = vrcp.f32 %v2214_v0 }
 0x51a   : > { %v2217_v54 = vpop.xlane.xlu1 %2216  ;;  %10746 = vmatpush3.bf16.msra.mxu0 %v10892_v42 }
 0x51b   : > { %11155 = vrcp.f32 %v2217_v54 }
 0x51f   : > { %v11150_v18 = vpop.eup %11149 }
 0x520   : > { %v2286_v17 = vmul.f32 %v11150_v18, %v12421_v57 }
 0x521   : > { %v11152_v48 = vpop.eup %11151 }
 0x522   : > { %v2287_v38 = vmul.f32 %v11152_v48, %v12427_v49 }
 0x523   : > { %v11154_v36 = vpop.eup %11153 }
 0x524   : > { %v2220_v45 = vpop.xlane.xlu0 %2219  ;;  %v2306_v50 = vpack.c.bf16 %v2287_v38, %v2286_v17  ;;  %v2288_v26 = vmul.f32 %v11154_v36, %v12432_v40 }
 0x525   : > { %v11156_v51 = vpop.eup %11155  ;;  %11157 = vrcp.f32 %v2220_v45 }
 0x526   : > { %v2289_v19 = vmul.f32 %v11156_v51, %v12439_v59  ;;  %10723 = vmatprep.mubr.msk.bf16.mxu1 %vm1941_vm0, %v2306_v50  ;;  %v2223_v13 = vpop.xlane.xlu1 %2222 }
 0x527   : > { %11159 = vrcp.f32 %v2223_v13 }
 0x528   : > { %v2307_v1 = vpack.c.bf16 %v2289_v19, %v2288_v26  ;;  %v2226_v12 = vpop.xlane.xlu0 %2225 }
 0x529   : > { %11161 = vrcp.f32 %v2226_v12 }
 0x52a   : > { %v2229_v6 = vpop.xlane.xlu1 %2228  ;;  %10724 = vmatmul.mubr.msk.bf16.vlgmr.msra.gmra.mrb[80].mxu1 %vm1941_vm0, %v2307_v1 }
 0x52b   : > { %11163 = vrcp.f32 %v2229_v6 }
 0x52f   : > { %v11158_v57 = vpop.eup %11157 }
 0x530   : > { %v2290_v47 = vmul.f32 %v11158_v57, %v12454_v28 }
 0x531   : > { %v11160_v49 = vpop.eup %11159 }
 0x532   : > { %v2291_v25 = vmul.f32 %v11160_v49, %v12458_v52 }
 0x533   : > { %v11162_v40 = vpop.eup %11161 }
 0x534   : > { %v2308_v23 = vpack.c.bf16 %v2291_v25, %v2290_v47  ;;  %v2292_v14 = vmul.f32 %v11162_v40, %v12462_v62  ;;  %v12542_v47 = vld [vmem:[%s14826_s4] ss:$0 sm:$0xff] }
 0x535   : > { %v11164_v59 = vpop.eup %11163 }
 0x536   : > { %10727 = vmatprep.mubr.msk.bf16.mxu1 %vm1941_vm0, %v2308_v23  ;;  %v2293_v2 = vmul.f32 %v11164_v59, %v12466_v9 }
 0x538   : > { %v2309_v30 = vpack.c.bf16 %v2293_v2, %v2292_v14 }
 0x53a   : > { %10728 = vmatmul.mubr.msk.bf16.gmra.mrb[84].mxu1 %vm1941_vm0, %v2309_v30 }
 0x53b   : > { %3590 = vmatprep.mubr.bf16.mxu1 %v14921_v37 }
 0x557   : > { %v10677_v4 = vpop.f32.mrb[56].mxu0 }
 0x558   : > { %v2356_v31 = vpop.f32.mrb[57].mxu0 }
 0x559   : > { %v10678_v5 = vpop.f32.mrb[58].mxu0 }
 0x55a   : > { %v2619_v28 = vpack.c.bf16 %v10678_v5, %v10677_v4  ;;  %v2359_v22 = vpop.f32.mrb[59].mxu0 }
 0x55b   : > { %v2618_v52 = vpack.c.bf16 %v2359_v22, %v2356_v31 }
 0x55d   : > { %10747 = vmatprep.mubr.bf16.mxu0 %v2618_v52 }
 0x55e   : > { %10748 = vmatmul.mubr.bf16.vlgmr.msra.gmra.mrb[72].mxu0 %v2619_v28 }
 0x567   : > { %v10681_v63 = vpop.f32.mrb[60].mxu0 }
 0x568   : > { %v2372_v43 = vpop.f32.mrb[61].mxu0 }
 0x569   : > { %v10682_v60 = vpop.f32.mrb[62].mxu0 }
 0x56a   : > { %v2621_v44 = vpack.c.bf16 %v10682_v60, %v10681_v63  ;;  %v2375_v62 = vpop.f32.mrb[63].mxu0 }
 0x56b   : > { %v2620_v39 = vpack.c.bf16 %v2375_v62, %v2372_v43 }
 0x56d   : > { %10751 = vmatprep.mubr.bf16.mxu0 %v2620_v39 }
 0x56e   : > { %10752 = vmatmul.mubr.bf16.gmra.mrb[76].mxu0 %v2621_v44 }
 0x577   : > { %v10693_v9 = vpop.f32.mrb[72].mxu1 }
 0x578   : > { %v2433_v46 = vpop.f32.mrb[73].mxu1 }
 0x579   : > { %v10694_v3 = vpop.f32.mrb[74].mxu1 }
 0x57a   : > { %v2623_v53 = vpack.c.bf16 %v10694_v3, %v10693_v9  ;;  %v2436_v27 = vpop.f32.mrb[75].mxu1  ;;  %v14922_v9 = vld [vmem:[#allocation13_spill] sm:$0xff] }
 0x57b   : > { %v2622_v56 = vpack.c.bf16 %v2436_v27, %v2433_v46 }
 0x57d   : > { %10755 = vmatprep.mubr.bf16.mxu0 %v2622_v56 }
 0x57e   : > { %10756 = vmatmul.mubr.bf16.gmra.mrb[80].mxu0 %v2623_v53 }
 0x57f   : > { %v10697_v35 = vpop.f32.mrb[76].mxu1 }
 0x580   : > { %v2449_v33 = vpop.f32.mrb[77].mxu1 }
 0x581   : > { %v10698_v16 = vpop.f32.mrb[78].mxu1 }
 0x582   : > { %v2625_v34 = vpack.c.bf16 %v10698_v16, %v10697_v35  ;;  %v2452_v32 = vpop.f32.mrb[79].mxu1 }
 0x583   : > { %v2624_v15 = vpack.c.bf16 %v2452_v32, %v2449_v33  ;;  %v14923_v33 = vld [vmem:[#allocation14_spill] sm:$0xff] }
 0x585   : > { %10759 = vmatprep.mubr.bf16.mxu0 %v2624_v15 }
 0x586   : > { %10760 = vmatmul.mubr.bf16.gmra.mrb[84].mxu0 %v2625_v34  ;;  %v14924_v34 = vld [vmem:[#allocation15_spill] sm:$0xff] }
 0x5d0   : > { %v10709_v55 = vpop.f32.mrb[64].mxu0 }
 0x5d1   : > { %v2510_v58 = vpop.f32.mrb[65].mxu0 }
 0x5d2   : > { %v10710_v61 = vpop.f32.mrb[66].mxu0 }
 0x5d3   : > { %v2627_v42 = vpack.c.bf16 %v10710_v61, %v10709_v55  ;;  %v2513_v29 = vpop.f32.mrb[67].mxu0  ;;  %v14925_v55 = vld [vmem:[#allocation16_spill] sm:$0xff] }
 0x5d4   : > { %v2626_v41 = vpack.c.bf16 %v2513_v29, %v2510_v58 }
 0x5d6   : > { %10763 = vmatprep.mubr.bf16.mxu0 %v2626_v41  ;;  %v14926_v41 = vld [vmem:[#allocation17_spill] sm:$0xff] }
 0x5d7   : > { %10764 = vmatmul.mubr.bf16.gmra.mrb[88].mxu0 %v2627_v42 }
 0x5d8   : > { %v10713_v0 = vpop.f32.mrb[68].mxu0 }
 0x5d9   : > { %v2526_v54 = vpop.f32.mrb[69].mxu0 }
 0x5da   : > { %v10714_v18 = vpop.f32.mrb[70].mxu0 }
 0x5db   : > { %v2629_v48 = vpack.c.bf16 %v10714_v18, %v10713_v0  ;;  %v2529_v17 = vpop.f32.mrb[71].mxu0 }
 0x5dc   : > { %v2628_v38 = vpack.c.bf16 %v2529_v17, %v2526_v54  ;;  %v14927_v17 = vld [vmem:[#allocation18_spill] sm:$0xff] }
 0x5de   : > { %10767 = vmatprep.mubr.bf16.mxu0 %v2628_v38 }
 0x5df   : > { %10768 = vmatmul.mubr.bf16.gmra.mrb[92].mxu0 %v2629_v48 }
 0x5fd   : > { %v10725_v36 = vpop.f32.mrb[80].mxu1 }
 0x5fe   : > { %v2587_v45 = vpop.f32.mrb[81].mxu1 }
 0x5ff   : > { %v10726_v50 = vpop.f32.mrb[82].mxu1 }
 0x600   : > { %v2631_v51 = vpack.c.bf16 %v10726_v50, %v10725_v36  ;;  %v2590_v26 = vpop.f32.mrb[83].mxu1 }
 0x601   : > { %v2630_v19 = vpack.c.bf16 %v2590_v26, %v2587_v45  ;;  %v14928_v45 = vld [vmem:[#allocation19_spill] sm:$0xff] }
 0x603   : > { %10771 = vmatprep.mubr.bf16.mxu0 %v2630_v19  ;;  %v14931_v19 = vld [vmem:[#allocation21_spill] sm:$0xff] }
 0x604   : > { %10772 = vmatmul.mubr.bf16.gmra.mrb[96].mxu0 %v2631_v51  ;;  %v14929_v51 = vld [vmem:[#allocation20_spill] sm:$0xff] }
 0x60d   : > { %v10729_v13 = vpop.f32.mrb[84].mxu1 }
 0x60e   : > { %v2603_v1 = vpop.f32.mrb[85].mxu1 }
 0x60f   : > { %v10730_v12 = vpop.f32.mrb[86].mxu1 }
 0x610   : > { %v2633_v6 = vpack.c.bf16 %v10730_v12, %v10729_v13  ;;  %v2606_v57 = vpop.f32.mrb[87].mxu1 }
 0x611   : > { %v2632_v49 = vpack.c.bf16 %v2606_v57, %v2603_v1 }
 0x613   : > { %10775 = vmatprep.mubr.bf16.mxu0 %v2632_v49 }
 0x614   : > { %10776 = vmatmul.mubr.bf16.gmra.mrb[100].mxu0 %v2633_v6 }
 0x615   : > { %3783 = vmatprep.mubr.bf16.mxu0 %v14921_v37 }
 0x631   : > { %v10749_v25 = vpop.f32.mrb[72].mxu0 }
 0x632   : > { %v2739_v40 = vpop.f32.mrb[73].mxu0  ;;  %v2748_v2 = vadd.f32 %v10749_v25, %v12542_v47 }
 0x633   : > { %v2740_v23 = vadd.f32 %v12542_v47, %v2739_v40  ;;  %v10750_v59 = vpop.f32.mrb[74].mxu0 }
 0x634   : > { %v2742_v14 = vpop.f32.mrb[75].mxu0  ;;  %v2751_v31 = vadd.f32 %v10750_v59, %v12542_v47  ;;  %v12557_v28 = vadd.f32 %v2748_v2, %v11550_v8  ;;  %v14935_v2 = vld [vmem:[#allocation23_spill] sm:$0xff] }
 0x635   : > { %v2743_v30 = vadd.f32 %v12542_v47, %v2742_v14  ;;  %v12548_v4 = vadd.f32 %v2740_v23, %v11547_v7  ;;  %v14933_v23 = vld [vmem:[#allocation22_spill] sm:$0xff] }
 0x636   : > { %v12561_v22 = vadd.f32 %v2751_v31, %v11559_v11 }
 0x637   : > { %2900 = vadd.xlane.f32.xlu0 %v12548_v4  ;;  %v12553_v5 = vadd.f32 %v2743_v30, %v11555_v10 }
 0x639   : > { %2902 = vadd.xlane.f32.xlu1 %v12553_v5 }
 0x63b   : > { %2904 = vadd.xlane.f32.xlu0 %v12557_v28 }
 0x63d   : > { %2906 = vadd.xlane.f32.xlu1 %v12561_v22 }
 0x641   : > { %v10753_v7 = vpop.f32.mrb[76].mxu0 }
 0x642   : > { %v2755_v52 = vpop.f32.mrb[77].mxu0  ;;  %v2764_v10 = vadd.f32 %v10753_v7, %v12542_v47  ;;  %v14937_v7 = vld [vmem:[#allocation24_spill] sm:$0xff] }
 0x643   : > { %v2756_v63 = vadd.f32 %v12542_v47, %v2755_v52  ;;  %v10754_v43 = vpop.f32.mrb[78].mxu0 }
 0x644   : > { %v2758_v60 = vpop.f32.mrb[79].mxu0  ;;  %v2767_v62 = vadd.f32 %v10754_v43, %v12542_v47  ;;  %v12577_v39 = vadd.f32 %v2764_v10, %v11598_v24 }
 0x645   : > { %v2759_v44 = vadd.f32 %v12542_v47, %v2758_v60  ;;  %v12568_v8 = vadd.f32 %v2756_v63, %v11588_v20  ;;  %v14939_v60 = vld [vmem:[#allocation25_spill] sm:$0xff] }
 0x646   : > { %v12581_v46 = vadd.f32 %v2767_v62, %v14922_v9 }
 0x647   : > { %2908 = vadd.xlane.f32.xlu0 %v12568_v8  ;;  %v12573_v11 = vadd.f32 %v2759_v44, %v11591_v21 }
 0x649   : > { %2910 = vadd.xlane.f32.xlu1 %v12573_v11 }
 0x64b   : > { %2912 = vadd.xlane.f32.xlu0 %v12577_v39 }
 0x64d   : > { %2914 = vadd.xlane.f32.xlu1 %v12581_v46 }
 0x651   : > { %v10757_v20 = vpop.f32.mrb[80].mxu0 }
 0x652   : > { %v2771_v3 = vpop.f32.mrb[81].mxu0  ;;  %v2780_v21 = vadd.f32 %v10757_v20, %v12542_v47 }
 0x653   : > { %v2772_v53 = vadd.f32 %v12542_v47, %v2771_v3  ;;  %v10758_v27 = vpop.f32.mrb[82].mxu0  ;;  %v10893_v3 = vld [vmem:[%s14831_s9 + $0x8] ss:$16 sps:$4 sm:$0xff]  }
 0x654   : > { %v2774_v56 = vpop.f32.mrb[83].mxu0  ;;  %v2783_v16 = vadd.f32 %v10758_v27, %v12542_v47  ;;  %v12597_v58 = vadd.f32 %v2780_v21, %v14925_v55  ;;  %v10896_v55 = vld [vmem:[%s14831_s9 + $0x28] ss:$16 sps:$4 sm:$0xff]  }
 0x655   : > { %v2775_v35 = vadd.f32 %v12542_v47, %v2774_v56  ;;  %v12588_v24 = vadd.f32 %v2772_v53, %v14923_v33  ;;  %v10895_v53 = vld [vmem:[%s14831_s9 + $0xc] ss:$16 sps:$4 sm:$0xff]  }
 0x656   : > { %v12602_v0 = vadd.f32 %v2783_v16, %v14926_v41  ;;  %3751 = vmatprep.subr.bf16.mxu0 %v10895_v53 }
 0x657   : > { %2916 = vadd.xlane.f32.xlu0 %v12588_v24  ;;  %v12593_v32 = vadd.f32 %v2775_v35, %v14924_v34  ;;  %3752 = vmatpush1.bf16.msra.mxu0 %v10893_v3 }
 0x659   : > { %v10761_v15 = vpop.f32.mrb[84].mxu0  ;;  %2918 = vadd.xlane.f32.xlu1 %v12593_v32 }
 0x65a   : > { %v2787_v61 = vpop.f32.mrb[85].mxu0  ;;  %v2796_v18 = vadd.f32 %v10761_v15, %v12542_v47 }
 0x65b   : > { %v2788_v42 = vadd.f32 %v12542_v47, %v2787_v61  ;;  %v10762_v29 = vpop.f32.mrb[86].mxu0  ;;  %2920 = vadd.xlane.f32.xlu0 %v12597_v58  ;;  %v10898_v61 = vld [vmem:[%s14831_s9 + $0x2c] ss:$16 sps:$4 sm:$0xff]  }
 0x65c   : > { %v2790_v54 = vpop.f32.mrb[87].mxu0  ;;  %v2799_v36 = vadd.f32 %v10762_v29, %v12542_v47  ;;  %v12617_v26 = vadd.f32 %v2796_v18, %v14929_v51  ;;  %v10901_v18 = vld [vmem:[%s14831_s9 + $0x4] ss:$16 sps:$4 sm:$0xff]   ;;  %3753 = vmatprep.subr.bf16.mxu0 %v10898_v61  ;;  %v10908_v61 = vld [vmem:[%s14831_s9 + $0x40] ss:$16 sps:$4 sm:$0xff]  }
 0x65d   : > { %v2791_v48 = vadd.f32 %v12542_v47, %v2790_v54  ;;  %2922 = vadd.xlane.f32.xlu1 %v12602_v0  ;;  %v12608_v38 = vadd.f32 %v2788_v42, %v14927_v17  ;;  %v10899_v54 = vld [vmem:[%s14831_s9] ss:$16 sps:$4 sm:$0xff]   ;;  %v10907_v17 = vld [vmem:[%s14831_s9 + $0x24] ss:$16 sps:$4 sm:$0xff]   ;;  %3754 = vmatpush1.bf16.msra.mxu0 %v10896_v55 }
 0x65e   : > { %14930 = vst [vmem:[#allocation13_spill] sm:$0xff] %v12617_v26  ;;  %v12621_v13 = vadd.f32 %v2799_v36, %v14931_v19  ;;  %v10902_v19 = vld [vmem:[%s14831_s9 + $0x48] ss:$16 sps:$4 sm:$0xff]   ;;  %3558 = vmatprep.subr.bf16.mxu1 %v10901_v18 }
 0x65f   : > { %2924 = vadd.xlane.f32.xlu0 %v12608_v38  ;;  %v12613_v50 = vadd.f32 %v2791_v48, %v14928_v45  ;;  %v10904_v48 = vld [vmem:[%s14831_s9 + $0x4c] ss:$16 sps:$4 sm:$0xff]   ;;  %3559 = vmatpush1.bf16.msra.mxu1 %v10899_v54 }
 0x660   : > { %14932 = vst [vmem:[#allocation14_spill] sm:$0xff] %v12621_v13  ;;  %v14941_v45 = vld [vmem:[#allocation26_spill] sm:$0xff]  ;;  %3755 = vmatprep.subr.bf16.mxu0 %v10904_v48  ;;  %3560 = vmatprep.subr.bf16.mxu1 %v10907_v17 }
 0x661   : > { %2926 = vadd.xlane.f32.xlu1 %v12613_v50  ;;  %3756 = vmatpush1.bf16.msra.mxu0 %v10902_v19  ;;  %v14949_v18 = vld [vmem:[#allocation30_spill] sm:$0xff] }
 0x662   : > { %v10913_v17 = vld [vmem:[%s14831_s9 + $0x6c] ss:$16 sps:$4 sm:$0xff]   ;;  %v10911_v19 = vld [vmem:[%s14831_s9 + $0x68] ss:$16 sps:$4 sm:$0xff]  }
 0x663   : > { %2928 = vadd.xlane.f32.xlu0 %v12617_v26  ;;  %3757 = vmatprep.subr.bf16.mxu0 %v10913_v17 }
 0x665   : > { %2930 = vadd.xlane.f32.xlu1 %v12621_v13  ;;  %3758 = vmatpush1.bf16.msra.mxu0 %v10911_v19 }
 0x6aa   : > { %v10765_v1 = vpop.f32.mrb[88].mxu0 }
 0x6ab   : > { %v2803_v12 = vpop.f32.mrb[89].mxu0  ;;  %v2812_v25 = vadd.f32 %v10765_v1, %v12542_v47 }
 0x6ac   : > { %v2804_v6 = vadd.f32 %v12542_v47, %v2803_v12  ;;  %v10766_v57 = vpop.f32.mrb[90].mxu0  ;;  %v14943_v12 = vld [vmem:[#allocation27_spill] sm:$0xff] }
 0x6ad   : > { %v2806_v49 = vpop.f32.mrb[91].mxu0  ;;  %v2815_v14 = vadd.f32 %v10766_v57, %v12542_v47  ;;  %v12637_v52 = vadd.f32 %v2812_v25, %v14937_v7  ;;  %v10905_v57 = vld [vmem:[%s14831_s9 + $0x20] ss:$16 sps:$4 sm:$0xff]   ;;  %v14945_v7 = vld [vmem:[#allocation28_spill] sm:$0xff] }
 0x6ae   : > { %v2807_v40 = vadd.f32 %v12542_v47, %v2806_v49  ;;  %v12628_v59 = vadd.f32 %v2804_v6, %v14933_v23  ;;  %3561 = vmatpush1.bf16.msra.mxu1 %v10905_v57 }
 0x6af   : > { %14938 = vst [vmem:[#allocation17_spill] sm:$0xff] %v12637_v52  ;;  %v12641_v10 = vadd.f32 %v2815_v14, %v14939_v60 }
 0x6b0   : > { %14934 = vst [vmem:[#allocation15_spill] sm:$0xff] %v12628_v59  ;;  %2932 = vadd.xlane.f32.xlu0 %v12628_v59  ;;  %v12633_v30 = vadd.f32 %v2807_v40, %v14935_v2 }
 0x6b1   : > { %14940 = vst [vmem:[#allocation18_spill] sm:$0xff] %v12641_v10 }
 0x6b2   : > { %14936 = vst [vmem:[#allocation16_spill] sm:$0xff] %v12633_v30  ;;  %2934 = vadd.xlane.f32.xlu1 %v12633_v30  ;;  %v10769_v31 = vpop.f32.mrb[92].mxu0 }
 0x6b3   : > { %v2819_v63 = vpop.f32.mrb[93].mxu0  ;;  %v2828_v49 = vadd.f32 %v10769_v31, %v12542_v47 }
 0x6b4   : > { %2936 = vadd.xlane.f32.xlu0 %v12637_v52  ;;  %v10770_v43 = vpop.f32.mrb[94].mxu0  ;;  %v2820_v35 = vadd.f32 %v12542_v47, %v2819_v63 }
 0x6b5   : > { %v2822_v44 = vpop.f32.mrb[95].mxu0  ;;  %v2831_v40 = vadd.f32 %v10770_v43, %v12542_v47  ;;  %v12707_v63 = vadd.f32 %v2828_v49, %v14945_v7  ;;  %v14947_v43 = vld [vmem:[#allocation29_spill] sm:$0xff]  ;;  %v14950_v49 = vld [vmem:[#allocation31_spill] sm:$0xff]  ;;  %v10917_v7 = vld [vmem:[%s14831_s9 + $0x88] ss:$16 sps:$4 sm:$0xff]  }
 0x6b6   : > { %2938 = vadd.xlane.f32.xlu1 %v12641_v10  ;;  %v2823_v42 = vadd.f32 %v12542_v47, %v2822_v44  ;;  %v12684_v51 = vadd.f32 %v2820_v35, %v14941_v45  ;;  %v10916_v45 = vld [vmem:[%s14831_s9 + $0x64] ss:$16 sps:$4 sm:$0xff]  }
 0x6b7   : > { %14946 = vst [vmem:[#allocation21_spill] sm:$0xff] %v12707_v63 }
 0x6b8   : > { %14942 = vst [vmem:[#allocation19_spill] sm:$0xff] %v12684_v51  ;;  %v12694_v6 = vadd.f32 %v2823_v42, %v14943_v12  ;;  %v10914_v12 = vld [vmem:[%s14831_s9 + $0x60] ss:$16 sps:$4 sm:$0xff]  }
 0x6ba   : > { %14944 = vst [vmem:[#allocation20_spill] sm:$0xff] %v12694_v6 }
 0x6c4   : > { %v2901_v62 = vpop.xlane.xlu0 %2900 }
 0x6c5   : > { %v2964_v9 = vmul.f32 0.0078125, %v2901_v62 }
 0x6c6   : > { %v2903_v20 = vpop.xlane.xlu1 %2902 }
 0x6c7   : > { %v12651_v27 = vsub.f32 %v12548_v4, %v2964_v9  ;;  %v2965_v56 = vmul.f32 0.0078125, %v2903_v20  ;;  %v12714_v9 = vadd.f32 %v2831_v40, %v14947_v43 }
 0x6c8   : > { %v2905_v21 = vpop.xlane.xlu0 %2904 }
 0x6c9   : > { %v12655_v33 = vsub.f32 %v12553_v5, %v2965_v56  ;;  %v2966_v16 = vmul.f32 0.0078125, %v2905_v21  ;;  %v3028_v34 = vmul.f32 %v12651_v27, %v12651_v27  ;;  %14948 = vst [vmem:[#allocation22_spill] sm:$0xff] %v12714_v9 }
 0x6ca   : > { %v2907_v15 = vpop.xlane.xlu1 %2906 }
 0x6cb   : > { %v2967_v29 = vmul.f32 0.0078125, %v2907_v15  ;;  %3060 = vadd.xlane.f32.xlu0 %v3028_v34  ;;  %v3029_v41 = vmul.f32 %v12655_v33, %v12655_v33  ;;  %v12681_v36 = vsub.f32 %v12557_v28, %v2966_v16  ;;  %v10910_v34 = vld [vmem:[%s14831_s9 + $0x44] ss:$16 sps:$4 sm:$0xff]  }
 0x6cc   : > { %3562 = vmatprep.subr.bf16.mxu1 %v10910_v34  ;;  %v10923_v34 = vld [vmem:[%s14831_s9 + $0xa8] ss:$16 sps:$4 sm:$0xff]  }
 0x6cd   : > { %3062 = vadd.xlane.f32.xlu1 %v3029_v41  ;;  %v12690_v1 = vsub.f32 %v12561_v22, %v2967_v29  ;;  %v3030_v25 = vmul.f32 %v12681_v36, %v12681_v36  ;;  %3563 = vmatpush1.bf16.msra.mxu1 %v10908_v61 }
 0x6ce   : > { %3564 = vmatprep.subr.bf16.mxu1 %v10916_v45 }
 0x6cf   : > { %2940 = vadd.xlane.f32.xlu0 %v12684_v51  ;;  %v3031_v23 = vmul.f32 %v12690_v1, %v12690_v1 }
 0x6d1   : > { %2942 = vadd.xlane.f32.xlu1 %v12694_v6  ;;  %3565 = vmatpush1.bf16.msra.mxu1 %v10914_v12 }
 0x6d3   : > { %3064 = vadd.xlane.f32.xlu0 %v3030_v25 }
 0x6d4   : > { %v2909_v14 = vpop.xlane.xlu0 %2908 }
 0x6d5   : > { %v2968_v2 = vmul.f32 0.0078125, %v2909_v14  ;;  %3066 = vadd.xlane.f32.xlu1 %v3031_v23  ;;  %v10919_v14 = vld [vmem:[%s14831_s9 + $0x8c] ss:$16 sps:$4 sm:$0xff]  }
 0x6d6   : > { %v2911_v31 = vpop.xlane.xlu1 %2910  ;;  %3759 = vmatprep.subr.bf16.mxu0 %v10919_v14  ;;  %v10934_v14 = vld [vmem:[%s14831_s9 + $0xc4] ss:$16 sps:$4 sm:$0xff]  }
 0x6d7   : > { %v12710_v60 = vsub.f32 %v12568_v8, %v2968_v2  ;;  %v2969_v44 = vmul.f32 0.0078125, %v2911_v31  ;;  %2944 = vadd.xlane.f32.xlu0 %v12707_v63  ;;  %v10773_v62 = vpop.f32.mrb[96].mxu0  ;;  %v10922_v2 = vld [vmem:[%s14831_s9 + $0x84] ss:$16 sps:$4 sm:$0xff]   ;;  %v10920_v31 = vld [vmem:[%s14831_s9 + $0x80] ss:$16 sps:$4 sm:$0xff]   ;;  %3760 = vmatpush1.bf16.msra.mxu0 %v10917_v7 }
 0x6d8   : > { %v2913_v20 = vpop.xlane.xlu0 %2912  ;;  %v2835_v3 = vpop.f32.mrb[97].mxu0  ;;  %v2844_v40 = vadd.f32 %v10773_v62, %v12542_v47  ;;  %3566 = vmatprep.subr.bf16.mxu1 %v10922_v2 }
 0x6d9   : > { %v12717_v53 = vsub.f32 %v12573_v11, %v2969_v44  ;;  %v2970_v56 = vmul.f32 0.0078125, %v2913_v20  ;;  %v2836_v21 = vadd.f32 %v12542_v47, %v2835_v3  ;;  %2946 = vadd.xlane.f32.xlu1 %v12714_v9  ;;  %v10774_v35 = vpop.f32.mrb[98].mxu0  ;;  %v3032_v16 = vmul.f32 %v12710_v60, %v12710_v60  ;;  %v14951_v3 = vld [vmem:[#allocation32_spill] sm:$0xff]  ;;  %3567 = vmatpush1.bf16.msra.mxu1 %v10920_v31 }
 0x6da   : > { %v2915_v15 = vpop.xlane.xlu1 %2914  ;;  %v2838_v55 = vpop.f32.mrb[99].mxu0  ;;  %v2847_v44 = vadd.f32 %v10774_v35, %v12542_v47  ;;  %v10928_v35 = vld [vmem:[%s14831_s9 + $0xa4] ss:$16 sps:$4 sm:$0xff]   ;;  %v10929_v31 = vld [vmem:[%s14831_s9 + $0xc8] ss:$16 sps:$4 sm:$0xff]  }
 0x6db   : > { %v2971_v42 = vmul.f32 0.0078125, %v2915_v15  ;;  %v2839_v29 = vadd.f32 %v12542_v47, %v2838_v55  ;;  %3068 = vadd.xlane.f32.xlu0 %v3032_v16  ;;  %v3033_v41 = vmul.f32 %v12717_v53, %v12717_v53  ;;  %v12733_v54 = vsub.f32 %v12577_v39, %v2970_v56  ;;  %v10926_v15 = vld [vmem:[%s14831_s9 + $0xa0] ss:$16 sps:$4 sm:$0xff]   ;;  %3568 = vmatprep.subr.bf16.mxu1 %v10928_v35  ;;  %v14954_v35 = vld [vmem:[#allocation34_spill] sm:$0xff] }
 0x6dc   : > { %v12736_v48 = vadd.f32 %v2836_v21, %v14949_v18  ;;  %v12777_v56 = vadd.f32 %v2844_v40, %v14951_v3  ;;  %v10925_v21 = vld [vmem:[%s14831_s9 + $0xac] ss:$16 sps:$4 sm:$0xff]  }
 0x6dd   : > { %3070 = vadd.xlane.f32.xlu1 %v3033_v41  ;;  %v12751_v57 = vsub.f32 %v12581_v46, %v2971_v42  ;;  %v12755_v25 = vadd.f32 %v2839_v29, %v14950_v49  ;;  %v3034_v23 = vmul.f32 %v12733_v54, %v12733_v54  ;;  %v14952_v29 = vld [vmem:[#allocation33_spill] sm:$0xff]  ;;  %3761 = vmatprep.subr.bf16.mxu0 %v10925_v21 }
 0x6de   : > { %v12796_v41 = vadd.f32 %v2847_v44, %v14952_v29  ;;  %3762 = vmatpush1.bf16.msra.mxu0 %v10923_v34  ;;  %3569 = vmatpush1.bf16.msra.mxu1 %v10926_v15  ;;  %v10932_v44 = vld [vmem:[%s14831_s9 + $0xc0] ss:$16 sps:$4 sm:$0xff]   ;;  %v10937_v34 = vld [vmem:[%s14831_s9 + $0xe4] ss:$16 sps:$4 sm:$0xff]   ;;  %v10940_v15 = vld [vmem:[%s14831_s9 + $0xec] ss:$16 sps:$4 sm:$0xff]  }
 0x6df   : > { %2948 = vadd.xlane.f32.xlu0 %v12736_v48  ;;  %v3035_v62 = vmul.f32 %v12751_v57, %v12751_v57  ;;  %3570 = vmatprep.subr.bf16.mxu1 %v10934_v14  ;;  %v10935_v29 = vld [vmem:[%s14831_s9 + $0xe0] ss:$16 sps:$4 sm:$0xff]  }
 0x6e0   : > { %14953 = vst [vmem:[#allocation23_spill] sm:$0xff] %v12796_v41 }
 0x6e1   : > { %2950 = vadd.xlane.f32.xlu1 %v12755_v25 }
 0x6e2   : > { %3571 = vmatpush1.bf16.msra.mxu1 %v10932_v44 }
 0x6e3   : > { %3072 = vadd.xlane.f32.xlu0 %v3034_v23  ;;  %v10931_v23 = vld [vmem:[%s14831_s9 + $0xcc] ss:$16 sps:$4 sm:$0xff]   ;;  %3572 = vmatprep.subr.bf16.mxu1 %v10937_v34 }
 0x6e4   : > { %v2917_v43 = vpop.xlane.xlu0 %2916  ;;  %3763 = vmatprep.subr.bf16.mxu0 %v10931_v23 }
 0x6e5   : > { %v2972_v20 = vmul.f32 0.0078125, %v2917_v43  ;;  %3074 = vadd.xlane.f32.xlu1 %v3035_v62  ;;  %3764 = vmatpush1.bf16.msra.mxu0 %v10929_v31 }
 0x6e6   : > { %v2919_v16 = vpop.xlane.xlu1 %2918  ;;  %3765 = vmatprep.subr.bf16.mxu0 %v10940_v15  ;;  %3573 = vmatpush1.bf16.msra.mxu1 %v10935_v29 }
 0x6e7   : > { %v12792_v55 = vsub.f32 %v12588_v24, %v2972_v20  ;;  %v2973_v61 = vmul.f32 0.0078125, %v2919_v16  ;;  %2952 = vadd.xlane.f32.xlu0 %v12777_v56  ;;  %v10777_v42 = vpop.f32.mrb[100].mxu0 }
 0x6e8   : > { %v2921_v18 = vpop.xlane.xlu0 %2920  ;;  %v2851_v17 = vpop.f32.mrb[101].mxu0 }
 0x6e9   : > { %v12799_v45 = vsub.f32 %v12593_v32, %v2973_v61  ;;  %v2974_v19 = vmul.f32 0.0078125, %v2921_v18  ;;  %v2852_v12 = vadd.f32 %v12542_v47, %v2851_v17  ;;  %2954 = vadd.xlane.f32.xlu1 %v12796_v41  ;;  %v10778_v49 = vpop.f32.mrb[102].mxu0  ;;  %v3036_v40 = vmul.f32 %v12792_v55, %v12792_v55  ;;  %v10938_v18 = vld [vmem:[%s14831_s9 + $0xe8] ss:$16 sps:$4 sm:$0xff]  }
 0x6ea   : > { %v2923_v2 = vpop.xlane.xlu1 %2922  ;;  %v2854_v7 = vpop.f32.mrb[103].mxu0  ;;  %3766 = vmatpush1.bf16.msra.mxu0 %v10938_v18 }
 0x6eb   : > { %v2975_v62 = vmul.f32 0.0078125, %v2923_v2  ;;  %v2855_v43 = vadd.f32 %v12542_v47, %v2854_v7  ;;  %3076 = vadd.xlane.f32.xlu0 %v3036_v40  ;;  %v3037_v20 = vmul.f32 %v12799_v45, %v12799_v45  ;;  %v12821_v21 = vsub.f32 %v12597_v58, %v2974_v19  ;;  %v14955_v19 = vld [vmem:[#allocation35_spill] sm:$0xff] }
 0x6ec   : > { %v2925_v3 = vpop.xlane.xlu0 %2924  ;;  %v12824_v16 = vadd.f32 %v2852_v12, %v14954_v35  ;;  %v2860_v40 = vadd.f32 %v10777_v42, %v12542_v47  ;;  %v2863_v7 = vadd.f32 %v10778_v49, %v12542_v47  ;;  %v14957_v47 = vld [vmem:[#allocation37_spill] sm:$0xff] }
 0x6ed   : > { %3078 = vadd.xlane.f32.xlu1 %v3037_v20  ;;  %v12839_v17 = vsub.f32 %v12602_v0, %v2975_v62  ;;  %v12843_v12 = vadd.f32 %v2855_v43, %v14955_v19  ;;  %v2976_v23 = vmul.f32 0.0078125, %v2925_v3  ;;  %v3038_v14 = vmul.f32 %v12821_v21, %v12821_v21  ;;  %v14956_v20 = vld [vmem:[#allocation36_spill] sm:$0xff] }
 0x6ee   : > { %v2927_v61 = vpop.xlane.xlu1 %2926  ;;  %v12856_v3 = vadd.f32 %v2860_v40, %v14956_v20  ;;  %v12863_v49 = vadd.f32 %v2863_v7, %v14957_v47 }
 0x6ef   : > { %2956 = vadd.xlane.f32.xlu0 %v12824_v16  ;;  %v2977_v31 = vmul.f32 0.0078125, %v2927_v61  ;;  %v3039_v44 = vmul.f32 %v12839_v17, %v12839_v17  ;;  %v12853_v43 = vsub.f32 %v12608_v38, %v2976_v23 }
 0x6f0   : > { %v2929_v2 = vpop.xlane.xlu0 %2928  ;;  %14958 = vst [vmem:[#allocation24_spill] sm:$0xff] %v12863_v49 }
 0x6f1   : > { %2958 = vadd.xlane.f32.xlu1 %v12843_v12  ;;  %v2978_v42 = vmul.f32 0.0078125, %v2929_v2  ;;  %v12859_v35 = vsub.f32 %v12613_v50, %v2977_v31  ;;  %v3040_v61 = vmul.f32 %v12853_v43, %v12853_v43 }
 0x6f2   : > { %v2931_v62 = vpop.xlane.xlu1 %2930 }
 0x6f3   : > { %3080 = vadd.xlane.f32.xlu0 %v3038_v14  ;;  %v2979_v34 = vmul.f32 0.0078125, %v2931_v62  ;;  %v12866_v15 = vsub.f32 %v12617_v26, %v2978_v42  ;;  %v3041_v18 = vmul.f32 %v12859_v35, %v12859_v35 }
 0x6f5   : > { %3082 = vadd.xlane.f32.xlu1 %v3039_v44  ;;  %v12872_v29 = vsub.f32 %v12621_v13, %v2979_v34  ;;  %v3042_v19 = vmul.f32 %v12866_v15, %v12866_v15 }
 0x6f7   : > { %2960 = vadd.xlane.f32.xlu0 %v12856_v3  ;;  %v3043_v40 = vmul.f32 %v12872_v29, %v12872_v29 }
 0x6f9   : > { %2962 = vadd.xlane.f32.xlu1 %v12863_v49 }
 0x6fb   : > { %3084 = vadd.xlane.f32.xlu0 %v3040_v61 }
 0x6fd   : > { %3086 = vadd.xlane.f32.xlu1 %v3041_v18 }
 0x6ff   : > { %3088 = vadd.xlane.f32.xlu0 %v3042_v19 }
 0x701   : > { %3090 = vadd.xlane.f32.xlu1 %v3043_v40 }
 0x73d   : > { %v2933_v23 = vpop.xlane.xlu0 %2932 }
 0x73e   : > { %v2980_v14 = vmul.f32 0.0078125, %v2933_v23 }
 0x73f   : > { %v2935_v2 = vpop.xlane.xlu1 %2934 }
 0x740   : > { %v12881_v7 = vsub.f32 %v12628_v59, %v2980_v14  ;;  %v2981_v31 = vmul.f32 0.0078125, %v2935_v2 }
 0x741   : > { %v2937_v44 = vpop.xlane.xlu0 %2936 }
 0x742   : > { %v12884_v62 = vsub.f32 %v12633_v30, %v2981_v31  ;;  %v2982_v42 = vmul.f32 0.0078125, %v2937_v44  ;;  %v3044_v20 = vmul.f32 %v12881_v7, %v12881_v7 }
 0x743   : > { %v2939_v34 = vpop.xlane.xlu1 %2938 }
 0x744   : > { %v12889_v47 = vsub.f32 %v12637_v52, %v2982_v42  ;;  %v2983_v61 = vmul.f32 0.0078125, %v2939_v34  ;;  %3092 = vadd.xlane.f32.xlu0 %v3044_v20  ;;  %v3045_v18 = vmul.f32 %v12884_v62, %v12884_v62  ;;  %v10941_v34 = vld [vmem:[%s14833_s11 + $0x40] sm:$0xff]  }
 0x745   : > { %10331 = vmatprep.subr.bf16.mxu1 %v10941_v34 }
 0x746   : > { %v12894_v19 = vsub.f32 %v12641_v10, %v2983_v61  ;;  %3094 = vadd.xlane.f32.xlu1 %v3045_v18  ;;  %v3046_v40 = vmul.f32 %v12889_v47, %v12889_v47  ;;  %v10943_v61 = vld [vmem:[%s14833_s11 + $0xc0] sm:$0xff]  }
 0x747   : > { %10443 = vmatprep.subr.bf16.mxu0 %v10943_v61 }
 0x748   : > { %3096 = vadd.xlane.f32.xlu0 %v3046_v40  ;;  %v3047_v23 = vmul.f32 %v12894_v19, %v12894_v19 }
 0x74a   : > { %3098 = vadd.xlane.f32.xlu1 %v3047_v23 }
 0x758   : > { %v3061_v14 = vpop.xlane.xlu0 %3060 }
 0x759   : > { %v3124_v2 = vmul.f32 0.0078125, %v3061_v14 }
 0x75a   : > { %v3063_v31 = vpop.xlane.xlu1 %3062 }
 0x75b   : > { %v3156_v44 = vadd.f32 1e-05, %v3124_v2  ;;  %v3125_v42 = vmul.f32 0.0078125, %v3063_v31 }
 0x75c   : > { %v2941_v20 = vpop.xlane.xlu0 %2940 }
 0x75d   : > { %11165 = vrsqrt.f32 %v3156_v44  ;;  %v3157_v18 = vadd.f32 1e-05, %v3125_v42  ;;  %v2984_v40 = vmul.f32 0.0078125, %v2941_v20 }
 0x75e   : > { %v2943_v10 = vpop.xlane.xlu1 %2942 }
 0x75f   : > { %11167 = vrsqrt.f32 %v3157_v18  ;;  %v12907_v23 = vsub.f32 %v12684_v51, %v2984_v40  ;;  %v2985_v14 = vmul.f32 0.0078125, %v2943_v10 }
 0x760   : > { %v3065_v2 = vpop.xlane.xlu0 %3064 }
 0x761   : > { %v12910_v31 = vsub.f32 %v12694_v6, %v2985_v14  ;;  %v3126_v52 = vmul.f32 0.0078125, %v3065_v2  ;;  %v3048_v30 = vmul.f32 %v12907_v23, %v12907_v23  ;;  %v12919_v14 = vld [vmem:[%s14829_s7] ss:$0 sm:$0xff] }
 0x762   : > { %v3067_v59 = vpop.xlane.xlu1 %3066 }
 0x763   : > { %v3158_v44 = vadd.f32 1e-05, %v3126_v52  ;;  %v3127_v42 = vmul.f32 0.0078125, %v3067_v59  ;;  %3100 = vadd.xlane.f32.xlu0 %v3048_v30  ;;  %v3049_v20 = vmul.f32 %v12910_v31, %v12910_v31 }
 0x764   : > { %v2945_v34 = vpop.xlane.xlu0 %2944 }
 0x765   : > { %11169 = vrsqrt.f32 %v3158_v44  ;;  %v3159_v61 = vadd.f32 1e-05, %v3127_v42  ;;  %v2986_v18 = vmul.f32 0.0078125, %v2945_v34  ;;  %3102 = vadd.xlane.f32.xlu1 %v3049_v20 }
 0x766   : > { %v2947_v10 = vpop.xlane.xlu1 %2946 }
 0x767   : > { %v11166_v40 = vpop.eup %11165  ;;  %11171 = vrsqrt.f32 %v3159_v61  ;;  %v12922_v52 = vsub.f32 %v12707_v63, %v2986_v18  ;;  %v2987_v59 = vmul.f32 0.0078125, %v2947_v10  ;;  %v12937_v10 = vld [vmem:[%s14830_s8] ss:$0 sm:$0xff] }
 0x768   : > { %v3220_v30 = vmul.f32 %v11166_v40, %v12651_v27  ;;  %v3069_v2 = vpop.xlane.xlu0 %3068 }
 0x769   : > { %v11168_v6 = vpop.eup %11167  ;;  %v12926_v44 = vsub.f32 %v12714_v9, %v2987_v59  ;;  %v3128_v42 = vmul.f32 0.0078125, %v3069_v2  ;;  %v3050_v20 = vmul.f32 %v12922_v52, %v12922_v52 }
 0x76a   : > { %v3258_v34 = vmul.f32 %v12919_v14, %v3220_v30  ;;  %v3221_v51 = vmul.f32 %v11168_v6, %v12655_v33  ;;  %v3071_v61 = vpop.xlane.xlu1 %3070 }
 0x76b   : > { %v3160_v13 = vadd.f32 1e-05, %v3128_v42  ;;  %v3129_v18 = vmul.f32 0.0078125, %v3071_v61  ;;  %3104 = vadd.xlane.f32.xlu0 %v3050_v20  ;;  %v3051_v27 = vmul.f32 %v12926_v44, %v12926_v44 }
 0x76c   : > { %v3259_v40 = vmul.f32 %v12919_v14, %v3221_v51  ;;  %v2949_v59 = vpop.xlane.xlu0 %2948  ;;  %v3296_v6 = vadd.f32 %v12937_v10, %v3258_v34 }
 0x76d   : > { %11173 = vrsqrt.f32 %v3160_v13  ;;  %v3161_v2 = vadd.f32 1e-05, %v3129_v18  ;;  %v2988_v30 = vmul.f32 0.0078125, %v2949_v59  ;;  %3106 = vadd.xlane.f32.xlu1 %v3051_v27  ;;  %v10942_v13 = vld [vmem:[%s14833_s11] sm:$0xff]  }
 0x76e   : > { %v2951_v33 = vpop.xlane.xlu1 %2950  ;;  %v3297_v42 = vadd.f32 %v12937_v10, %v3259_v40  ;;  %v10944_v59 = vld [vmem:[%s14833_s11 + $0x80] sm:$0xff]  }
 0x76f   : > { %v11170_v20 = vpop.eup %11169  ;;  %11175 = vrsqrt.f32 %v3161_v2  ;;  %v12943_v61 = vsub.f32 %v12736_v48, %v2988_v30  ;;  %v2989_v9 = vmul.f32 0.0078125, %v2951_v33 }
 0x770   : > { %v3073_v63 = vpop.xlane.xlu0 %3072  ;;  %v3328_v26 = vpack.c.bf16 %v3297_v42, %v3296_v6  ;;  %v3222_v51 = vmul.f32 %v11170_v20, %v12681_v36 }
 0x771   : > { %v11172_v18 = vpop.eup %11171  ;;  %v12950_v27 = vsub.f32 %v12755_v25, %v2989_v9  ;;  %v3130_v34 = vmul.f32 0.0078125, %v3073_v63  ;;  %v3052_v40 = vmul.f32 %v12943_v61, %v12943_v61 }
 0x772   : > { %3591 = vmatmul.mubr.bf16.vlgmr.msra.gmra.mrb[88].mxu1 %v3328_v26  ;;  %v3075_v2 = vpop.xlane.xlu1 %3074  ;;  %3784 = vmatmul.mubr.bf16.vlgmr.msra.gmra.mrb[104].mxu0 %v3328_v26  ;;  %v3223_v36 = vmul.f32 %v11172_v18, %v12690_v1  ;;  %v3260_v30 = vmul.f32 %v12919_v14, %v3222_v51  ;;  %v10945_v1 = vld [vmem:[%s14833_s11 + $0x48] sm:$0xff]  }
 0x773   : > { %v3162_v33 = vadd.f32 1e-05, %v3130_v34  ;;  %v3131_v6 = vmul.f32 0.0078125, %v3075_v2  ;;  %3108 = vadd.xlane.f32.xlu0 %v3052_v40  ;;  %v3053_v63 = vmul.f32 %v12950_v27, %v12950_v27  ;;  %3600 = vmatprep.mubr.bf16.mxu1 %v14921_v37  ;;  %v10946_v51 = vld [vmem:[%s14833_s11 + $0x8] sm:$0xff]  }
 0x774   : > { %v2953_v9 = vpop.xlane.xlu0 %2952  ;;  %3793 = vmatprep.mubr.bf16.mxu0 %v14921_v37  ;;  %v3261_v42 = vmul.f32 %v12919_v14, %v3223_v36  ;;  %10332 = vmatpush3.bf16.msra.mxu1 %v10942_v13  ;;  %v3298_v34 = vadd.f32 %v12937_v10, %v3260_v30  ;;  %v10948_v30 = vld [vmem:[%s14833_s11 + $0x88] sm:$0xff]  }
 0x775   : > { %11177 = vrsqrt.f32 %v3162_v33  ;;  %v3163_v26 = vadd.f32 1e-05, %v3131_v6  ;;  %v2990_v20 = vmul.f32 0.0078125, %v2953_v9  ;;  %3110 = vadd.xlane.f32.xlu1 %v3053_v63  ;;  %10444 = vmatpush3.bf16.msra.mxu0 %v10944_v59  ;;  %v10947_v59 = vld [vmem:[%s14833_s11 + $0xc8] sm:$0xff]  }
 0x776   : > { %v2955_v18 = vpop.xlane.xlu1 %2954  ;;  %v3299_v40 = vadd.f32 %v12937_v10, %v3261_v42  ;;  %10333 = vmatprep.subr.bf16.mxu1 %v10945_v1  ;;  %10445 = vmatprep.subr.bf16.mxu0 %v10947_v59 }
 0x777   : > { %v11174_v2 = vpop.eup %11173  ;;  %11179 = vrsqrt.f32 %v3163_v26  ;;  %v12973_v13 = vsub.f32 %v12777_v56, %v2990_v20  ;;  %v2991_v36 = vmul.f32 0.0078125, %v2955_v18 }
 0x778   : > { %v3077_v33 = vpop.xlane.xlu0 %3076  ;;  %v3329_v6 = vpack.c.bf16 %v3299_v40, %v3298_v34  ;;  %v3224_v63 = vmul.f32 %v11174_v2, %v12710_v60  ;;  %10334 = vmatpush3.bf16.msra.mxu1 %v10946_v51 }
 0x779   : > { %v11176_v9 = vpop.eup %11175  ;;  %v12983_v42 = vsub.f32 %v12796_v41, %v2991_v36  ;;  %v3132_v26 = vmul.f32 0.0078125, %v3077_v33  ;;  %v3054_v20 = vmul.f32 %v12973_v13, %v12973_v13  ;;  %10446 = vmatpush3.bf16.msra.mxu0 %v10948_v30 }
 0x77a   : > { %3601 = vmatmul.mubr.bf16.gmra.mrb[92].mxu1 %v3329_v6  ;;  %v3079_v1 = vpop.xlane.xlu1 %3078  ;;  %3794 = vmatmul.mubr.bf16.gmra.mrb[108].mxu0 %v3329_v6  ;;  %v3225_v18 = vmul.f32 %v11176_v9, %v12717_v53  ;;  %v3262_v60 = vmul.f32 %v12919_v14, %v3224_v63 }
 0x77b   : > { %v3164_v51 = vadd.f32 1e-05, %v3132_v26  ;;  %v3133_v34 = vmul.f32 0.0078125, %v3079_v1  ;;  %3112 = vadd.xlane.f32.xlu0 %v3054_v20  ;;  %v3055_v40 = vmul.f32 %v12983_v42, %v12983_v42  ;;  %3610 = vmatprep.mubr.bf16.mxu1 %v14921_v37 }
 0x77c   : > { %v2957_v2 = vpop.xlane.xlu0 %2956  ;;  %3803 = vmatprep.mubr.bf16.mxu0 %v14921_v37  ;;  %v3263_v36 = vmul.f32 %v12919_v14, %v3225_v18  ;;  %v3300_v6 = vadd.f32 %v12937_v10, %v3262_v60 }
 0x77d   : > { %11181 = vrsqrt.f32 %v3164_v51  ;;  %v3165_v59 = vadd.f32 1e-05, %v3133_v34  ;;  %v2992_v33 = vmul.f32 0.0078125, %v2957_v2  ;;  %3114 = vadd.xlane.f32.xlu1 %v3055_v40 }
 0x77e   : > { %v2959_v53 = vpop.xlane.xlu1 %2958  ;;  %v3301_v63 = vadd.f32 %v12937_v10, %v3263_v36 }
 0x77f   : > { %v11178_v9 = vpop.eup %11177  ;;  %11183 = vrsqrt.f32 %v3165_v59  ;;  %v12997_v26 = vsub.f32 %v12824_v16, %v2992_v33  ;;  %v2993_v20 = vmul.f32 0.0078125, %v2959_v53 }
 0x780   : > { %v3081_v1 = vpop.xlane.xlu0 %3080  ;;  %v3330_v41 = vpack.c.bf16 %v3301_v63, %v3300_v6  ;;  %v3226_v18 = vmul.f32 %v11178_v9, %v12733_v54  ;;  %v10950_v9 = vld [vmem:[%s14833_s11 + $0x10] sm:$0xff]  }
 0x781   : > { %v11180_v30 = vpop.eup %11179  ;;  %v13001_v51 = vsub.f32 %v12843_v12, %v2993_v20  ;;  %v3134_v34 = vmul.f32 0.0078125, %v3081_v1  ;;  %v3056_v60 = vmul.f32 %v12997_v26, %v12997_v26 }
 0x782   : > { %3611 = vmatmul.mubr.bf16.gmra.mrb[96].mxu1 %v3330_v41  ;;  %3804 = vmatmul.mubr.bf16.gmra.mrb[112].mxu0 %v3330_v41  ;;  %v3083_v40 = vpop.xlane.xlu1 %3082  ;;  %v3227_v2 = vmul.f32 %v11180_v30, %v12751_v57  ;;  %v3264_v36 = vmul.f32 %v12919_v14, %v3226_v18  ;;  %v10949_v57 = vld [vmem:[%s14833_s11 + $0x50] sm:$0xff]  }
 0x783   : > { %v3166_v59 = vadd.f32 1e-05, %v3134_v34  ;;  %v3135_v33 = vmul.f32 0.0078125, %v3083_v40  ;;  %3116 = vadd.xlane.f32.xlu0 %v3056_v60  ;;  %v3057_v54 = vmul.f32 %v13001_v51, %v13001_v51  ;;  %3620 = vmatprep.mubr.bf16.mxu1 %v14921_v37  ;;  %v10951_v40 = vld [vmem:[%s14833_s11 + $0xd0] sm:$0xff]  }
 0x784   : > { %v2961_v53 = vpop.xlane.xlu0 %2960  ;;  %3813 = vmatprep.mubr.bf16.mxu0 %v14921_v37  ;;  %v3265_v6 = vmul.f32 %v12919_v14, %v3227_v2  ;;  %v3302_v1 = vadd.f32 %v12937_v10, %v3264_v36  ;;  %10335 = vmatprep.subr.bf16.mxu1 %v10949_v57  ;;  %v10952_v36 = vld [vmem:[%s14833_s11 + $0x90] sm:$0xff]  }
 0x785   : > { %11185 = vrsqrt.f32 %v3166_v59  ;;  %v3167_v41 = vadd.f32 1e-05, %v3135_v33  ;;  %v2994_v63 = vmul.f32 0.0078125, %v2961_v53  ;;  %3118 = vadd.xlane.f32.xlu1 %v3057_v54  ;;  %10336 = vmatpush3.bf16.msra.mxu1 %v10950_v9 }
 0x786   : > { %v2963_v20 = vpop.xlane.xlu1 %2962  ;;  %v3303_v18 = vadd.f32 %v12937_v10, %v3265_v6  ;;  %10447 = vmatprep.subr.bf16.mxu0 %v10951_v40 }
 0x787   : > { %v11182_v30 = vpop.eup %11181  ;;  %11187 = vrsqrt.f32 %v3167_v41  ;;  %v13021_v34 = vsub.f32 %v12856_v3, %v2994_v63  ;;  %v2995_v60 = vmul.f32 0.0078125, %v2963_v20  ;;  %10448 = vmatpush3.bf16.msra.mxu0 %v10952_v36 }
 0x788   : > { %v3085_v2 = vpop.xlane.xlu0 %3084  ;;  %v3331_v59 = vpack.c.bf16 %v3303_v18, %v3302_v1  ;;  %v3228_v33 = vmul.f32 %v11182_v30, %v12792_v55 }
 0x789   : > { %v11184_v54 = vpop.eup %11183  ;;  %v13031_v53 = vsub.f32 %v12863_v49, %v2995_v60  ;;  %v3136_v6 = vmul.f32 0.0078125, %v3085_v2  ;;  %v3058_v41 = vmul.f32 %v13021_v34, %v13021_v34 }
 0x78a   : > { %3621 = vmatmul.mubr.bf16.gmra.mrb[100].mxu1 %v3331_v59  ;;  %3814 = vmatmul.mubr.bf16.gmra.mrb[116].mxu0 %v3331_v59  ;;  %v3087_v63 = vpop.xlane.xlu1 %3086  ;;  %v3229_v57 = vmul.f32 %v11184_v54, %v12799_v45  ;;  %v3266_v55 = vmul.f32 %v12919_v14, %v3228_v33 }
 0x78b   : > { %v3168_v9 = vadd.f32 1e-05, %v3136_v6  ;;  %v3137_v20 = vmul.f32 0.0078125, %v3087_v63  ;;  %3120 = vadd.xlane.f32.xlu0 %v3058_v41  ;;  %v3059_v1 = vmul.f32 %v13031_v53, %v13031_v53  ;;  %3630 = vmatprep.mubr.bf16.mxu1 %v14921_v37 }
 0x78c   : > { %v3089_v18 = vpop.xlane.xlu0 %3088  ;;  %3823 = vmatprep.mubr.bf16.mxu0 %v14921_v37  ;;  %v3267_v30 = vmul.f32 %v12919_v14, %v3229_v57  ;;  %v3304_v2 = vadd.f32 %v12937_v10, %v3266_v55 }
 0x78d   : > { %11189 = vrsqrt.f32 %v3168_v9  ;;  %v3169_v60 = vadd.f32 1e-05, %v3137_v20  ;;  %v3138_v40 = vmul.f32 0.0078125, %v3089_v18  ;;  %3122 = vadd.xlane.f32.xlu1 %v3059_v1  ;;  %v10954_v20 = vld [vmem:[%s14833_s11 + $0x18] sm:$0xff]  }
 0x78e   : > { %v3091_v45 = vpop.xlane.xlu1 %3090  ;;  %v3305_v59 = vadd.f32 %v12937_v10, %v3267_v30  ;;  %v10955_v18 = vld [vmem:[%s14833_s11 + $0xd8] sm:$0xff]  }
 0x78f   : > { %v11186_v33 = vpop.eup %11185  ;;  %11191 = vrsqrt.f32 %v3169_v60  ;;  %v3170_v54 = vadd.f32 1e-05, %v3138_v40  ;;  %v3139_v6 = vmul.f32 0.0078125, %v3091_v45  ;;  %v10956_v40 = vld [vmem:[%s14833_s11 + $0x98] sm:$0xff]   ;;  %10449 = vmatprep.subr.bf16.mxu0 %v10955_v18  ;;  %v10962_v18 = vld [vmem:[%s14833_s11 + $0x28] sm:$0xff]  }
 0x790   : > { %v3332_v41 = vpack.c.bf16 %v3305_v59, %v3304_v2  ;;  %v3230_v63 = vmul.f32 %v11186_v33, %v12821_v21  ;;  %v10953_v21 = vld [vmem:[%s14833_s11 + $0x58] sm:$0xff]   ;;  %10450 = vmatpush3.bf16.msra.mxu0 %v10956_v40  ;;  %v10965_v40 = vld [vmem:[%s14833_s11 + $0x70] sm:$0xff]  }
 0x791   : > { %v11188_v49 = vpop.eup %11187  ;;  %11193 = vrsqrt.f32 %v3170_v54  ;;  %v3171_v57 = vadd.f32 1e-05, %v3139_v6  ;;  %10337 = vmatprep.subr.bf16.mxu1 %v10953_v21  ;;  %v10958_v21 = vld [vmem:[%s14833_s11 + $0x20] sm:$0xff]  }
 0x792   : > { %3631 = vmatmul.mubr.bf16.gmra.mrb[104].mxu1 %v3332_v41  ;;  %3824 = vmatmul.mubr.bf16.gmra.mrb[120].mxu0 %v3332_v41  ;;  %v3231_v36 = vmul.f32 %v11188_v49, %v12839_v17  ;;  %v3268_v9 = vmul.f32 %v12919_v14, %v3230_v63 }
 0x793   : > { %11195 = vrsqrt.f32 %v3171_v57  ;;  %3640 = vmatprep.mubr.bf16.mxu1 %v14921_v37  ;;  %3833 = vmatprep.mubr.bf16.mxu0 %v14921_v37 }
 0x794   : > { %v3269_v55 = vmul.f32 %v12919_v14, %v3231_v36  ;;  %v3306_v1 = vadd.f32 %v12937_v10, %v3268_v9  ;;  %10338 = vmatpush3.bf16.msra.mxu1 %v10954_v20 }
 0x796   : > { %v3307_v17 = vadd.f32 %v12937_v10, %v3269_v55 }
 0x797   : > { %v11190_v49 = vpop.eup %11189 }
 0x798   : > { %v3333_v30 = vpack.c.bf16 %v3307_v17, %v3306_v1  ;;  %v3232_v60 = vmul.f32 %v11190_v49, %v12853_v43  ;;  %v10961_v49 = vld [vmem:[%s14833_s11 + $0x68] sm:$0xff]  }
 0x799   : > { %v11192_v45 = vpop.eup %11191 }
 0x79a   : > { %3641 = vmatmul.mubr.bf16.gmra.mrb[108].mxu1 %v3333_v30  ;;  %3834 = vmatmul.mubr.bf16.gmra.mrb[124].mxu0 %v3333_v30  ;;  %v3233_v2 = vmul.f32 %v11192_v45, %v12859_v35  ;;  %v3270_v59 = vmul.f32 %v12919_v14, %v3232_v60  ;;  %v10957_v35 = vld [vmem:[%s14833_s11 + $0x60] sm:$0xff]   ;;  %v10963_v30 = vld [vmem:[%s14833_s11 + $0xe8] sm:$0xff]   ;;  %v10967_v45 = vld [vmem:[%s14833_s11 + $0xf0] sm:$0xff]  }
 0x79b   : > { %v11194_v33 = vpop.eup %11193  ;;  %3650 = vmatprep.mubr.bf16.mxu1 %v14921_v37  ;;  %3843 = vmatprep.mubr.bf16.mxu0 %v14921_v37  ;;  %v10964_v60 = vld [vmem:[%s14833_s11 + $0xa8] sm:$0xff]  }
 0x79c   : > { %v3271_v43 = vmul.f32 %v12919_v14, %v3233_v2  ;;  %v3308_v6 = vadd.f32 %v12937_v10, %v3270_v59  ;;  %v3234_v63 = vmul.f32 %v11194_v33, %v12866_v15  ;;  %10339 = vmatprep.subr.bf16.mxu1 %v10957_v35  ;;  %v10959_v15 = vld [vmem:[%s14833_s11 + $0xe0] sm:$0xff]   ;;  %v10966_v2 = vld [vmem:[%s14833_s11 + $0x30] sm:$0xff]   ;;  %v10969_v33 = vld [vmem:[%s14833_s11 + $0x78] sm:$0xff]  }
 0x79d   : > { %v11196_v54 = vpop.eup %11195  ;;  %10340 = vmatpush3.bf16.msra.mxu1 %v10958_v21  ;;  %10451 = vmatprep.subr.bf16.mxu0 %v10959_v15  ;;  %v10968_v59 = vld [vmem:[%s14833_s11 + $0xb0] sm:$0xff]  }
 0x79e   : > { %v3309_v41 = vadd.f32 %v12937_v10, %v3271_v43  ;;  %v3235_v57 = vmul.f32 %v11196_v54, %v12872_v29  ;;  %v3272_v55 = vmul.f32 %v12919_v14, %v3234_v63  ;;  %v10960_v29 = vld [vmem:[%s14833_s11 + $0xa0] sm:$0xff]   ;;  %10341 = vmatprep.subr.bf16.mxu1 %v10961_v49  ;;  %v10970_v43 = vld [vmem:[%s14833_s11 + $0xf8] sm:$0xff]  }
 0x79f   : > { %10452 = vmatpush3.bf16.msra.mxu0 %v10960_v29  ;;  %v10971_v54 = vld [vmem:[%s14833_s11 + $0x38] sm:$0xff]  }
 0x7a0   : > { %v3334_v36 = vpack.c.bf16 %v3309_v41, %v3308_v6  ;;  %v3273_v9 = vmul.f32 %v12919_v14, %v3235_v57  ;;  %v3310_v1 = vadd.f32 %v12937_v10, %v3272_v55  ;;  %10453 = vmatprep.subr.bf16.mxu0 %v10963_v30  ;;  %v10972_v6 = vld [vmem:[%s14833_s11 + $0xb8] sm:$0xff]  }
 0x7a1   : > { %10342 = vmatpush3.bf16.msra.mxu1 %v10962_v18 }
 0x7a2   : > { %3651 = vmatmul.mubr.bf16.gmra.mrb[112].mxu1 %v3334_v36  ;;  %3844 = vmatmul.mubr.bf16.gmra.mrb[128].mxu0 %v3334_v36  ;;  %v3311_v20 = vadd.f32 %v12937_v10, %v3273_v9 }
 0x7a3   : > { %3660 = vmatprep.mubr.bf16.mxu1 %v14921_v37  ;;  %3853 = vmatprep.mubr.bf16.mxu0 %v14921_v37 }
 0x7a4   : > { %v3335_v17 = vpack.c.bf16 %v3311_v20, %v3310_v1  ;;  %10454 = vmatpush3.bf16.msra.mxu0 %v10964_v60  ;;  %10343 = vmatprep.subr.bf16.mxu1 %v10965_v40 }
 0x7a5   : > { %10455 = vmatprep.subr.bf16.mxu0 %v10967_v45  ;;  %10344 = vmatpush3.bf16.msra.mxu1 %v10966_v2 }
 0x7a6   : > { %10345 = vmatprep.subr.bf16.mxu1 %v10969_v33 }
 0x7a8   : > { %10456 = vmatpush3.bf16.msra.mxu0 %v10968_v59 }
 0x7a9   : > { %10457 = vmatprep.subr.bf16.mxu0 %v10970_v43  ;;  %10346 = vmatpush3.bf16.msra.mxu1 %v10971_v54 }
 0x7aa   : > { %3661 = vmatmul.mubr.bf16.gmra.mrb[116].mxu1 %v3335_v17  ;;  %3854 = vmatmul.mubr.bf16.gmra.mrb[132].mxu0 %v3335_v17 }
 0x7ab   : > { %3670 = vmatprep.mubr.bf16.mxu1 %v14921_v37  ;;  %3863 = vmatprep.mubr.bf16.mxu0 %v14921_v37 }
 0x7ac   : > { %10458 = vmatpush3.bf16.msra.mxu0 %v10972_v6 }
 0x7d1   : > { %v3093_v41 = vpop.xlane.xlu0 %3092 }
 0x7d2   : > { %v3140_v63 = vmul.f32 0.0078125, %v3093_v41 }
 0x7d3   : > { %v3095_v57 = vpop.xlane.xlu1 %3094 }
 0x7d4   : > { %v3172_v35 = vadd.f32 1e-05, %v3140_v63  ;;  %v3141_v36 = vmul.f32 0.0078125, %v3095_v57 }
 0x7d5   : > { %v3097_v9 = vpop.xlane.xlu0 %3096 }
 0x7d6   : > { %11197 = vrsqrt.f32 %v3172_v35  ;;  %v3173_v55 = vadd.f32 1e-05, %v3141_v36  ;;  %v3142_v21 = vmul.f32 0.0078125, %v3097_v9 }
 0x7d7   : > { %v3099_v15 = vpop.xlane.xlu1 %3098 }
 0x7d8   : > { %11199 = vrsqrt.f32 %v3173_v55  ;;  %v3174_v29 = vadd.f32 1e-05, %v3142_v21  ;;  %v3143_v20 = vmul.f32 0.0078125, %v3099_v15 }
 0x7da   : > { %11201 = vrsqrt.f32 %v3174_v29  ;;  %v3175_v1 = vadd.f32 1e-05, %v3143_v20 }
 0x7dc   : > { %11203 = vrsqrt.f32 %v3175_v1 }
 0x7e0   : > { %v11198_v17 = vpop.eup %11197 }
 0x7e1   : > { %v3236_v49 = vmul.f32 %v11198_v17, %v12881_v7 }
 0x7e2   : > { %v11200_v18 = vpop.eup %11199 }
 0x7e3   : > { %v3237_v30 = vmul.f32 %v11200_v18, %v12884_v62  ;;  %v3274_v60 = vmul.f32 %v12919_v14, %v3236_v49 }
 0x7e4   : > { %v11202_v40 = vpop.eup %11201 }
 0x7e5   : > { %v3275_v45 = vmul.f32 %v12919_v14, %v3237_v30  ;;  %v3312_v59 = vadd.f32 %v12937_v10, %v3274_v60  ;;  %v3238_v43 = vmul.f32 %v11202_v40, %v12889_v47 }
 0x7e6   : > { %v11204_v2 = vpop.eup %11203 }
 0x7e7   : > { %v3313_v33 = vadd.f32 %v12937_v10, %v3275_v45  ;;  %v3239_v54 = vmul.f32 %v11204_v2, %v12894_v19  ;;  %v3276_v62 = vmul.f32 %v12919_v14, %v3238_v43 }
 0x7e9   : > { %v3336_v6 = vpack.c.bf16 %v3313_v33, %v3312_v59  ;;  %v3277_v7 = vmul.f32 %v12919_v14, %v3239_v54  ;;  %v3314_v63 = vadd.f32 %v12937_v10, %v3276_v62 }
 0x7eb   : > { %3671 = vmatmul.mubr.bf16.gmra.mrb[120].mxu1 %v3336_v6  ;;  %3864 = vmatmul.mubr.bf16.gmra.mrb[136].mxu0 %v3336_v6  ;;  %v3315_v41 = vadd.f32 %v12937_v10, %v3277_v7 }
 0x7ec   : > { %3680 = vmatprep.mubr.bf16.mxu1 %v14921_v37  ;;  %3873 = vmatprep.mubr.bf16.mxu0 %v14921_v37 }
 0x7ed   : > { %v3337_v47 = vpack.c.bf16 %v3315_v41, %v3314_v63 }
 0x7f0   : > { %v3101_v57 = vpop.xlane.xlu0 %3100 }
 0x7f1   : > { %v3144_v35 = vmul.f32 0.0078125, %v3101_v57 }
 0x7f2   : > { %v3103_v36 = vpop.xlane.xlu1 %3102 }
 0x7f3   : > { %v3176_v19 = vadd.f32 1e-05, %v3144_v35  ;;  %v3145_v9 = vmul.f32 0.0078125, %v3103_v36  ;;  %3681 = vmatmul.mubr.bf16.gmra.mrb[124].mxu1 %v3337_v47  ;;  %3874 = vmatmul.mubr.bf16.gmra.mrb[140].mxu0 %v3337_v47 }
 0x7f4   : > { %3690 = vmatprep.mubr.bf16.mxu1 %v14921_v37  ;;  %3883 = vmatprep.mubr.bf16.mxu0 %v14921_v37 }
 0x7f5   : > { %11205 = vrsqrt.f32 %v3176_v19  ;;  %v3177_v55 = vadd.f32 1e-05, %v3145_v9 }
 0x7f7   : > { %11207 = vrsqrt.f32 %v3177_v55 }
 0x7f8   : > { %v3105_v21 = vpop.xlane.xlu0 %3104 }
 0x7f9   : > { %v3146_v15 = vmul.f32 0.0078125, %v3105_v21 }
 0x7fa   : > { %v3107_v29 = vpop.xlane.xlu1 %3106 }
 0x7fb   : > { %v3178_v20 = vadd.f32 1e-05, %v3146_v15  ;;  %v3147_v1 = vmul.f32 0.0078125, %v3107_v29 }
 0x7fd   : > { %11209 = vrsqrt.f32 %v3178_v20  ;;  %v3179_v17 = vadd.f32 1e-05, %v3147_v1 }
 0x7ff   : > { %v11206_v49 = vpop.eup %11205  ;;  %11211 = vrsqrt.f32 %v3179_v17 }
 0x800   : > { %v3109_v18 = vpop.xlane.xlu0 %3108  ;;  %v3240_v30 = vmul.f32 %v11206_v49, %v12907_v23 }
 0x801   : > { %v11208_v60 = vpop.eup %11207  ;;  %v3148_v40 = vmul.f32 0.0078125, %v3109_v18 }
 0x802   : > { %v3111_v45 = vpop.xlane.xlu1 %3110  ;;  %v3241_v2 = vmul.f32 %v11208_v60, %v12910_v31  ;;  %v3278_v59 = vmul.f32 %v12919_v14, %v3240_v30 }
 0x803   : > { %v3180_v33 = vadd.f32 1e-05, %v3148_v40  ;;  %v3149_v43 = vmul.f32 0.0078125, %v3111_v45 }
 0x804   : > { %v3279_v54 = vmul.f32 %v12919_v14, %v3241_v2  ;;  %v3316_v7 = vadd.f32 %v12937_v10, %v3278_v59 }
 0x805   : > { %11213 = vrsqrt.f32 %v3180_v33  ;;  %v3181_v6 = vadd.f32 1e-05, %v3149_v43 }
 0x806   : > { %v3317_v62 = vadd.f32 %v12937_v10, %v3279_v54 }
 0x807   : > { %v11210_v41 = vpop.eup %11209  ;;  %11215 = vrsqrt.f32 %v3181_v6 }
 0x808   : > { %v3113_v23 = vpop.xlane.xlu0 %3112  ;;  %v3338_v63 = vpack.c.bf16 %v3317_v62, %v3316_v7  ;;  %v3242_v57 = vmul.f32 %v11210_v41, %v12922_v52 }
 0x809   : > { %v11212_v35 = vpop.eup %11211  ;;  %v3150_v31 = vmul.f32 0.0078125, %v3113_v23 }
 0x80a   : > { %v3115_v47 = vpop.xlane.xlu1 %3114  ;;  %3691 = vmatmul.mubr.bf16.gmra.mrb[128].mxu1 %v3338_v63  ;;  %3884 = vmatmul.mubr.bf16.gmra.mrb[144].mxu0 %v3338_v63  ;;  %v3243_v36 = vmul.f32 %v11212_v35, %v12926_v44  ;;  %v3280_v19 = vmul.f32 %v12919_v14, %v3242_v57 }
 0x80b   : > { %v3182_v9 = vadd.f32 1e-05, %v3150_v31  ;;  %v3151_v55 = vmul.f32 0.0078125, %v3115_v47  ;;  %3700 = vmatprep.mubr.bf16.mxu1 %v14921_v37  ;;  %3893 = vmatprep.mubr.bf16.mxu0 %v14921_v37 }
 0x80c   : > { %v3281_v21 = vmul.f32 %v12919_v14, %v3243_v36  ;;  %v3318_v52 = vadd.f32 %v12937_v10, %v3280_v19 }
 0x80d   : > { %11217 = vrsqrt.f32 %v3182_v9  ;;  %v3183_v15 = vadd.f32 1e-05, %v3151_v55 }
 0x80e   : > { %v3319_v29 = vadd.f32 %v12937_v10, %v3281_v21 }
 0x80f   : > { %v11214_v20 = vpop.eup %11213  ;;  %11219 = vrsqrt.f32 %v3183_v15 }
 0x810   : > { %v3117_v1 = vpop.xlane.xlu0 %3116  ;;  %v3339_v44 = vpack.c.bf16 %v3319_v29, %v3318_v52  ;;  %v3244_v17 = vmul.f32 %v11214_v20, %v12943_v61 }
 0x811   : > { %v11216_v49 = vpop.eup %11215  ;;  %v3152_v18 = vmul.f32 0.0078125, %v3117_v1 }
 0x812   : > { %v3119_v30 = vpop.xlane.xlu1 %3118  ;;  %3701 = vmatmul.mubr.bf16.gmra.mrb[132].mxu1 %v3339_v44  ;;  %3894 = vmatmul.mubr.bf16.gmra.mrb[148].mxu0 %v3339_v44  ;;  %v3245_v60 = vmul.f32 %v11216_v49, %v12950_v27  ;;  %v3282_v40 = vmul.f32 %v12919_v14, %v3244_v17 }
 0x813   : > { %v3184_v45 = vadd.f32 1e-05, %v3152_v18  ;;  %v3153_v2 = vmul.f32 0.0078125, %v3119_v30  ;;  %3710 = vmatprep.mubr.bf16.mxu1 %v14921_v37  ;;  %3903 = vmatprep.mubr.bf16.mxu0 %v14921_v37 }
 0x814   : > { %v3283_v59 = vmul.f32 %v12919_v14, %v3245_v60  ;;  %v3320_v61 = vadd.f32 %v12937_v10, %v3282_v40 }
 0x815   : > { %11221 = vrsqrt.f32 %v3184_v45  ;;  %v3185_v33 = vadd.f32 1e-05, %v3153_v2 }
 0x816   : > { %v3321_v43 = vadd.f32 %v12937_v10, %v3283_v59 }
 0x817   : > { %v11218_v54 = vpop.eup %11217  ;;  %11223 = vrsqrt.f32 %v3185_v33 }
 0x818   : > { %v3121_v6 = vpop.xlane.xlu0 %3120  ;;  %v3340_v27 = vpack.c.bf16 %v3321_v43, %v3320_v61  ;;  %v3246_v7 = vmul.f32 %v11218_v54, %v12973_v13 }
 0x819   : > { %v11220_v62 = vpop.eup %11219  ;;  %v3154_v41 = vmul.f32 0.0078125, %v3121_v6 }
 0x81a   : > { %v3123_v23 = vpop.xlane.xlu1 %3122  ;;  %3711 = vmatmul.mubr.bf16.gmra.mrb[136].mxu1 %v3340_v27  ;;  %3904 = vmatmul.mubr.bf16.gmra.mrb[152].mxu0 %v3340_v27  ;;  %v3247_v63 = vmul.f32 %v11220_v62, %v12983_v42  ;;  %v3284_v57 = vmul.f32 %v12919_v14, %v3246_v7 }
 0x81b   : > { %v3186_v35 = vadd.f32 1e-05, %v3154_v41  ;;  %v3155_v31 = vmul.f32 0.0078125, %v3123_v23  ;;  %3720 = vmatprep.mubr.bf16.mxu1 %v14921_v37  ;;  %3913 = vmatprep.mubr.bf16.mxu0 %v14921_v37 }
 0x81c   : > { %v3285_v47 = vmul.f32 %v12919_v14, %v3247_v63  ;;  %v3322_v13 = vadd.f32 %v12937_v10, %v3284_v57 }
 0x81d   : > { %11225 = vrsqrt.f32 %v3186_v35  ;;  %v3187_v36 = vadd.f32 1e-05, %v3155_v31 }
 0x81e   : > { %v3323_v19 = vadd.f32 %v12937_v10, %v3285_v47 }
 0x81f   : > { %v11222_v9 = vpop.eup %11221  ;;  %11227 = vrsqrt.f32 %v3187_v36 }
 0x820   : > { %v3341_v55 = vpack.c.bf16 %v3323_v19, %v3322_v13  ;;  %v3248_v42 = vmul.f32 %v11222_v9, %v12997_v26 }
 0x821   : > { %v11224_v21 = vpop.eup %11223 }
 0x822   : > { %3721 = vmatmul.mubr.bf16.gmra.mrb[140].mxu1 %v3341_v55  ;;  %3914 = vmatmul.mubr.bf16.gmra.mrb[156].mxu0 %v3341_v55  ;;  %v3249_v15 = vmul.f32 %v11224_v21, %v13001_v51  ;;  %v3286_v52 = vmul.f32 %v12919_v14, %v3248_v42 }
 0x823   : > { %3730 = vmatprep.mubr.bf16.mxu1 %v14921_v37  ;;  %3923 = vmatprep.mubr.bf16.mxu0 %v14921_v37 }
 0x824   : > { %v3287_v29 = vmul.f32 %v12919_v14, %v3249_v15  ;;  %v3324_v20 = vadd.f32 %v12937_v10, %v3286_v52 }
 0x826   : > { %v3325_v1 = vadd.f32 %v12937_v10, %v3287_v29 }
 0x827   : > { %v11226_v44 = vpop.eup %11225 }
 0x828   : > { %v3342_v17 = vpack.c.bf16 %v3325_v1, %v3324_v20  ;;  %v3250_v26 = vmul.f32 %v11226_v44, %v13021_v34  ;;  %v3378_v34 = vlaneseq }
 0x829   : > { %v11228_v49 = vpop.eup %11227 }
 0x82a   : > { %3731 = vmatmul.mubr.bf16.gmra.mrb[144].mxu1 %v3342_v17  ;;  %3924 = vmatmul.mubr.bf16.gmra.mrb[160].mxu0 %v3342_v17  ;;  %v3251_v51 = vmul.f32 %v11228_v49, %v13031_v53  ;;  %v3288_v18 = vmul.f32 %v12919_v14, %v3250_v26  ;;  %v3379_v2 = vshrl.u32 %v3378_v34, 7  ;;  %v3376_v53 = vld [vmem:[%s14832_s10] sm:$0xf] }
 0x82b   : > { %3740 = vmatprep.mubr.bf16.mxu1 %v14921_v37  ;;  %3933 = vmatprep.mubr.bf16.mxu0 %v14921_v37 }
 0x82c   : > { %v3289_v30 = vmul.f32 %v12919_v14, %v3251_v51  ;;  %v3326_v60 = vadd.f32 %v12937_v10, %v3288_v18  ;;  %v3380_v59 = vsub.s32 0, %v3379_v2  ;;  %v3388_v33 = vsub.s32 2, %v3379_v2 }
 0x82d   : > { %v3384_v61 = vsub.s32 1, %v3379_v2  ;;  %v3392_v43 = vsub.s32 3, %v3379_v2 }
 0x82e   : > { %v3327_v40 = vadd.f32 %v12937_v10, %v3289_v30  ;;  %v13195_v54 = vrot.slane %v3376_v53, %v3380_v59  ;;  %v13197_v14 = vrot.slane %v3376_v53, %v3388_v33 }
 0x82f   : > { %v13199_v6 = vrot.slane %v3376_v53, %v3384_v61  ;;  %v13201_v10 = vrot.slane %v3376_v53, %v3392_v43 }
 0x830   : > { %v3343_v45 = vpack.c.bf16 %v3327_v40, %v3326_v60 }
 0x832   : > { %3741 = vmatmul.mubr.bf16.gmra.mrb[148].mxu1 %v3343_v45  ;;  %3934 = vmatmul.mubr.bf16.gmra.mrb[164].mxu0 %v3343_v45 }
 0x845   : > { %v3592_v27 = vpop.f32.mrb[88].mxu1  ;;  %v3785_v7 = vpop.f32.mrb[104].mxu0 }
 0x846   : > { %v3593_v62 = vadd.f32 %v3592_v27, %v13195_v54  ;;  %v3786_v41 = vadd.f32 %v3785_v7, %v13197_v14  ;;  %v3594_v23 = vpop.f32.mrb[89].mxu1  ;;  %v3787_v63 = vpop.f32.mrb[105].mxu0 }
 0x847   : > { %v3595_v57 = vadd.f32 %v3594_v23, %v13199_v6  ;;  %v3788_v35 = vadd.f32 %v3787_v63, %v13201_v10  ;;  %v3596_v31 = vpop.f32.mrb[90].mxu1  ;;  %v3789_v47 = vpop.f32.mrb[106].mxu0 }
 0x848   : > { %v3597_v36 = vadd.f32 %v3596_v31, %v13195_v54  ;;  %v3790_v13 = vadd.f32 %v3789_v47, %v13197_v14  ;;  %v3598_v19 = vpop.f32.mrb[91].mxu1  ;;  %v3791_v9 = vpop.f32.mrb[107].mxu0  ;;  %v3944_v21 = vmax.f32 %v3593_v62, 0.0  ;;  %v3946_v15 = vmax.f32 %v3786_v41, 0.0 }
 0x849   : > { %v3599_v55 = vadd.f32 %v3598_v19, %v13199_v6  ;;  %v3792_v42 = vadd.f32 %v3791_v9, %v13201_v10  ;;  %v3945_v20 = vmax.f32 %v3595_v57, 0.0  ;;  %v3947_v1 = vmax.f32 %v3788_v35, 0.0 }
 0x84a   : > { %v3948_v52 = vmax.f32 %v3597_v36, 0.0  ;;  %v3950_v29 = vmax.f32 %v3790_v13, 0.0 }
 0x84b   : > { %v3949_v44 = vmax.f32 %v3599_v55, 0.0  ;;  %v3951_v17 = vmax.f32 %v3792_v42, 0.0 }
 0x84c   : > { %v4072_v26 = vpack.c.bf16 %v3948_v52, %v3944_v21  ;;  %v4074_v49 = vpack.c.bf16 %v3950_v29, %v3946_v15 }
 0x84d   : > { %v3602_v51 = vpop.f32.mrb[92].mxu1  ;;  %v3795_v18 = vpop.f32.mrb[108].mxu0  ;;  %v4073_v30 = vpack.c.bf16 %v3949_v44, %v3945_v20  ;;  %v4075_v60 = vpack.c.bf16 %v3951_v17, %v3947_v1 }
 0x84e   : > { %v3603_v40 = vadd.f32 %v3602_v51, %v13195_v54  ;;  %v3796_v45 = vadd.f32 %v3795_v18, %v13197_v14  ;;  %v3604_v34 = vpop.f32.mrb[93].mxu1  ;;  %v3797_v2 = vpop.f32.mrb[109].mxu0 }
 0x84f   : > { %v3605_v59 = vadd.f32 %v3604_v34, %v13199_v6  ;;  %v3798_v33 = vadd.f32 %v3797_v2, %v13201_v10  ;;  %v3606_v53 = vpop.f32.mrb[94].mxu1  ;;  %v3799_v61 = vpop.f32.mrb[110].mxu0  ;;  %4431 = vmatprep.mubr.bf16.mxu1 %v4073_v30  ;;  %4592 = vmatprep.mubr.bf16.mxu0 %v4075_v60 }
 0x850   : > { %v3607_v43 = vadd.f32 %v3606_v53, %v13195_v54  ;;  %v3800_v27 = vadd.f32 %v3799_v61, %v13197_v14  ;;  %v3608_v7 = vpop.f32.mrb[95].mxu1  ;;  %v3801_v62 = vpop.f32.mrb[111].mxu0  ;;  %4432 = vmatmul.mubr.bf16.vlgmr.msra.gmra.mrb[152].mxu1 %v4072_v26  ;;  %4593 = vmatmul.mubr.bf16.vlgmr.msra.gmra.mrb[168].mxu0 %v4074_v49  ;;  %v3952_v63 = vmax.f32 %v3603_v40, 0.0  ;;  %v3954_v57 = vmax.f32 %v3796_v45, 0.0 }
 0x851   : > { %v3609_v41 = vadd.f32 %v3608_v7, %v13199_v6  ;;  %v3802_v23 = vadd.f32 %v3801_v62, %v13201_v10  ;;  %v3953_v47 = vmax.f32 %v3605_v59, 0.0  ;;  %v3955_v36 = vmax.f32 %v3798_v33, 0.0 }
 0x852   : > { %v3956_v35 = vmax.f32 %v3607_v43, 0.0  ;;  %v3958_v31 = vmax.f32 %v3800_v27, 0.0 }
 0x853   : > { %v3957_v13 = vmax.f32 %v3609_v41, 0.0  ;;  %v3959_v19 = vmax.f32 %v3802_v23, 0.0 }
 0x854   : > { %v4076_v9 = vpack.c.bf16 %v3956_v35, %v3952_v63  ;;  %v4078_v55 = vpack.c.bf16 %v3958_v31, %v3954_v57 }
 0x855   : > { %v3612_v42 = vpop.f32.mrb[96].mxu1  ;;  %v3805_v21 = vpop.f32.mrb[112].mxu0  ;;  %v4077_v15 = vpack.c.bf16 %v3957_v13, %v3953_v47  ;;  %v4079_v52 = vpack.c.bf16 %v3959_v19, %v3955_v36 }
 0x856   : > { %v3613_v29 = vadd.f32 %v3612_v42, %v13195_v54  ;;  %v3806_v20 = vadd.f32 %v3805_v21, %v13197_v14  ;;  %v3614_v1 = vpop.f32.mrb[97].mxu1  ;;  %v3807_v44 = vpop.f32.mrb[113].mxu0 }
 0x857   : > { %v3615_v17 = vadd.f32 %v3614_v1, %v13199_v6  ;;  %v3808_v26 = vadd.f32 %v3807_v44, %v13201_v10  ;;  %v3616_v49 = vpop.f32.mrb[98].mxu1  ;;  %v3809_v51 = vpop.f32.mrb[114].mxu0  ;;  %4439 = vmatprep.mubr.bf16.mxu1 %v4077_v15  ;;  %4600 = vmatprep.mubr.bf16.mxu0 %v4079_v52 }
 0x858   : > { %v3617_v18 = vadd.f32 %v3616_v49, %v13195_v54  ;;  %v3810_v30 = vadd.f32 %v3809_v51, %v13197_v14  ;;  %v3618_v60 = vpop.f32.mrb[99].mxu1  ;;  %v3811_v40 = vpop.f32.mrb[115].mxu0  ;;  %4440 = vmatmul.mubr.bf16.gmra.mrb[156].mxu1 %v4076_v9  ;;  %4601 = vmatmul.mubr.bf16.gmra.mrb[172].mxu0 %v4078_v55  ;;  %v3960_v2 = vmax.f32 %v3613_v29, 0.0  ;;  %v3962_v59 = vmax.f32 %v3806_v20, 0.0 }
 0x859   : > { %v3619_v45 = vadd.f32 %v3618_v60, %v13199_v6  ;;  %v3812_v34 = vadd.f32 %v3811_v40, %v13201_v10  ;;  %v3961_v61 = vmax.f32 %v3615_v17, 0.0  ;;  %v3963_v43 = vmax.f32 %v3808_v26, 0.0 }
 0x85a   : > { %v3964_v33 = vmax.f32 %v3617_v18, 0.0  ;;  %v3966_v53 = vmax.f32 %v3810_v30, 0.0 }
 0x85b   : > { %v3965_v27 = vmax.f32 %v3619_v45, 0.0  ;;  %v3967_v7 = vmax.f32 %v3812_v34, 0.0 }
 0x85c   : > { %v4080_v62 = vpack.c.bf16 %v3964_v33, %v3960_v2  ;;  %v4082_v41 = vpack.c.bf16 %v3966_v53, %v3962_v59 }
 0x85d   : > { %v3622_v23 = vpop.f32.mrb[100].mxu1  ;;  %v3815_v63 = vpop.f32.mrb[116].mxu0  ;;  %v4081_v57 = vpack.c.bf16 %v3965_v27, %v3961_v61  ;;  %v4083_v35 = vpack.c.bf16 %v3967_v7, %v3963_v43 }
 0x85e   : > { %v3623_v31 = vadd.f32 %v3622_v23, %v13195_v54  ;;  %v3816_v47 = vadd.f32 %v3815_v63, %v13197_v14  ;;  %v3624_v36 = vpop.f32.mrb[101].mxu1  ;;  %v3817_v13 = vpop.f32.mrb[117].mxu0 }
 0x85f   : > { %v3625_v19 = vadd.f32 %v3624_v36, %v13199_v6  ;;  %v3818_v9 = vadd.f32 %v3817_v13, %v13201_v10  ;;  %v3626_v55 = vpop.f32.mrb[102].mxu1  ;;  %v3819_v42 = vpop.f32.mrb[118].mxu0  ;;  %4447 = vmatprep.mubr.bf16.mxu1 %v4081_v57  ;;  %4608 = vmatprep.mubr.bf16.mxu0 %v4083_v35 }
 0x860   : > { %v3627_v21 = vadd.f32 %v3626_v55, %v13195_v54  ;;  %v3820_v15 = vadd.f32 %v3819_v42, %v13197_v14  ;;  %v3628_v52 = vpop.f32.mrb[103].mxu1  ;;  %v3821_v29 = vpop.f32.mrb[119].mxu0  ;;  %4448 = vmatmul.mubr.bf16.gmra.mrb[160].mxu1 %v4080_v62  ;;  %4609 = vmatmul.mubr.bf16.gmra.mrb[176].mxu0 %v4082_v41  ;;  %v3968_v44 = vmax.f32 %v3623_v31, 0.0  ;;  %v3970_v17 = vmax.f32 %v3816_v47, 0.0 }
 0x861   : > { %v3629_v20 = vadd.f32 %v3628_v52, %v13199_v6  ;;  %v3822_v1 = vadd.f32 %v3821_v29, %v13201_v10  ;;  %v3969_v51 = vmax.f32 %v3625_v19, 0.0  ;;  %v3971_v18 = vmax.f32 %v3818_v9, 0.0 }
 0x862   : > { %v3972_v26 = vmax.f32 %v3627_v21, 0.0  ;;  %v3974_v49 = vmax.f32 %v3820_v15, 0.0 }
 0x863   : > { %v3973_v30 = vmax.f32 %v3629_v20, 0.0  ;;  %v3975_v60 = vmax.f32 %v3822_v1, 0.0 }
 0x864   : > { %v4084_v40 = vpack.c.bf16 %v3972_v26, %v3968_v44  ;;  %v4086_v45 = vpack.c.bf16 %v3974_v49, %v3970_v17 }
 0x865   : > { %v3632_v34 = vpop.f32.mrb[104].mxu1  ;;  %v3825_v2 = vpop.f32.mrb[120].mxu0  ;;  %v4085_v59 = vpack.c.bf16 %v3973_v30, %v3969_v51  ;;  %v4087_v33 = vpack.c.bf16 %v3975_v60, %v3971_v18 }
 0x866   : > { %v3633_v53 = vadd.f32 %v3632_v34, %v13195_v54  ;;  %v3826_v61 = vadd.f32 %v3825_v2, %v13197_v14  ;;  %v3634_v43 = vpop.f32.mrb[105].mxu1  ;;  %v3827_v27 = vpop.f32.mrb[121].mxu0 }
 0x867   : > { %v3635_v7 = vadd.f32 %v3634_v43, %v13199_v6  ;;  %v3828_v62 = vadd.f32 %v3827_v27, %v13201_v10  ;;  %v3636_v41 = vpop.f32.mrb[106].mxu1  ;;  %v3829_v23 = vpop.f32.mrb[122].mxu0  ;;  %4455 = vmatprep.mubr.bf16.mxu1 %v4085_v59  ;;  %4616 = vmatprep.mubr.bf16.mxu0 %v4087_v33 }
 0x868   : > { %v3637_v63 = vadd.f32 %v3636_v41, %v13195_v54  ;;  %v3830_v57 = vadd.f32 %v3829_v23, %v13197_v14  ;;  %v3638_v35 = vpop.f32.mrb[107].mxu1  ;;  %v3831_v31 = vpop.f32.mrb[123].mxu0  ;;  %4456 = vmatmul.mubr.bf16.gmra.mrb[164].mxu1 %v4084_v40  ;;  %4617 = vmatmul.mubr.bf16.gmra.mrb[180].mxu0 %v4086_v45  ;;  %v3976_v13 = vmax.f32 %v3633_v53, 0.0  ;;  %v3978_v19 = vmax.f32 %v3826_v61, 0.0 }
 0x869   : > { %v3639_v47 = vadd.f32 %v3638_v35, %v13199_v6  ;;  %v3832_v36 = vadd.f32 %v3831_v31, %v13201_v10  ;;  %v3977_v42 = vmax.f32 %v3635_v7, 0.0  ;;  %v3979_v21 = vmax.f32 %v3828_v62, 0.0 }
 0x86a   : > { %v3980_v9 = vmax.f32 %v3637_v63, 0.0  ;;  %v3982_v55 = vmax.f32 %v3830_v57, 0.0 }
 0x86b   : > { %v3981_v15 = vmax.f32 %v3639_v47, 0.0  ;;  %v3983_v52 = vmax.f32 %v3832_v36, 0.0 }
 0x86c   : > { %v4088_v29 = vpack.c.bf16 %v3980_v9, %v3976_v13  ;;  %v4090_v20 = vpack.c.bf16 %v3982_v55, %v3978_v19 }
 0x86d   : > { %v3642_v1 = vpop.f32.mrb[108].mxu1  ;;  %v3835_v44 = vpop.f32.mrb[124].mxu0  ;;  %v4089_v17 = vpack.c.bf16 %v3981_v15, %v3977_v42  ;;  %v4091_v26 = vpack.c.bf16 %v3983_v52, %v3979_v21 }
 0x86e   : > { %v3643_v49 = vadd.f32 %v3642_v1, %v13195_v54  ;;  %v3836_v51 = vadd.f32 %v3835_v44, %v13197_v14  ;;  %v3644_v18 = vpop.f32.mrb[109].mxu1  ;;  %v3837_v30 = vpop.f32.mrb[125].mxu0 }
 0x86f   : > { %v3645_v60 = vadd.f32 %v3644_v18, %v13199_v6  ;;  %v3838_v40 = vadd.f32 %v3837_v30, %v13201_v10  ;;  %v3646_v45 = vpop.f32.mrb[110].mxu1  ;;  %v3839_v34 = vpop.f32.mrb[126].mxu0  ;;  %4463 = vmatprep.mubr.bf16.mxu1 %v4089_v17  ;;  %4624 = vmatprep.mubr.bf16.mxu0 %v4091_v26 }
 0x870   : > { %v3647_v2 = vadd.f32 %v3646_v45, %v13195_v54  ;;  %v3840_v59 = vadd.f32 %v3839_v34, %v13197_v14  ;;  %v3648_v33 = vpop.f32.mrb[111].mxu1  ;;  %v3841_v53 = vpop.f32.mrb[127].mxu0  ;;  %4464 = vmatmul.mubr.bf16.gmra.mrb[168].mxu1 %v4088_v29  ;;  %4625 = vmatmul.mubr.bf16.gmra.mrb[184].mxu0 %v4090_v20  ;;  %v3984_v27 = vmax.f32 %v3643_v49, 0.0  ;;  %v3986_v7 = vmax.f32 %v3836_v51, 0.0 }
 0x871   : > { %v3649_v61 = vadd.f32 %v3648_v33, %v13199_v6  ;;  %v3842_v43 = vadd.f32 %v3841_v53, %v13201_v10  ;;  %v3985_v23 = vmax.f32 %v3645_v60, 0.0  ;;  %v3987_v63 = vmax.f32 %v3838_v40, 0.0 }
 0x872   : > { %v3988_v62 = vmax.f32 %v3647_v2, 0.0  ;;  %v3990_v41 = vmax.f32 %v3840_v59, 0.0 }
 0x873   : > { %v3989_v57 = vmax.f32 %v3649_v61, 0.0  ;;  %v3991_v35 = vmax.f32 %v3842_v43, 0.0 }
 0x874   : > { %v4092_v31 = vpack.c.bf16 %v3988_v62, %v3984_v27  ;;  %v4094_v47 = vpack.c.bf16 %v3990_v41, %v3986_v7 }
 0x875   : > { %v3652_v36 = vpop.f32.mrb[112].mxu1  ;;  %v3845_v13 = vpop.f32.mrb[128].mxu0  ;;  %v4093_v19 = vpack.c.bf16 %v3989_v57, %v3985_v23  ;;  %v4095_v9 = vpack.c.bf16 %v3991_v35, %v3987_v63 }
 0x876   : > { %v3653_v55 = vadd.f32 %v3652_v36, %v13195_v54  ;;  %v3846_v42 = vadd.f32 %v3845_v13, %v13197_v14  ;;  %v3654_v21 = vpop.f32.mrb[113].mxu1  ;;  %v3847_v15 = vpop.f32.mrb[129].mxu0 }
 0x877   : > { %v3655_v52 = vadd.f32 %v3654_v21, %v13199_v6  ;;  %v3848_v29 = vadd.f32 %v3847_v15, %v13201_v10  ;;  %v3656_v20 = vpop.f32.mrb[114].mxu1  ;;  %v3849_v1 = vpop.f32.mrb[130].mxu0  ;;  %4471 = vmatprep.mubr.bf16.mxu1 %v4093_v19  ;;  %4632 = vmatprep.mubr.bf16.mxu0 %v4095_v9 }
 0x878   : > { %v3657_v44 = vadd.f32 %v3656_v20, %v13195_v54  ;;  %v3850_v17 = vadd.f32 %v3849_v1, %v13197_v14  ;;  %v3658_v26 = vpop.f32.mrb[115].mxu1  ;;  %v3851_v49 = vpop.f32.mrb[131].mxu0  ;;  %4472 = vmatmul.mubr.bf16.gmra.mrb[172].mxu1 %v4092_v31  ;;  %4633 = vmatmul.mubr.bf16.gmra.mrb[188].mxu0 %v4094_v47  ;;  %v3992_v30 = vmax.f32 %v3653_v55, 0.0  ;;  %v3994_v60 = vmax.f32 %v3846_v42, 0.0 }
 0x879   : > { %v3659_v51 = vadd.f32 %v3658_v26, %v13199_v6  ;;  %v3852_v18 = vadd.f32 %v3851_v49, %v13201_v10  ;;  %v3993_v34 = vmax.f32 %v3655_v52, 0.0  ;;  %v3995_v2 = vmax.f32 %v3848_v29, 0.0 }
 0x87a   : > { %v3996_v40 = vmax.f32 %v3657_v44, 0.0  ;;  %v3998_v45 = vmax.f32 %v3850_v17, 0.0 }
 0x87b   : > { %v3997_v59 = vmax.f32 %v3659_v51, 0.0  ;;  %v3999_v33 = vmax.f32 %v3852_v18, 0.0 }
 0x87c   : > { %v4096_v53 = vpack.c.bf16 %v3996_v40, %v3992_v30  ;;  %v4098_v61 = vpack.c.bf16 %v3998_v45, %v3994_v60 }
 0x87d   : > { %v3662_v43 = vpop.f32.mrb[116].mxu1  ;;  %v3855_v27 = vpop.f32.mrb[132].mxu0  ;;  %v4097_v7 = vpack.c.bf16 %v3997_v59, %v3993_v34  ;;  %v4099_v62 = vpack.c.bf16 %v3999_v33, %v3995_v2 }
 0x87e   : > { %v3663_v41 = vadd.f32 %v3662_v43, %v13195_v54  ;;  %v3856_v23 = vadd.f32 %v3855_v27, %v13197_v14  ;;  %v3664_v63 = vpop.f32.mrb[117].mxu1  ;;  %v3857_v57 = vpop.f32.mrb[133].mxu0 }
 0x87f   : > { %v3665_v35 = vadd.f32 %v3664_v63, %v13199_v6  ;;  %v3858_v31 = vadd.f32 %v3857_v57, %v13201_v10  ;;  %v3666_v47 = vpop.f32.mrb[118].mxu1  ;;  %v3859_v36 = vpop.f32.mrb[134].mxu0  ;;  %4479 = vmatprep.mubr.bf16.mxu1 %v4097_v7  ;;  %4640 = vmatprep.mubr.bf16.mxu0 %v4099_v62 }
 0x880   : > { %v3667_v13 = vadd.f32 %v3666_v47, %v13195_v54  ;;  %v3860_v19 = vadd.f32 %v3859_v36, %v13197_v14  ;;  %v3668_v9 = vpop.f32.mrb[119].mxu1  ;;  %v3861_v55 = vpop.f32.mrb[135].mxu0  ;;  %4480 = vmatmul.mubr.bf16.gmra.mrb[176].mxu1 %v4096_v53  ;;  %4641 = vmatmul.mubr.bf16.gmra.mrb[192].mxu0 %v4098_v61  ;;  %v4000_v15 = vmax.f32 %v3663_v41, 0.0  ;;  %v4002_v52 = vmax.f32 %v3856_v23, 0.0 }
 0x881   : > { %v3669_v42 = vadd.f32 %v3668_v9, %v13199_v6  ;;  %v3862_v21 = vadd.f32 %v3861_v55, %v13201_v10  ;;  %v4001_v1 = vmax.f32 %v3665_v35, 0.0  ;;  %v4003_v44 = vmax.f32 %v3858_v31, 0.0 }
 0x882   : > { %v4004_v29 = vmax.f32 %v3667_v13, 0.0  ;;  %v4006_v20 = vmax.f32 %v3860_v19, 0.0 }
 0x883   : > { %v4005_v17 = vmax.f32 %v3669_v42, 0.0  ;;  %v4007_v26 = vmax.f32 %v3862_v21, 0.0 }
 0x884   : > { %v4100_v49 = vpack.c.bf16 %v4004_v29, %v4000_v15  ;;  %v4102_v51 = vpack.c.bf16 %v4006_v20, %v4002_v52 }
 0x885   : > { %v4101_v18 = vpack.c.bf16 %v4005_v17, %v4001_v1  ;;  %v4103_v30 = vpack.c.bf16 %v4007_v26, %v4003_v44 }
 0x887   : > { %4487 = vmatprep.mubr.bf16.mxu1 %v4101_v18  ;;  %4648 = vmatprep.mubr.bf16.mxu0 %v4103_v30 }
 0x888   : > { %4488 = vmatmul.mubr.bf16.gmra.mrb[180].mxu1 %v4100_v49  ;;  %4649 = vmatmul.mubr.bf16.gmra.mrb[196].mxu0 %v4102_v51 }
 0x8be   : > { %v3672_v60 = vpop.f32.mrb[120].mxu1  ;;  %v3865_v40 = vpop.f32.mrb[136].mxu0 }
 0x8bf   : > { %v3673_v45 = vadd.f32 %v3672_v60, %v13195_v54  ;;  %v3866_v34 = vadd.f32 %v3865_v40, %v13197_v14  ;;  %v3674_v2 = vpop.f32.mrb[121].mxu1  ;;  %v3867_v59 = vpop.f32.mrb[137].mxu0 }
 0x8c0   : > { %v3675_v33 = vadd.f32 %v3674_v2, %v13199_v6  ;;  %v3868_v53 = vadd.f32 %v3867_v59, %v13201_v10  ;;  %v3676_v61 = vpop.f32.mrb[122].mxu1  ;;  %v3869_v43 = vpop.f32.mrb[138].mxu0 }
 0x8c1   : > { %v3677_v27 = vadd.f32 %v3676_v61, %v13195_v54  ;;  %v3870_v7 = vadd.f32 %v3869_v43, %v13197_v14  ;;  %v3678_v62 = vpop.f32.mrb[123].mxu1  ;;  %v3871_v41 = vpop.f32.mrb[139].mxu0  ;;  %v4008_v57 = vmax.f32 %v3673_v45, 0.0  ;;  %v4010_v35 = vmax.f32 %v3866_v34, 0.0 }
 0x8c2   : > { %v3679_v23 = vadd.f32 %v3678_v62, %v13199_v6  ;;  %v3872_v63 = vadd.f32 %v3871_v41, %v13201_v10  ;;  %v4009_v36 = vmax.f32 %v3675_v33, 0.0  ;;  %v4011_v13 = vmax.f32 %v3868_v53, 0.0 }
 0x8c3   : > { %v4012_v31 = vmax.f32 %v3677_v27, 0.0  ;;  %v4014_v47 = vmax.f32 %v3870_v7, 0.0 }
 0x8c4   : > { %v4013_v19 = vmax.f32 %v3679_v23, 0.0  ;;  %v4015_v9 = vmax.f32 %v3872_v63, 0.0 }
 0x8c5   : > { %v4104_v55 = vpack.c.bf16 %v4012_v31, %v4008_v57  ;;  %v4106_v42 = vpack.c.bf16 %v4014_v47, %v4010_v35 }
 0x8c6   : > { %v3682_v21 = vpop.f32.mrb[124].mxu1  ;;  %v3875_v15 = vpop.f32.mrb[140].mxu0  ;;  %v4105_v52 = vpack.c.bf16 %v4013_v19, %v4009_v36  ;;  %v4107_v29 = vpack.c.bf16 %v4015_v9, %v4011_v13 }
 0x8c7   : > { %v3683_v20 = vadd.f32 %v3682_v21, %v13195_v54  ;;  %v3876_v1 = vadd.f32 %v3875_v15, %v13197_v14  ;;  %v3684_v44 = vpop.f32.mrb[125].mxu1  ;;  %v3877_v17 = vpop.f32.mrb[141].mxu0 }
 0x8c8   : > { %v3685_v26 = vadd.f32 %v3684_v44, %v13199_v6  ;;  %v3878_v49 = vadd.f32 %v3877_v17, %v13201_v10  ;;  %v3686_v51 = vpop.f32.mrb[126].mxu1  ;;  %v3879_v18 = vpop.f32.mrb[142].mxu0  ;;  %4495 = vmatprep.mubr.bf16.mxu1 %v4105_v52  ;;  %4656 = vmatprep.mubr.bf16.mxu0 %v4107_v29 }
 0x8c9   : > { %v3687_v30 = vadd.f32 %v3686_v51, %v13195_v54  ;;  %v3880_v60 = vadd.f32 %v3879_v18, %v13197_v14  ;;  %v3688_v40 = vpop.f32.mrb[127].mxu1  ;;  %v3881_v45 = vpop.f32.mrb[143].mxu0  ;;  %4496 = vmatmul.mubr.bf16.gmra.mrb[184].mxu1 %v4104_v55  ;;  %4657 = vmatmul.mubr.bf16.gmra.mrb[200].mxu0 %v4106_v42  ;;  %v4016_v59 = vmax.f32 %v3683_v20, 0.0  ;;  %v4018_v33 = vmax.f32 %v3876_v1, 0.0 }
 0x8ca   : > { %v3689_v34 = vadd.f32 %v3688_v40, %v13199_v6  ;;  %v3882_v2 = vadd.f32 %v3881_v45, %v13201_v10  ;;  %v4017_v43 = vmax.f32 %v3685_v26, 0.0  ;;  %v4019_v27 = vmax.f32 %v3878_v49, 0.0 }
 0x8cb   : > { %v4020_v53 = vmax.f32 %v3687_v30, 0.0  ;;  %v4022_v61 = vmax.f32 %v3880_v60, 0.0 }
 0x8cc   : > { %v4021_v7 = vmax.f32 %v3689_v34, 0.0  ;;  %v4023_v62 = vmax.f32 %v3882_v2, 0.0 }
 0x8cd   : > { %v4108_v41 = vpack.c.bf16 %v4020_v53, %v4016_v59  ;;  %v4110_v23 = vpack.c.bf16 %v4022_v61, %v4018_v33 }
 0x8ce   : > { %v4109_v63 = vpack.c.bf16 %v4021_v7, %v4017_v43  ;;  %v4111_v57 = vpack.c.bf16 %v4023_v62, %v4019_v27 }
 0x8d0   : > { %4503 = vmatprep.mubr.bf16.mxu1 %v4109_v63  ;;  %4664 = vmatprep.mubr.bf16.mxu0 %v4111_v57 }
 0x8d1   : > { %4504 = vmatmul.mubr.bf16.gmra.mrb[188].mxu1 %v4108_v41  ;;  %4665 = vmatmul.mubr.bf16.gmra.mrb[204].mxu0 %v4110_v23 }
 0x8dd   : > { %v3692_v35 = vpop.f32.mrb[128].mxu1  ;;  %v3885_v31 = vpop.f32.mrb[144].mxu0 }
 0x8de   : > { %v3693_v47 = vadd.f32 %v3692_v35, %v13195_v54  ;;  %v3886_v36 = vadd.f32 %v3885_v31, %v13197_v14  ;;  %v3694_v13 = vpop.f32.mrb[129].mxu1  ;;  %v3887_v19 = vpop.f32.mrb[145].mxu0 }
 0x8df   : > { %v3695_v9 = vadd.f32 %v3694_v13, %v13199_v6  ;;  %v3888_v55 = vadd.f32 %v3887_v19, %v13201_v10  ;;  %v3696_v42 = vpop.f32.mrb[130].mxu1  ;;  %v3889_v21 = vpop.f32.mrb[146].mxu0 }
 0x8e0   : > { %v3697_v15 = vadd.f32 %v3696_v42, %v13195_v54  ;;  %v3890_v52 = vadd.f32 %v3889_v21, %v13197_v14  ;;  %v3698_v29 = vpop.f32.mrb[131].mxu1  ;;  %v3891_v20 = vpop.f32.mrb[147].mxu0  ;;  %v4024_v17 = vmax.f32 %v3693_v47, 0.0  ;;  %v4026_v26 = vmax.f32 %v3886_v36, 0.0 }
 0x8e1   : > { %v3699_v1 = vadd.f32 %v3698_v29, %v13199_v6  ;;  %v3892_v44 = vadd.f32 %v3891_v20, %v13201_v10  ;;  %v4025_v18 = vmax.f32 %v3695_v9, 0.0  ;;  %v4027_v30 = vmax.f32 %v3888_v55, 0.0 }
 0x8e2   : > { %v4028_v49 = vmax.f32 %v3697_v15, 0.0  ;;  %v4030_v51 = vmax.f32 %v3890_v52, 0.0 }
 0x8e3   : > { %v4029_v60 = vmax.f32 %v3699_v1, 0.0  ;;  %v4031_v40 = vmax.f32 %v3892_v44, 0.0 }
 0x8e4   : > { %v4112_v45 = vpack.c.bf16 %v4028_v49, %v4024_v17  ;;  %v4114_v34 = vpack.c.bf16 %v4030_v51, %v4026_v26 }
 0x8e5   : > { %v3702_v2 = vpop.f32.mrb[132].mxu1  ;;  %v3895_v59 = vpop.f32.mrb[148].mxu0  ;;  %v4113_v33 = vpack.c.bf16 %v4029_v60, %v4025_v18  ;;  %v4115_v53 = vpack.c.bf16 %v4031_v40, %v4027_v30 }
 0x8e6   : > { %v3703_v61 = vadd.f32 %v3702_v2, %v13195_v54  ;;  %v3896_v43 = vadd.f32 %v3895_v59, %v13197_v14  ;;  %v3704_v27 = vpop.f32.mrb[133].mxu1  ;;  %v3897_v7 = vpop.f32.mrb[149].mxu0 }
 0x8e7   : > { %v3705_v62 = vadd.f32 %v3704_v27, %v13199_v6  ;;  %v3898_v41 = vadd.f32 %v3897_v7, %v13201_v10  ;;  %v3706_v23 = vpop.f32.mrb[134].mxu1  ;;  %v3899_v63 = vpop.f32.mrb[150].mxu0  ;;  %4511 = vmatprep.mubr.bf16.mxu1 %v4113_v33  ;;  %4672 = vmatprep.mubr.bf16.mxu0 %v4115_v53 }
 0x8e8   : > { %v3707_v57 = vadd.f32 %v3706_v23, %v13195_v54  ;;  %v3900_v35 = vadd.f32 %v3899_v63, %v13197_v14  ;;  %v3708_v31 = vpop.f32.mrb[135].mxu1  ;;  %v3901_v47 = vpop.f32.mrb[151].mxu0  ;;  %4512 = vmatmul.mubr.bf16.gmra.mrb[192].mxu1 %v4112_v45  ;;  %4673 = vmatmul.mubr.bf16.gmra.mrb[208].mxu0 %v4114_v34  ;;  %v4032_v19 = vmax.f32 %v3703_v61, 0.0  ;;  %v4034_v9 = vmax.f32 %v3896_v43, 0.0 }
 0x8e9   : > { %v3709_v36 = vadd.f32 %v3708_v31, %v13199_v6  ;;  %v3902_v13 = vadd.f32 %v3901_v47, %v13201_v10  ;;  %v4033_v21 = vmax.f32 %v3705_v62, 0.0  ;;  %v4035_v15 = vmax.f32 %v3898_v41, 0.0 }
 0x8ea   : > { %v4036_v55 = vmax.f32 %v3707_v57, 0.0  ;;  %v4038_v42 = vmax.f32 %v3900_v35, 0.0 }
 0x8eb   : > { %v4037_v52 = vmax.f32 %v3709_v36, 0.0  ;;  %v4039_v29 = vmax.f32 %v3902_v13, 0.0 }
 0x8ec   : > { %v4116_v20 = vpack.c.bf16 %v4036_v55, %v4032_v19  ;;  %v4118_v1 = vpack.c.bf16 %v4038_v42, %v4034_v9 }
 0x8ed   : > { %v3712_v44 = vpop.f32.mrb[136].mxu1  ;;  %v3905_v17 = vpop.f32.mrb[152].mxu0  ;;  %v4117_v26 = vpack.c.bf16 %v4037_v52, %v4033_v21  ;;  %v4119_v49 = vpack.c.bf16 %v4039_v29, %v4035_v15 }
 0x8ee   : > { %v3713_v51 = vadd.f32 %v3712_v44, %v13195_v54  ;;  %v3906_v18 = vadd.f32 %v3905_v17, %v13197_v14  ;;  %v3714_v30 = vpop.f32.mrb[137].mxu1  ;;  %v3907_v60 = vpop.f32.mrb[153].mxu0 }
 0x8ef   : > { %v3715_v40 = vadd.f32 %v3714_v30, %v13199_v6  ;;  %v3908_v45 = vadd.f32 %v3907_v60, %v13201_v10  ;;  %v3716_v34 = vpop.f32.mrb[138].mxu1  ;;  %v3909_v2 = vpop.f32.mrb[154].mxu0  ;;  %4519 = vmatprep.mubr.bf16.mxu1 %v4117_v26  ;;  %4680 = vmatprep.mubr.bf16.mxu0 %v4119_v49 }
 0x8f0   : > { %v3717_v59 = vadd.f32 %v3716_v34, %v13195_v54  ;;  %v3910_v33 = vadd.f32 %v3909_v2, %v13197_v14  ;;  %v3718_v53 = vpop.f32.mrb[139].mxu1  ;;  %v3911_v61 = vpop.f32.mrb[155].mxu0  ;;  %4520 = vmatmul.mubr.bf16.gmra.mrb[196].mxu1 %v4116_v20  ;;  %4681 = vmatmul.mubr.bf16.gmra.mrb[212].mxu0 %v4118_v1  ;;  %v4040_v7 = vmax.f32 %v3713_v51, 0.0  ;;  %v4042_v62 = vmax.f32 %v3906_v18, 0.0 }
 0x8f1   : > { %v3719_v43 = vadd.f32 %v3718_v53, %v13199_v6  ;;  %v3912_v27 = vadd.f32 %v3911_v61, %v13201_v10  ;;  %v4041_v63 = vmax.f32 %v3715_v40, 0.0  ;;  %v4043_v57 = vmax.f32 %v3908_v45, 0.0 }
 0x8f2   : > { %v4044_v41 = vmax.f32 %v3717_v59, 0.0  ;;  %v4046_v23 = vmax.f32 %v3910_v33, 0.0 }
 0x8f3   : > { %v4045_v35 = vmax.f32 %v3719_v43, 0.0  ;;  %v4047_v31 = vmax.f32 %v3912_v27, 0.0 }
 0x8f4   : > { %v4120_v47 = vpack.c.bf16 %v4044_v41, %v4040_v7  ;;  %v4122_v36 = vpack.c.bf16 %v4046_v23, %v4042_v62 }
 0x8f5   : > { %v3722_v13 = vpop.f32.mrb[140].mxu1  ;;  %v3915_v19 = vpop.f32.mrb[156].mxu0  ;;  %v4121_v9 = vpack.c.bf16 %v4045_v35, %v4041_v63  ;;  %v4123_v55 = vpack.c.bf16 %v4047_v31, %v4043_v57 }
 0x8f6   : > { %v3723_v42 = vadd.f32 %v3722_v13, %v13195_v54  ;;  %v3916_v21 = vadd.f32 %v3915_v19, %v13197_v14  ;;  %v3724_v15 = vpop.f32.mrb[141].mxu1  ;;  %v3917_v52 = vpop.f32.mrb[157].mxu0 }
 0x8f7   : > { %v3725_v29 = vadd.f32 %v3724_v15, %v13199_v6  ;;  %v3918_v20 = vadd.f32 %v3917_v52, %v13201_v10  ;;  %v3726_v1 = vpop.f32.mrb[142].mxu1  ;;  %v3919_v44 = vpop.f32.mrb[158].mxu0  ;;  %4527 = vmatprep.mubr.bf16.mxu1 %v4121_v9  ;;  %4688 = vmatprep.mubr.bf16.mxu0 %v4123_v55 }
 0x8f8   : > { %v3727_v17 = vadd.f32 %v3726_v1, %v13195_v54  ;;  %v3920_v26 = vadd.f32 %v3919_v44, %v13197_v14  ;;  %v3728_v49 = vpop.f32.mrb[143].mxu1  ;;  %v3921_v51 = vpop.f32.mrb[159].mxu0  ;;  %4528 = vmatmul.mubr.bf16.gmra.mrb[200].mxu1 %v4120_v47  ;;  %4689 = vmatmul.mubr.bf16.gmra.mrb[216].mxu0 %v4122_v36  ;;  %v4048_v60 = vmax.f32 %v3723_v42, 0.0  ;;  %v4050_v40 = vmax.f32 %v3916_v21, 0.0 }
 0x8f9   : > { %v3729_v18 = vadd.f32 %v3728_v49, %v13199_v6  ;;  %v3922_v30 = vadd.f32 %v3921_v51, %v13201_v10  ;;  %v4049_v2 = vmax.f32 %v3725_v29, 0.0  ;;  %v4051_v59 = vmax.f32 %v3918_v20, 0.0 }
 0x8fa   : > { %v4052_v45 = vmax.f32 %v3727_v17, 0.0  ;;  %v4054_v34 = vmax.f32 %v3920_v26, 0.0 }
 0x8fb   : > { %v4053_v33 = vmax.f32 %v3729_v18, 0.0  ;;  %v4055_v53 = vmax.f32 %v3922_v30, 0.0 }
 0x8fc   : > { %v4124_v61 = vpack.c.bf16 %v4052_v45, %v4048_v60  ;;  %v4126_v43 = vpack.c.bf16 %v4054_v34, %v4050_v40 }
 0x8fd   : > { %v3732_v27 = vpop.f32.mrb[144].mxu1  ;;  %v3925_v7 = vpop.f32.mrb[160].mxu0  ;;  %v4125_v62 = vpack.c.bf16 %v4053_v33, %v4049_v2  ;;  %v4127_v41 = vpack.c.bf16 %v4055_v53, %v4051_v59 }
 0x8fe   : > { %v3733_v23 = vadd.f32 %v3732_v27, %v13195_v54  ;;  %v3926_v63 = vadd.f32 %v3925_v7, %v13197_v14  ;;  %v3734_v57 = vpop.f32.mrb[145].mxu1  ;;  %v3927_v35 = vpop.f32.mrb[161].mxu0 }
 0x8ff   : > { %v3735_v31 = vadd.f32 %v3734_v57, %v13199_v6  ;;  %v3928_v47 = vadd.f32 %v3927_v35, %v13201_v10  ;;  %v3736_v36 = vpop.f32.mrb[146].mxu1  ;;  %v3929_v13 = vpop.f32.mrb[162].mxu0  ;;  %4535 = vmatprep.mubr.bf16.mxu1 %v4125_v62  ;;  %4696 = vmatprep.mubr.bf16.mxu0 %v4127_v41 }
 0x900   : > { %v3737_v19 = vadd.f32 %v3736_v36, %v13195_v54  ;;  %v3930_v9 = vadd.f32 %v3929_v13, %v13197_v14  ;;  %v3738_v55 = vpop.f32.mrb[147].mxu1  ;;  %v3931_v42 = vpop.f32.mrb[163].mxu0  ;;  %4536 = vmatmul.mubr.bf16.gmra.mrb[204].mxu1 %v4124_v61  ;;  %4697 = vmatmul.mubr.bf16.gmra.mrb[220].mxu0 %v4126_v43  ;;  %v4056_v52 = vmax.f32 %v3733_v23, 0.0  ;;  %v4058_v29 = vmax.f32 %v3926_v63, 0.0 }
 0x901   : > { %v3739_v21 = vadd.f32 %v3738_v55, %v13199_v6  ;;  %v3932_v15 = vadd.f32 %v3931_v42, %v13201_v10  ;;  %v4057_v44 = vmax.f32 %v3735_v31, 0.0  ;;  %v4059_v17 = vmax.f32 %v3928_v47, 0.0 }
 0x902   : > { %v4060_v20 = vmax.f32 %v3737_v19, 0.0  ;;  %v4062_v1 = vmax.f32 %v3930_v9, 0.0 }
 0x903   : > { %v4061_v26 = vmax.f32 %v3739_v21, 0.0  ;;  %v4063_v49 = vmax.f32 %v3932_v15, 0.0  ;;  %v13336_v15 = vld [vmem:[%s14834_s12] ss:$0 sm:$0xff] }
 0x904   : > { %v4128_v51 = vpack.c.bf16 %v4060_v20, %v4056_v52  ;;  %v4130_v18 = vpack.c.bf16 %v4062_v1, %v4058_v29 }
 0x905   : > { %v3742_v30 = vpop.f32.mrb[148].mxu1  ;;  %v3935_v60 = vpop.f32.mrb[164].mxu0  ;;  %v4129_v40 = vpack.c.bf16 %v4061_v26, %v4057_v44  ;;  %v4131_v45 = vpack.c.bf16 %v4063_v49, %v4059_v17 }
 0x906   : > { %v3743_v34 = vadd.f32 %v3742_v30, %v13195_v54  ;;  %v3936_v2 = vadd.f32 %v3935_v60, %v13197_v14  ;;  %v3744_v59 = vpop.f32.mrb[149].mxu1  ;;  %v3937_v33 = vpop.f32.mrb[165].mxu0 }
 0x907   : > { %v3745_v53 = vadd.f32 %v3744_v59, %v13199_v6  ;;  %v3938_v61 = vadd.f32 %v3937_v33, %v13201_v10  ;;  %v3746_v43 = vpop.f32.mrb[150].mxu1  ;;  %v3939_v27 = vpop.f32.mrb[166].mxu0  ;;  %4543 = vmatprep.mubr.bf16.mxu1 %v4129_v40  ;;  %4704 = vmatprep.mubr.bf16.mxu0 %v4131_v45 }
 0x908   : > { %v3747_v7 = vadd.f32 %v3746_v43, %v13195_v54  ;;  %v3940_v62 = vadd.f32 %v3939_v27, %v13197_v14  ;;  %v3748_v41 = vpop.f32.mrb[151].mxu1  ;;  %v3941_v23 = vpop.f32.mrb[167].mxu0  ;;  %4544 = vmatmul.mubr.bf16.gmra.mrb[208].mxu1 %v4128_v51  ;;  %4705 = vmatmul.mubr.bf16.gmra.mrb[224].mxu0 %v4130_v18  ;;  %v4064_v35 = vmax.f32 %v3743_v34, 0.0  ;;  %v4066_v31 = vmax.f32 %v3936_v2, 0.0 }
 0x909   : > { %v3749_v63 = vadd.f32 %v3748_v41, %v13199_v6  ;;  %v3942_v57 = vadd.f32 %v3941_v23, %v13201_v10  ;;  %v4065_v13 = vmax.f32 %v3745_v53, 0.0  ;;  %v4067_v19 = vmax.f32 %v3938_v61, 0.0 }
 0x90a   : > { %v4068_v47 = vmax.f32 %v3747_v7, 0.0  ;;  %v4070_v36 = vmax.f32 %v3940_v62, 0.0 }
 0x90b   : > { %v4069_v9 = vmax.f32 %v3749_v63, 0.0  ;;  %v4071_v55 = vmax.f32 %v3942_v57, 0.0 }
 0x90c   : > { %v4132_v42 = vpack.c.bf16 %v4068_v47, %v4064_v35  ;;  %v4134_v54 = vpack.c.bf16 %v4070_v36, %v4066_v31 }
 0x90d   : > { %v4133_v21 = vpack.c.bf16 %v4069_v9, %v4065_v13  ;;  %v4135_v14 = vpack.c.bf16 %v4071_v55, %v4067_v19 }
 0x90f   : > { %4551 = vmatprep.mubr.bf16.mxu1 %v4133_v21  ;;  %4712 = vmatprep.mubr.bf16.mxu0 %v4135_v14 }
 0x910   : > { %4552 = vmatmul.mubr.bf16.gmra.mrb[212].mxu1 %v4132_v42  ;;  %4713 = vmatmul.mubr.bf16.gmra.mrb[228].mxu0 %v4134_v54 }
 0x911   : > { %6031 = vmatprep.mubr.bf16.mxu1 %v14921_v37  ;;  %6224 = vmatprep.mubr.bf16.mxu0 %v14921_v37 }
 0x923   : > { %v10347_v6 = vpop.f32.mrb[152].mxu1  ;;  %v10459_v10 = vpop.f32.mrb[168].mxu0 }
 0x924   : > { %v10348_v52 = vpop.f32.mrb[153].mxu1  ;;  %v10460_v29 = vpop.f32.mrb[169].mxu0 }
 0x925   : > { %v10349_v20 = vadd.f32 %v10348_v52, %v10347_v6  ;;  %v10461_v1 = vadd.f32 %v10460_v29, %v10459_v10  ;;  %v10350_v44 = vpop.f32.mrb[154].mxu1  ;;  %v10462_v17 = vpop.f32.mrb[170].mxu0 }
 0x926   : > { %v10351_v26 = vpop.f32.mrb[155].mxu1  ;;  %v10463_v49 = vpop.f32.mrb[171].mxu0 }
 0x927   : > { %v4434_v51 = vadd.f32 %v10349_v20, %v13336_v15  ;;  %v10352_v18 = vadd.f32 %v10351_v26, %v10350_v44  ;;  %v10464_v30 = vadd.f32 %v10463_v49, %v10462_v17 }
 0x929   : > { %v4595_v60 = vadd.f32 %v10461_v1, %v4434_v51  ;;  %v4437_v40 = vadd.f32 %v10352_v18, %v13336_v15 }
 0x92b   : > { %v4598_v45 = vadd.f32 %v10464_v30, %v4437_v40  ;;  %v10353_v34 = vpop.f32.mrb[156].mxu1  ;;  %v10465_v2 = vpop.f32.mrb[172].mxu0  ;;  %v13341_v59 = vadd.f32 %v4595_v60, %v12548_v4 }
 0x92c   : > { %v10354_v33 = vpop.f32.mrb[157].mxu1  ;;  %v10466_v53 = vpop.f32.mrb[173].mxu0 }
 0x92d   : > { %v10355_v61 = vadd.f32 %v10354_v33, %v10353_v34  ;;  %v10467_v43 = vadd.f32 %v10466_v53, %v10465_v2  ;;  %v10356_v27 = vpop.f32.mrb[158].mxu1  ;;  %v10468_v7 = vpop.f32.mrb[174].mxu0  ;;  %4755 = vadd.xlane.f32.xlu0 %v13341_v59  ;;  %v13345_v62 = vadd.f32 %v4598_v45, %v12553_v5 }
 0x92e   : > { %v10357_v41 = vpop.f32.mrb[159].mxu1  ;;  %v10469_v23 = vpop.f32.mrb[175].mxu0 }
 0x92f   : > { %v4442_v63 = vadd.f32 %v10355_v61, %v13336_v15  ;;  %v10358_v57 = vadd.f32 %v10357_v41, %v10356_v27  ;;  %v10470_v35 = vadd.f32 %v10469_v23, %v10468_v7  ;;  %4757 = vadd.xlane.f32.xlu1 %v13345_v62 }
 0x931   : > { %v4603_v4 = vadd.f32 %v10467_v43, %v4442_v63  ;;  %v4445_v31 = vadd.f32 %v10358_v57, %v13336_v15 }
 0x933   : > { %v4606_v47 = vadd.f32 %v10470_v35, %v4445_v31  ;;  %v10359_v36 = vpop.f32.mrb[160].mxu1  ;;  %v10471_v13 = vpop.f32.mrb[176].mxu0  ;;  %v13351_v19 = vadd.f32 %v4603_v4, %v12557_v28 }
 0x934   : > { %v10360_v9 = vpop.f32.mrb[161].mxu1  ;;  %v10472_v5 = vpop.f32.mrb[177].mxu0 }
 0x935   : > { %v10361_v55 = vadd.f32 %v10360_v9, %v10359_v36  ;;  %v10473_v42 = vadd.f32 %v10472_v5, %v10471_v13  ;;  %v10362_v54 = vpop.f32.mrb[162].mxu1  ;;  %v10474_v21 = vpop.f32.mrb[178].mxu0  ;;  %4759 = vadd.xlane.f32.xlu0 %v13351_v19  ;;  %v13355_v14 = vadd.f32 %v4606_v47, %v12561_v22 }
 0x936   : > { %v10363_v6 = vpop.f32.mrb[163].mxu1  ;;  %v10475_v10 = vpop.f32.mrb[179].mxu0 }
 0x937   : > { %v4450_v52 = vadd.f32 %v10361_v55, %v13336_v15  ;;  %v10364_v29 = vadd.f32 %v10363_v6, %v10362_v54  ;;  %v10476_v20 = vadd.f32 %v10475_v10, %v10474_v21  ;;  %4761 = vadd.xlane.f32.xlu1 %v13355_v14 }
 0x939   : > { %v4611_v28 = vadd.f32 %v10473_v42, %v4450_v52  ;;  %v4453_v1 = vadd.f32 %v10364_v29, %v13336_v15 }
 0x93b   : > { %v4614_v44 = vadd.f32 %v10476_v20, %v4453_v1  ;;  %v10365_v17 = vpop.f32.mrb[164].mxu1  ;;  %v10477_v26 = vpop.f32.mrb[180].mxu0  ;;  %v13361_v49 = vadd.f32 %v4611_v28, %v12568_v8 }
 0x93c   : > { %v10366_v51 = vpop.f32.mrb[165].mxu1  ;;  %v10478_v22 = vpop.f32.mrb[181].mxu0 }
 0x93d   : > { %v10367_v18 = vadd.f32 %v10366_v51, %v10365_v17  ;;  %v10479_v30 = vadd.f32 %v10478_v22, %v10477_v26  ;;  %v10368_v60 = vpop.f32.mrb[166].mxu1  ;;  %v10480_v40 = vpop.f32.mrb[182].mxu0  ;;  %4763 = vadd.xlane.f32.xlu0 %v13361_v49  ;;  %v13365_v45 = vadd.f32 %v4614_v44, %v12573_v11 }
 0x93e   : > { %v10369_v34 = vpop.f32.mrb[167].mxu1  ;;  %v10481_v2 = vpop.f32.mrb[183].mxu0 }
 0x93f   : > { %v4458_v33 = vadd.f32 %v10367_v18, %v13336_v15  ;;  %v10370_v53 = vadd.f32 %v10369_v34, %v10368_v60  ;;  %v10482_v61 = vadd.f32 %v10481_v2, %v10480_v40  ;;  %4765 = vadd.xlane.f32.xlu1 %v13365_v45 }
 0x941   : > { %v4619_v8 = vadd.f32 %v10479_v30, %v4458_v33  ;;  %v4461_v43 = vadd.f32 %v10370_v53, %v13336_v15 }
 0x943   : > { %v4622_v27 = vadd.f32 %v10482_v61, %v4461_v43  ;;  %v10371_v7 = vpop.f32.mrb[168].mxu1  ;;  %v10483_v41 = vpop.f32.mrb[184].mxu0  ;;  %v13371_v23 = vadd.f32 %v4619_v8, %v12577_v39 }
 0x944   : > { %v10372_v63 = vpop.f32.mrb[169].mxu1  ;;  %v10484_v11 = vpop.f32.mrb[185].mxu0 }
 0x945   : > { %v10373_v57 = vadd.f32 %v10372_v63, %v10371_v7  ;;  %v10485_v35 = vadd.f32 %v10484_v11, %v10483_v41  ;;  %v10374_v4 = vpop.f32.mrb[170].mxu1  ;;  %v10486_v31 = vpop.f32.mrb[186].mxu0  ;;  %4767 = vadd.xlane.f32.xlu0 %v13371_v23  ;;  %v13375_v47 = vadd.f32 %v4622_v27, %v12581_v46 }
 0x946   : > { %v10375_v36 = vpop.f32.mrb[171].mxu1  ;;  %v10487_v13 = vpop.f32.mrb[187].mxu0 }
 0x947   : > { %v4466_v9 = vadd.f32 %v10373_v57, %v13336_v15  ;;  %v10376_v5 = vadd.f32 %v10375_v36, %v10374_v4  ;;  %v10488_v55 = vadd.f32 %v10487_v13, %v10486_v31  ;;  %4769 = vadd.xlane.f32.xlu1 %v13375_v47 }
 0x949   : > { %v4627_v39 = vadd.f32 %v10485_v35, %v4466_v9  ;;  %v4469_v42 = vadd.f32 %v10376_v5, %v13336_v15 }
 0x94b   : > { %v4630_v54 = vadd.f32 %v10488_v55, %v4469_v42  ;;  %v10377_v21 = vpop.f32.mrb[172].mxu1  ;;  %v10489_v6 = vpop.f32.mrb[188].mxu0  ;;  %v13381_v10 = vadd.f32 %v4627_v39, %v12588_v24 }
 0x94c   : > { %v10378_v52 = vpop.f32.mrb[173].mxu1  ;;  %v10490_v46 = vpop.f32.mrb[189].mxu0 }
 0x94d   : > { %v10379_v29 = vadd.f32 %v10378_v52, %v10377_v21  ;;  %v10491_v20 = vadd.f32 %v10490_v46, %v10489_v6  ;;  %v10380_v28 = vpop.f32.mrb[174].mxu1  ;;  %v10492_v1 = vpop.f32.mrb[190].mxu0  ;;  %4771 = vadd.xlane.f32.xlu0 %v13381_v10  ;;  %v13385_v44 = vadd.f32 %v4630_v54, %v12593_v32 }
 0x94e   : > { %v10381_v17 = vpop.f32.mrb[175].mxu1  ;;  %v10493_v26 = vpop.f32.mrb[191].mxu0 }
 0x94f   : > { %v4474_v51 = vadd.f32 %v10379_v29, %v13336_v15  ;;  %v10382_v22 = vadd.f32 %v10381_v17, %v10380_v28  ;;  %v10494_v18 = vadd.f32 %v10493_v26, %v10492_v1  ;;  %4773 = vadd.xlane.f32.xlu1 %v13385_v44  ;;  %v14959_v1 = vld [vmem:[#allocation13_spill] sm:$0xff]  ;;  %v14960_v26 = vld [vmem:[#allocation14_spill] sm:$0xff] }
 0x951   : > { %v4635_v24 = vadd.f32 %v10491_v20, %v4474_v51  ;;  %v4477_v30 = vadd.f32 %v10382_v22, %v13336_v15 }
 0x953   : > { %v4638_v60 = vadd.f32 %v10494_v18, %v4477_v30  ;;  %v10383_v40 = vpop.f32.mrb[176].mxu1  ;;  %v10495_v34 = vpop.f32.mrb[192].mxu0  ;;  %v13391_v2 = vadd.f32 %v4635_v24, %v12597_v58 }
 0x954   : > { %v10384_v33 = vpop.f32.mrb[177].mxu1  ;;  %v10496_v32 = vpop.f32.mrb[193].mxu0 }
 0x955   : > { %v10385_v53 = vadd.f32 %v10384_v33, %v10383_v40  ;;  %v10497_v61 = vadd.f32 %v10496_v32, %v10495_v34  ;;  %v10386_v8 = vpop.f32.mrb[178].mxu1  ;;  %v10498_v43 = vpop.f32.mrb[194].mxu0  ;;  %4775 = vadd.xlane.f32.xlu0 %v13391_v2  ;;  %v13395_v27 = vadd.f32 %v4638_v60, %v12602_v0 }
 0x956   : > { %v10387_v7 = vpop.f32.mrb[179].mxu1  ;;  %v10499_v41 = vpop.f32.mrb[195].mxu0 }
 0x957   : > { %v4482_v63 = vadd.f32 %v10385_v53, %v13336_v15  ;;  %v10388_v11 = vadd.f32 %v10387_v7, %v10386_v8  ;;  %v10500_v57 = vadd.f32 %v10499_v41, %v10498_v43  ;;  %4777 = vadd.xlane.f32.xlu1 %v13395_v27 }
 0x959   : > { %v4643_v58 = vadd.f32 %v10497_v61, %v4482_v63  ;;  %v4485_v35 = vadd.f32 %v10388_v11, %v13336_v15 }
 0x95b   : > { %v4646_v4 = vadd.f32 %v10500_v57, %v4485_v35  ;;  %v10389_v31 = vpop.f32.mrb[180].mxu1  ;;  %v10501_v36 = vpop.f32.mrb[196].mxu0  ;;  %v13401_v13 = vadd.f32 %v4643_v58, %v12608_v38  ;;  %v14961_v57 = vld [vmem:[#allocation15_spill] sm:$0xff] }
 0x95c   : > { %v10390_v9 = vpop.f32.mrb[181].mxu1  ;;  %v10502_v0 = vpop.f32.mrb[197].mxu0 }
 0x95d   : > { %v10391_v5 = vadd.f32 %v10390_v9, %v10389_v31  ;;  %v10503_v55 = vadd.f32 %v10502_v0, %v10501_v36  ;;  %v10392_v39 = vpop.f32.mrb[182].mxu1  ;;  %v10504_v42 = vpop.f32.mrb[198].mxu0  ;;  %4779 = vadd.xlane.f32.xlu0 %v13401_v13  ;;  %v13405_v54 = vadd.f32 %v4646_v4, %v12613_v50 }
 0x95e   : > { %v10393_v21 = vpop.f32.mrb[183].mxu1  ;;  %v10505_v6 = vpop.f32.mrb[199].mxu0 }
 0x95f   : > { %v4490_v52 = vadd.f32 %v10391_v5, %v13336_v15  ;;  %v10394_v46 = vadd.f32 %v10393_v21, %v10392_v39  ;;  %v10506_v29 = vadd.f32 %v10505_v6, %v10504_v42  ;;  %4781 = vadd.xlane.f32.xlu1 %v13405_v54  ;;  %v14962_v5 = vld [vmem:[#allocation16_spill] sm:$0xff] }
 0x961   : > { %v4651_v38 = vadd.f32 %v10503_v55, %v4490_v52  ;;  %v4493_v20 = vadd.f32 %v10394_v46, %v13336_v15 }
 0x963   : > { %v4654_v28 = vadd.f32 %v10506_v29, %v4493_v20  ;;  %v13411_v17 = vadd.f32 %v4651_v38, %v14959_v1  ;;  %v14963_v20 = vld [vmem:[#allocation17_spill] sm:$0xff]  ;;  %v14964_v1 = vld [vmem:[#allocation18_spill] sm:$0xff] }
 0x965   : > { %4783 = vadd.xlane.f32.xlu0 %v13411_v17  ;;  %v13415_v50 = vadd.f32 %v4654_v28, %v14960_v26 }
 0x967   : > { %4785 = vadd.xlane.f32.xlu1 %v13415_v50 }
 0x99c   : > { %v10395_v51 = vpop.f32.mrb[184].mxu1  ;;  %v10507_v22 = vpop.f32.mrb[200].mxu0 }
 0x99d   : > { %v10396_v18 = vpop.f32.mrb[185].mxu1  ;;  %v10508_v24 = vpop.f32.mrb[201].mxu0 }
 0x99e   : > { %v10397_v30 = vadd.f32 %v10396_v18, %v10395_v51  ;;  %v10509_v60 = vadd.f32 %v10508_v24, %v10507_v22  ;;  %v10398_v40 = vpop.f32.mrb[186].mxu1  ;;  %v10510_v34 = vpop.f32.mrb[202].mxu0 }
 0x99f   : > { %v10399_v33 = vpop.f32.mrb[187].mxu1  ;;  %v10511_v32 = vpop.f32.mrb[203].mxu0 }
 0x9a0   : > { %v4498_v53 = vadd.f32 %v10397_v30, %v13336_v15  ;;  %v10400_v61 = vadd.f32 %v10399_v33, %v10398_v40  ;;  %v10512_v8 = vadd.f32 %v10511_v32, %v10510_v34 }
 0x9a2   : > { %v4659_v43 = vadd.f32 %v10509_v60, %v4498_v53  ;;  %v4501_v7 = vadd.f32 %v10400_v61, %v13336_v15 }
 0x9a4   : > { %v4662_v41 = vadd.f32 %v10512_v8, %v4501_v7  ;;  %v10401_v63 = vpop.f32.mrb[188].mxu1  ;;  %v10513_v11 = vpop.f32.mrb[204].mxu0  ;;  %v13421_v58 = vadd.f32 %v4659_v43, %v14961_v57 }
 0x9a5   : > { %v10402_v35 = vpop.f32.mrb[189].mxu1  ;;  %v10514_v4 = vpop.f32.mrb[205].mxu0 }
 0x9a6   : > { %v10403_v31 = vadd.f32 %v10402_v35, %v10401_v63  ;;  %v10515_v36 = vadd.f32 %v10514_v4, %v10513_v11  ;;  %v10404_v9 = vpop.f32.mrb[190].mxu1  ;;  %v10516_v0 = vpop.f32.mrb[206].mxu0  ;;  %4787 = vadd.xlane.f32.xlu0 %v13421_v58  ;;  %v13425_v55 = vadd.f32 %v4662_v41, %v14962_v5  ;;  %v5239_v4 = vld [vmem:[%s14837_s15 + $0x40] sm:$0xff] }
 0x9a7   : > { %v10405_v39 = vpop.f32.mrb[191].mxu1  ;;  %v10517_v42 = vpop.f32.mrb[207].mxu0 }
 0x9a8   : > { %v4506_v21 = vadd.f32 %v10403_v31, %v13336_v15  ;;  %v10406_v6 = vadd.f32 %v10405_v39, %v10404_v9  ;;  %v10518_v52 = vadd.f32 %v10517_v42, %v10516_v0  ;;  %4789 = vadd.xlane.f32.xlu1 %v13425_v55  ;;  %v5232_v31 = vld [vmem:[%s14837_s15 + $0x8] sm:$0xff] }
 0x9aa   : > { %v4667_v46 = vadd.f32 %v10515_v36, %v4506_v21  ;;  %v4509_v29 = vadd.f32 %v10406_v6, %v13336_v15 }
 0x9ac   : > { %v4670_v38 = vadd.f32 %v10518_v52, %v4509_v29  ;;  %v13431_v28 = vadd.f32 %v4667_v46, %v14963_v20  ;;  %v14965_v20 = vld [vmem:[#allocation19_spill] sm:$0xff] }
 0x9ae   : > { %4791 = vadd.xlane.f32.xlu0 %v13431_v28  ;;  %v13435_v26 = vadd.f32 %v4670_v38, %v14964_v1 }
 0x9b0   : > { %4793 = vadd.xlane.f32.xlu1 %v13435_v26 }
 0x9ba   : > { %v4756_v51 = vpop.xlane.xlu0 %4755 }
 0x9bb   : > { %v4819_v22 = vmul.f32 0.0078125, %v4756_v51  ;;  %v10407_v18 = vpop.f32.mrb[192].mxu1  ;;  %v10519_v24 = vpop.f32.mrb[208].mxu0 }
 0x9bc   : > { %v10408_v30 = vpop.f32.mrb[193].mxu1  ;;  %v10520_v60 = vpop.f32.mrb[209].mxu0 }
 0x9bd   : > { %v13439_v40 = vsub.f32 %v13341_v59, %v4819_v22  ;;  %v10409_v34 = vadd.f32 %v10408_v30, %v10407_v18  ;;  %v10521_v33 = vadd.f32 %v10520_v60, %v10519_v24  ;;  %v4758_v32 = vpop.xlane.xlu1 %4757  ;;  %v10410_v53 = vpop.f32.mrb[194].mxu1  ;;  %v5231_v59 = vld [vmem:[%s14837_s15] sm:$0xff]  ;;  %v5248_v30 = vld [vmem:[%s14837_s15 + $0x88] sm:$0xff] }
 0x9be   : > { %v4820_v61 = vmul.f32 0.0078125, %v4758_v32  ;;  %v10522_v8 = vpop.f32.mrb[210].mxu0  ;;  %v10411_v43 = vpop.f32.mrb[195].mxu1  ;;  %v9571_v0 = vcombine.high %v5231_v59, %v5239_v4  ;;  %v9570_v42 = vcombine.low %v5231_v59, %v5239_v4  ;;  %v5247_v18 = vld [vmem:[%s14837_s15 + $0x80] sm:$0xff] }
 0x9bf   : > { %v4514_v7 = vadd.f32 %v10409_v34, %v13336_v15  ;;  %v10412_v41 = vadd.f32 %v10411_v43, %v10410_v53  ;;  %v10523_v63 = vpop.f32.mrb[211].mxu0  ;;  %v4883_v11 = vmul.f32 %v13439_v40, %v13439_v40  ;;  %v5255_v24 = vld [vmem:[%s14837_s15 + $0xc0] sm:$0xff]  ;;  %v5256_v43 = vld [vmem:[%s14837_s15 + $0xc8] sm:$0xff] }
 0x9c0   : > { %v13445_v57 = vsub.f32 %v13345_v62, %v4820_v61  ;;  %v10524_v35 = vadd.f32 %v10523_v63, %v10522_v8  ;;  %v5240_v62 = vld [vmem:[%s14837_s15 + $0x48] sm:$0xff]  ;;  %5999 = vmatprep.subr.bf16.mxu1 %v9571_v0  ;;  %v14966_v61 = vld [vmem:[#allocation20_spill] sm:$0xff] }
 0x9c1   : > { %v4675_v36 = vadd.f32 %v10521_v33, %v4514_v7  ;;  %v4517_v9 = vadd.f32 %v10412_v41, %v13336_v15  ;;  %4915 = vadd.xlane.f32.xlu0 %v4883_v11  ;;  %v9572_v21 = vcombine.low %v5232_v31, %v5240_v62  ;;  %v9573_v6 = vcombine.high %v5232_v31, %v5240_v62 }
 0x9c2   : > { %v4760_v5 = vpop.xlane.xlu0 %4759  ;;  %v4884_v39 = vmul.f32 %v13445_v57, %v13445_v57  ;;  %6000 = vmatpush1.bf16.msra.mxu1 %v9570_v42  ;;  %v9587_v11 = vcombine.high %v5247_v18, %v5255_v24 }
 0x9c3   : > { %v4678_v52 = vadd.f32 %v10524_v35, %v4517_v9  ;;  %v4821_v46 = vmul.f32 0.0078125, %v4760_v5  ;;  %v10413_v29 = vpop.f32.mrb[196].mxu1  ;;  %v10525_v38 = vpop.f32.mrb[212].mxu0  ;;  %v13463_v1 = vadd.f32 %v4675_v36, %v14965_v20  ;;  %6192 = vmatprep.subr.bf16.mxu0 %v9573_v6  ;;  %v9588_v35 = vcombine.low %v5248_v30, %v5256_v43 }
 0x9c4   : > { %4917 = vadd.xlane.f32.xlu1 %v4884_v39  ;;  %v10414_v51 = vpop.f32.mrb[197].mxu1  ;;  %v10526_v22 = vpop.f32.mrb[213].mxu0  ;;  %6193 = vmatpush1.bf16.msra.mxu0 %v9572_v21  ;;  %v9589_v9 = vcombine.high %v5248_v30, %v5256_v43 }
 0x9c5   : > { %v13475_v60 = vsub.f32 %v13351_v19, %v4821_v46  ;;  %v10415_v34 = vadd.f32 %v10414_v51, %v10413_v29  ;;  %v10527_v33 = vadd.f32 %v10526_v22, %v10525_v38  ;;  %v4762_v32 = vpop.xlane.xlu1 %4761  ;;  %v10416_v53 = vpop.f32.mrb[198].mxu1  ;;  %4795 = vadd.xlane.f32.xlu0 %v13463_v1  ;;  %v13479_v8 = vadd.f32 %v4678_v52, %v14966_v61  ;;  %v14967_v29 = vld [vmem:[#allocation21_spill] sm:$0xff] }
 0x9c6   : > { %v4822_v7 = vmul.f32 0.0078125, %v4762_v32  ;;  %v10528_v41 = vpop.f32.mrb[214].mxu0  ;;  %v10417_v63 = vpop.f32.mrb[199].mxu1  ;;  %v9586_v19 = vcombine.low %v5247_v18, %v5255_v24  ;;  %6001 = vmatprep.subr.bf16.mxu1 %v9587_v11  ;;  %6194 = vmatprep.subr.bf16.mxu0 %v9589_v9 }
 0x9c7   : > { %v4522_v59 = vadd.f32 %v10415_v34, %v13336_v15  ;;  %v10418_v4 = vadd.f32 %v10417_v63, %v10416_v53  ;;  %v10529_v31 = vpop.f32.mrb[215].mxu0  ;;  %v4885_v36 = vmul.f32 %v13475_v60, %v13475_v60 }
 0x9c8   : > { %v13488_v0 = vsub.f32 %v13355_v14, %v4822_v7  ;;  %v10530_v62 = vadd.f32 %v10529_v31, %v10528_v41  ;;  %4797 = vadd.xlane.f32.xlu1 %v13479_v8  ;;  %6002 = vmatpush1.bf16.msra.mxu1 %v9586_v19  ;;  %v5263_v7 = vld [vmem:[%s14837_s15 + $0x100] sm:$0xff]  ;;  %v5264_v41 = vld [vmem:[%s14837_s15 + $0x108] sm:$0xff] }
 0x9c9   : > { %v4683_v5 = vadd.f32 %v10527_v33, %v4522_v59  ;;  %v4525_v39 = vadd.f32 %v10418_v4, %v13336_v15  ;;  %4919 = vadd.xlane.f32.xlu0 %v4885_v36  ;;  %6195 = vmatpush1.bf16.msra.mxu0 %v9588_v35  ;;  %v14968_v33 = vld [vmem:[#allocation22_spill] sm:$0xff] }
 0x9ca   : > { %v4764_v42 = vpop.xlane.xlu0 %4763  ;;  %v4886_v21 = vmul.f32 %v13488_v0, %v13488_v0  ;;  %v5272_v4 = vld [vmem:[%s14837_s15 + $0x148] sm:$0xff] }
 0x9cb   : > { %v4686_v6 = vadd.f32 %v10530_v62, %v4525_v39  ;;  %v4823_v52 = vmul.f32 0.0078125, %v4764_v42  ;;  %v10419_v46 = vpop.f32.mrb[200].mxu1  ;;  %v10531_v14 = vpop.f32.mrb[216].mxu0  ;;  %v13495_v38 = vadd.f32 %v4683_v5, %v14967_v29  ;;  %v9604_v62 = vcombine.low %v5264_v41, %v5272_v4 }
 0x9cc   : > { %4921 = vadd.xlane.f32.xlu1 %v4886_v21  ;;  %v10420_v20 = vpop.f32.mrb[201].mxu1  ;;  %v10532_v51 = vpop.f32.mrb[217].mxu0  ;;  %v9605_v42 = vcombine.high %v5264_v41, %v5272_v4  ;;  %v5295_v4 = vld [vmem:[%s14837_s15 + $0x200] sm:$0xff] }
 0x9cd   : > { %v13498_v22 = vsub.f32 %v13361_v49, %v4823_v52  ;;  %v10421_v18 = vadd.f32 %v10420_v20, %v10419_v46  ;;  %v10533_v24 = vadd.f32 %v10532_v51, %v10531_v14  ;;  %v4766_v30 = vpop.xlane.xlu1 %4765  ;;  %v10422_v34 = vpop.f32.mrb[202].mxu1  ;;  %4799 = vadd.xlane.f32.xlu0 %v13495_v38  ;;  %v13502_v32 = vadd.f32 %v4686_v6, %v14968_v33  ;;  %v5271_v49 = vld [vmem:[%s14837_s15 + $0x140] sm:$0xff]  ;;  %v5280_v46 = vld [vmem:[%s14837_s15 + $0x188] sm:$0xff] }
 0x9ce   : > { %v4824_v53 = vmul.f32 0.0078125, %v4766_v30  ;;  %v10534_v61 = vpop.f32.mrb[218].mxu0  ;;  %v10423_v43 = vpop.f32.mrb[203].mxu1  ;;  %v9603_v59 = vcombine.high %v5263_v7, %v5271_v49  ;;  %v9602_v9 = vcombine.low %v5263_v7, %v5271_v49  ;;  %v5287_v52 = vld [vmem:[%s14837_s15 + $0x1c0] sm:$0xff]  ;;  %6196 = vmatprep.subr.bf16.mxu0 %v9605_v42  ;;  %v5288_v30 = vld [vmem:[%s14837_s15 + $0x1c8] sm:$0xff] }
 0x9cf   : > { %v4530_v63 = vadd.f32 %v10421_v18, %v13336_v15  ;;  %v10424_v19 = vadd.f32 %v10423_v43, %v10422_v34  ;;  %v10535_v11 = vpop.f32.mrb[219].mxu0  ;;  %v4887_v35 = vmul.f32 %v13498_v22, %v13498_v22  ;;  %6197 = vmatpush1.bf16.msra.mxu0 %v9604_v62  ;;  %v9621_v43 = vcombine.high %v5280_v46, %v5288_v30  ;;  %v5304_v42 = vld [vmem:[%s14837_s15 + $0x248] sm:$0xff] }
 0x9d0   : > { %v13520_v31 = vsub.f32 %v13365_v45, %v4824_v53  ;;  %v10536_v36 = vadd.f32 %v10535_v11, %v10534_v61  ;;  %4801 = vadd.xlane.f32.xlu1 %v13502_v32  ;;  %6003 = vmatprep.subr.bf16.mxu1 %v9603_v59  ;;  %v5279_v45 = vld [vmem:[%s14837_s15 + $0x180] sm:$0xff]  ;;  %v9620_v61 = vcombine.low %v5280_v46, %v5288_v30  ;;  %v5312_v30 = vld [vmem:[%s14837_s15 + $0x288] sm:$0xff] }
 0x9d1   : > { %v4691_v5 = vadd.f32 %v10533_v24, %v4530_v63  ;;  %v4533_v39 = vadd.f32 %v10424_v19, %v13336_v15  ;;  %4923 = vadd.xlane.f32.xlu0 %v4887_v35  ;;  %6004 = vmatpush1.bf16.msra.mxu1 %v9602_v9  ;;  %v9619_v24 = vcombine.high %v5279_v45, %v5287_v52 }
 0x9d2   : > { %v4768_v21 = vpop.xlane.xlu0 %4767  ;;  %v4888_v6 = vmul.f32 %v13520_v31, %v13520_v31  ;;  %v9618_v53 = vcombine.low %v5279_v45, %v5287_v52  ;;  %6198 = vmatprep.subr.bf16.mxu0 %v9621_v43 }
 0x9d3   : > { %v4694_v14 = vadd.f32 %v10536_v36, %v4533_v39  ;;  %v4825_v29 = vmul.f32 0.0078125, %v4768_v21  ;;  %v10425_v20 = vpop.f32.mrb[204].mxu1  ;;  %v10537_v51 = vpop.f32.mrb[220].mxu0  ;;  %v13536_v18 = vadd.f32 %v4691_v5, %v12736_v48  ;;  %6005 = vmatprep.subr.bf16.mxu1 %v9619_v24  ;;  %v5296_v39 = vld [vmem:[%s14837_s15 + $0x208] sm:$0xff]  ;;  %6199 = vmatpush1.bf16.msra.mxu0 %v9620_v61  ;;  %v5319_v24 = vld [vmem:[%s14837_s15 + $0x2c0] sm:$0xff] }
 0x9d4   : > { %4925 = vadd.xlane.f32.xlu1 %v4888_v6  ;;  %v10426_v34 = vpop.f32.mrb[205].mxu1  ;;  %v10538_v33 = vpop.f32.mrb[221].mxu0 }
 0x9d5   : > { %v13542_v7 = vsub.f32 %v13371_v23, %v4825_v29  ;;  %v10427_v49 = vadd.f32 %v10426_v34, %v10425_v20  ;;  %v10539_v41 = vadd.f32 %v10538_v33, %v10537_v51  ;;  %v4770_v48 = vpop.xlane.xlu1 %4769  ;;  %v10428_v63 = vpop.f32.mrb[206].mxu1  ;;  %4803 = vadd.xlane.f32.xlu0 %v13536_v18  ;;  %v13546_v19 = vadd.f32 %v4694_v14, %v12755_v25  ;;  %v5303_v23 = vld [vmem:[%s14837_s15 + $0x240] sm:$0xff] }
 0x9d6   : > { %v4826_v11 = vmul.f32 0.0078125, %v4770_v48  ;;  %v10540_v35 = vpop.f32.mrb[222].mxu0  ;;  %v10429_v59 = vpop.f32.mrb[207].mxu1  ;;  %6006 = vmatpush1.bf16.msra.mxu1 %v9618_v53  ;;  %v9635_v5 = vcombine.high %v5295_v4, %v5303_v23  ;;  %v9634_v45 = vcombine.low %v5295_v4, %v5303_v23  ;;  %v9636_v20 = vcombine.low %v5296_v39, %v5304_v42 }
 0x9d7   : > { %v4538_v36 = vadd.f32 %v10427_v49, %v13336_v15  ;;  %v10430_v9 = vadd.f32 %v10429_v59, %v10428_v63  ;;  %v10541_v62 = vpop.f32.mrb[223].mxu0  ;;  %v4889_v25 = vmul.f32 %v13542_v7, %v13542_v7  ;;  %v9637_v51 = vcombine.high %v5296_v39, %v5304_v42 }
 0x9d8   : > { %v13564_v21 = vsub.f32 %v13375_v47, %v4826_v11  ;;  %v10542_v6 = vadd.f32 %v10541_v62, %v10540_v35  ;;  %4805 = vadd.xlane.f32.xlu1 %v13546_v19  ;;  %6007 = vmatprep.subr.bf16.mxu1 %v9635_v5  ;;  %v5311_v47 = vld [vmem:[%s14837_s15 + $0x280] sm:$0xff] }
 0x9d9   : > { %v4699_v52 = vadd.f32 %v10539_v41, %v4538_v36  ;;  %v4541_v46 = vadd.f32 %v10430_v9, %v13336_v15  ;;  %4927 = vadd.xlane.f32.xlu0 %v4889_v25  ;;  %v9651_v49 = vcombine.high %v5311_v47, %v5319_v24  ;;  %v5320_v41 = vld [vmem:[%s14837_s15 + $0x2c8] sm:$0xff]  ;;  %6200 = vmatprep.subr.bf16.mxu0 %v9637_v51  ;;  %v14969_v9 = vld [vmem:[#allocation23_spill] sm:$0xff] }
 0x9da   : > { %v4772_v14 = vpop.xlane.xlu0 %4771  ;;  %v4890_v29 = vmul.f32 %v13564_v21, %v13564_v21  ;;  %6008 = vmatpush1.bf16.msra.mxu1 %v9634_v45  ;;  %v9650_v11 = vcombine.low %v5311_v47, %v5319_v24  ;;  %v9653_v35 = vcombine.high %v5312_v30, %v5320_v41  ;;  %6201 = vmatpush1.bf16.msra.mxu0 %v9636_v20  ;;  %v5328_v45 = vld [vmem:[%s14837_s15 + $0x308] sm:$0xff] }
 0x9db   : > { %v4702_v34 = vadd.f32 %v10542_v6, %v4541_v46  ;;  %v4827_v33 = vmul.f32 0.0078125, %v4772_v14  ;;  %v10431_v53 = vpop.f32.mrb[208].mxu1  ;;  %v10543_v61 = vpop.f32.mrb[224].mxu0  ;;  %v13580_v43 = vadd.f32 %v4699_v52, %v12777_v56  ;;  %6009 = vmatprep.subr.bf16.mxu1 %v9651_v49  ;;  %v9652_v42 = vcombine.low %v5312_v30, %v5320_v41  ;;  %v5335_v6 = vld [vmem:[%s14837_s15 + $0x340] sm:$0xff]  ;;  %v5336_v20 = vld [vmem:[%s14837_s15 + $0x348] sm:$0xff] }
 0x9dc   : > { %4929 = vadd.xlane.f32.xlu1 %v4890_v29  ;;  %v10432_v48 = vpop.f32.mrb[209].mxu1  ;;  %v10544_v63 = vpop.f32.mrb[225].mxu0  ;;  %6202 = vmatprep.subr.bf16.mxu0 %v9653_v35  ;;  %v9668_v41 = vcombine.low %v5328_v45, %v5336_v20 }
 0x9dd   : > { %v13586_v59 = vsub.f32 %v13381_v10, %v4827_v33  ;;  %v10433_v4 = vadd.f32 %v10432_v48, %v10431_v53  ;;  %v10545_v23 = vadd.f32 %v10544_v63, %v10543_v61  ;;  %v4774_v36 = vpop.xlane.xlu1 %4773  ;;  %v10434_v56 = vpop.f32.mrb[210].mxu1  ;;  %4807 = vadd.xlane.f32.xlu0 %v13580_v43  ;;  %v13590_v62 = vadd.f32 %v4702_v34, %v14969_v9  ;;  %v5327_v10 = vld [vmem:[%s14837_s15 + $0x300] sm:$0xff]  ;;  %v5344_v63 = vld [vmem:[%s14837_s15 + $0x388] sm:$0xff] }
 0x9de   : > { %v4828_v25 = vmul.f32 0.0078125, %v4774_v36  ;;  %v10546_v5 = vpop.f32.mrb[226].mxu0  ;;  %v10435_v39 = vpop.f32.mrb[211].mxu1  ;;  %6010 = vmatpush1.bf16.msra.mxu1 %v9650_v11  ;;  %v9666_v24 = vcombine.low %v5327_v10, %v5335_v6  ;;  %v9667_v30 = vcombine.high %v5327_v10, %v5335_v6  ;;  %v9669_v53 = vcombine.high %v5328_v45, %v5336_v20  ;;  %6203 = vmatpush1.bf16.msra.mxu0 %v9652_v42  ;;  %v5351_v48 = vld [vmem:[%s14837_s15 + $0x3c0] sm:$0xff]  ;;  %v5352_v9 = vld [vmem:[%s14837_s15 + $0x3c8] sm:$0xff] }
 0x9df   : > { %v4546_v52 = vadd.f32 %v10433_v4, %v13336_v15  ;;  %v10436_v46 = vadd.f32 %v10435_v39, %v10434_v56  ;;  %v10547_v14 = vpop.f32.mrb[227].mxu0  ;;  %v4891_v29 = vmul.f32 %v13586_v59, %v13586_v59  ;;  %v9685_v42 = vcombine.high %v5344_v63, %v5352_v9 }
 0x9e0   : > { %v13608_v51 = vsub.f32 %v13385_v44, %v4828_v25  ;;  %v10548_v47 = vadd.f32 %v10547_v14, %v10546_v5  ;;  %4809 = vadd.xlane.f32.xlu1 %v13590_v62  ;;  %6011 = vmatprep.subr.bf16.mxu1 %v9667_v30  ;;  %v5343_v44 = vld [vmem:[%s14837_s15 + $0x380] sm:$0xff] }
 0x9e1   : > { %v4707_v34 = vadd.f32 %v10545_v23, %v4546_v52  ;;  %v4549_v33 = vadd.f32 %v10436_v46, %v13336_v15  ;;  %4931 = vadd.xlane.f32.xlu0 %v4891_v29  ;;  %6204 = vmatprep.subr.bf16.mxu0 %v9669_v53  ;;  %v9683_v56 = vcombine.high %v5343_v44, %v5351_v48 }
 0x9e2   : > { %v4776_v61 = vpop.xlane.xlu0 %4775  ;;  %v4892_v49 = vmul.f32 %v13608_v51, %v13608_v51  ;;  %6012 = vmatpush1.bf16.msra.mxu1 %v9666_v24  ;;  %v9682_v39 = vcombine.low %v5343_v44, %v5351_v48  ;;  %6205 = vmatpush1.bf16.msra.mxu0 %v9668_v41 }
 0x9e3   : > { %v4710_v11 = vadd.f32 %v10548_v47, %v4549_v33  ;;  %v4829_v35 = vmul.f32 0.0078125, %v4776_v61  ;;  %v10549_v4 = vpop.f32.mrb[228].mxu0  ;;  %v10437_v23 = vpop.f32.mrb[212].mxu1  ;;  %v13624_v36 = vadd.f32 %v4707_v34, %v12824_v16  ;;  %6013 = vmatprep.subr.bf16.mxu1 %v9683_v56  ;;  %v9684_v47 = vcombine.low %v5344_v63, %v5352_v9  ;;  %6206 = vmatprep.subr.bf16.mxu0 %v9685_v42 }
 0x9e4   : > { %4933 = vadd.xlane.f32.xlu1 %v4892_v49  ;;  %v10550_v25 = vpop.f32.mrb[229].mxu0  ;;  %v4778_v5 = vpop.xlane.xlu1 %4777 }
 0x9e5   : > { %v13630_v10 = vsub.f32 %v13391_v2, %v4829_v35  ;;  %v10551_v6 = vadd.f32 %v10550_v25, %v10549_v4  ;;  %v4830_v45 = vmul.f32 0.0078125, %v4778_v5  ;;  %v10438_v52 = vpop.f32.mrb[213].mxu1  ;;  %v10552_v16 = vpop.f32.mrb[230].mxu0  ;;  %4811 = vadd.xlane.f32.xlu0 %v13624_v36  ;;  %v13634_v46 = vadd.f32 %v4710_v11, %v12843_v12  ;;  %v14970_v4 = vld [vmem:[#allocation24_spill] sm:$0xff] }
 0x9e6   : > { %v10439_v14 = vadd.f32 %v10438_v52, %v10437_v23  ;;  %v10440_v29 = vpop.f32.mrb[214].mxu1  ;;  %v10553_v20 = vpop.f32.mrb[231].mxu0  ;;  %6014 = vmatpush1.bf16.msra.mxu1 %v9682_v39  ;;  %6207 = vmatpush1.bf16.msra.mxu0 %v9684_v47 }
 0x9e7   : > { %v13637_v24 = vsub.f32 %v13395_v27, %v4830_v45  ;;  %v10441_v2 = vpop.f32.mrb[215].mxu1  ;;  %v10554_v30 = vadd.f32 %v10553_v20, %v10552_v16  ;;  %v4893_v34 = vmul.f32 %v13630_v10, %v13630_v10  ;;  %v13677_v45 = vld [vmem:[%s14837_s15 + $0x10] sm:$0xff] }
 0x9e8   : > { %v4554_v33 = vadd.f32 %v10439_v14, %v13336_v15  ;;  %v10442_v12 = vadd.f32 %v10441_v2, %v10440_v29  ;;  %4813 = vadd.xlane.f32.xlu1 %v13634_v46  ;;  %v13696_v14 = vld [vmem:[%s14837_s15 + $0x58] sm:$0xff] }
 0x9e9   : > { %4935 = vadd.xlane.f32.xlu0 %v4893_v34  ;;  %v4894_v53 = vmul.f32 %v13637_v24, %v13637_v24 }
 0x9ea   : > { %v4557_v61 = vadd.f32 %v10442_v12, %v13336_v15  ;;  %v4780_v27 = vpop.xlane.xlu0 %4779  ;;  %v4715_v49 = vadd.f32 %v10551_v6, %v4554_v33 }
 0x9eb   : > { %v4831_v41 = vmul.f32 0.0078125, %v4780_v27 }
 0x9ec   : > { %v4718_v44 = vadd.f32 %v10554_v30, %v4557_v61  ;;  %4937 = vadd.xlane.f32.xlu1 %v4894_v53  ;;  %v4782_v48 = vpop.xlane.xlu1 %4781  ;;  %v13647_v63 = vadd.f32 %v4715_v49, %v12856_v3 }
 0x9ed   : > { %v13650_v11 = vsub.f32 %v13401_v13, %v4831_v41  ;;  %v4832_v35 = vmul.f32 0.0078125, %v4782_v48 }
 0x9ee   : > { %4815 = vadd.xlane.f32.xlu0 %v13647_v63  ;;  %v13654_v23 = vadd.f32 %v4718_v44, %v14970_v4 }
 0x9ef   : > { %v13657_v15 = vsub.f32 %v13405_v54, %v4832_v35  ;;  %v4895_v56 = vmul.f32 %v13650_v11, %v13650_v11 }
 0x9f0   : > { %4817 = vadd.xlane.f32.xlu1 %v13654_v23 }
 0x9f1   : > { %v4896_v3 = vmul.f32 %v13657_v15, %v13657_v15 }
 0x9f2   : > { %4939 = vadd.xlane.f32.xlu0 %v4895_v56  ;;  %v4784_v13 = vpop.xlane.xlu0 %4783 }
 0x9f3   : > { %v4833_v9 = vmul.f32 0.0078125, %v4784_v13 }
 0x9f4   : > { %4941 = vadd.xlane.f32.xlu1 %v4896_v3  ;;  %v4786_v25 = vpop.xlane.xlu1 %4785 }
 0x9f5   : > { %v13665_v5 = vsub.f32 %v13411_v17, %v4833_v9  ;;  %v4834_v39 = vmul.f32 0.0078125, %v4786_v25  ;;  %v13682_v17 = vld [vmem:[%s14837_s15 + $0x50] sm:$0xff] }
 0x9f6   : > { %v9574_v52 = vcombine.low %v13677_v45, %v13682_v17  ;;  %v9575_v16 = vcombine.high %v13677_v45, %v13682_v17 }
 0x9f7   : > { %v13668_v54 = vsub.f32 %v13415_v50, %v4834_v39  ;;  %v4897_v42 = vmul.f32 %v13665_v5, %v13665_v5  ;;  %v13687_v50 = vld [vmem:[%s14837_s15 + $0x18] sm:$0xff] }
 0x9f8   : > { %v9576_v29 = vcombine.low %v13687_v50, %v13696_v14  ;;  %v9577_v20 = vcombine.high %v13687_v50, %v13696_v14  ;;  %6385 = vmatprep.subr.bf16.mxu1 %v9575_v16 }
 0x9f9   : > { %4943 = vadd.xlane.f32.xlu0 %v4897_v42  ;;  %v4898_v6 = vmul.f32 %v13668_v54, %v13668_v54 }
 0x9fa   : > { %6578 = vmatprep.subr.bf16.mxu0 %v9577_v20 }
 0x9fb   : > { %4945 = vadd.xlane.f32.xlu1 %v4898_v6 }
 0xa33   : > { %v4788_v47 = vpop.xlane.xlu0 %4787 }
 0xa34   : > { %v4835_v2 = vmul.f32 0.0078125, %v4788_v47 }
 0xa35   : > { %v4790_v30 = vpop.xlane.xlu1 %4789 }
 0xa36   : > { %v13703_v34 = vsub.f32 %v13421_v58, %v4835_v2  ;;  %v4836_v33 = vmul.f32 0.0078125, %v4790_v30 }
 0xa38   : > { %v13706_v12 = vsub.f32 %v13425_v55, %v4836_v33  ;;  %v4899_v53 = vmul.f32 %v13703_v34, %v13703_v34 }
 0xa3a   : > { %4947 = vadd.xlane.f32.xlu0 %v4899_v53  ;;  %v4900_v61 = vmul.f32 %v13706_v12, %v13706_v12 }
 0xa3b   : > { %v4792_v27 = vpop.xlane.xlu0 %4791 }
 0xa3c   : > { %v4837_v49 = vmul.f32 0.0078125, %v4792_v27  ;;  %4949 = vadd.xlane.f32.xlu1 %v4900_v61 }
 0xa3d   : > { %v4794_v41 = vpop.xlane.xlu1 %4793 }
 0xa3e   : > { %v13713_v44 = vsub.f32 %v13431_v28, %v4837_v49  ;;  %v4838_v58 = vmul.f32 0.0078125, %v4794_v41 }
 0xa40   : > { %v13716_v48 = vsub.f32 %v13435_v26, %v4838_v58  ;;  %v4901_v55 = vmul.f32 %v13713_v44, %v13713_v44 }
 0xa42   : > { %4951 = vadd.xlane.f32.xlu0 %v4901_v55  ;;  %v4902_v35 = vmul.f32 %v13716_v48, %v13716_v48 }
 0xa44   : > { %4953 = vadd.xlane.f32.xlu1 %v4902_v35 }
 0xa4e   : > { %v4916_v4 = vpop.xlane.xlu0 %4915 }
 0xa4f   : > { %v4979_v56 = vmul.f32 0.0078125, %v4916_v4 }
 0xa51   : > { %v5011_v3 = vadd.f32 1e-05, %v4979_v56  ;;  %v4918_v13 = vpop.xlane.xlu1 %4917 }
 0xa52   : > { %v4980_v9 = vmul.f32 0.0078125, %v4918_v13  ;;  %v4796_v25 = vpop.xlane.xlu0 %4795 }
 0xa53   : > { %11229 = vrsqrt.f32 %v5011_v3  ;;  %v4839_v28 = vmul.f32 0.0078125, %v4796_v25 }
 0xa54   : > { %v5012_v39 = vadd.f32 1e-05, %v4980_v9 }
 0xa55   : > { %v13723_v26 = vsub.f32 %v13463_v1, %v4839_v28  ;;  %v4798_v42 = vpop.xlane.xlu1 %4797 }
 0xa56   : > { %11231 = vrsqrt.f32 %v5012_v39  ;;  %v4840_v6 = vmul.f32 0.0078125, %v4798_v42  ;;  %v4920_v16 = vpop.xlane.xlu0 %4919 }
 0xa57   : > { %v4981_v20 = vmul.f32 0.0078125, %v4920_v16  ;;  %v4903_v47 = vmul.f32 %v13723_v26, %v13723_v26 }
 0xa58   : > { %v13728_v2 = vsub.f32 %v13479_v8, %v4840_v6  ;;  %v13738_v8 = vld [vmem:[%s14835_s13] ss:$0 sm:$0xff] }
 0xa59   : > { %v5013_v30 = vadd.f32 1e-05, %v4981_v20  ;;  %v4922_v33 = vpop.xlane.xlu1 %4921  ;;  %4955 = vadd.xlane.f32.xlu0 %v4903_v47 }
 0xa5a   : > { %v4982_v53 = vmul.f32 0.0078125, %v4922_v33  ;;  %v4800_v61 = vpop.xlane.xlu0 %4799  ;;  %v4904_v1 = vmul.f32 %v13728_v2, %v13728_v2 }
 0xa5b   : > { %11233 = vrsqrt.f32 %v5013_v30  ;;  %v4841_v27 = vmul.f32 0.0078125, %v4800_v61 }
 0xa5c   : > { %v5014_v49 = vadd.f32 1e-05, %v4982_v53  ;;  %4957 = vadd.xlane.f32.xlu1 %v4904_v1 }
 0xa5d   : > { %v11230_v41 = vpop.eup %11229  ;;  %v13733_v58 = vsub.f32 %v13495_v38, %v4841_v27  ;;  %v4802_v55 = vpop.xlane.xlu1 %4801  ;;  %v5249_v27 = vld [vmem:[%s14837_s15 + $0x90] sm:$0xff] }
 0xa5e   : > { %v5075_v35 = vmul.f32 %v11230_v41, %v13439_v40  ;;  %11235 = vrsqrt.f32 %v5014_v49  ;;  %v4842_v4 = vmul.f32 0.0078125, %v4802_v55  ;;  %v4924_v56 = vpop.xlane.xlu0 %4923  ;;  %v13751_v40 = vld [vmem:[%s14836_s14] ss:$0 sm:$0xff]  ;;  %v5257_v49 = vld [vmem:[%s14837_s15 + $0xd0] sm:$0xff] }
 0xa5f   : > { %v4983_v3 = vmul.f32 0.0078125, %v4924_v56  ;;  %v4905_v13 = vmul.f32 %v13733_v58, %v13733_v58 }
 0xa60   : > { %v11232_v9 = vpop.eup %11231  ;;  %v13744_v25 = vsub.f32 %v13502_v32, %v4842_v4  ;;  %v5113_v38 = vmul.f32 %v13738_v8, %v5075_v35  ;;  %v5250_v4 = vld [vmem:[%s14837_s15 + $0x98] sm:$0xff] }
 0xa61   : > { %v5076_v28 = vmul.f32 %v11232_v9, %v13445_v57  ;;  %v5015_v39 = vadd.f32 1e-05, %v4983_v3  ;;  %v4926_v42 = vpop.xlane.xlu1 %4925  ;;  %4959 = vadd.xlane.f32.xlu0 %v4905_v13 }
 0xa62   : > { %v4984_v6 = vmul.f32 0.0078125, %v4926_v42  ;;  %v4804_v16 = vpop.xlane.xlu0 %4803  ;;  %v4906_v20 = vmul.f32 %v13744_v25, %v13744_v25  ;;  %v5151_v33 = vadd.f32 %v13751_v40, %v5113_v38  ;;  %v9591_v38 = vcombine.high %v5249_v27, %v5257_v49 }
 0xa63   : > { %v5114_v32 = vmul.f32 %v13738_v8, %v5076_v28  ;;  %11237 = vrsqrt.f32 %v5015_v39  ;;  %v4843_v47 = vmul.f32 0.0078125, %v4804_v16 }
 0xa64   : > { %v5016_v30 = vadd.f32 1e-05, %v4984_v6  ;;  %4961 = vadd.xlane.f32.xlu1 %v4906_v20  ;;  %v5265_v20 = vld [vmem:[%s14837_s15 + $0x110] sm:$0xff] }
 0xa65   : > { %v11234_v57 = vpop.eup %11233  ;;  %v5152_v53 = vadd.f32 %v13751_v40, %v5114_v32  ;;  %v13759_v61 = vsub.f32 %v13536_v18, %v4843_v47  ;;  %v4806_v1 = vpop.xlane.xlu1 %4805  ;;  %v5258_v18 = vld [vmem:[%s14837_s15 + $0xd8] sm:$0xff] }
 0xa66   : > { %v5077_v41 = vmul.f32 %v11234_v57, %v13475_v60  ;;  %11239 = vrsqrt.f32 %v5016_v30  ;;  %v4844_v55 = vmul.f32 0.0078125, %v4806_v1  ;;  %v4928_v35 = vpop.xlane.xlu0 %4927  ;;  %v9593_v16 = vcombine.high %v5250_v4, %v5258_v18 }
 0xa67   : > { %v13774_v56 = vpack.c.bf16 %v5152_v53, %v5151_v33  ;;  %v4985_v3 = vmul.f32 0.0078125, %v4928_v35  ;;  %v4907_v13 = vmul.f32 %v13759_v61, %v13759_v61  ;;  %v9590_v33 = vcombine.low %v5249_v27, %v5257_v49  ;;  %v5274_v35 = vld [vmem:[%s14837_s15 + $0x158] sm:$0xff] }
 0xa68   : > { %v11236_v9 = vpop.eup %11235  ;;  %v13779_v60 = vsub.f32 %v13546_v19, %v4844_v55  ;;  %v5115_v28 = vmul.f32 %v13738_v8, %v5077_v41  ;;  %v5273_v19 = vld [vmem:[%s14837_s15 + $0x150] sm:$0xff]  ;;  %v9592_v1 = vcombine.low %v5250_v4, %v5258_v18  ;;  %v5266_v55 = vld [vmem:[%s14837_s15 + $0x118] sm:$0xff] }
 0xa69   : > { %v5078_v39 = vmul.f32 %v11236_v9, %v13488_v0  ;;  %v5017_v42 = vadd.f32 1e-05, %v4985_v3  ;;  %v4930_v6 = vpop.xlane.xlu1 %4929  ;;  %6032 = vmatmul.mubr.bf16.vlgmr.msra.gmra.mrb[216].mxu1 %v13774_v56  ;;  %6225 = vmatmul.mubr.bf16.vlgmr.msra.gmra.mrb[232].mxu0 %v13774_v56  ;;  %v9607_v41 = vcombine.high %v5265_v20, %v5273_v19 }
 0xa6a   : > { %v4986_v32 = vmul.f32 0.0078125, %v4930_v6  ;;  %4963 = vadd.xlane.f32.xlu0 %v4907_v13  ;;  %v4808_v47 = vpop.xlane.xlu0 %4807  ;;  %v4908_v0 = vmul.f32 %v13779_v60, %v13779_v60  ;;  %6041 = vmatprep.mubr.bf16.mxu1 %v14921_v37  ;;  %v5153_v45 = vadd.f32 %v13751_v40, %v5115_v28  ;;  %v9609_v13 = vcombine.high %v5266_v55, %v5274_v35 }
 0xa6b   : > { %v5116_v30 = vmul.f32 %v13738_v8, %v5078_v39  ;;  %11241 = vrsqrt.f32 %v5017_v42  ;;  %v4845_v57 = vmul.f32 0.0078125, %v4808_v47  ;;  %6234 = vmatprep.mubr.bf16.mxu0 %v14921_v37  ;;  %6386 = vmatpush1.bf16.msra.mxu1 %v9574_v52  ;;  %v9608_v6 = vcombine.low %v5266_v55, %v5274_v35 }
 0xa6c   : > { %v5018_v53 = vadd.f32 1e-05, %v4986_v32  ;;  %4965 = vadd.xlane.f32.xlu1 %v4908_v0  ;;  %6579 = vmatpush1.bf16.msra.mxu0 %v9576_v29 }
 0xa6d   : > { %v11238_v3 = vpop.eup %11237  ;;  %v5154_v17 = vadd.f32 %v13751_v40, %v5116_v30  ;;  %v13811_v52 = vsub.f32 %v13580_v43, %v4845_v57  ;;  %v4810_v50 = vpop.xlane.xlu1 %4809  ;;  %6387 = vmatprep.subr.bf16.mxu1 %v9591_v38  ;;  %6580 = vmatprep.subr.bf16.mxu0 %v9593_v16  ;;  %v9606_v38 = vcombine.low %v5265_v20, %v5273_v19 }
 0xa6e   : > { %v5079_v14 = vmul.f32 %v11238_v3, %v13498_v22  ;;  %11243 = vrsqrt.f32 %v5018_v53  ;;  %v4846_v29 = vmul.f32 0.0078125, %v4810_v50  ;;  %v4932_v27 = vpop.xlane.xlu0 %4931 }
 0xa6f   : > { %v13814_v49 = vpack.c.bf16 %v5154_v17, %v5153_v45  ;;  %v4987_v4 = vmul.f32 0.0078125, %v4932_v27  ;;  %v4909_v18 = vmul.f32 %v13811_v52, %v13811_v52  ;;  %6388 = vmatpush1.bf16.msra.mxu1 %v9590_v33 }
 0xa70   : > { %v11240_v9 = vpop.eup %11239  ;;  %v13819_v43 = vsub.f32 %v13590_v62, %v4846_v29  ;;  %6581 = vmatpush1.bf16.msra.mxu0 %v9592_v1  ;;  %6389 = vmatprep.subr.bf16.mxu1 %v9607_v41  ;;  %v5117_v22 = vmul.f32 %v13738_v8, %v5079_v14 }
 0xa71   : > { %v5080_v28 = vmul.f32 %v11240_v9, %v13520_v31  ;;  %v5019_v39 = vadd.f32 1e-05, %v4987_v4  ;;  %v4934_v42 = vpop.xlane.xlu1 %4933  ;;  %6042 = vmatmul.mubr.bf16.gmra.mrb[220].mxu1 %v13814_v49  ;;  %6235 = vmatmul.mubr.bf16.gmra.mrb[236].mxu0 %v13814_v49 }
 0xa72   : > { %v4988_v16 = vmul.f32 0.0078125, %v4934_v42  ;;  %4967 = vadd.xlane.f32.xlu0 %v4909_v18  ;;  %v4812_v32 = vpop.xlane.xlu0 %4811  ;;  %v4910_v62 = vmul.f32 %v13819_v43, %v13819_v43  ;;  %6051 = vmatprep.mubr.bf16.mxu1 %v14921_v37  ;;  %v5155_v0 = vadd.f32 %v13751_v40, %v5117_v22 }
 0xa73   : > { %v5118_v20 = vmul.f32 %v13738_v8, %v5080_v28  ;;  %11245 = vrsqrt.f32 %v5019_v39  ;;  %v4847_v19 = vmul.f32 0.0078125, %v4812_v32  ;;  %6244 = vmatprep.mubr.bf16.mxu0 %v14921_v37  ;;  %6582 = vmatprep.subr.bf16.mxu0 %v9609_v13 }
 0xa74   : > { %v5020_v31 = vadd.f32 1e-05, %v4988_v16  ;;  %4969 = vadd.xlane.f32.xlu1 %v4910_v62  ;;  %6390 = vmatpush1.bf16.msra.mxu1 %v9606_v38 }
 0xa75   : > { %v11242_v47 = vpop.eup %11241  ;;  %v5156_v30 = vadd.f32 %v13751_v40, %v5118_v20  ;;  %v13833_v57 = vsub.f32 %v13624_v36, %v4847_v19  ;;  %v4814_v33 = vpop.xlane.xlu1 %4813  ;;  %6583 = vmatpush1.bf16.msra.mxu0 %v9608_v6 }
 0xa76   : > { %v5081_v53 = vmul.f32 %v11242_v47, %v13542_v7  ;;  %11247 = vrsqrt.f32 %v5020_v31  ;;  %v4848_v1 = vmul.f32 0.0078125, %v4814_v33  ;;  %v4936_v41 = vpop.xlane.xlu0 %4935 }
 0xa77   : > { %v13836_v55 = vpack.c.bf16 %v5156_v30, %v5155_v0  ;;  %v4989_v35 = vmul.f32 0.0078125, %v4936_v41  ;;  %v4911_v3 = vmul.f32 %v13833_v57, %v13833_v57 }
 0xa78   : > { %v11244_v45 = vpop.eup %11243  ;;  %v13841_v17 = vsub.f32 %v13634_v46, %v4848_v1  ;;  %v5119_v36 = vmul.f32 %v13738_v8, %v5081_v53 }
 0xa79   : > { %v5082_v50 = vmul.f32 %v11244_v45, %v13564_v21  ;;  %v5021_v14 = vadd.f32 1e-05, %v4989_v35  ;;  %v4938_v29 = vpop.xlane.xlu1 %4937  ;;  %6052 = vmatmul.mubr.bf16.gmra.mrb[224].mxu1 %v13836_v55  ;;  %6245 = vmatmul.mubr.bf16.gmra.mrb[240].mxu0 %v13836_v55 }
 0xa7a   : > { %v4990_v7 = vmul.f32 0.0078125, %v4938_v29  ;;  %4971 = vadd.xlane.f32.xlu0 %v4911_v3  ;;  %v4912_v27 = vmul.f32 %v13841_v17, %v13841_v17  ;;  %6061 = vmatprep.mubr.bf16.mxu1 %v14921_v37  ;;  %v5157_v9 = vadd.f32 %v13751_v40, %v5119_v36  ;;  %v5281_v36 = vld [vmem:[%s14837_s15 + $0x190] sm:$0xff] }
 0xa7b   : > { %v5120_v46 = vmul.f32 %v13738_v8, %v5082_v50  ;;  %11249 = vrsqrt.f32 %v5021_v14  ;;  %v4816_v4 = vpop.xlane.xlu0 %4815  ;;  %6254 = vmatprep.mubr.bf16.mxu0 %v14921_v37  ;;  %v5289_v50 = vld [vmem:[%s14837_s15 + $0x1d0] sm:$0xff]  ;;  %v5282_v14 = vld [vmem:[%s14837_s15 + $0x198] sm:$0xff] }
 0xa7c   : > { %v5022_v21 = vadd.f32 1e-05, %v4990_v7  ;;  %v4849_v18 = vmul.f32 0.0078125, %v4816_v4  ;;  %4973 = vadd.xlane.f32.xlu1 %v4912_v27  ;;  %v9622_v27 = vcombine.low %v5281_v36, %v5289_v50  ;;  %v5290_v4 = vld [vmem:[%s14837_s15 + $0x1d8] sm:$0xff] }
 0xa7d   : > { %v11246_v13 = vpop.eup %11245  ;;  %v5158_v38 = vadd.f32 %v13751_v40, %v5120_v46  ;;  %v4818_v22 = vpop.xlane.xlu1 %4817  ;;  %v9623_v46 = vcombine.high %v5281_v36, %v5289_v50 }
 0xa7e   : > { %v5083_v28 = vmul.f32 %v11246_v13, %v13586_v59  ;;  %11251 = vrsqrt.f32 %v5022_v21  ;;  %v13856_v39 = vsub.f32 %v13647_v63, %v4849_v18  ;;  %v4850_v42 = vmul.f32 0.0078125, %v4818_v22 }
 0xa7f   : > { %v13858_v6 = vpack.c.bf16 %v5158_v38, %v5157_v9  ;;  %v4940_v16 = vpop.xlane.xlu0 %4939  ;;  %v9624_v9 = vcombine.low %v5282_v14, %v5290_v4  ;;  %v9625_v38 = vcombine.high %v5282_v14, %v5290_v4  ;;  %6391 = vmatprep.subr.bf16.mxu1 %v9623_v46  ;;  %v5314_v46 = vld [vmem:[%s14837_s15 + $0x298] sm:$0xff] }
 0xa80   : > { %v11248_v32 = vpop.eup %11247  ;;  %v13861_v62 = vsub.f32 %v13654_v23, %v4850_v42  ;;  %v4991_v20 = vmul.f32 0.0078125, %v4940_v16  ;;  %v4913_v19 = vmul.f32 %v13856_v39, %v13856_v39  ;;  %v5121_v31 = vmul.f32 %v13738_v8, %v5083_v28  ;;  %6392 = vmatpush1.bf16.msra.mxu1 %v9622_v27  ;;  %v5321_v27 = vld [vmem:[%s14837_s15 + $0x2d0] sm:$0xff] }
 0xa81   : > { %v5084_v59 = vmul.f32 %v11248_v32, %v13608_v51  ;;  %6062 = vmatmul.mubr.bf16.gmra.mrb[228].mxu1 %v13858_v6  ;;  %6255 = vmatmul.mubr.bf16.gmra.mrb[244].mxu0 %v13858_v6  ;;  %v4942_v63 = vpop.xlane.xlu1 %4941 }
 0xa82   : > { %v5023_v47 = vadd.f32 1e-05, %v4991_v20  ;;  %v4992_v0 = vmul.f32 0.0078125, %v4942_v63  ;;  %4975 = vadd.xlane.f32.xlu0 %v4913_v19  ;;  %v4914_v23 = vmul.f32 %v13861_v62, %v13861_v62  ;;  %6071 = vmatprep.mubr.bf16.mxu1 %v14921_v37  ;;  %v5159_v53 = vadd.f32 %v13751_v40, %v5121_v31 }
 0xa83   : > { %v5122_v30 = vmul.f32 %v13738_v8, %v5084_v59  ;;  %6264 = vmatprep.mubr.bf16.mxu0 %v14921_v37  ;;  %6584 = vmatprep.subr.bf16.mxu0 %v9625_v38  ;;  %v5329_v38 = vld [vmem:[%s14837_s15 + $0x310] sm:$0xff] }
 0xa84   : > { %11253 = vrsqrt.f32 %v5023_v47  ;;  %v5024_v33 = vadd.f32 1e-05, %v4992_v0  ;;  %4977 = vadd.xlane.f32.xlu1 %v4914_v23  ;;  %6585 = vmatpush1.bf16.msra.mxu0 %v9624_v9 }
 0xa85   : > { %v11250_v51 = vpop.eup %11249  ;;  %v5160_v1 = vadd.f32 %v13751_v40, %v5122_v30 }
 0xa86   : > { %v5085_v41 = vmul.f32 %v11250_v51, %v13630_v10  ;;  %11255 = vrsqrt.f32 %v5024_v33  ;;  %v4944_v35 = vpop.xlane.xlu0 %4943  ;;  %v5305_v51 = vld [vmem:[%s14837_s15 + $0x250] sm:$0xff] }
 0xa87   : > { %v13877_v3 = vpack.c.bf16 %v5160_v1, %v5159_v53  ;;  %v4993_v45 = vmul.f32 0.0078125, %v4944_v35  ;;  %v5298_v53 = vld [vmem:[%s14837_s15 + $0x218] sm:$0xff] }
 0xa88   : > { %v11252_v29 = vpop.eup %11251  ;;  %v5123_v10 = vmul.f32 %v13738_v8, %v5085_v41  ;;  %v4946_v7 = vpop.xlane.xlu1 %4945 }
 0xa89   : > { %v5086_v21 = vmul.f32 %v11252_v29, %v13637_v24  ;;  %v5025_v18 = vadd.f32 1e-05, %v4993_v45  ;;  %6072 = vmatmul.mubr.bf16.gmra.mrb[232].mxu1 %v13877_v3  ;;  %6265 = vmatmul.mubr.bf16.gmra.mrb[248].mxu0 %v13877_v3  ;;  %v4994_v13 = vmul.f32 0.0078125, %v4946_v7  ;;  %v5306_v45 = vld [vmem:[%s14837_s15 + $0x258] sm:$0xff]  ;;  %v5313_v7 = vld [vmem:[%s14837_s15 + $0x290] sm:$0xff] }
 0xa8a   : > { %6081 = vmatprep.mubr.bf16.mxu1 %v14921_v37  ;;  %6274 = vmatprep.mubr.bf16.mxu0 %v14921_v37  ;;  %v5161_v24 = vadd.f32 %v13751_v40, %v5123_v10  ;;  %v9640_v36 = vcombine.low %v5298_v53, %v5306_v45  ;;  %v9641_v50 = vcombine.high %v5298_v53, %v5306_v45  ;;  %v13991_v53 = vld [vmem:[%s14837_s15 + $0x28] sm:$0xff] }
 0xa8b   : > { %v5124_v22 = vmul.f32 %v13738_v8, %v5086_v21  ;;  %11257 = vrsqrt.f32 %v5025_v18  ;;  %v5026_v28 = vadd.f32 1e-05, %v4994_v13  ;;  %v9655_v4 = vcombine.high %v5313_v7, %v5321_v27  ;;  %v5322_v21 = vld [vmem:[%s14837_s15 + $0x2d8] sm:$0xff] }
 0xa8c   : > { %6586 = vmatprep.subr.bf16.mxu0 %v9641_v50  ;;  %v9654_v18 = vcombine.low %v5313_v7, %v5321_v27  ;;  %v9656_v13 = vcombine.low %v5314_v46, %v5322_v21  ;;  %v9657_v9 = vcombine.high %v5314_v46, %v5322_v21 }
 0xa8d   : > { %v5162_v42 = vadd.f32 %v13751_v40, %v5124_v22  ;;  %11259 = vrsqrt.f32 %v5026_v28  ;;  %6587 = vmatpush1.bf16.msra.mxu0 %v9640_v36  ;;  %v5337_v22 = vld [vmem:[%s14837_s15 + $0x350] sm:$0xff]  ;;  %v5330_v28 = vld [vmem:[%s14837_s15 + $0x318] sm:$0xff] }
 0xa8e   : > { %v11254_v16 = vpop.eup %11253  ;;  %6588 = vmatprep.subr.bf16.mxu0 %v9657_v9 }
 0xa8f   : > { %v13900_v32 = vpack.c.bf16 %v5162_v42, %v5161_v24  ;;  %v5087_v20 = vmul.f32 %v11254_v16, %v13650_v11  ;;  %v9670_v24 = vcombine.low %v5329_v38, %v5337_v22  ;;  %v9671_v42 = vcombine.high %v5329_v38, %v5337_v22  ;;  %v5338_v16 = vld [vmem:[%s14837_s15 + $0x358] sm:$0xff] }
 0xa90   : > { %v11256_v19 = vpop.eup %11255 }
 0xa91   : > { %v5125_v31 = vmul.f32 %v13738_v8, %v5087_v20  ;;  %v5088_v59 = vmul.f32 %v11256_v19, %v13657_v15  ;;  %6082 = vmatmul.mubr.bf16.gmra.mrb[236].mxu1 %v13900_v32  ;;  %6275 = vmatmul.mubr.bf16.gmra.mrb[252].mxu0 %v13900_v32  ;;  %v5297_v15 = vld [vmem:[%s14837_s15 + $0x210] sm:$0xff]  ;;  %v9672_v20 = vcombine.low %v5330_v28, %v5338_v16 }
 0xa92   : > { %6091 = vmatprep.mubr.bf16.mxu1 %v14921_v37  ;;  %6284 = vmatprep.mubr.bf16.mxu0 %v14921_v37  ;;  %v9639_v35 = vcombine.high %v5297_v15, %v5305_v51  ;;  %v9673_v19 = vcombine.high %v5330_v28, %v5338_v16 }
 0xa93   : > { %v5126_v63 = vmul.f32 %v13738_v8, %v5088_v59  ;;  %v5163_v0 = vadd.f32 %v13751_v40, %v5125_v31  ;;  %6589 = vmatpush1.bf16.msra.mxu0 %v9656_v13  ;;  %v5345_v31 = vld [vmem:[%s14837_s15 + $0x390] sm:$0xff] }
 0xa94   : > { %6393 = vmatprep.subr.bf16.mxu1 %v9639_v35  ;;  %v5353_v59 = vld [vmem:[%s14837_s15 + $0x3d0] sm:$0xff]  ;;  %6590 = vmatprep.subr.bf16.mxu0 %v9673_v19 }
 0xa95   : > { %v11258_v47 = vpop.eup %11257  ;;  %v5164_v11 = vadd.f32 %v13751_v40, %v5126_v63  ;;  %v5346_v63 = vld [vmem:[%s14837_s15 + $0x398] sm:$0xff] }
 0xa96   : > { %v5089_v23 = vmul.f32 %v11258_v47, %v13665_v5  ;;  %v9638_v5 = vcombine.low %v5297_v15, %v5305_v51  ;;  %v9686_v47 = vcombine.low %v5345_v31, %v5353_v59  ;;  %v13981_v15 = vld [vmem:[%s14837_s15 + $0x20] sm:$0xff] }
 0xa97   : > { %v11260_v30 = vpop.eup %11259  ;;  %v13913_v33 = vpack.c.bf16 %v5164_v11, %v5163_v0  ;;  %v9687_v0 = vcombine.high %v5345_v31, %v5353_v59  ;;  %v5354_v11 = vld [vmem:[%s14837_s15 + $0x3d8] sm:$0xff]  ;;  %6591 = vmatpush1.bf16.msra.mxu0 %v9672_v20  ;;  %v13986_v51 = vld [vmem:[%s14837_s15 + $0x60] sm:$0xff] }
 0xa98   : > { %v5127_v1 = vmul.f32 %v13738_v8, %v5089_v23  ;;  %v5090_v41 = vmul.f32 %v11260_v30, %v13668_v54  ;;  %6394 = vmatpush1.bf16.msra.mxu1 %v9638_v5  ;;  %v9688_v23 = vcombine.low %v5346_v63, %v5354_v11  ;;  %v9689_v30 = vcombine.high %v5346_v63, %v5354_v11  ;;  %v14000_v5 = vld [vmem:[%s14837_s15 + $0x68] sm:$0xff] }
 0xa99   : > { %6092 = vmatmul.mubr.bf16.gmra.mrb[240].mxu1 %v13913_v33  ;;  %6285 = vmatmul.mubr.bf16.gmra.mrb[0].mxu0 %v13913_v33  ;;  %v9580_v35 = vcombine.low %v13991_v53, %v14000_v5  ;;  %v9581_v45 = vcombine.high %v13991_v53, %v14000_v5 }
 0xa9a   : > { %v5128_v14 = vmul.f32 %v13738_v8, %v5090_v41  ;;  %6101 = vmatprep.mubr.bf16.mxu1 %v14921_v37  ;;  %6294 = vmatprep.mubr.bf16.mxu0 %v14921_v37  ;;  %v5165_v54 = vadd.f32 %v13751_v40, %v5127_v1  ;;  %v9578_v1 = vcombine.low %v13981_v15, %v13986_v51 }
 0xa9b   : > { %6395 = vmatprep.subr.bf16.mxu1 %v9655_v4  ;;  %6592 = vmatprep.subr.bf16.mxu0 %v9689_v30  ;;  %v9579_v41 = vcombine.high %v13981_v15, %v13986_v51  ;;  %v5284_v15 = vld [vmem:[%s14837_s15 + $0x1a8] sm:$0xff] }
 0xa9c   : > { %v5166_v29 = vadd.f32 %v13751_v40, %v5128_v14  ;;  %6396 = vmatpush1.bf16.msra.mxu1 %v9654_v18  ;;  %6593 = vmatpush1.bf16.msra.mxu0 %v9688_v23  ;;  %v5292_v51 = vld [vmem:[%s14837_s15 + $0x1e8] sm:$0xff] }
 0xa9d   : > { %6397 = vmatprep.subr.bf16.mxu1 %v9671_v42  ;;  %6964 = vmatprep.subr.bf16.mxu0 %v9581_v45 }
 0xa9e   : > { %v13936_v10 = vpack.c.bf16 %v5166_v29, %v5165_v54 }
 0xaa0   : > { %6398 = vmatpush1.bf16.msra.mxu1 %v9670_v24 }
 0xaa1   : > { %6102 = vmatmul.mubr.bf16.gmra.mrb[244].mxu1 %v13936_v10  ;;  %6295 = vmatmul.mubr.bf16.gmra.mrb[4].mxu0 %v13936_v10 }
 0xaa2   : > { %6111 = vmatprep.mubr.bf16.mxu1 %v14921_v37  ;;  %6304 = vmatprep.mubr.bf16.mxu0 %v14921_v37 }
 0xaa3   : > { %6399 = vmatprep.subr.bf16.mxu1 %v9687_v0 }
 0xaa4   : > { %6400 = vmatpush1.bf16.msra.mxu1 %v9686_v47 }
 0xaa5   : > { %6771 = vmatprep.subr.bf16.mxu1 %v9579_v41 }
 0xac7   : > { %v4948_v36 = vpop.xlane.xlu0 %4947 }
 0xac8   : > { %v4995_v50 = vmul.f32 0.0078125, %v4948_v36 }
 0xac9   : > { %v4950_v14 = vpop.xlane.xlu1 %4949 }
 0xaca   : > { %v5027_v54 = vadd.f32 1e-05, %v4995_v50  ;;  %v4996_v29 = vmul.f32 0.0078125, %v4950_v14 }
 0xacc   : > { %11261 = vrsqrt.f32 %v5027_v54  ;;  %v5028_v7 = vadd.f32 1e-05, %v4996_v29 }
 0xace   : > { %11263 = vrsqrt.f32 %v5028_v7 }
 0xacf   : > { %v4952_v27 = vpop.xlane.xlu0 %4951 }
 0xad0   : > { %v4997_v46 = vmul.f32 0.0078125, %v4952_v27 }
 0xad1   : > { %v4954_v4 = vpop.xlane.xlu1 %4953 }
 0xad2   : > { %v5029_v21 = vadd.f32 1e-05, %v4997_v46  ;;  %v4998_v18 = vmul.f32 0.0078125, %v4954_v4 }
 0xad4   : > { %11265 = vrsqrt.f32 %v5029_v21  ;;  %v5030_v13 = vadd.f32 1e-05, %v4998_v18 }
 0xad6   : > { %v11262_v9 = vpop.eup %11261  ;;  %11267 = vrsqrt.f32 %v5030_v13 }
 0xad7   : > { %v5091_v38 = vmul.f32 %v11262_v9, %v13703_v34 }
 0xad8   : > { %v11264_v22 = vpop.eup %11263 }
 0xad9   : > { %v5129_v28 = vmul.f32 %v13738_v8, %v5091_v38  ;;  %v5092_v24 = vmul.f32 %v11264_v22, %v13706_v12 }
 0xadb   : > { %v5130_v42 = vmul.f32 %v13738_v8, %v5092_v24  ;;  %v5167_v16 = vadd.f32 %v13751_v40, %v5129_v28 }
 0xadd   : > { %v5168_v20 = vadd.f32 %v13751_v40, %v5130_v42 }
 0xade   : > { %v11266_v19 = vpop.eup %11265 }
 0xadf   : > { %v14012_v31 = vpack.c.bf16 %v5168_v20, %v5167_v16  ;;  %v5093_v59 = vmul.f32 %v11266_v19, %v13713_v44 }
 0xae0   : > { %v11268_v63 = vpop.eup %11267 }
 0xae1   : > { %v5131_v47 = vmul.f32 %v13738_v8, %v5093_v59  ;;  %v5094_v34 = vmul.f32 %v11268_v63, %v13716_v48  ;;  %6112 = vmatmul.mubr.bf16.gmra.mrb[248].mxu1 %v14012_v31  ;;  %6305 = vmatmul.mubr.bf16.gmra.mrb[8].mxu0 %v14012_v31 }
 0xae2   : > { %6121 = vmatprep.mubr.bf16.mxu1 %v14921_v37  ;;  %6314 = vmatprep.mubr.bf16.mxu0 %v14921_v37 }
 0xae3   : > { %v5132_v12 = vmul.f32 %v13738_v8, %v5094_v34  ;;  %v5169_v0 = vadd.f32 %v13751_v40, %v5131_v47 }
 0xae5   : > { %v5170_v11 = vadd.f32 %v13751_v40, %v5132_v12 }
 0xae6   : > { %v4956_v44 = vpop.xlane.xlu0 %4955 }
 0xae7   : > { %v14024_v23 = vpack.c.bf16 %v5170_v11, %v5169_v0  ;;  %v4999_v30 = vmul.f32 0.0078125, %v4956_v44 }
 0xae9   : > { %v5031_v41 = vadd.f32 1e-05, %v4999_v30  ;;  %v4958_v48 = vpop.xlane.xlu1 %4957  ;;  %6122 = vmatmul.mubr.bf16.gmra.mrb[252].mxu1 %v14024_v23  ;;  %6315 = vmatmul.mubr.bf16.gmra.mrb[12].mxu0 %v14024_v23 }
 0xaea   : > { %v5000_v45 = vmul.f32 0.0078125, %v4958_v48  ;;  %6131 = vmatprep.mubr.bf16.mxu1 %v14921_v37  ;;  %6324 = vmatprep.mubr.bf16.mxu0 %v14921_v37 }
 0xaeb   : > { %11269 = vrsqrt.f32 %v5031_v41 }
 0xaec   : > { %v5032_v36 = vadd.f32 1e-05, %v5000_v45 }
 0xaee   : > { %11271 = vrsqrt.f32 %v5032_v36  ;;  %v4960_v50 = vpop.xlane.xlu0 %4959 }
 0xaef   : > { %v5001_v14 = vmul.f32 0.0078125, %v4960_v50 }
 0xaf1   : > { %v5033_v54 = vadd.f32 1e-05, %v5001_v14  ;;  %v4962_v29 = vpop.xlane.xlu1 %4961 }
 0xaf2   : > { %v5002_v7 = vmul.f32 0.0078125, %v4962_v29 }
 0xaf3   : > { %11273 = vrsqrt.f32 %v5033_v54 }
 0xaf4   : > { %v5034_v27 = vadd.f32 1e-05, %v5002_v7 }
 0xaf5   : > { %v11270_v46 = vpop.eup %11269 }
 0xaf6   : > { %v5095_v4 = vmul.f32 %v11270_v46, %v13723_v26  ;;  %11275 = vrsqrt.f32 %v5034_v27 }
 0xaf7   : > { %v4964_v21 = vpop.xlane.xlu0 %4963 }
 0xaf8   : > { %v11272_v18 = vpop.eup %11271  ;;  %v5003_v13 = vmul.f32 0.0078125, %v4964_v21  ;;  %v5133_v9 = vmul.f32 %v13738_v8, %v5095_v4 }
 0xaf9   : > { %v5096_v38 = vmul.f32 %v11272_v18, %v13728_v2  ;;  %v4966_v22 = vpop.xlane.xlu1 %4965 }
 0xafa   : > { %v5035_v28 = vadd.f32 1e-05, %v5003_v13  ;;  %v5004_v24 = vmul.f32 0.0078125, %v4966_v22  ;;  %v5171_v19 = vadd.f32 %v13751_v40, %v5133_v9 }
 0xafb   : > { %v5134_v42 = vmul.f32 %v13738_v8, %v5096_v38 }
 0xafc   : > { %11277 = vrsqrt.f32 %v5035_v28  ;;  %v5036_v16 = vadd.f32 1e-05, %v5004_v24 }
 0xafd   : > { %v11274_v20 = vpop.eup %11273  ;;  %v5172_v26 = vadd.f32 %v13751_v40, %v5134_v42 }
 0xafe   : > { %v5097_v59 = vmul.f32 %v11274_v20, %v13733_v58  ;;  %11279 = vrsqrt.f32 %v5036_v16 }
 0xaff   : > { %v14037_v63 = vpack.c.bf16 %v5172_v26, %v5171_v19  ;;  %v4968_v47 = vpop.xlane.xlu0 %4967 }
 0xb00   : > { %v11276_v34 = vpop.eup %11275  ;;  %v5005_v2 = vmul.f32 0.0078125, %v4968_v47  ;;  %v5135_v12 = vmul.f32 %v13738_v8, %v5097_v59 }
 0xb01   : > { %v5098_v0 = vmul.f32 %v11276_v34, %v13744_v25  ;;  %v4970_v11 = vpop.xlane.xlu1 %4969  ;;  %6132 = vmatmul.mubr.bf16.gmra.mrb[0].mxu1 %v14037_v63  ;;  %6325 = vmatmul.mubr.bf16.gmra.mrb[16].mxu0 %v14037_v63 }
 0xb02   : > { %v5037_v44 = vadd.f32 1e-05, %v5005_v2  ;;  %v5006_v30 = vmul.f32 0.0078125, %v4970_v11  ;;  %6141 = vmatprep.mubr.bf16.mxu1 %v14921_v37  ;;  %6334 = vmatprep.mubr.bf16.mxu0 %v14921_v37  ;;  %v5173_v48 = vadd.f32 %v13751_v40, %v5135_v12 }
 0xb03   : > { %v5136_v58 = vmul.f32 %v13738_v8, %v5098_v0 }
 0xb04   : > { %11281 = vrsqrt.f32 %v5037_v44  ;;  %v5038_v41 = vadd.f32 1e-05, %v5006_v30 }
 0xb05   : > { %v5174_v45 = vadd.f32 %v13751_v40, %v5136_v58 }
 0xb06   : > { %v11278_v25 = vpop.eup %11277  ;;  %11283 = vrsqrt.f32 %v5038_v41 }
 0xb07   : > { %v14048_v36 = vpack.c.bf16 %v5174_v45, %v5173_v48  ;;  %v5099_v50 = vmul.f32 %v11278_v25, %v13759_v61  ;;  %v4972_v14 = vpop.xlane.xlu0 %4971 }
 0xb08   : > { %v11280_v54 = vpop.eup %11279  ;;  %v5007_v29 = vmul.f32 0.0078125, %v4972_v14 }
 0xb09   : > { %v5137_v7 = vmul.f32 %v13738_v8, %v5099_v50  ;;  %v5100_v27 = vmul.f32 %v11280_v54, %v13779_v60  ;;  %v4974_v46 = vpop.xlane.xlu1 %4973  ;;  %6142 = vmatmul.mubr.bf16.gmra.mrb[4].mxu1 %v14048_v36  ;;  %6335 = vmatmul.mubr.bf16.gmra.mrb[20].mxu0 %v14048_v36 }
 0xb0a   : > { %v5039_v4 = vadd.f32 1e-05, %v5007_v29  ;;  %v5008_v21 = vmul.f32 0.0078125, %v4974_v46  ;;  %6151 = vmatprep.mubr.bf16.mxu1 %v14921_v37  ;;  %6344 = vmatprep.mubr.bf16.mxu0 %v14921_v37 }
 0xb0b   : > { %v5138_v61 = vmul.f32 %v13738_v8, %v5100_v27  ;;  %v5175_v13 = vadd.f32 %v13751_v40, %v5137_v7  ;;  %v5260_v27 = vld [vmem:[%s14837_s15 + $0xe8] sm:$0xff] }
 0xb0c   : > { %11285 = vrsqrt.f32 %v5039_v4  ;;  %v5040_v18 = vadd.f32 1e-05, %v5008_v21  ;;  %v5267_v21 = vld [vmem:[%s14837_s15 + $0x120] sm:$0xff] }
 0xb0d   : > { %v5176_v9 = vadd.f32 %v13751_v40, %v5138_v61  ;;  %v5275_v61 = vld [vmem:[%s14837_s15 + $0x160] sm:$0xff] }
 0xb0e   : > { %v11282_v60 = vpop.eup %11281  ;;  %11287 = vrsqrt.f32 %v5040_v18  ;;  %v5268_v18 = vld [vmem:[%s14837_s15 + $0x128] sm:$0xff]  ;;  %v9610_v53 = vcombine.low %v5267_v21, %v5275_v61 }
 0xb0f   : > { %v14060_v38 = vpack.c.bf16 %v5176_v9, %v5175_v13  ;;  %v5101_v22 = vmul.f32 %v11282_v60, %v13811_v52  ;;  %v4976_v28 = vpop.xlane.xlu0 %4975  ;;  %v5276_v13 = vld [vmem:[%s14837_s15 + $0x168] sm:$0xff] }
 0xb10   : > { %v11284_v24 = vpop.eup %11283  ;;  %v5009_v42 = vmul.f32 0.0078125, %v4976_v28  ;;  %v9613_v28 = vcombine.high %v5268_v18, %v5276_v13 }
 0xb11   : > { %v5139_v16 = vmul.f32 %v13738_v8, %v5101_v22  ;;  %v5102_v20 = vmul.f32 %v11284_v24, %v13819_v43  ;;  %v4978_v19 = vpop.xlane.xlu1 %4977  ;;  %6152 = vmatmul.mubr.bf16.gmra.mrb[8].mxu1 %v14060_v38  ;;  %6345 = vmatmul.mubr.bf16.gmra.mrb[24].mxu0 %v14060_v38  ;;  %v9611_v22 = vcombine.high %v5267_v21, %v5275_v61  ;;  %v5283_v24 = vld [vmem:[%s14837_s15 + $0x1a0] sm:$0xff]  ;;  %v5340_v21 = vld [vmem:[%s14837_s15 + $0x368] sm:$0xff]  ;;  %v14207_v61 = vld [vmem:[%s14837_s15 + $0x30] sm:$0xff] }
 0xb12   : > { %v5041_v26 = vadd.f32 1e-05, %v5009_v42  ;;  %v5010_v59 = vmul.f32 0.0078125, %v4978_v19  ;;  %6161 = vmatprep.mubr.bf16.mxu1 %v14921_v37  ;;  %6354 = vmatprep.mubr.bf16.mxu0 %v14921_v37  ;;  %v5291_v42 = vld [vmem:[%s14837_s15 + $0x1e0] sm:$0xff]  ;;  %v5300_v19 = vld [vmem:[%s14837_s15 + $0x228] sm:$0xff] }
 0xb13   : > { %v5140_v52 = vmul.f32 %v13738_v8, %v5102_v20  ;;  %v5177_v34 = vadd.f32 %v13751_v40, %v5139_v16  ;;  %v9627_v5 = vcombine.high %v5283_v24, %v5291_v42  ;;  %v5299_v16 = vld [vmem:[%s14837_s15 + $0x220] sm:$0xff] }
 0xb14   : > { %11289 = vrsqrt.f32 %v5041_v26  ;;  %v5042_v47 = vadd.f32 1e-05, %v5010_v59  ;;  %v5307_v20 = vld [vmem:[%s14837_s15 + $0x260] sm:$0xff]  ;;  %v5308_v26 = vld [vmem:[%s14837_s15 + $0x268] sm:$0xff]  ;;  %v9626_v59 = vcombine.low %v5283_v24, %v5291_v42 }
 0xb15   : > { %v5178_v2 = vadd.f32 %v13751_v40, %v5140_v52  ;;  %v9628_v52 = vcombine.low %v5284_v15, %v5292_v51 }
 0xb16   : > { %v11286_v43 = vpop.eup %11285  ;;  %11291 = vrsqrt.f32 %v5042_v47 }
 0xb17   : > { %v14072_v12 = vpack.c.bf16 %v5178_v2, %v5177_v34  ;;  %v5103_v0 = vmul.f32 %v11286_v43, %v13833_v57  ;;  %v9643_v2 = vcombine.high %v5299_v16, %v5307_v20  ;;  %v9645_v43 = vcombine.high %v5300_v19, %v5308_v26 }
 0xb18   : > { %v11288_v11 = vpop.eup %11287 }
 0xb19   : > { %v5141_v44 = vmul.f32 %v13738_v8, %v5103_v0  ;;  %v5104_v30 = vmul.f32 %v11288_v11, %v13841_v17  ;;  %6162 = vmatmul.mubr.bf16.gmra.mrb[12].mxu1 %v14072_v12  ;;  %6355 = vmatmul.mubr.bf16.gmra.mrb[28].mxu0 %v14072_v12  ;;  %v14170_v0 = vld [vmem:[%s14837_s15 + $0x2a0] sm:$0xff] }
 0xb1a   : > { %6171 = vmatprep.mubr.bf16.mxu1 %v14921_v37  ;;  %6364 = vmatprep.mubr.bf16.mxu0 %v14921_v37  ;;  %v5323_v11 = vld [vmem:[%s14837_s15 + $0x2e0] sm:$0xff] }
 0xb1b   : > { %v5142_v58 = vmul.f32 %v13738_v8, %v5104_v30  ;;  %v5179_v41 = vadd.f32 %v13751_v40, %v5141_v44 }
 0xb1d   : > { %v5180_v48 = vadd.f32 %v13751_v40, %v5142_v58  ;;  %v5316_v58 = vld [vmem:[%s14837_s15 + $0x2a8] sm:$0xff] }
 0xb1e   : > { %v11290_v57 = vpop.eup %11289 }
 0xb1f   : > { %v14084_v45 = vpack.c.bf16 %v5180_v48, %v5179_v41  ;;  %v5105_v25 = vmul.f32 %v11290_v57, %v13856_v39  ;;  %v5324_v41 = vld [vmem:[%s14837_s15 + $0x2e8] sm:$0xff] }
 0xb20   : > { %v11292_v17 = vpop.eup %11291 }
 0xb21   : > { %v5143_v50 = vmul.f32 %v13738_v8, %v5105_v25  ;;  %v5106_v14 = vmul.f32 %v11292_v17, %v13861_v62  ;;  %6172 = vmatmul.mubr.bf16.gmra.mrb[16].mxu1 %v14084_v45  ;;  %6365 = vmatmul.mubr.bf16.gmra.mrb[32].mxu0 %v14084_v45  ;;  %v5251_v62 = vld [vmem:[%s14837_s15 + $0xa0] sm:$0xff] }
 0xb22   : > { %6181 = vmatprep.mubr.bf16.mxu1 %v14921_v37  ;;  %6374 = vmatprep.mubr.bf16.mxu0 %v14921_v37 }
 0xb23   : > { %v5144_v54 = vmul.f32 %v13738_v8, %v5106_v14  ;;  %v5181_v29 = vadd.f32 %v13751_v40, %v5143_v50  ;;  %v5259_v8 = vld [vmem:[%s14837_s15 + $0xe0] sm:$0xff] }
 0xb24   : > { %v9595_v46 = vcombine.high %v5251_v62, %v5259_v8  ;;  %v9594_v9 = vcombine.low %v5251_v62, %v5259_v8 }
 0xb25   : > { %v5182_v7 = vadd.f32 %v13751_v40, %v5144_v54  ;;  %v5252_v40 = vld [vmem:[%s14837_s15 + $0xa8] sm:$0xff]  ;;  %v9642_v54 = vcombine.low %v5299_v16, %v5307_v20 }
 0xb26   : > { %v9597_v4 = vcombine.high %v5252_v40, %v5260_v27  ;;  %v9596_v60 = vcombine.low %v5252_v40, %v5260_v27  ;;  %v9661_v40 = vcombine.high %v5316_v58, %v5324_v41  ;;  %v5331_v27 = vld [vmem:[%s14837_s15 + $0x320] sm:$0xff]  ;;  %v5348_v20 = vld [vmem:[%s14837_s15 + $0x3a8] sm:$0xff] }
 0xb27   : > { %v14096_v39 = vpack.c.bf16 %v5182_v7, %v5181_v29  ;;  %v9644_v29 = vcombine.low %v5300_v19, %v5308_v26  ;;  %v9659_v7 = vcombine.high %v14170_v0, %v5323_v11  ;;  %v5356_v19 = vld [vmem:[%s14837_s15 + $0x3e8] sm:$0xff] }
 0xb29   : > { %6182 = vmatmul.mubr.bf16.gmra.mrb[20].mxu1 %v14096_v39  ;;  %6375 = vmatmul.mubr.bf16.gmra.mrb[36].mxu0 %v14096_v39 }
 0xb2a   : > { %6417 = vmatprep.mubr.bf16.mxu1 %v14921_v37  ;;  %6610 = vmatprep.mubr.bf16.mxu0 %v14921_v37 }
 0xb31   : > { %6418 = vmatmul.mubr.bf16.vlgmr.msra.gmra.mrb[24].mxu1 %v13774_v56  ;;  %6611 = vmatmul.mubr.bf16.vlgmr.msra.gmra.mrb[40].mxu0 %v13774_v56 }
 0xb32   : > { %6427 = vmatprep.mubr.bf16.mxu1 %v14921_v37  ;;  %6620 = vmatprep.mubr.bf16.mxu0 %v14921_v37 }
 0xb33   : > { %6772 = vmatpush1.bf16.msra.mxu1 %v9578_v1  ;;  %6965 = vmatpush1.bf16.msra.mxu0 %v9580_v35  ;;  %v9612_v1 = vcombine.low %v5268_v18, %v5276_v13  ;;  %v9629_v35 = vcombine.high %v5284_v15, %v5292_v51  ;;  %v14212_v18 = vld [vmem:[%s14837_s15 + $0x70] sm:$0xff]  ;;  %v14217_v13 = vld [vmem:[%s14837_s15 + $0x38] sm:$0xff] }
 0xb34   : > { %6773 = vmatprep.subr.bf16.mxu1 %v9595_v46  ;;  %6966 = vmatprep.subr.bf16.mxu0 %v9597_v4  ;;  %v5339_v46 = vld [vmem:[%s14837_s15 + $0x360] sm:$0xff]  ;;  %v5332_v4 = vld [vmem:[%s14837_s15 + $0x328] sm:$0xff] }
 0xb35   : > { %v9675_v15 = vcombine.high %v5331_v27, %v5339_v46  ;;  %v9677_v51 = vcombine.high %v5332_v4, %v5340_v21 }
 0xb37   : > { %6774 = vmatpush1.bf16.msra.mxu1 %v9594_v9  ;;  %6967 = vmatpush1.bf16.msra.mxu0 %v9596_v60  ;;  %v9658_v9 = vcombine.low %v14170_v0, %v5323_v11  ;;  %v9660_v60 = vcombine.low %v5316_v58, %v5324_v41  ;;  %v9676_v0 = vcombine.low %v5332_v4, %v5340_v21 }
 0xb38   : > { %6775 = vmatprep.subr.bf16.mxu1 %v9611_v22  ;;  %6968 = vmatprep.subr.bf16.mxu0 %v9613_v28  ;;  %v9582_v22 = vcombine.low %v14207_v61, %v14212_v18  ;;  %v14225_v28 = vld [vmem:[%s14837_s15 + $0x78] sm:$0xff]  ;;  %v9693_v58 = vcombine.high %v5348_v20, %v5356_v19 }
 0xb39   : > { %6428 = vmatmul.mubr.bf16.gmra.mrb[28].mxu1 %v13814_v49  ;;  %6621 = vmatmul.mubr.bf16.gmra.mrb[44].mxu0 %v13814_v49 }
 0xb3a   : > { %6437 = vmatprep.mubr.bf16.mxu1 %v14921_v37  ;;  %6630 = vmatprep.mubr.bf16.mxu0 %v14921_v37 }
 0xb3b   : > { %6776 = vmatpush1.bf16.msra.mxu1 %v9610_v53  ;;  %6969 = vmatpush1.bf16.msra.mxu0 %v9612_v1  ;;  %v5347_v53 = vld [vmem:[%s14837_s15 + $0x3a0] sm:$0xff] }
 0xb3c   : > { %v6033_v47 = vpop.f32.mrb[216].mxu1  ;;  %v6226_v34 = vpop.f32.mrb[232].mxu0  ;;  %6777 = vmatprep.subr.bf16.mxu1 %v9627_v5  ;;  %6970 = vmatprep.subr.bf16.mxu0 %v9629_v35  ;;  %v5355_v1 = vld [vmem:[%s14837_s15 + $0x3e0] sm:$0xff]  ;;  %v9584_v5 = vcombine.low %v14217_v13, %v14225_v28 }
 0xb3d   : > { %v6035_v44 = vpop.f32.mrb[217].mxu1  ;;  %v6228_v30 = vpop.f32.mrb[233].mxu0  ;;  %v9691_v11 = vcombine.high %v5347_v53, %v5355_v1  ;;  %v9690_v41 = vcombine.low %v5347_v53, %v5355_v1 }
 0xb3e   : > { %v9961_v48 = vpack.c.bf16 %v6035_v44, %v6033_v47  ;;  %v9962_v57 = vpack.c.bf16 %v6228_v30, %v6226_v34  ;;  %v6037_v25 = vpop.f32.mrb[218].mxu1  ;;  %v6230_v17 = vpop.f32.mrb[234].mxu0 }
 0xb3f   : > { %v6039_v50 = vpop.f32.mrb[219].mxu1  ;;  %v6232_v14 = vpop.f32.mrb[235].mxu0  ;;  %6778 = vmatpush1.bf16.msra.mxu1 %v9626_v59  ;;  %6971 = vmatpush1.bf16.msra.mxu0 %v9628_v52 }
 0xb40   : > { %9079 = vst [vmem:[%s14182_s19] sm:$0xff] %v9961_v48  ;;  %9080 = vst [vmem:[%s14182_s19 + $0x8] sm:$0xff] %v9962_v57  ;;  %v9969_v62 = vpack.c.bf16 %v6039_v50, %v6037_v25  ;;  %v9970_v8 = vpack.c.bf16 %v6232_v14, %v6230_v17  ;;  %6779 = vmatprep.subr.bf16.mxu1 %v9643_v2  ;;  %6972 = vmatprep.subr.bf16.mxu0 %v9645_v43 }
 0xb41   : > { %6438 = vmatmul.mubr.bf16.gmra.mrb[32].mxu1 %v13836_v55  ;;  %6631 = vmatmul.mubr.bf16.gmra.mrb[48].mxu0 %v13836_v55  ;;  %v9674_v43 = vcombine.low %v5331_v27, %v5339_v46  ;;  %v9692_v48 = vcombine.low %v5348_v20, %v5356_v19  ;;  %v9583_v17 = vcombine.high %v14207_v61, %v14212_v18  ;;  %v5293_v61 = vld [vmem:[%s14837_s15 + $0x1f0] sm:$0xff] }
 0xb42   : > { %9087 = vst [vmem:[%s14182_s19 + $0x40] sm:$0xff] %v9969_v62  ;;  %9088 = vst [vmem:[%s14182_s19 + $0x48] sm:$0xff] %v9970_v8  ;;  %6447 = vmatprep.mubr.bf16.mxu1 %v14921_v37  ;;  %6640 = vmatprep.mubr.bf16.mxu0 %v14921_v37  ;;  %v9585_v50 = vcombine.high %v14217_v13, %v14225_v28  ;;  %v5294_v28 = vld [vmem:[%s14837_s15 + $0x1f8] sm:$0xff] }
 0xb43   : > { %6780 = vmatpush1.bf16.msra.mxu1 %v9642_v54  ;;  %6973 = vmatpush1.bf16.msra.mxu0 %v9644_v29 }
 0xb44   : > { %v6043_v24 = vpop.f32.mrb[220].mxu1  ;;  %v6236_v42 = vpop.f32.mrb[236].mxu0  ;;  %6781 = vmatprep.subr.bf16.mxu1 %v9659_v7  ;;  %6974 = vmatprep.subr.bf16.mxu0 %v9661_v40 }
 0xb45   : > { %v6045_v35 = vpop.f32.mrb[221].mxu1  ;;  %v6238_v16 = vpop.f32.mrb[237].mxu0 }
 0xb46   : > { %v9977_v26 = vpack.c.bf16 %v6045_v35, %v6043_v24  ;;  %v9978_v59 = vpack.c.bf16 %v6238_v16, %v6236_v42  ;;  %v6047_v52 = vpop.f32.mrb[222].mxu1  ;;  %v6240_v47 = vpop.f32.mrb[238].mxu0 }
 0xb47   : > { %v6049_v34 = vpop.f32.mrb[223].mxu1  ;;  %v6242_v2 = vpop.f32.mrb[239].mxu0  ;;  %6782 = vmatpush1.bf16.msra.mxu1 %v9658_v9  ;;  %6975 = vmatpush1.bf16.msra.mxu0 %v9660_v60 }
 0xb48   : > { %9095 = vst [vmem:[%s14182_s19 + $0x80] sm:$0xff] %v9977_v26  ;;  %9096 = vst [vmem:[%s14182_s19 + $0x88] sm:$0xff] %v9978_v59  ;;  %v9985_v44 = vpack.c.bf16 %v6049_v34, %v6047_v52  ;;  %v9986_v30 = vpack.c.bf16 %v6242_v2, %v6240_v47  ;;  %6783 = vmatprep.subr.bf16.mxu1 %v9675_v15  ;;  %6976 = vmatprep.subr.bf16.mxu0 %v9677_v51 }
 0xb49   : > { %6448 = vmatmul.mubr.bf16.gmra.mrb[36].mxu1 %v13858_v6  ;;  %6641 = vmatmul.mubr.bf16.gmra.mrb[52].mxu0 %v13858_v6 }
 0xb4a   : > { %9103 = vst [vmem:[%s14182_s19 + $0xc0] sm:$0xff] %v9985_v44  ;;  %9104 = vst [vmem:[%s14182_s19 + $0xc8] sm:$0xff] %v9986_v30  ;;  %6457 = vmatprep.mubr.bf16.mxu1 %v14921_v37  ;;  %6650 = vmatprep.mubr.bf16.mxu0 %v14921_v37 }
 0xb4b   : > { %6784 = vmatpush1.bf16.msra.mxu1 %v9674_v43  ;;  %6977 = vmatpush1.bf16.msra.mxu0 %v9676_v0 }
 0xb4c   : > { %v6053_v57 = vpop.f32.mrb[224].mxu1  ;;  %v6246_v25 = vpop.f32.mrb[240].mxu0  ;;  %6785 = vmatprep.subr.bf16.mxu1 %v9691_v11  ;;  %6978 = vmatprep.subr.bf16.mxu0 %v9693_v58 }
 0xb4d   : > { %v6055_v14 = vpop.f32.mrb[225].mxu1  ;;  %v6248_v54 = vpop.f32.mrb[241].mxu0 }
 0xb4e   : > { %v9993_v29 = vpack.c.bf16 %v6055_v14, %v6053_v57  ;;  %v9994_v7 = vpack.c.bf16 %v6248_v54, %v6246_v25  ;;  %v6057_v62 = vpop.f32.mrb[226].mxu1  ;;  %v6250_v8 = vpop.f32.mrb[242].mxu0 }
 0xb4f   : > { %v6059_v40 = vpop.f32.mrb[227].mxu1  ;;  %v6252_v27 = vpop.f32.mrb[243].mxu0  ;;  %6786 = vmatpush1.bf16.msra.mxu1 %v9690_v41  ;;  %6979 = vmatpush1.bf16.msra.mxu0 %v9692_v48 }
 0xb50   : > { %9111 = vst [vmem:[%s14182_s19 + $0x100] sm:$0xff] %v9993_v29  ;;  %9112 = vst [vmem:[%s14182_s19 + $0x108] sm:$0xff] %v9994_v7  ;;  %v10001_v46 = vpack.c.bf16 %v6059_v40, %v6057_v62  ;;  %v10002_v4 = vpack.c.bf16 %v6252_v27, %v6250_v8  ;;  %7157 = vmatprep.subr.bf16.mxu1 %v9583_v17  ;;  %7350 = vmatprep.subr.bf16.mxu0 %v9585_v50 }
 0xb51   : > { %6458 = vmatmul.mubr.bf16.gmra.mrb[40].mxu1 %v13877_v3  ;;  %6651 = vmatmul.mubr.bf16.gmra.mrb[56].mxu0 %v13877_v3 }
 0xb52   : > { %9119 = vst [vmem:[%s14182_s19 + $0x140] sm:$0xff] %v10001_v46  ;;  %9120 = vst [vmem:[%s14182_s19 + $0x148] sm:$0xff] %v10002_v4  ;;  %6467 = vmatprep.mubr.bf16.mxu1 %v14921_v37  ;;  %6660 = vmatprep.mubr.bf16.mxu0 %v14921_v37 }
 0xb54   : > { %v6063_v21 = vpop.f32.mrb[228].mxu1  ;;  %v6256_v9 = vpop.f32.mrb[244].mxu0 }
 0xb55   : > { %v6065_v60 = vpop.f32.mrb[229].mxu1  ;;  %v6258_v24 = vpop.f32.mrb[245].mxu0 }
 0xb56   : > { %v10009_v42 = vpack.c.bf16 %v6065_v60, %v6063_v21  ;;  %v10010_v15 = vpack.c.bf16 %v6258_v24, %v6256_v9  ;;  %v6067_v51 = vpop.f32.mrb[230].mxu1  ;;  %v6260_v53 = vpop.f32.mrb[246].mxu0 }
 0xb57   : > { %v6069_v1 = vpop.f32.mrb[231].mxu1  ;;  %v6262_v35 = vpop.f32.mrb[247].mxu0 }
 0xb58   : > { %9127 = vst [vmem:[%s14182_s19 + $0x180] sm:$0xff] %v10009_v42  ;;  %9128 = vst [vmem:[%s14182_s19 + $0x188] sm:$0xff] %v10010_v15  ;;  %v10017_v16 = vpack.c.bf16 %v6069_v1, %v6067_v51  ;;  %v10018_v20 = vpack.c.bf16 %v6262_v35, %v6260_v53 }
 0xb59   : > { %6468 = vmatmul.mubr.bf16.gmra.mrb[44].mxu1 %v13900_v32  ;;  %6661 = vmatmul.mubr.bf16.gmra.mrb[60].mxu0 %v13900_v32 }
 0xb5a   : > { %9135 = vst [vmem:[%s14182_s19 + $0x1c0] sm:$0xff] %v10017_v16  ;;  %9136 = vst [vmem:[%s14182_s19 + $0x1c8] sm:$0xff] %v10018_v20  ;;  %6477 = vmatprep.mubr.bf16.mxu1 %v14921_v37  ;;  %6670 = vmatprep.mubr.bf16.mxu0 %v14921_v37 }
 0xb5c   : > { %v6073_v19 = vpop.f32.mrb[232].mxu1  ;;  %v6266_v26 = vpop.f32.mrb[248].mxu0 }
 0xb5d   : > { %v6075_v59 = vpop.f32.mrb[233].mxu1  ;;  %v6268_v52 = vpop.f32.mrb[249].mxu0 }
 0xb5e   : > { %v10025_v47 = vpack.c.bf16 %v6075_v59, %v6073_v19  ;;  %v10026_v34 = vpack.c.bf16 %v6268_v52, %v6266_v26  ;;  %v6077_v2 = vpop.f32.mrb[234].mxu1  ;;  %v6270_v43 = vpop.f32.mrb[250].mxu0 }
 0xb5f   : > { %v6079_v0 = vpop.f32.mrb[235].mxu1  ;;  %v6272_v11 = vpop.f32.mrb[251].mxu0 }
 0xb60   : > { %9143 = vst [vmem:[%s14182_s19 + $0x200] sm:$0xff] %v10025_v47  ;;  %9144 = vst [vmem:[%s14182_s19 + $0x208] sm:$0xff] %v10026_v34  ;;  %v10033_v44 = vpack.c.bf16 %v6079_v0, %v6077_v2  ;;  %v10034_v30 = vpack.c.bf16 %v6272_v11, %v6270_v43  ;;  %v5253_v43 = vld [vmem:[%s14837_s15 + $0xb0] sm:$0xff]  ;;  %v5254_v11 = vld [vmem:[%s14837_s15 + $0xb8] sm:$0xff] }
 0xb61   : > { %6478 = vmatmul.mubr.bf16.gmra.mrb[48].mxu1 %v13913_v33  ;;  %6671 = vmatmul.mubr.bf16.gmra.mrb[64].mxu0 %v13913_v33  ;;  %v5261_v0 = vld [vmem:[%s14837_s15 + $0xf0] sm:$0xff] }
 0xb62   : > { %9151 = vst [vmem:[%s14182_s19 + $0x240] sm:$0xff] %v10033_v44  ;;  %9152 = vst [vmem:[%s14182_s19 + $0x248] sm:$0xff] %v10034_v30  ;;  %6487 = vmatprep.mubr.bf16.mxu1 %v14921_v37  ;;  %6680 = vmatprep.mubr.bf16.mxu0 %v14921_v37  ;;  %v5262_v44 = vld [vmem:[%s14837_s15 + $0xf8] sm:$0xff]  ;;  %v9599_v30 = vcombine.high %v5253_v43, %v5261_v0 }
 0xb64   : > { %v6083_v58 = vpop.f32.mrb[236].mxu1  ;;  %v6276_v41 = vpop.f32.mrb[252].mxu0 }
 0xb65   : > { %v6085_v48 = vpop.f32.mrb[237].mxu1  ;;  %v6278_v57 = vpop.f32.mrb[253].mxu0 }
 0xb66   : > { %v10041_v25 = vpack.c.bf16 %v6085_v48, %v6083_v58  ;;  %v10042_v17 = vpack.c.bf16 %v6278_v57, %v6276_v41  ;;  %v6087_v50 = vpop.f32.mrb[238].mxu1  ;;  %v6280_v14 = vpop.f32.mrb[254].mxu0  ;;  %v9601_v58 = vcombine.high %v5254_v11, %v5262_v44  ;;  %v5269_v41 = vld [vmem:[%s14837_s15 + $0x130] sm:$0xff]  ;;  %v5270_v57 = vld [vmem:[%s14837_s15 + $0x138] sm:$0xff] }
 0xb67   : > { %v6089_v54 = vpop.f32.mrb[239].mxu1  ;;  %v6282_v29 = vpop.f32.mrb[255].mxu0  ;;  %v5277_v48 = vld [vmem:[%s14837_s15 + $0x170] sm:$0xff] }
 0xb68   : > { %9159 = vst [vmem:[%s14182_s19 + $0x280] sm:$0xff] %v10041_v25  ;;  %9160 = vst [vmem:[%s14182_s19 + $0x288] sm:$0xff] %v10042_v17  ;;  %v10049_v7 = vpack.c.bf16 %v6089_v54, %v6087_v50  ;;  %v10050_v62 = vpack.c.bf16 %v6282_v29, %v6280_v14  ;;  %v5278_v25 = vld [vmem:[%s14837_s15 + $0x178] sm:$0xff]  ;;  %v9598_v17 = vcombine.low %v5253_v43, %v5261_v0 }
 0xb69   : > { %6488 = vmatmul.mubr.bf16.gmra.mrb[52].mxu1 %v13936_v10  ;;  %6681 = vmatmul.mubr.bf16.gmra.mrb[68].mxu0 %v13936_v10  ;;  %v9600_v50 = vcombine.low %v5254_v11, %v5262_v44  ;;  %v9615_v29 = vcombine.high %v5269_v41, %v5277_v48  ;;  %v5318_v0 = vld [vmem:[%s14837_s15 + $0x2b8] sm:$0xff] }
 0xb6a   : > { %9167 = vst [vmem:[%s14182_s19 + $0x2c0] sm:$0xff] %v10049_v7  ;;  %9168 = vst [vmem:[%s14182_s19 + $0x2c8] sm:$0xff] %v10050_v62  ;;  %6497 = vmatprep.mubr.bf16.mxu1 %v14921_v37  ;;  %6690 = vmatprep.mubr.bf16.mxu0 %v14921_v37  ;;  %v9617_v7 = vcombine.high %v5270_v57, %v5278_v25  ;;  %v5285_v62 = vld [vmem:[%s14837_s15 + $0x1b0] sm:$0xff]  ;;  %v5326_v11 = vld [vmem:[%s14837_s15 + $0x2f8] sm:$0xff] }
 0xb6c   : > { %v6093_v8 = vpop.f32.mrb[240].mxu1  ;;  %v6286_v40 = vpop.f32.mrb[0].mxu0 }
 0xb6d   : > { %v6095_v27 = vpop.f32.mrb[241].mxu1  ;;  %v6288_v46 = vpop.f32.mrb[1].mxu0 }
 0xb6e   : > { %v10057_v4 = vpack.c.bf16 %v6095_v27, %v6093_v8  ;;  %v10058_v21 = vpack.c.bf16 %v6288_v46, %v6286_v40  ;;  %v6097_v9 = vpop.f32.mrb[242].mxu1  ;;  %v6290_v60 = vpop.f32.mrb[2].mxu0 }
 0xb6f   : > { %v6099_v24 = vpop.f32.mrb[243].mxu1  ;;  %v6292_v42 = vpop.f32.mrb[3].mxu0 }
 0xb70   : > { %9175 = vst [vmem:[%s14182_s19 + $0x300] sm:$0xff] %v10057_v4  ;;  %9176 = vst [vmem:[%s14182_s19 + $0x308] sm:$0xff] %v10058_v21  ;;  %v10065_v15 = vpack.c.bf16 %v6099_v24, %v6097_v9  ;;  %v10066_v51 = vpack.c.bf16 %v6292_v42, %v6290_v60  ;;  %v9614_v21 = vcombine.low %v5269_v41, %v5277_v48 }
 0xb71   : > { %6498 = vmatmul.mubr.bf16.gmra.mrb[56].mxu1 %v14012_v31  ;;  %6691 = vmatmul.mubr.bf16.gmra.mrb[72].mxu0 %v14012_v31  ;;  %v9616_v9 = vcombine.low %v5270_v57, %v5278_v25  ;;  %v9631_v60 = vcombine.high %v5285_v62, %v5293_v61 }
 0xb72   : > { %9183 = vst [vmem:[%s14182_s19 + $0x340] sm:$0xff] %v10065_v15  ;;  %9184 = vst [vmem:[%s14182_s19 + $0x348] sm:$0xff] %v10066_v51  ;;  %6507 = vmatprep.mubr.bf16.mxu1 %v14921_v37  ;;  %6700 = vmatprep.mubr.bf16.mxu0 %v14921_v37  ;;  %v5301_v51 = vld [vmem:[%s14837_s15 + $0x230] sm:$0xff] }
 0xb74   : > { %v6103_v53 = vpop.f32.mrb[244].mxu1  ;;  %v6296_v1 = vpop.f32.mrb[4].mxu0 }
 0xb75   : > { %v6105_v35 = vpop.f32.mrb[245].mxu1  ;;  %v6298_v16 = vpop.f32.mrb[5].mxu0 }
 0xb76   : > { %v10073_v20 = vpack.c.bf16 %v6105_v35, %v6103_v53  ;;  %v10074_v19 = vpack.c.bf16 %v6298_v16, %v6296_v1  ;;  %v6107_v26 = vpop.f32.mrb[246].mxu1  ;;  %v6300_v59 = vpop.f32.mrb[6].mxu0  ;;  %v5309_v53 = vld [vmem:[%s14837_s15 + $0x270] sm:$0xff]  ;;  %v5302_v1 = vld [vmem:[%s14837_s15 + $0x238] sm:$0xff]  ;;  %v9630_v16 = vcombine.low %v5285_v62, %v5293_v61 }
 0xb77   : > { %v6109_v52 = vpop.f32.mrb[247].mxu1  ;;  %v6302_v47 = vpop.f32.mrb[7].mxu0  ;;  %v5310_v35 = vld [vmem:[%s14837_s15 + $0x278] sm:$0xff]  ;;  %v9646_v25 = vcombine.low %v5301_v51, %v5309_v53  ;;  %v5341_v62 = vld [vmem:[%s14837_s15 + $0x370] sm:$0xff] }
 0xb78   : > { %9191 = vst [vmem:[%s14182_s19 + $0x380] sm:$0xff] %v10073_v20  ;;  %9192 = vst [vmem:[%s14182_s19 + $0x388] sm:$0xff] %v10074_v19  ;;  %v10081_v34 = vpack.c.bf16 %v6109_v52, %v6107_v26  ;;  %v10082_v2 = vpack.c.bf16 %v6302_v47, %v6300_v59  ;;  %v9647_v59 = vcombine.high %v5301_v51, %v5309_v53  ;;  %v5317_v47 = vld [vmem:[%s14837_s15 + $0x2b0] sm:$0xff]  ;;  %v5334_v61 = vld [vmem:[%s14837_s15 + $0x338] sm:$0xff] }
 0xb79   : > { %6508 = vmatmul.mubr.bf16.gmra.mrb[60].mxu1 %v14024_v23  ;;  %6701 = vmatmul.mubr.bf16.gmra.mrb[76].mxu0 %v14024_v23  ;;  %v9649_v52 = vcombine.high %v5302_v1, %v5310_v35 }
 0xb7a   : > { %9199 = vst [vmem:[%s14182_s19 + $0x3c0] sm:$0xff] %v10081_v34  ;;  %9200 = vst [vmem:[%s14182_s19 + $0x3c8] sm:$0xff] %v10082_v2  ;;  %6517 = vmatprep.mubr.bf16.mxu1 %v14921_v37  ;;  %6710 = vmatprep.mubr.bf16.mxu0 %v14921_v37  ;;  %v5325_v34 = vld [vmem:[%s14837_s15 + $0x2f0] sm:$0xff] }
 0xb81   : > { %6518 = vmatmul.mubr.bf16.gmra.mrb[64].mxu1 %v14037_v63  ;;  %6711 = vmatmul.mubr.bf16.gmra.mrb[80].mxu0 %v14037_v63 }
 0xb82   : > { %6527 = vmatprep.mubr.bf16.mxu1 %v14921_v37  ;;  %6720 = vmatprep.mubr.bf16.mxu0 %v14921_v37 }
 0xb89   : > { %6528 = vmatmul.mubr.bf16.gmra.mrb[68].mxu1 %v14048_v36  ;;  %6721 = vmatmul.mubr.bf16.gmra.mrb[84].mxu0 %v14048_v36 }
 0xb8a   : > { %6537 = vmatprep.mubr.bf16.mxu1 %v14921_v37  ;;  %6730 = vmatprep.mubr.bf16.mxu0 %v14921_v37 }
 0xb91   : > { %6538 = vmatmul.mubr.bf16.gmra.mrb[72].mxu1 %v14060_v38  ;;  %6731 = vmatmul.mubr.bf16.gmra.mrb[88].mxu0 %v14060_v38 }
 0xb92   : > { %6547 = vmatprep.mubr.bf16.mxu1 %v14921_v37  ;;  %6740 = vmatprep.mubr.bf16.mxu0 %v14921_v37 }
 0xb99   : > { %6548 = vmatmul.mubr.bf16.gmra.mrb[76].mxu1 %v14072_v12  ;;  %6741 = vmatmul.mubr.bf16.gmra.mrb[92].mxu0 %v14072_v12 }
 0xb9a   : > { %6557 = vmatprep.mubr.bf16.mxu1 %v14921_v37  ;;  %6750 = vmatprep.mubr.bf16.mxu0 %v14921_v37 }
 0xba1   : > { %6558 = vmatmul.mubr.bf16.gmra.mrb[80].mxu1 %v14084_v45  ;;  %6751 = vmatmul.mubr.bf16.gmra.mrb[96].mxu0 %v14084_v45 }
 0xba2   : > { %6567 = vmatprep.mubr.bf16.mxu1 %v14921_v37  ;;  %6760 = vmatprep.mubr.bf16.mxu0 %v14921_v37 }
 0xba9   : > { %6568 = vmatmul.mubr.bf16.gmra.mrb[84].mxu1 %v14096_v39  ;;  %6761 = vmatmul.mubr.bf16.gmra.mrb[100].mxu0 %v14096_v39 }
 0xbaa   : > { %6803 = vmatprep.mubr.bf16.mxu1 %v14921_v37  ;;  %6996 = vmatprep.mubr.bf16.mxu0 %v14921_v37 }
 0xbb1   : > { %6804 = vmatmul.mubr.bf16.vlgmr.msra.gmra.mrb[88].mxu1 %v13774_v56  ;;  %6997 = vmatmul.mubr.bf16.vlgmr.msra.gmra.mrb[104].mxu0 %v13774_v56 }
 0xbb2   : > { %6813 = vmatprep.mubr.bf16.mxu1 %v14921_v37  ;;  %7006 = vmatprep.mubr.bf16.mxu0 %v14921_v37 }
 0xbb3   : > { %7158 = vmatpush1.bf16.msra.mxu1 %v9582_v22  ;;  %7351 = vmatpush1.bf16.msra.mxu0 %v9584_v5  ;;  %v5286_v22 = vld [vmem:[%s14837_s15 + $0x1b8] sm:$0xff] }
 0xbb4   : > { %v6113_v14 = vpop.f32.mrb[248].mxu1  ;;  %v6306_v54 = vpop.f32.mrb[8].mxu0  ;;  %7159 = vmatprep.subr.bf16.mxu1 %v9599_v30  ;;  %7352 = vmatprep.subr.bf16.mxu0 %v9601_v58  ;;  %v9633_v15 = vcombine.high %v5286_v22, %v5294_v28  ;;  %v9632_v20 = vcombine.low %v5286_v22, %v5294_v28  ;;  %v9664_v22 = vcombine.low %v5318_v0, %v5326_v11 }
 0xbb5   : > { %v6115_v18 = vpop.f32.mrb[249].mxu1  ;;  %v6308_v13 = vpop.f32.mrb[9].mxu0 }
 0xbb6   : > { %v10089_v5 = vpack.c.bf16 %v6115_v18, %v6113_v14  ;;  %v10090_v8 = vpack.c.bf16 %v6308_v13, %v6306_v54  ;;  %v6117_v40 = vpop.f32.mrb[250].mxu1  ;;  %v6310_v27 = vpop.f32.mrb[10].mxu0  ;;  %v5342_v18 = vld [vmem:[%s14837_s15 + $0x378] sm:$0xff]  ;;  %v9662_v13 = vcombine.low %v5317_v47, %v5325_v34 }
 0xbb7   : > { %v6119_v46 = vpop.f32.mrb[251].mxu1  ;;  %v6312_v4 = vpop.f32.mrb[11].mxu0  ;;  %7160 = vmatpush1.bf16.msra.mxu1 %v9598_v17  ;;  %7353 = vmatpush1.bf16.msra.mxu0 %v9600_v50  ;;  %v9648_v17 = vcombine.low %v5302_v1, %v5310_v35  ;;  %v9663_v50 = vcombine.high %v5317_v47, %v5325_v34 }
 0xbb8   : > { %9207 = vst [vmem:[%s14182_s19 + $0x400] sm:$0xff] %v10089_v5  ;;  %9208 = vst [vmem:[%s14182_s19 + $0x408] sm:$0xff] %v10090_v8  ;;  %v10097_v24 = vpack.c.bf16 %v6119_v46, %v6117_v40  ;;  %v10098_v42 = vpack.c.bf16 %v6312_v4, %v6310_v27  ;;  %7161 = vmatprep.subr.bf16.mxu1 %v9615_v29  ;;  %7354 = vmatprep.subr.bf16.mxu0 %v9617_v7  ;;  %v5333_v7 = vld [vmem:[%s14837_s15 + $0x330] sm:$0xff]  ;;  %v5350_v27 = vld [vmem:[%s14837_s15 + $0x3b8] sm:$0xff] }
 0xbb9   : > { %6814 = vmatmul.mubr.bf16.gmra.mrb[92].mxu1 %v13814_v49  ;;  %7007 = vmatmul.mubr.bf16.gmra.mrb[108].mxu0 %v13814_v49  ;;  %v9665_v29 = vcombine.high %v5318_v0, %v5326_v11  ;;  %v9679_v28 = vcombine.high %v5333_v7, %v5341_v62  ;;  %v9681_v5 = vcombine.high %v5334_v61, %v5342_v18  ;;  %v5349_v8 = vld [vmem:[%s14837_s15 + $0x3b0] sm:$0xff]  ;;  %v5358_v46 = vld [vmem:[%s14837_s15 + $0x3f8] sm:$0xff] }
 0xbba   : > { %9215 = vst [vmem:[%s14182_s19 + $0x440] sm:$0xff] %v10097_v24  ;;  %9216 = vst [vmem:[%s14182_s19 + $0x448] sm:$0xff] %v10098_v42  ;;  %6823 = vmatprep.mubr.bf16.mxu1 %v14921_v37  ;;  %7016 = vmatprep.mubr.bf16.mxu0 %v14921_v37  ;;  %v5357_v40 = vld [vmem:[%s14837_s15 + $0x3f0] sm:$0xff]  ;;  %v9678_v4 = vcombine.low %v5333_v7, %v5341_v62  ;;  %v9696_v42 = vcombine.low %v5350_v27, %v5358_v46 }
 0xbbb   : > { %7162 = vmatpush1.bf16.msra.mxu1 %v9614_v21  ;;  %7355 = vmatpush1.bf16.msra.mxu0 %v9616_v9  ;;  %v9680_v21 = vcombine.low %v5334_v61, %v5342_v18  ;;  %v9695_v9 = vcombine.high %v5349_v8, %v5357_v40  ;;  %v9694_v24 = vcombine.low %v5349_v8, %v5357_v40 }
 0xbbc   : > { %v6123_v19 = vpop.f32.mrb[252].mxu1  ;;  %v6316_v26 = vpop.f32.mrb[12].mxu0  ;;  %7163 = vmatprep.subr.bf16.mxu1 %v9631_v60  ;;  %7356 = vmatprep.subr.bf16.mxu0 %v9633_v15  ;;  %v9697_v60 = vcombine.high %v5350_v27, %v5358_v46 }
 0xbbd   : > { %v6125_v2 = vpop.f32.mrb[253].mxu1  ;;  %v6318_v43 = vpop.f32.mrb[13].mxu0 }
 0xbbe   : > { %v10105_v44 = vpack.c.bf16 %v6125_v2, %v6123_v19  ;;  %v10106_v30 = vpack.c.bf16 %v6318_v43, %v6316_v26  ;;  %v6127_v58 = vpop.f32.mrb[254].mxu1  ;;  %v6320_v41 = vpop.f32.mrb[14].mxu0 }
 0xbbf   : > { %v6129_v48 = vpop.f32.mrb[255].mxu1  ;;  %v6322_v57 = vpop.f32.mrb[15].mxu0  ;;  %7164 = vmatpush1.bf16.msra.mxu1 %v9630_v16  ;;  %7357 = vmatpush1.bf16.msra.mxu0 %v9632_v20 }
 0xbc0   : > { %9223 = vst [vmem:[%s14182_s19 + $0x480] sm:$0xff] %v10105_v44  ;;  %9224 = vst [vmem:[%s14182_s19 + $0x488] sm:$0xff] %v10106_v30  ;;  %v10113_v14 = vpack.c.bf16 %v6129_v48, %v6127_v58  ;;  %v10114_v54 = vpack.c.bf16 %v6322_v57, %v6320_v41  ;;  %7165 = vmatprep.subr.bf16.mxu1 %v9647_v59  ;;  %7358 = vmatprep.subr.bf16.mxu0 %v9649_v52 }
 0xbc1   : > { %6824 = vmatmul.mubr.bf16.gmra.mrb[96].mxu1 %v13836_v55  ;;  %7017 = vmatmul.mubr.bf16.gmra.mrb[112].mxu0 %v13836_v55 }
 0xbc2   : > { %9231 = vst [vmem:[%s14182_s19 + $0x4c0] sm:$0xff] %v10113_v14  ;;  %9232 = vst [vmem:[%s14182_s19 + $0x4c8] sm:$0xff] %v10114_v54  ;;  %6833 = vmatprep.mubr.bf16.mxu1 %v14921_v37  ;;  %7026 = vmatprep.mubr.bf16.mxu0 %v14921_v37 }
 0xbc3   : > { %7166 = vmatpush1.bf16.msra.mxu1 %v9646_v25  ;;  %7359 = vmatpush1.bf16.msra.mxu0 %v9648_v17 }
 0xbc4   : > { %7167 = vmatprep.subr.bf16.mxu1 %v9663_v50  ;;  %7360 = vmatprep.subr.bf16.mxu0 %v9665_v29 }
 0xbc7   : > { %7168 = vmatpush1.bf16.msra.mxu1 %v9662_v13  ;;  %7361 = vmatpush1.bf16.msra.mxu0 %v9664_v22 }
 0xbc8   : > { %7169 = vmatprep.subr.bf16.mxu1 %v9679_v28  ;;  %7362 = vmatprep.subr.bf16.mxu0 %v9681_v5 }
 0xbc9   : > { %6834 = vmatmul.mubr.bf16.gmra.mrb[100].mxu1 %v13858_v6  ;;  %7027 = vmatmul.mubr.bf16.gmra.mrb[116].mxu0 %v13858_v6 }
 0xbca   : > { %6843 = vmatprep.mubr.bf16.mxu1 %v14921_v37  ;;  %7036 = vmatprep.mubr.bf16.mxu0 %v14921_v37 }
 0xbcb   : > { %7170 = vmatpush1.bf16.msra.mxu1 %v9678_v4  ;;  %7363 = vmatpush1.bf16.msra.mxu0 %v9680_v21 }
 0xbcc   : > { %7171 = vmatprep.subr.bf16.mxu1 %v9695_v9  ;;  %7364 = vmatprep.subr.bf16.mxu0 %v9697_v60 }
 0xbcf   : > { %7172 = vmatpush1.bf16.msra.mxu1 %v9694_v24  ;;  %7365 = vmatpush1.bf16.msra.mxu0 %v9696_v42 }
 0xbd1   : > { %6844 = vmatmul.mubr.bf16.gmra.mrb[104].mxu1 %v13877_v3  ;;  %7037 = vmatmul.mubr.bf16.gmra.mrb[120].mxu0 %v13877_v3 }
 0xbd2   : > { %6853 = vmatprep.mubr.bf16.mxu1 %v14921_v37  ;;  %7046 = vmatprep.mubr.bf16.mxu0 %v14921_v37 }
 0xbd4   : > { %v6133_v15 = vpop.f32.mrb[0].mxu1  ;;  %v6326_v51 = vpop.f32.mrb[16].mxu0 }
 0xbd5   : > { %v6135_v53 = vpop.f32.mrb[1].mxu1  ;;  %v6328_v1 = vpop.f32.mrb[17].mxu0 }
 0xbd6   : > { %v10121_v35 = vpack.c.bf16 %v6135_v53, %v6133_v15  ;;  %v10122_v16 = vpack.c.bf16 %v6328_v1, %v6326_v51  ;;  %v6137_v20 = vpop.f32.mrb[2].mxu1  ;;  %v6330_v19 = vpop.f32.mrb[18].mxu0 }
 0xbd7   : > { %v6139_v26 = vpop.f32.mrb[3].mxu1  ;;  %v6332_v59 = vpop.f32.mrb[19].mxu0 }
 0xbd8   : > { %9239 = vst [vmem:[%s14182_s19 + $0x500] sm:$0xff] %v10121_v35  ;;  %9240 = vst [vmem:[%s14182_s19 + $0x508] sm:$0xff] %v10122_v16  ;;  %v10129_v52 = vpack.c.bf16 %v6139_v26, %v6137_v20  ;;  %v10130_v47 = vpack.c.bf16 %v6332_v59, %v6330_v19 }
 0xbd9   : > { %6854 = vmatmul.mubr.bf16.gmra.mrb[108].mxu1 %v13900_v32  ;;  %7047 = vmatmul.mubr.bf16.gmra.mrb[124].mxu0 %v13900_v32 }
 0xbda   : > { %9247 = vst [vmem:[%s14182_s19 + $0x540] sm:$0xff] %v10129_v52  ;;  %9248 = vst [vmem:[%s14182_s19 + $0x548] sm:$0xff] %v10130_v47  ;;  %6863 = vmatprep.mubr.bf16.mxu1 %v14921_v37  ;;  %7056 = vmatprep.mubr.bf16.mxu0 %v14921_v37 }
 0xbdc   : > { %v6143_v34 = vpop.f32.mrb[4].mxu1  ;;  %v6336_v2 = vpop.f32.mrb[20].mxu0 }
 0xbdd   : > { %v6145_v43 = vpop.f32.mrb[5].mxu1  ;;  %v6338_v0 = vpop.f32.mrb[21].mxu0 }
 0xbde   : > { %v10137_v11 = vpack.c.bf16 %v6145_v43, %v6143_v34  ;;  %v10138_v44 = vpack.c.bf16 %v6338_v0, %v6336_v2  ;;  %v6147_v30 = vpop.f32.mrb[6].mxu1  ;;  %v6340_v58 = vpop.f32.mrb[22].mxu0 }
 0xbdf   : > { %v6149_v41 = vpop.f32.mrb[7].mxu1  ;;  %v6342_v48 = vpop.f32.mrb[23].mxu0 }
 0xbe0   : > { %9255 = vst [vmem:[%s14182_s19 + $0x580] sm:$0xff] %v10137_v11  ;;  %9256 = vst [vmem:[%s14182_s19 + $0x588] sm:$0xff] %v10138_v44  ;;  %v10145_v57 = vpack.c.bf16 %v6149_v41, %v6147_v30  ;;  %v10146_v25 = vpack.c.bf16 %v6342_v48, %v6340_v58 }
 0xbe1   : > { %6864 = vmatmul.mubr.bf16.gmra.mrb[112].mxu1 %v13913_v33  ;;  %7057 = vmatmul.mubr.bf16.gmra.mrb[128].mxu0 %v13913_v33 }
 0xbe2   : > { %9263 = vst [vmem:[%s14182_s19 + $0x5c0] sm:$0xff] %v10145_v57  ;;  %9264 = vst [vmem:[%s14182_s19 + $0x5c8] sm:$0xff] %v10146_v25  ;;  %6873 = vmatprep.mubr.bf16.mxu1 %v14921_v37  ;;  %7066 = vmatprep.mubr.bf16.mxu0 %v14921_v37 }
 0xbe4   : > { %v6153_v17 = vpop.f32.mrb[8].mxu1  ;;  %v6346_v50 = vpop.f32.mrb[24].mxu0 }
 0xbe5   : > { %v6155_v14 = vpop.f32.mrb[9].mxu1  ;;  %v6348_v54 = vpop.f32.mrb[25].mxu0 }
 0xbe6   : > { %v10153_v29 = vpack.c.bf16 %v6155_v14, %v6153_v17  ;;  %v10154_v7 = vpack.c.bf16 %v6348_v54, %v6346_v50  ;;  %v6157_v62 = vpop.f32.mrb[10].mxu1  ;;  %v6350_v61 = vpop.f32.mrb[26].mxu0 }
 0xbe7   : > { %v6159_v18 = vpop.f32.mrb[11].mxu1  ;;  %v6352_v13 = vpop.f32.mrb[27].mxu0 }
 0xbe8   : > { %9271 = vst [vmem:[%s14182_s19 + $0x600] sm:$0xff] %v10153_v29  ;;  %9272 = vst [vmem:[%s14182_s19 + $0x608] sm:$0xff] %v10154_v7  ;;  %v10161_v22 = vpack.c.bf16 %v6159_v18, %v6157_v62  ;;  %v10162_v28 = vpack.c.bf16 %v6352_v13, %v6350_v61 }
 0xbe9   : > { %6874 = vmatmul.mubr.bf16.gmra.mrb[116].mxu1 %v13936_v10  ;;  %7067 = vmatmul.mubr.bf16.gmra.mrb[132].mxu0 %v13936_v10 }
 0xbea   : > { %9279 = vst [vmem:[%s14182_s19 + $0x640] sm:$0xff] %v10161_v22  ;;  %9280 = vst [vmem:[%s14182_s19 + $0x648] sm:$0xff] %v10162_v28  ;;  %6883 = vmatprep.mubr.bf16.mxu1 %v14921_v37  ;;  %7076 = vmatprep.mubr.bf16.mxu0 %v14921_v37 }
 0xbec   : > { %v6163_v5 = vpop.f32.mrb[12].mxu1  ;;  %v6356_v8 = vpop.f32.mrb[28].mxu0 }
 0xbed   : > { %v6165_v40 = vpop.f32.mrb[13].mxu1  ;;  %v6358_v27 = vpop.f32.mrb[29].mxu0 }
 0xbee   : > { %v10169_v46 = vpack.c.bf16 %v6165_v40, %v6163_v5  ;;  %v10170_v4 = vpack.c.bf16 %v6358_v27, %v6356_v8  ;;  %v6167_v21 = vpop.f32.mrb[14].mxu1  ;;  %v6360_v9 = vpop.f32.mrb[30].mxu0 }
 0xbef   : > { %v6169_v60 = vpop.f32.mrb[15].mxu1  ;;  %v6362_v24 = vpop.f32.mrb[31].mxu0 }
 0xbf0   : > { %9287 = vst [vmem:[%s14182_s19 + $0x680] sm:$0xff] %v10169_v46  ;;  %9288 = vst [vmem:[%s14182_s19 + $0x688] sm:$0xff] %v10170_v4  ;;  %v10177_v42 = vpack.c.bf16 %v6169_v60, %v6167_v21  ;;  %v10178_v15 = vpack.c.bf16 %v6362_v24, %v6360_v9 }
 0xbf1   : > { %6884 = vmatmul.mubr.bf16.gmra.mrb[120].mxu1 %v14012_v31  ;;  %7077 = vmatmul.mubr.bf16.gmra.mrb[136].mxu0 %v14012_v31 }
 0xbf2   : > { %9295 = vst [vmem:[%s14182_s19 + $0x6c0] sm:$0xff] %v10177_v42  ;;  %9296 = vst [vmem:[%s14182_s19 + $0x6c8] sm:$0xff] %v10178_v15  ;;  %6893 = vmatprep.mubr.bf16.mxu1 %v14921_v37  ;;  %7086 = vmatprep.mubr.bf16.mxu0 %v14921_v37 }
 0xbf4   : > { %v6173_v51 = vpop.f32.mrb[16].mxu1  ;;  %v6366_v53 = vpop.f32.mrb[32].mxu0 }
 0xbf5   : > { %v6175_v1 = vpop.f32.mrb[17].mxu1  ;;  %v6368_v35 = vpop.f32.mrb[33].mxu0 }
 0xbf6   : > { %v10185_v16 = vpack.c.bf16 %v6175_v1, %v6173_v51  ;;  %v10186_v20 = vpack.c.bf16 %v6368_v35, %v6366_v53  ;;  %v6177_v19 = vpop.f32.mrb[18].mxu1  ;;  %v6370_v26 = vpop.f32.mrb[34].mxu0 }
 0xbf7   : > { %v6179_v59 = vpop.f32.mrb[19].mxu1  ;;  %v6372_v52 = vpop.f32.mrb[35].mxu0 }
 0xbf8   : > { %9303 = vst [vmem:[%s14182_s19 + $0x700] sm:$0xff] %v10185_v16  ;;  %9304 = vst [vmem:[%s14182_s19 + $0x708] sm:$0xff] %v10186_v20  ;;  %v10193_v47 = vpack.c.bf16 %v6179_v59, %v6177_v19  ;;  %v10194_v34 = vpack.c.bf16 %v6372_v52, %v6370_v26 }
 0xbf9   : > { %6894 = vmatmul.mubr.bf16.gmra.mrb[124].mxu1 %v14024_v23  ;;  %7087 = vmatmul.mubr.bf16.gmra.mrb[140].mxu0 %v14024_v23 }
 0xbfa   : > { %9311 = vst [vmem:[%s14182_s19 + $0x740] sm:$0xff] %v10193_v47  ;;  %9312 = vst [vmem:[%s14182_s19 + $0x748] sm:$0xff] %v10194_v34  ;;  %6903 = vmatprep.mubr.bf16.mxu1 %v14921_v37  ;;  %7096 = vmatprep.mubr.bf16.mxu0 %v14921_v37 }
 0xbfc   : > { %v6183_v2 = vpop.f32.mrb[20].mxu1  ;;  %v6376_v43 = vpop.f32.mrb[36].mxu0 }
 0xbfd   : > { %v6185_v0 = vpop.f32.mrb[21].mxu1  ;;  %v6378_v11 = vpop.f32.mrb[37].mxu0 }
 0xbfe   : > { %v10201_v44 = vpack.c.bf16 %v6185_v0, %v6183_v2  ;;  %v10202_v30 = vpack.c.bf16 %v6378_v11, %v6376_v43  ;;  %v6187_v58 = vpop.f32.mrb[22].mxu1  ;;  %v6380_v41 = vpop.f32.mrb[38].mxu0 }
 0xbff   : > { %v6189_v48 = vpop.f32.mrb[23].mxu1  ;;  %v6382_v57 = vpop.f32.mrb[39].mxu0 }
 0xc00   : > { %9319 = vst [vmem:[%s14182_s19 + $0x780] sm:$0xff] %v10201_v44  ;;  %9320 = vst [vmem:[%s14182_s19 + $0x788] sm:$0xff] %v10202_v30  ;;  %v10209_v25 = vpack.c.bf16 %v6189_v48, %v6187_v58  ;;  %v10210_v17 = vpack.c.bf16 %v6382_v57, %v6380_v41 }
 0xc01   : > { %6904 = vmatmul.mubr.bf16.gmra.mrb[128].mxu1 %v14037_v63  ;;  %7097 = vmatmul.mubr.bf16.gmra.mrb[144].mxu0 %v14037_v63 }
 0xc02   : > { %9327 = vst [vmem:[%s14182_s19 + $0x7c0] sm:$0xff] %v10209_v25  ;;  %9328 = vst [vmem:[%s14182_s19 + $0x7c8] sm:$0xff] %v10210_v17  ;;  %6913 = vmatprep.mubr.bf16.mxu1 %v14921_v37  ;;  %7106 = vmatprep.mubr.bf16.mxu0 %v14921_v37 }
 0xc04   : > { %v6419_v50 = vpop.f32.mrb[24].mxu1  ;;  %v6612_v14 = vpop.f32.mrb[40].mxu0 }
 0xc05   : > { %v6421_v54 = vpop.f32.mrb[25].mxu1  ;;  %v6614_v29 = vpop.f32.mrb[41].mxu0 }
 0xc06   : > { %v9963_v7 = vpack.c.bf16 %v6421_v54, %v6419_v50  ;;  %v9964_v62 = vpack.c.bf16 %v6614_v29, %v6612_v14  ;;  %v6423_v61 = vpop.f32.mrb[26].mxu1  ;;  %v6616_v18 = vpop.f32.mrb[42].mxu0 }
 0xc07   : > { %v6425_v13 = vpop.f32.mrb[27].mxu1  ;;  %v6618_v22 = vpop.f32.mrb[43].mxu0 }
 0xc08   : > { %9081 = vst [vmem:[%s14182_s19 + $0x10] sm:$0xff] %v9963_v7  ;;  %9082 = vst [vmem:[%s14182_s19 + $0x18] sm:$0xff] %v9964_v62  ;;  %v9971_v28 = vpack.c.bf16 %v6425_v13, %v6423_v61  ;;  %v9972_v5 = vpack.c.bf16 %v6618_v22, %v6616_v18 }
 0xc09   : > { %6914 = vmatmul.mubr.bf16.gmra.mrb[132].mxu1 %v14048_v36  ;;  %7107 = vmatmul.mubr.bf16.gmra.mrb[148].mxu0 %v14048_v36 }
 0xc0a   : > { %9089 = vst [vmem:[%s14182_s19 + $0x50] sm:$0xff] %v9971_v28  ;;  %9090 = vst [vmem:[%s14182_s19 + $0x58] sm:$0xff] %v9972_v5  ;;  %6923 = vmatprep.mubr.bf16.mxu1 %v14921_v37  ;;  %7116 = vmatprep.mubr.bf16.mxu0 %v14921_v37 }
 0xc0c   : > { %v6429_v8 = vpop.f32.mrb[28].mxu1  ;;  %v6622_v40 = vpop.f32.mrb[44].mxu0 }
 0xc0d   : > { %v6431_v27 = vpop.f32.mrb[29].mxu1  ;;  %v6624_v46 = vpop.f32.mrb[45].mxu0 }
 0xc0e   : > { %v9979_v4 = vpack.c.bf16 %v6431_v27, %v6429_v8  ;;  %v9980_v21 = vpack.c.bf16 %v6624_v46, %v6622_v40  ;;  %v6433_v9 = vpop.f32.mrb[30].mxu1  ;;  %v6626_v60 = vpop.f32.mrb[46].mxu0 }
 0xc0f   : > { %v6435_v24 = vpop.f32.mrb[31].mxu1  ;;  %v6628_v42 = vpop.f32.mrb[47].mxu0 }
 0xc10   : > { %9097 = vst [vmem:[%s14182_s19 + $0x90] sm:$0xff] %v9979_v4  ;;  %9098 = vst [vmem:[%s14182_s19 + $0x98] sm:$0xff] %v9980_v21  ;;  %v9987_v15 = vpack.c.bf16 %v6435_v24, %v6433_v9  ;;  %v9988_v51 = vpack.c.bf16 %v6628_v42, %v6626_v60 }
 0xc11   : > { %6924 = vmatmul.mubr.bf16.gmra.mrb[136].mxu1 %v14060_v38  ;;  %7117 = vmatmul.mubr.bf16.gmra.mrb[152].mxu0 %v14060_v38 }
 0xc12   : > { %9105 = vst [vmem:[%s14182_s19 + $0xd0] sm:$0xff] %v9987_v15  ;;  %9106 = vst [vmem:[%s14182_s19 + $0xd8] sm:$0xff] %v9988_v51  ;;  %6933 = vmatprep.mubr.bf16.mxu1 %v14921_v37  ;;  %7126 = vmatprep.mubr.bf16.mxu0 %v14921_v37 }
 0xc14   : > { %v6439_v53 = vpop.f32.mrb[32].mxu1  ;;  %v6632_v1 = vpop.f32.mrb[48].mxu0 }
 0xc15   : > { %v6441_v35 = vpop.f32.mrb[33].mxu1  ;;  %v6634_v16 = vpop.f32.mrb[49].mxu0 }
 0xc16   : > { %v9995_v20 = vpack.c.bf16 %v6441_v35, %v6439_v53  ;;  %v9996_v19 = vpack.c.bf16 %v6634_v16, %v6632_v1  ;;  %v6443_v26 = vpop.f32.mrb[34].mxu1  ;;  %v6636_v59 = vpop.f32.mrb[50].mxu0 }
 0xc17   : > { %v6445_v52 = vpop.f32.mrb[35].mxu1  ;;  %v6638_v47 = vpop.f32.mrb[51].mxu0 }
 0xc18   : > { %9113 = vst [vmem:[%s14182_s19 + $0x110] sm:$0xff] %v9995_v20  ;;  %9114 = vst [vmem:[%s14182_s19 + $0x118] sm:$0xff] %v9996_v19  ;;  %v10003_v34 = vpack.c.bf16 %v6445_v52, %v6443_v26  ;;  %v10004_v2 = vpack.c.bf16 %v6638_v47, %v6636_v59 }
 0xc19   : > { %6934 = vmatmul.mubr.bf16.gmra.mrb[140].mxu1 %v14072_v12  ;;  %7127 = vmatmul.mubr.bf16.gmra.mrb[156].mxu0 %v14072_v12 }
 0xc1a   : > { %9121 = vst [vmem:[%s14182_s19 + $0x150] sm:$0xff] %v10003_v34  ;;  %9122 = vst [vmem:[%s14182_s19 + $0x158] sm:$0xff] %v10004_v2  ;;  %6943 = vmatprep.mubr.bf16.mxu1 %v14921_v37  ;;  %7136 = vmatprep.mubr.bf16.mxu0 %v14921_v37 }
 0xc1c   : > { %v6449_v43 = vpop.f32.mrb[36].mxu1  ;;  %v6642_v0 = vpop.f32.mrb[52].mxu0 }
 0xc1d   : > { %v6451_v11 = vpop.f32.mrb[37].mxu1  ;;  %v6644_v44 = vpop.f32.mrb[53].mxu0 }
 0xc1e   : > { %v10011_v30 = vpack.c.bf16 %v6451_v11, %v6449_v43  ;;  %v10012_v58 = vpack.c.bf16 %v6644_v44, %v6642_v0  ;;  %v6453_v41 = vpop.f32.mrb[38].mxu1  ;;  %v6646_v48 = vpop.f32.mrb[54].mxu0 }
 0xc1f   : > { %v6455_v57 = vpop.f32.mrb[39].mxu1  ;;  %v6648_v25 = vpop.f32.mrb[55].mxu0 }
 0xc20   : > { %9129 = vst [vmem:[%s14182_s19 + $0x190] sm:$0xff] %v10011_v30  ;;  %9130 = vst [vmem:[%s14182_s19 + $0x198] sm:$0xff] %v10012_v58  ;;  %v10019_v17 = vpack.c.bf16 %v6455_v57, %v6453_v41  ;;  %v10020_v50 = vpack.c.bf16 %v6648_v25, %v6646_v48 }
 0xc21   : > { %6944 = vmatmul.mubr.bf16.gmra.mrb[144].mxu1 %v14084_v45  ;;  %7137 = vmatmul.mubr.bf16.gmra.mrb[160].mxu0 %v14084_v45 }
 0xc22   : > { %9137 = vst [vmem:[%s14182_s19 + $0x1d0] sm:$0xff] %v10019_v17  ;;  %9138 = vst [vmem:[%s14182_s19 + $0x1d8] sm:$0xff] %v10020_v50  ;;  %6953 = vmatprep.mubr.bf16.mxu1 %v14921_v37  ;;  %7146 = vmatprep.mubr.bf16.mxu0 %v14921_v37 }
 0xc24   : > { %v6459_v14 = vpop.f32.mrb[40].mxu1  ;;  %v6652_v54 = vpop.f32.mrb[56].mxu0 }
 0xc25   : > { %v6461_v29 = vpop.f32.mrb[41].mxu1  ;;  %v6654_v7 = vpop.f32.mrb[57].mxu0 }
 0xc26   : > { %v10027_v62 = vpack.c.bf16 %v6461_v29, %v6459_v14  ;;  %v10028_v61 = vpack.c.bf16 %v6654_v7, %v6652_v54  ;;  %v6463_v18 = vpop.f32.mrb[42].mxu1  ;;  %v6656_v13 = vpop.f32.mrb[58].mxu0 }
 0xc27   : > { %v6465_v22 = vpop.f32.mrb[43].mxu1  ;;  %v6658_v28 = vpop.f32.mrb[59].mxu0 }
 0xc28   : > { %9145 = vst [vmem:[%s14182_s19 + $0x210] sm:$0xff] %v10027_v62  ;;  %9146 = vst [vmem:[%s14182_s19 + $0x218] sm:$0xff] %v10028_v61  ;;  %v10035_v5 = vpack.c.bf16 %v6465_v22, %v6463_v18  ;;  %v10036_v8 = vpack.c.bf16 %v6658_v28, %v6656_v13 }
 0xc29   : > { %6954 = vmatmul.mubr.bf16.gmra.mrb[148].mxu1 %v14096_v39  ;;  %7147 = vmatmul.mubr.bf16.gmra.mrb[164].mxu0 %v14096_v39 }
 0xc2a   : > { %9153 = vst [vmem:[%s14182_s19 + $0x250] sm:$0xff] %v10035_v5  ;;  %9154 = vst [vmem:[%s14182_s19 + $0x258] sm:$0xff] %v10036_v8  ;;  %7189 = vmatprep.mubr.bf16.mxu1 %v14921_v37  ;;  %7382 = vmatprep.mubr.bf16.mxu0 %v14921_v37 }
 0xc2c   : > { %v6469_v40 = vpop.f32.mrb[44].mxu1  ;;  %v6662_v27 = vpop.f32.mrb[60].mxu0 }
 0xc2d   : > { %v6471_v46 = vpop.f32.mrb[45].mxu1  ;;  %v6664_v4 = vpop.f32.mrb[61].mxu0 }
 0xc2e   : > { %v10043_v21 = vpack.c.bf16 %v6471_v46, %v6469_v40  ;;  %v10044_v9 = vpack.c.bf16 %v6664_v4, %v6662_v27  ;;  %v6473_v60 = vpop.f32.mrb[46].mxu1  ;;  %v6666_v24 = vpop.f32.mrb[62].mxu0 }
 0xc2f   : > { %v6475_v42 = vpop.f32.mrb[47].mxu1  ;;  %v6668_v15 = vpop.f32.mrb[63].mxu0 }
 0xc30   : > { %9161 = vst [vmem:[%s14182_s19 + $0x290] sm:$0xff] %v10043_v21  ;;  %9162 = vst [vmem:[%s14182_s19 + $0x298] sm:$0xff] %v10044_v9  ;;  %v10051_v51 = vpack.c.bf16 %v6475_v42, %v6473_v60  ;;  %v10052_v53 = vpack.c.bf16 %v6668_v15, %v6666_v24 }
 0xc31   : > { %7190 = vmatmul.mubr.bf16.vlgmr.msra.gmra.mrb[152].mxu1 %v13774_v56  ;;  %7383 = vmatmul.mubr.bf16.vlgmr.msra.gmra.mrb[168].mxu0 %v13774_v56 }
 0xc32   : > { %9169 = vst [vmem:[%s14182_s19 + $0x2d0] sm:$0xff] %v10051_v51  ;;  %9170 = vst [vmem:[%s14182_s19 + $0x2d8] sm:$0xff] %v10052_v53  ;;  %7199 = vmatprep.mubr.bf16.mxu1 %v14921_v37  ;;  %7392 = vmatprep.mubr.bf16.mxu0 %v14921_v37 }
 0xc34   : > { %v6479_v1 = vpop.f32.mrb[48].mxu1  ;;  %v6672_v35 = vpop.f32.mrb[64].mxu0 }
 0xc35   : > { %v6481_v16 = vpop.f32.mrb[49].mxu1  ;;  %v6674_v20 = vpop.f32.mrb[65].mxu0 }
 0xc36   : > { %v10059_v19 = vpack.c.bf16 %v6481_v16, %v6479_v1  ;;  %v10060_v26 = vpack.c.bf16 %v6674_v20, %v6672_v35  ;;  %v6483_v59 = vpop.f32.mrb[50].mxu1  ;;  %v6676_v52 = vpop.f32.mrb[66].mxu0 }
 0xc37   : > { %v6485_v47 = vpop.f32.mrb[51].mxu1  ;;  %v6678_v34 = vpop.f32.mrb[67].mxu0 }
 0xc38   : > { %9177 = vst [vmem:[%s14182_s19 + $0x310] sm:$0xff] %v10059_v19  ;;  %9178 = vst [vmem:[%s14182_s19 + $0x318] sm:$0xff] %v10060_v26  ;;  %v10067_v56 = vpack.c.bf16 %v6485_v47, %v6483_v59  ;;  %v10068_v2 = vpack.c.bf16 %v6678_v34, %v6676_v52 }
 0xc39   : > { %7200 = vmatmul.mubr.bf16.gmra.mrb[156].mxu1 %v13814_v49  ;;  %7393 = vmatmul.mubr.bf16.gmra.mrb[172].mxu0 %v13814_v49 }
 0xc3a   : > { %9185 = vst [vmem:[%s14182_s19 + $0x350] sm:$0xff] %v10067_v56  ;;  %9186 = vst [vmem:[%s14182_s19 + $0x358] sm:$0xff] %v10068_v2  ;;  %7209 = vmatprep.mubr.bf16.mxu1 %v14921_v37  ;;  %7402 = vmatprep.mubr.bf16.mxu0 %v14921_v37 }
 0xc3c   : > { %v6489_v43 = vpop.f32.mrb[52].mxu1  ;;  %v6682_v0 = vpop.f32.mrb[68].mxu0 }
 0xc3d   : > { %v6491_v11 = vpop.f32.mrb[53].mxu1  ;;  %v6684_v44 = vpop.f32.mrb[69].mxu0 }
 0xc3e   : > { %v10075_v30 = vpack.c.bf16 %v6491_v11, %v6489_v43  ;;  %v10076_v58 = vpack.c.bf16 %v6684_v44, %v6682_v0  ;;  %v6493_v41 = vpop.f32.mrb[54].mxu1  ;;  %v6686_v48 = vpop.f32.mrb[70].mxu0 }
 0xc3f   : > { %v6495_v57 = vpop.f32.mrb[55].mxu1  ;;  %v6688_v25 = vpop.f32.mrb[71].mxu0 }
 0xc40   : > { %9193 = vst [vmem:[%s14182_s19 + $0x390] sm:$0xff] %v10075_v30  ;;  %9194 = vst [vmem:[%s14182_s19 + $0x398] sm:$0xff] %v10076_v58  ;;  %v10083_v49 = vpack.c.bf16 %v6495_v57, %v6493_v41  ;;  %v10084_v17 = vpack.c.bf16 %v6688_v25, %v6686_v48 }
 0xc41   : > { %7210 = vmatmul.mubr.bf16.gmra.mrb[160].mxu1 %v13836_v55  ;;  %7403 = vmatmul.mubr.bf16.gmra.mrb[176].mxu0 %v13836_v55 }
 0xc42   : > { %9201 = vst [vmem:[%s14182_s19 + $0x3d0] sm:$0xff] %v10083_v49  ;;  %9202 = vst [vmem:[%s14182_s19 + $0x3d8] sm:$0xff] %v10084_v17  ;;  %7219 = vmatprep.mubr.bf16.mxu1 %v14921_v37  ;;  %7412 = vmatprep.mubr.bf16.mxu0 %v14921_v37 }
 0xc44   : > { %v6499_v50 = vpop.f32.mrb[56].mxu1  ;;  %v6692_v14 = vpop.f32.mrb[72].mxu0 }
 0xc45   : > { %v6501_v54 = vpop.f32.mrb[57].mxu1  ;;  %v6694_v29 = vpop.f32.mrb[73].mxu0 }
 0xc46   : > { %v10091_v7 = vpack.c.bf16 %v6501_v54, %v6499_v50  ;;  %v10092_v62 = vpack.c.bf16 %v6694_v29, %v6692_v14  ;;  %v6503_v61 = vpop.f32.mrb[58].mxu1  ;;  %v6696_v18 = vpop.f32.mrb[74].mxu0 }
 0xc47   : > { %v6505_v13 = vpop.f32.mrb[59].mxu1  ;;  %v6698_v22 = vpop.f32.mrb[75].mxu0 }
 0xc48   : > { %9209 = vst [vmem:[%s14182_s19 + $0x410] sm:$0xff] %v10091_v7  ;;  %9210 = vst [vmem:[%s14182_s19 + $0x418] sm:$0xff] %v10092_v62  ;;  %v10099_v55 = vpack.c.bf16 %v6505_v13, %v6503_v61  ;;  %v10100_v28 = vpack.c.bf16 %v6698_v22, %v6696_v18 }
 0xc49   : > { %7220 = vmatmul.mubr.bf16.gmra.mrb[164].mxu1 %v13858_v6  ;;  %7413 = vmatmul.mubr.bf16.gmra.mrb[180].mxu0 %v13858_v6 }
 0xc4a   : > { %9217 = vst [vmem:[%s14182_s19 + $0x450] sm:$0xff] %v10099_v55  ;;  %9218 = vst [vmem:[%s14182_s19 + $0x458] sm:$0xff] %v10100_v28  ;;  %7229 = vmatprep.mubr.bf16.mxu1 %v14921_v37  ;;  %7422 = vmatprep.mubr.bf16.mxu0 %v14921_v37 }
 0xc4c   : > { %v6509_v5 = vpop.f32.mrb[60].mxu1  ;;  %v6702_v8 = vpop.f32.mrb[76].mxu0 }
 0xc4d   : > { %v6511_v40 = vpop.f32.mrb[61].mxu1  ;;  %v6704_v27 = vpop.f32.mrb[77].mxu0 }
 0xc4e   : > { %v10107_v46 = vpack.c.bf16 %v6511_v40, %v6509_v5  ;;  %v10108_v4 = vpack.c.bf16 %v6704_v27, %v6702_v8  ;;  %v6513_v21 = vpop.f32.mrb[62].mxu1  ;;  %v6706_v9 = vpop.f32.mrb[78].mxu0 }
 0xc4f   : > { %v6515_v60 = vpop.f32.mrb[63].mxu1  ;;  %v6708_v24 = vpop.f32.mrb[79].mxu0 }
 0xc50   : > { %9225 = vst [vmem:[%s14182_s19 + $0x490] sm:$0xff] %v10107_v46  ;;  %9226 = vst [vmem:[%s14182_s19 + $0x498] sm:$0xff] %v10108_v4  ;;  %v10115_v6 = vpack.c.bf16 %v6515_v60, %v6513_v21  ;;  %v10116_v42 = vpack.c.bf16 %v6708_v24, %v6706_v9 }
 0xc51   : > { %7230 = vmatmul.mubr.bf16.gmra.mrb[168].mxu1 %v13877_v3  ;;  %7423 = vmatmul.mubr.bf16.gmra.mrb[184].mxu0 %v13877_v3 }
 0xc52   : > { %9233 = vst [vmem:[%s14182_s19 + $0x4d0] sm:$0xff] %v10115_v6  ;;  %9234 = vst [vmem:[%s14182_s19 + $0x4d8] sm:$0xff] %v10116_v42  ;;  %7239 = vmatprep.mubr.bf16.mxu1 %v14921_v37  ;;  %7432 = vmatprep.mubr.bf16.mxu0 %v14921_v37 }
 0xc54   : > { %v6519_v15 = vpop.f32.mrb[64].mxu1  ;;  %v6712_v51 = vpop.f32.mrb[80].mxu0 }
 0xc55   : > { %v6521_v53 = vpop.f32.mrb[65].mxu1  ;;  %v6714_v1 = vpop.f32.mrb[81].mxu0 }
 0xc56   : > { %v10123_v35 = vpack.c.bf16 %v6521_v53, %v6519_v15  ;;  %v10124_v16 = vpack.c.bf16 %v6714_v1, %v6712_v51  ;;  %v6523_v20 = vpop.f32.mrb[66].mxu1  ;;  %v6716_v19 = vpop.f32.mrb[82].mxu0 }
 0xc57   : > { %v6525_v26 = vpop.f32.mrb[67].mxu1  ;;  %v6718_v59 = vpop.f32.mrb[83].mxu0 }
 0xc58   : > { %9241 = vst [vmem:[%s14182_s19 + $0x510] sm:$0xff] %v10123_v35  ;;  %9242 = vst [vmem:[%s14182_s19 + $0x518] sm:$0xff] %v10124_v16  ;;  %v10131_v3 = vpack.c.bf16 %v6525_v26, %v6523_v20  ;;  %v10132_v52 = vpack.c.bf16 %v6718_v59, %v6716_v19 }
 0xc59   : > { %7240 = vmatmul.mubr.bf16.gmra.mrb[172].mxu1 %v13900_v32  ;;  %7433 = vmatmul.mubr.bf16.gmra.mrb[188].mxu0 %v13900_v32 }
 0xc5a   : > { %9249 = vst [vmem:[%s14182_s19 + $0x550] sm:$0xff] %v10131_v3  ;;  %9250 = vst [vmem:[%s14182_s19 + $0x558] sm:$0xff] %v10132_v52  ;;  %7249 = vmatprep.mubr.bf16.mxu1 %v14921_v37  ;;  %7442 = vmatprep.mubr.bf16.mxu0 %v14921_v37 }
 0xc5c   : > { %v6529_v47 = vpop.f32.mrb[68].mxu1  ;;  %v6722_v34 = vpop.f32.mrb[84].mxu0 }
 0xc5d   : > { %v6531_v56 = vpop.f32.mrb[69].mxu1  ;;  %v6724_v2 = vpop.f32.mrb[85].mxu0 }
 0xc5e   : > { %v10139_v43 = vpack.c.bf16 %v6531_v56, %v6529_v47  ;;  %v10140_v0 = vpack.c.bf16 %v6724_v2, %v6722_v34  ;;  %v6533_v11 = vpop.f32.mrb[70].mxu1  ;;  %v6726_v44 = vpop.f32.mrb[86].mxu0 }
 0xc5f   : > { %v6535_v30 = vpop.f32.mrb[71].mxu1  ;;  %v6728_v58 = vpop.f32.mrb[87].mxu0 }
 0xc60   : > { %9257 = vst [vmem:[%s14182_s19 + $0x590] sm:$0xff] %v10139_v43  ;;  %9258 = vst [vmem:[%s14182_s19 + $0x598] sm:$0xff] %v10140_v0  ;;  %v10147_v32 = vpack.c.bf16 %v6535_v30, %v6533_v11  ;;  %v10148_v41 = vpack.c.bf16 %v6728_v58, %v6726_v44 }
 0xc61   : > { %7250 = vmatmul.mubr.bf16.gmra.mrb[176].mxu1 %v13913_v33  ;;  %7443 = vmatmul.mubr.bf16.gmra.mrb[192].mxu0 %v13913_v33 }
 0xc62   : > { %9265 = vst [vmem:[%s14182_s19 + $0x5d0] sm:$0xff] %v10147_v32  ;;  %9266 = vst [vmem:[%s14182_s19 + $0x5d8] sm:$0xff] %v10148_v41  ;;  %7259 = vmatprep.mubr.bf16.mxu1 %v14921_v37  ;;  %7452 = vmatprep.mubr.bf16.mxu0 %v14921_v37 }
 0xc64   : > { %v6539_v48 = vpop.f32.mrb[72].mxu1  ;;  %v6732_v57 = vpop.f32.mrb[88].mxu0 }
 0xc65   : > { %v6541_v25 = vpop.f32.mrb[73].mxu1  ;;  %v6734_v49 = vpop.f32.mrb[89].mxu0 }
 0xc66   : > { %v10155_v17 = vpack.c.bf16 %v6541_v25, %v6539_v48  ;;  %v10156_v50 = vpack.c.bf16 %v6734_v49, %v6732_v57  ;;  %v6543_v14 = vpop.f32.mrb[74].mxu1  ;;  %v6736_v54 = vpop.f32.mrb[90].mxu0 }
 0xc67   : > { %v6545_v29 = vpop.f32.mrb[75].mxu1  ;;  %v6738_v7 = vpop.f32.mrb[91].mxu0 }
 0xc68   : > { %9273 = vst [vmem:[%s14182_s19 + $0x610] sm:$0xff] %v10155_v17  ;;  %9274 = vst [vmem:[%s14182_s19 + $0x618] sm:$0xff] %v10156_v50  ;;  %v10163_v33 = vpack.c.bf16 %v6545_v29, %v6543_v14  ;;  %v10164_v62 = vpack.c.bf16 %v6738_v7, %v6736_v54 }
 0xc69   : > { %7260 = vmatmul.mubr.bf16.gmra.mrb[180].mxu1 %v13936_v10  ;;  %7453 = vmatmul.mubr.bf16.gmra.mrb[196].mxu0 %v13936_v10 }
 0xc6a   : > { %9281 = vst [vmem:[%s14182_s19 + $0x650] sm:$0xff] %v10163_v33  ;;  %9282 = vst [vmem:[%s14182_s19 + $0x658] sm:$0xff] %v10164_v62  ;;  %7269 = vmatprep.mubr.bf16.mxu1 %v14921_v37  ;;  %7462 = vmatprep.mubr.bf16.mxu0 %v14921_v37 }
 0xc6c   : > { %v6549_v61 = vpop.f32.mrb[76].mxu1  ;;  %v6742_v18 = vpop.f32.mrb[92].mxu0 }
 0xc6d   : > { %v6551_v13 = vpop.f32.mrb[77].mxu1  ;;  %v6744_v22 = vpop.f32.mrb[93].mxu0 }
 0xc6e   : > { %v10171_v55 = vpack.c.bf16 %v6551_v13, %v6549_v61  ;;  %v10172_v28 = vpack.c.bf16 %v6744_v22, %v6742_v18  ;;  %v6553_v5 = vpop.f32.mrb[78].mxu1  ;;  %v6746_v8 = vpop.f32.mrb[94].mxu0 }
 0xc6f   : > { %v6555_v40 = vpop.f32.mrb[79].mxu1  ;;  %v6748_v27 = vpop.f32.mrb[95].mxu0 }
 0xc70   : > { %9289 = vst [vmem:[%s14182_s19 + $0x690] sm:$0xff] %v10171_v55  ;;  %9290 = vst [vmem:[%s14182_s19 + $0x698] sm:$0xff] %v10172_v28  ;;  %v10179_v10 = vpack.c.bf16 %v6555_v40, %v6553_v5  ;;  %v10180_v46 = vpack.c.bf16 %v6748_v27, %v6746_v8 }
 0xc71   : > { %7270 = vmatmul.mubr.bf16.gmra.mrb[184].mxu1 %v14012_v31  ;;  %7463 = vmatmul.mubr.bf16.gmra.mrb[200].mxu0 %v14012_v31 }
 0xc72   : > { %9297 = vst [vmem:[%s14182_s19 + $0x6d0] sm:$0xff] %v10179_v10  ;;  %9298 = vst [vmem:[%s14182_s19 + $0x6d8] sm:$0xff] %v10180_v46  ;;  %7279 = vmatprep.mubr.bf16.mxu1 %v14921_v37  ;;  %7472 = vmatprep.mubr.bf16.mxu0 %v14921_v37 }
 0xc74   : > { %v6559_v4 = vpop.f32.mrb[80].mxu1  ;;  %v6752_v21 = vpop.f32.mrb[96].mxu0 }
 0xc75   : > { %v6561_v9 = vpop.f32.mrb[81].mxu1  ;;  %v6754_v60 = vpop.f32.mrb[97].mxu0 }
 0xc76   : > { %v10187_v24 = vpack.c.bf16 %v6561_v9, %v6559_v4  ;;  %v10188_v6 = vpack.c.bf16 %v6754_v60, %v6752_v21  ;;  %v6563_v42 = vpop.f32.mrb[82].mxu1  ;;  %v6756_v15 = vpop.f32.mrb[98].mxu0 }
 0xc77   : > { %v6565_v51 = vpop.f32.mrb[83].mxu1  ;;  %v6758_v53 = vpop.f32.mrb[99].mxu0 }
 0xc78   : > { %9305 = vst [vmem:[%s14182_s19 + $0x710] sm:$0xff] %v10187_v24  ;;  %9306 = vst [vmem:[%s14182_s19 + $0x718] sm:$0xff] %v10188_v6  ;;  %v10195_v31 = vpack.c.bf16 %v6565_v51, %v6563_v42  ;;  %v10196_v1 = vpack.c.bf16 %v6758_v53, %v6756_v15 }
 0xc79   : > { %7280 = vmatmul.mubr.bf16.gmra.mrb[188].mxu1 %v14024_v23  ;;  %7473 = vmatmul.mubr.bf16.gmra.mrb[204].mxu0 %v14024_v23 }
 0xc7a   : > { %9313 = vst [vmem:[%s14182_s19 + $0x750] sm:$0xff] %v10195_v31  ;;  %9314 = vst [vmem:[%s14182_s19 + $0x758] sm:$0xff] %v10196_v1  ;;  %7289 = vmatprep.mubr.bf16.mxu1 %v14921_v37  ;;  %7482 = vmatprep.mubr.bf16.mxu0 %v14921_v37 }
 0xc7c   : > { %v6569_v35 = vpop.f32.mrb[84].mxu1  ;;  %v6762_v16 = vpop.f32.mrb[100].mxu0 }
 0xc7d   : > { %v6571_v20 = vpop.f32.mrb[85].mxu1  ;;  %v6764_v19 = vpop.f32.mrb[101].mxu0 }
 0xc7e   : > { %v10203_v26 = vpack.c.bf16 %v6571_v20, %v6569_v35  ;;  %v10204_v59 = vpack.c.bf16 %v6764_v19, %v6762_v16  ;;  %v6573_v3 = vpop.f32.mrb[86].mxu1  ;;  %v6766_v52 = vpop.f32.mrb[102].mxu0 }
 0xc7f   : > { %v6575_v47 = vpop.f32.mrb[87].mxu1  ;;  %v6768_v34 = vpop.f32.mrb[103].mxu0 }
 0xc80   : > { %9321 = vst [vmem:[%s14182_s19 + $0x790] sm:$0xff] %v10203_v26  ;;  %9322 = vst [vmem:[%s14182_s19 + $0x798] sm:$0xff] %v10204_v59  ;;  %v10211_v23 = vpack.c.bf16 %v6575_v47, %v6573_v3  ;;  %v10212_v56 = vpack.c.bf16 %v6768_v34, %v6766_v52 }
 0xc81   : > { %7290 = vmatmul.mubr.bf16.gmra.mrb[192].mxu1 %v14037_v63  ;;  %7483 = vmatmul.mubr.bf16.gmra.mrb[208].mxu0 %v14037_v63 }
 0xc82   : > { %9329 = vst [vmem:[%s14182_s19 + $0x7d0] sm:$0xff] %v10211_v23  ;;  %9330 = vst [vmem:[%s14182_s19 + $0x7d8] sm:$0xff] %v10212_v56  ;;  %7299 = vmatprep.mubr.bf16.mxu1 %v14921_v37  ;;  %7492 = vmatprep.mubr.bf16.mxu0 %v14921_v37 }
 0xc84   : > { %v6805_v2 = vpop.f32.mrb[88].mxu1  ;;  %v6998_v43 = vpop.f32.mrb[104].mxu0 }
 0xc85   : > { %v6807_v0 = vpop.f32.mrb[89].mxu1  ;;  %v7000_v11 = vpop.f32.mrb[105].mxu0 }
 0xc86   : > { %v9965_v44 = vpack.c.bf16 %v6807_v0, %v6805_v2  ;;  %v9966_v30 = vpack.c.bf16 %v7000_v11, %v6998_v43  ;;  %v6809_v58 = vpop.f32.mrb[90].mxu1  ;;  %v7002_v32 = vpop.f32.mrb[106].mxu0 }
 0xc87   : > { %v6811_v41 = vpop.f32.mrb[91].mxu1  ;;  %v7004_v48 = vpop.f32.mrb[107].mxu0 }
 0xc88   : > { %9083 = vst [vmem:[%s14182_s19 + $0x20] sm:$0xff] %v9965_v44  ;;  %9084 = vst [vmem:[%s14182_s19 + $0x28] sm:$0xff] %v9966_v30  ;;  %v9973_v63 = vpack.c.bf16 %v6811_v41, %v6809_v58  ;;  %v9974_v57 = vpack.c.bf16 %v7004_v48, %v7002_v32 }
 0xc89   : > { %7300 = vmatmul.mubr.bf16.gmra.mrb[196].mxu1 %v14048_v36  ;;  %7493 = vmatmul.mubr.bf16.gmra.mrb[212].mxu0 %v14048_v36 }
 0xc8a   : > { %9091 = vst [vmem:[%s14182_s19 + $0x60] sm:$0xff] %v9973_v63  ;;  %9092 = vst [vmem:[%s14182_s19 + $0x68] sm:$0xff] %v9974_v57  ;;  %7309 = vmatprep.mubr.bf16.mxu1 %v14921_v37  ;;  %7502 = vmatprep.mubr.bf16.mxu0 %v14921_v37 }
 0xc8c   : > { %v6815_v25 = vpop.f32.mrb[92].mxu1  ;;  %v7008_v49 = vpop.f32.mrb[108].mxu0 }
 0xc8d   : > { %v6817_v17 = vpop.f32.mrb[93].mxu1  ;;  %v7010_v50 = vpop.f32.mrb[109].mxu0 }
 0xc8e   : > { %v9981_v14 = vpack.c.bf16 %v6817_v17, %v6815_v25  ;;  %v9982_v54 = vpack.c.bf16 %v7010_v50, %v7008_v49  ;;  %v6819_v29 = vpop.f32.mrb[94].mxu1  ;;  %v7012_v7 = vpop.f32.mrb[110].mxu0 }
 0xc8f   : > { %v6821_v33 = vpop.f32.mrb[95].mxu1  ;;  %v7014_v62 = vpop.f32.mrb[111].mxu0 }
 0xc90   : > { %9099 = vst [vmem:[%s14182_s19 + $0xa0] sm:$0xff] %v9981_v14  ;;  %9100 = vst [vmem:[%s14182_s19 + $0xa8] sm:$0xff] %v9982_v54  ;;  %v9989_v36 = vpack.c.bf16 %v6821_v33, %v6819_v29  ;;  %v9990_v61 = vpack.c.bf16 %v7014_v62, %v7012_v7 }
 0xc91   : > { %7310 = vmatmul.mubr.bf16.gmra.mrb[200].mxu1 %v14060_v38  ;;  %7503 = vmatmul.mubr.bf16.gmra.mrb[216].mxu0 %v14060_v38 }
 0xc92   : > { %9107 = vst [vmem:[%s14182_s19 + $0xe0] sm:$0xff] %v9989_v36  ;;  %9108 = vst [vmem:[%s14182_s19 + $0xe8] sm:$0xff] %v9990_v61  ;;  %7319 = vmatprep.mubr.bf16.mxu1 %v14921_v37  ;;  %7512 = vmatprep.mubr.bf16.mxu0 %v14921_v37 }
 0xc94   : > { %v6825_v18 = vpop.f32.mrb[96].mxu1  ;;  %v7018_v13 = vpop.f32.mrb[112].mxu0 }
 0xc95   : > { %v6827_v22 = vpop.f32.mrb[97].mxu1  ;;  %v7020_v55 = vpop.f32.mrb[113].mxu0 }
 0xc96   : > { %v9997_v28 = vpack.c.bf16 %v6827_v22, %v6825_v18  ;;  %v9998_v5 = vpack.c.bf16 %v7020_v55, %v7018_v13  ;;  %v6829_v8 = vpop.f32.mrb[98].mxu1  ;;  %v7022_v40 = vpop.f32.mrb[114].mxu0 }
 0xc97   : > { %v6831_v27 = vpop.f32.mrb[99].mxu1  ;;  %v7024_v10 = vpop.f32.mrb[115].mxu0 }
 0xc98   : > { %9115 = vst [vmem:[%s14182_s19 + $0x120] sm:$0xff] %v9997_v28  ;;  %9116 = vst [vmem:[%s14182_s19 + $0x128] sm:$0xff] %v9998_v5  ;;  %v10005_v38 = vpack.c.bf16 %v6831_v27, %v6829_v8  ;;  %v10006_v46 = vpack.c.bf16 %v7024_v10, %v7022_v40 }
 0xc99   : > { %7320 = vmatmul.mubr.bf16.gmra.mrb[204].mxu1 %v14072_v12  ;;  %7513 = vmatmul.mubr.bf16.gmra.mrb[220].mxu0 %v14072_v12 }
 0xc9a   : > { %9123 = vst [vmem:[%s14182_s19 + $0x160] sm:$0xff] %v10005_v38  ;;  %9124 = vst [vmem:[%s14182_s19 + $0x168] sm:$0xff] %v10006_v46  ;;  %7329 = vmatprep.mubr.bf16.mxu1 %v14921_v37  ;;  %7522 = vmatprep.mubr.bf16.mxu0 %v14921_v37 }
 0xc9c   : > { %v6835_v4 = vpop.f32.mrb[100].mxu1  ;;  %v7028_v21 = vpop.f32.mrb[116].mxu0 }
 0xc9d   : > { %v6837_v9 = vpop.f32.mrb[101].mxu1  ;;  %v7030_v60 = vpop.f32.mrb[117].mxu0 }
 0xc9e   : > { %v10013_v24 = vpack.c.bf16 %v6837_v9, %v6835_v4  ;;  %v10014_v6 = vpack.c.bf16 %v7030_v60, %v7028_v21  ;;  %v6839_v42 = vpop.f32.mrb[102].mxu1  ;;  %v7032_v15 = vpop.f32.mrb[118].mxu0 }
 0xc9f   : > { %v6841_v51 = vpop.f32.mrb[103].mxu1  ;;  %v7034_v53 = vpop.f32.mrb[119].mxu0 }
 0xca0   : > { %9131 = vst [vmem:[%s14182_s19 + $0x1a0] sm:$0xff] %v10013_v24  ;;  %9132 = vst [vmem:[%s14182_s19 + $0x1a8] sm:$0xff] %v10014_v6  ;;  %v10021_v12 = vpack.c.bf16 %v6841_v51, %v6839_v42  ;;  %v10022_v31 = vpack.c.bf16 %v7034_v53, %v7032_v15 }
 0xca1   : > { %7330 = vmatmul.mubr.bf16.gmra.mrb[208].mxu1 %v14084_v45  ;;  %7523 = vmatmul.mubr.bf16.gmra.mrb[224].mxu0 %v14084_v45 }
 0xca2   : > { %9139 = vst [vmem:[%s14182_s19 + $0x1e0] sm:$0xff] %v10021_v12  ;;  %9140 = vst [vmem:[%s14182_s19 + $0x1e8] sm:$0xff] %v10022_v31  ;;  %7339 = vmatprep.mubr.bf16.mxu1 %v14921_v37  ;;  %7532 = vmatprep.mubr.bf16.mxu0 %v14921_v37 }
 0xca4   : > { %v6845_v1 = vpop.f32.mrb[104].mxu1  ;;  %v7038_v35 = vpop.f32.mrb[120].mxu0 }
 0xca5   : > { %v6847_v16 = vpop.f32.mrb[105].mxu1  ;;  %v7040_v20 = vpop.f32.mrb[121].mxu0 }
 0xca6   : > { %v10029_v19 = vpack.c.bf16 %v6847_v16, %v6845_v1  ;;  %v10030_v26 = vpack.c.bf16 %v7040_v20, %v7038_v35  ;;  %v6849_v59 = vpop.f32.mrb[106].mxu1  ;;  %v7042_v3 = vpop.f32.mrb[122].mxu0 }
 0xca7   : > { %v6851_v52 = vpop.f32.mrb[107].mxu1  ;;  %v7044_v47 = vpop.f32.mrb[123].mxu0 }
 0xca8   : > { %9147 = vst [vmem:[%s14182_s19 + $0x220] sm:$0xff] %v10029_v19  ;;  %9148 = vst [vmem:[%s14182_s19 + $0x228] sm:$0xff] %v10030_v26  ;;  %v10037_v45 = vpack.c.bf16 %v6851_v52, %v6849_v59  ;;  %v10038_v34 = vpack.c.bf16 %v7044_v47, %v7042_v3 }
 0xca9   : > { %7340 = vmatmul.mubr.bf16.gmra.mrb[212].mxu1 %v14096_v39  ;;  %7533 = vmatmul.mubr.bf16.gmra.mrb[228].mxu0 %v14096_v39 }
 0xcaa   : > { %9155 = vst [vmem:[%s14182_s19 + $0x260] sm:$0xff] %v10037_v45  ;;  %9156 = vst [vmem:[%s14182_s19 + $0x268] sm:$0xff] %v10038_v34 }
 0xcac   : > { %v6855_v37 = vpop.f32.mrb[108].mxu1  ;;  %v7048_v23 = vpop.f32.mrb[124].mxu0 }
 0xcad   : > { %v6857_v56 = vpop.f32.mrb[109].mxu1  ;;  %v7050_v2 = vpop.f32.mrb[125].mxu0 }
 0xcae   : > { %v10045_v43 = vpack.c.bf16 %v6857_v56, %v6855_v37  ;;  %v10046_v0 = vpack.c.bf16 %v7050_v2, %v7048_v23  ;;  %v6859_v11 = vpop.f32.mrb[110].mxu1  ;;  %v7052_v44 = vpop.f32.mrb[126].mxu0 }
 0xcaf   : > { %v6861_v30 = vpop.f32.mrb[111].mxu1  ;;  %v7054_v58 = vpop.f32.mrb[127].mxu0 }
 0xcb0   : > { %9163 = vst [vmem:[%s14182_s19 + $0x2a0] sm:$0xff] %v10045_v43  ;;  %9164 = vst [vmem:[%s14182_s19 + $0x2a8] sm:$0xff] %v10046_v0  ;;  %v10053_v32 = vpack.c.bf16 %v6861_v30, %v6859_v11  ;;  %v10054_v39 = vpack.c.bf16 %v7054_v58, %v7052_v44 }
 0xcb2   : > { %9171 = vst [vmem:[%s14182_s19 + $0x2e0] sm:$0xff] %v10053_v32  ;;  %9172 = vst [vmem:[%s14182_s19 + $0x2e8] sm:$0xff] %v10054_v39 }
 0xcb4   : > { %v6865_v41 = vpop.f32.mrb[112].mxu1  ;;  %v7058_v48 = vpop.f32.mrb[128].mxu0 }
 0xcb5   : > { %v6867_v63 = vpop.f32.mrb[113].mxu1  ;;  %v7060_v57 = vpop.f32.mrb[129].mxu0 }
 0xcb6   : > { %v10061_v25 = vpack.c.bf16 %v6867_v63, %v6865_v41  ;;  %v10062_v49 = vpack.c.bf16 %v7060_v57, %v7058_v48  ;;  %v6869_v17 = vpop.f32.mrb[114].mxu1  ;;  %v7062_v50 = vpop.f32.mrb[130].mxu0 }
 0xcb7   : > { %v6871_v14 = vpop.f32.mrb[115].mxu1  ;;  %v7064_v54 = vpop.f32.mrb[131].mxu0 }
 0xcb8   : > { %9179 = vst [vmem:[%s14182_s19 + $0x320] sm:$0xff] %v10061_v25  ;;  %9180 = vst [vmem:[%s14182_s19 + $0x328] sm:$0xff] %v10062_v49  ;;  %v10069_v29 = vpack.c.bf16 %v6871_v14, %v6869_v17  ;;  %v10070_v7 = vpack.c.bf16 %v7064_v54, %v7062_v50 }
 0xcba   : > { %9187 = vst [vmem:[%s14182_s19 + $0x360] sm:$0xff] %v10069_v29  ;;  %9188 = vst [vmem:[%s14182_s19 + $0x368] sm:$0xff] %v10070_v7 }
 0xcbc   : > { %v6875_v33 = vpop.f32.mrb[116].mxu1  ;;  %v7068_v62 = vpop.f32.mrb[132].mxu0 }
 0xcbd   : > { %v6877_v36 = vpop.f32.mrb[117].mxu1  ;;  %v7070_v61 = vpop.f32.mrb[133].mxu0 }
 0xcbe   : > { %v10077_v18 = vpack.c.bf16 %v6877_v36, %v6875_v33  ;;  %v10078_v13 = vpack.c.bf16 %v7070_v61, %v7068_v62  ;;  %v6879_v22 = vpop.f32.mrb[118].mxu1  ;;  %v7072_v55 = vpop.f32.mrb[134].mxu0 }
 0xcbf   : > { %v6881_v28 = vpop.f32.mrb[119].mxu1  ;;  %v7074_v5 = vpop.f32.mrb[135].mxu0 }
 0xcc0   : > { %9195 = vst [vmem:[%s14182_s19 + $0x3a0] sm:$0xff] %v10077_v18  ;;  %9196 = vst [vmem:[%s14182_s19 + $0x3a8] sm:$0xff] %v10078_v13  ;;  %v10085_v8 = vpack.c.bf16 %v6881_v28, %v6879_v22  ;;  %v10086_v40 = vpack.c.bf16 %v7074_v5, %v7072_v55 }
 0xcc2   : > { %9203 = vst [vmem:[%s14182_s19 + $0x3e0] sm:$0xff] %v10085_v8  ;;  %9204 = vst [vmem:[%s14182_s19 + $0x3e8] sm:$0xff] %v10086_v40 }
 0xcc4   : > { %v6885_v27 = vpop.f32.mrb[120].mxu1  ;;  %v7078_v10 = vpop.f32.mrb[136].mxu0 }
 0xcc5   : > { %v6887_v38 = vpop.f32.mrb[121].mxu1  ;;  %v7080_v46 = vpop.f32.mrb[137].mxu0 }
 0xcc6   : > { %v10093_v4 = vpack.c.bf16 %v6887_v38, %v6885_v27  ;;  %v10094_v21 = vpack.c.bf16 %v7080_v46, %v7078_v10  ;;  %v6889_v9 = vpop.f32.mrb[122].mxu1  ;;  %v7082_v60 = vpop.f32.mrb[138].mxu0 }
 0xcc7   : > { %v6891_v24 = vpop.f32.mrb[123].mxu1  ;;  %v7084_v6 = vpop.f32.mrb[139].mxu0 }
 0xcc8   : > { %9211 = vst [vmem:[%s14182_s19 + $0x420] sm:$0xff] %v10093_v4  ;;  %9212 = vst [vmem:[%s14182_s19 + $0x428] sm:$0xff] %v10094_v21  ;;  %v10101_v42 = vpack.c.bf16 %v6891_v24, %v6889_v9  ;;  %v10102_v15 = vpack.c.bf16 %v7084_v6, %v7082_v60 }
 0xcca   : > { %9219 = vst [vmem:[%s14182_s19 + $0x460] sm:$0xff] %v10101_v42  ;;  %9220 = vst [vmem:[%s14182_s19 + $0x468] sm:$0xff] %v10102_v15 }
 0xccc   : > { %v6895_v51 = vpop.f32.mrb[124].mxu1  ;;  %v7088_v53 = vpop.f32.mrb[140].mxu0 }
 0xccd   : > { %v6897_v12 = vpop.f32.mrb[125].mxu1  ;;  %v7090_v31 = vpop.f32.mrb[141].mxu0 }
 0xcce   : > { %v10109_v1 = vpack.c.bf16 %v6897_v12, %v6895_v51  ;;  %v10110_v35 = vpack.c.bf16 %v7090_v31, %v7088_v53  ;;  %v6899_v16 = vpop.f32.mrb[126].mxu1  ;;  %v7092_v20 = vpop.f32.mrb[142].mxu0 }
 0xccf   : > { %v6901_v19 = vpop.f32.mrb[127].mxu1  ;;  %v7094_v26 = vpop.f32.mrb[143].mxu0 }
 0xcd0   : > { %9227 = vst [vmem:[%s14182_s19 + $0x4a0] sm:$0xff] %v10109_v1  ;;  %9228 = vst [vmem:[%s14182_s19 + $0x4a8] sm:$0xff] %v10110_v35  ;;  %v10117_v59 = vpack.c.bf16 %v6901_v19, %v6899_v16  ;;  %v10118_v3 = vpack.c.bf16 %v7094_v26, %v7092_v20 }
 0xcd2   : > { %9235 = vst [vmem:[%s14182_s19 + $0x4e0] sm:$0xff] %v10117_v59  ;;  %9236 = vst [vmem:[%s14182_s19 + $0x4e8] sm:$0xff] %v10118_v3 }
 0xcd4   : > { %v6905_v52 = vpop.f32.mrb[128].mxu1  ;;  %v7098_v47 = vpop.f32.mrb[144].mxu0 }
 0xcd5   : > { %v6907_v45 = vpop.f32.mrb[129].mxu1  ;;  %v7100_v34 = vpop.f32.mrb[145].mxu0 }
 0xcd6   : > { %v10125_v37 = vpack.c.bf16 %v6907_v45, %v6905_v52  ;;  %v10126_v23 = vpack.c.bf16 %v7100_v34, %v7098_v47  ;;  %v6909_v56 = vpop.f32.mrb[130].mxu1  ;;  %v7102_v2 = vpop.f32.mrb[146].mxu0 }
 0xcd7   : > { %v6911_v43 = vpop.f32.mrb[131].mxu1  ;;  %v7104_v0 = vpop.f32.mrb[147].mxu0 }
 0xcd8   : > { %9243 = vst [vmem:[%s14182_s19 + $0x520] sm:$0xff] %v10125_v37  ;;  %9244 = vst [vmem:[%s14182_s19 + $0x528] sm:$0xff] %v10126_v23  ;;  %v10133_v11 = vpack.c.bf16 %v6911_v43, %v6909_v56  ;;  %v10134_v44 = vpack.c.bf16 %v7104_v0, %v7102_v2 }
 0xcda   : > { %9251 = vst [vmem:[%s14182_s19 + $0x560] sm:$0xff] %v10133_v11  ;;  %9252 = vst [vmem:[%s14182_s19 + $0x568] sm:$0xff] %v10134_v44 }
 0xcdc   : > { %v6915_v30 = vpop.f32.mrb[132].mxu1  ;;  %v7108_v58 = vpop.f32.mrb[148].mxu0 }
 0xcdd   : > { %v6917_v32 = vpop.f32.mrb[133].mxu1  ;;  %v7110_v39 = vpop.f32.mrb[149].mxu0 }
 0xcde   : > { %v10141_v41 = vpack.c.bf16 %v6917_v32, %v6915_v30  ;;  %v10142_v48 = vpack.c.bf16 %v7110_v39, %v7108_v58  ;;  %v6919_v63 = vpop.f32.mrb[134].mxu1  ;;  %v7112_v57 = vpop.f32.mrb[150].mxu0 }
 0xcdf   : > { %v6921_v25 = vpop.f32.mrb[135].mxu1  ;;  %v7114_v49 = vpop.f32.mrb[151].mxu0 }
 0xce0   : > { %9259 = vst [vmem:[%s14182_s19 + $0x5a0] sm:$0xff] %v10141_v41  ;;  %9260 = vst [vmem:[%s14182_s19 + $0x5a8] sm:$0xff] %v10142_v48  ;;  %v10149_v17 = vpack.c.bf16 %v6921_v25, %v6919_v63  ;;  %v10150_v50 = vpack.c.bf16 %v7114_v49, %v7112_v57 }
 0xce2   : > { %9267 = vst [vmem:[%s14182_s19 + $0x5e0] sm:$0xff] %v10149_v17  ;;  %9268 = vst [vmem:[%s14182_s19 + $0x5e8] sm:$0xff] %v10150_v50 }
 0xce4   : > { %v6925_v14 = vpop.f32.mrb[136].mxu1  ;;  %v7118_v54 = vpop.f32.mrb[152].mxu0 }
 0xce5   : > { %v6927_v29 = vpop.f32.mrb[137].mxu1  ;;  %v7120_v7 = vpop.f32.mrb[153].mxu0 }
 0xce6   : > { %v10157_v33 = vpack.c.bf16 %v6927_v29, %v6925_v14  ;;  %v10158_v62 = vpack.c.bf16 %v7120_v7, %v7118_v54  ;;  %v6929_v36 = vpop.f32.mrb[138].mxu1  ;;  %v7122_v61 = vpop.f32.mrb[154].mxu0 }
 0xce7   : > { %v6931_v18 = vpop.f32.mrb[139].mxu1  ;;  %v7124_v13 = vpop.f32.mrb[155].mxu0 }
 0xce8   : > { %9275 = vst [vmem:[%s14182_s19 + $0x620] sm:$0xff] %v10157_v33  ;;  %9276 = vst [vmem:[%s14182_s19 + $0x628] sm:$0xff] %v10158_v62  ;;  %v10165_v22 = vpack.c.bf16 %v6931_v18, %v6929_v36  ;;  %v10166_v55 = vpack.c.bf16 %v7124_v13, %v7122_v61 }
 0xcea   : > { %9283 = vst [vmem:[%s14182_s19 + $0x660] sm:$0xff] %v10165_v22  ;;  %9284 = vst [vmem:[%s14182_s19 + $0x668] sm:$0xff] %v10166_v55 }
 0xcec   : > { %v6935_v28 = vpop.f32.mrb[140].mxu1  ;;  %v7128_v5 = vpop.f32.mrb[156].mxu0 }
 0xced   : > { %v6937_v8 = vpop.f32.mrb[141].mxu1  ;;  %v7130_v40 = vpop.f32.mrb[157].mxu0 }
 0xcee   : > { %v10173_v27 = vpack.c.bf16 %v6937_v8, %v6935_v28  ;;  %v10174_v10 = vpack.c.bf16 %v7130_v40, %v7128_v5  ;;  %v6939_v38 = vpop.f32.mrb[142].mxu1  ;;  %v7132_v46 = vpop.f32.mrb[158].mxu0 }
 0xcef   : > { %v6941_v4 = vpop.f32.mrb[143].mxu1  ;;  %v7134_v21 = vpop.f32.mrb[159].mxu0 }
 0xcf0   : > { %9291 = vst [vmem:[%s14182_s19 + $0x6a0] sm:$0xff] %v10173_v27  ;;  %9292 = vst [vmem:[%s14182_s19 + $0x6a8] sm:$0xff] %v10174_v10  ;;  %v10181_v9 = vpack.c.bf16 %v6941_v4, %v6939_v38  ;;  %v10182_v60 = vpack.c.bf16 %v7134_v21, %v7132_v46 }
 0xcf2   : > { %9299 = vst [vmem:[%s14182_s19 + $0x6e0] sm:$0xff] %v10181_v9  ;;  %9300 = vst [vmem:[%s14182_s19 + $0x6e8] sm:$0xff] %v10182_v60 }
 0xcf4   : > { %v6945_v24 = vpop.f32.mrb[144].mxu1  ;;  %v7138_v6 = vpop.f32.mrb[160].mxu0 }
 0xcf5   : > { %v6947_v42 = vpop.f32.mrb[145].mxu1  ;;  %v7140_v15 = vpop.f32.mrb[161].mxu0 }
 0xcf6   : > { %v10189_v51 = vpack.c.bf16 %v6947_v42, %v6945_v24  ;;  %v10190_v53 = vpack.c.bf16 %v7140_v15, %v7138_v6  ;;  %v6949_v12 = vpop.f32.mrb[146].mxu1  ;;  %v7142_v31 = vpop.f32.mrb[162].mxu0 }
 0xcf7   : > { %v6951_v1 = vpop.f32.mrb[147].mxu1  ;;  %v7144_v35 = vpop.f32.mrb[163].mxu0 }
 0xcf8   : > { %9307 = vst [vmem:[%s14182_s19 + $0x720] sm:$0xff] %v10189_v51  ;;  %9308 = vst [vmem:[%s14182_s19 + $0x728] sm:$0xff] %v10190_v53  ;;  %v10197_v16 = vpack.c.bf16 %v6951_v1, %v6949_v12  ;;  %v10198_v20 = vpack.c.bf16 %v7144_v35, %v7142_v31 }
 0xcfa   : > { %9315 = vst [vmem:[%s14182_s19 + $0x760] sm:$0xff] %v10197_v16  ;;  %9316 = vst [vmem:[%s14182_s19 + $0x768] sm:$0xff] %v10198_v20 }
 0xcfc   : > { %v6955_v19 = vpop.f32.mrb[148].mxu1  ;;  %v7148_v26 = vpop.f32.mrb[164].mxu0 }
 0xcfd   : > { %v6957_v59 = vpop.f32.mrb[149].mxu1  ;;  %v7150_v3 = vpop.f32.mrb[165].mxu0 }
 0xcfe   : > { %v10205_v52 = vpack.c.bf16 %v6957_v59, %v6955_v19  ;;  %v10206_v47 = vpack.c.bf16 %v7150_v3, %v7148_v26  ;;  %v6959_v45 = vpop.f32.mrb[150].mxu1  ;;  %v7152_v34 = vpop.f32.mrb[166].mxu0 }
 0xcff   : > { %v6961_v37 = vpop.f32.mrb[151].mxu1  ;;  %v7154_v23 = vpop.f32.mrb[167].mxu0 }
 0xd00   : > { %9323 = vst [vmem:[%s14182_s19 + $0x7a0] sm:$0xff] %v10205_v52  ;;  %9324 = vst [vmem:[%s14182_s19 + $0x7a8] sm:$0xff] %v10206_v47  ;;  %v10213_v56 = vpack.c.bf16 %v6961_v37, %v6959_v45  ;;  %v10214_v2 = vpack.c.bf16 %v7154_v23, %v7152_v34 }
 0xd02   : > { %9331 = vst [vmem:[%s14182_s19 + $0x7e0] sm:$0xff] %v10213_v56  ;;  %9332 = vst [vmem:[%s14182_s19 + $0x7e8] sm:$0xff] %v10214_v2 }
 0xd04   : > { %v7191_v43 = vpop.f32.mrb[152].mxu1  ;;  %v7384_v0 = vpop.f32.mrb[168].mxu0 }
 0xd05   : > { %v7193_v11 = vpop.f32.mrb[153].mxu1  ;;  %v7386_v44 = vpop.f32.mrb[169].mxu0 }
 0xd06   : > { %v9967_v30 = vpack.c.bf16 %v7193_v11, %v7191_v43  ;;  %v9968_v58 = vpack.c.bf16 %v7386_v44, %v7384_v0  ;;  %v7195_v32 = vpop.f32.mrb[154].mxu1  ;;  %v7388_v39 = vpop.f32.mrb[170].mxu0 }
 0xd07   : > { %v7197_v41 = vpop.f32.mrb[155].mxu1  ;;  %v7390_v48 = vpop.f32.mrb[171].mxu0 }
 0xd08   : > { %9085 = vst [vmem:[%s14182_s19 + $0x30] sm:$0xff] %v9967_v30  ;;  %9086 = vst [vmem:[%s14182_s19 + $0x38] sm:$0xff] %v9968_v58  ;;  %v9975_v63 = vpack.c.bf16 %v7197_v41, %v7195_v32  ;;  %v9976_v57 = vpack.c.bf16 %v7390_v48, %v7388_v39 }
 0xd0a   : > { %9093 = vst [vmem:[%s14182_s19 + $0x70] sm:$0xff] %v9975_v63  ;;  %9094 = vst [vmem:[%s14182_s19 + $0x78] sm:$0xff] %v9976_v57 }
 0xd0c   : > { %v7201_v25 = vpop.f32.mrb[156].mxu1  ;;  %v7394_v49 = vpop.f32.mrb[172].mxu0 }
 0xd0d   : > { %v7203_v17 = vpop.f32.mrb[157].mxu1  ;;  %v7396_v50 = vpop.f32.mrb[173].mxu0 }
 0xd0e   : > { %v9983_v14 = vpack.c.bf16 %v7203_v17, %v7201_v25  ;;  %v9984_v54 = vpack.c.bf16 %v7396_v50, %v7394_v49  ;;  %v7205_v29 = vpop.f32.mrb[158].mxu1  ;;  %v7398_v7 = vpop.f32.mrb[174].mxu0 }
 0xd0f   : > { %v7207_v33 = vpop.f32.mrb[159].mxu1  ;;  %v7400_v62 = vpop.f32.mrb[175].mxu0 }
 0xd10   : > { %9101 = vst [vmem:[%s14182_s19 + $0xb0] sm:$0xff] %v9983_v14  ;;  %9102 = vst [vmem:[%s14182_s19 + $0xb8] sm:$0xff] %v9984_v54  ;;  %v9991_v36 = vpack.c.bf16 %v7207_v33, %v7205_v29  ;;  %v9992_v61 = vpack.c.bf16 %v7400_v62, %v7398_v7 }
 0xd12   : > { %9109 = vst [vmem:[%s14182_s19 + $0xf0] sm:$0xff] %v9991_v36  ;;  %9110 = vst [vmem:[%s14182_s19 + $0xf8] sm:$0xff] %v9992_v61 }
 0xd14   : > { %v7211_v18 = vpop.f32.mrb[160].mxu1  ;;  %v7404_v13 = vpop.f32.mrb[176].mxu0 }
 0xd15   : > { %v7213_v22 = vpop.f32.mrb[161].mxu1  ;;  %v7406_v55 = vpop.f32.mrb[177].mxu0 }
 0xd16   : > { %v9999_v28 = vpack.c.bf16 %v7213_v22, %v7211_v18  ;;  %v10000_v5 = vpack.c.bf16 %v7406_v55, %v7404_v13  ;;  %v7215_v8 = vpop.f32.mrb[162].mxu1  ;;  %v7408_v40 = vpop.f32.mrb[178].mxu0 }
 0xd17   : > { %v7217_v27 = vpop.f32.mrb[163].mxu1  ;;  %v7410_v10 = vpop.f32.mrb[179].mxu0 }
 0xd18   : > { %9117 = vst [vmem:[%s14182_s19 + $0x130] sm:$0xff] %v9999_v28  ;;  %9118 = vst [vmem:[%s14182_s19 + $0x138] sm:$0xff] %v10000_v5  ;;  %v10007_v38 = vpack.c.bf16 %v7217_v27, %v7215_v8  ;;  %v10008_v46 = vpack.c.bf16 %v7410_v10, %v7408_v40 }
 0xd1a   : > { %9125 = vst [vmem:[%s14182_s19 + $0x170] sm:$0xff] %v10007_v38  ;;  %9126 = vst [vmem:[%s14182_s19 + $0x178] sm:$0xff] %v10008_v46 }
 0xd1c   : > { %v7221_v4 = vpop.f32.mrb[164].mxu1  ;;  %v7414_v21 = vpop.f32.mrb[180].mxu0 }
 0xd1d   : > { %v7223_v9 = vpop.f32.mrb[165].mxu1  ;;  %v7416_v60 = vpop.f32.mrb[181].mxu0 }
 0xd1e   : > { %v10015_v24 = vpack.c.bf16 %v7223_v9, %v7221_v4  ;;  %v10016_v6 = vpack.c.bf16 %v7416_v60, %v7414_v21  ;;  %v7225_v42 = vpop.f32.mrb[166].mxu1  ;;  %v7418_v15 = vpop.f32.mrb[182].mxu0 }
 0xd1f   : > { %v7227_v51 = vpop.f32.mrb[167].mxu1  ;;  %v7420_v53 = vpop.f32.mrb[183].mxu0 }
 0xd20   : > { %9133 = vst [vmem:[%s14182_s19 + $0x1b0] sm:$0xff] %v10015_v24  ;;  %9134 = vst [vmem:[%s14182_s19 + $0x1b8] sm:$0xff] %v10016_v6  ;;  %v10023_v12 = vpack.c.bf16 %v7227_v51, %v7225_v42  ;;  %v10024_v31 = vpack.c.bf16 %v7420_v53, %v7418_v15 }
 0xd22   : > { %9141 = vst [vmem:[%s14182_s19 + $0x1f0] sm:$0xff] %v10023_v12  ;;  %9142 = vst [vmem:[%s14182_s19 + $0x1f8] sm:$0xff] %v10024_v31 }
 0xd24   : > { %v7231_v1 = vpop.f32.mrb[168].mxu1  ;;  %v7424_v35 = vpop.f32.mrb[184].mxu0 }
 0xd25   : > { %v7233_v16 = vpop.f32.mrb[169].mxu1  ;;  %v7426_v20 = vpop.f32.mrb[185].mxu0 }
 0xd26   : > { %v10031_v19 = vpack.c.bf16 %v7233_v16, %v7231_v1  ;;  %v10032_v26 = vpack.c.bf16 %v7426_v20, %v7424_v35  ;;  %v7235_v59 = vpop.f32.mrb[170].mxu1  ;;  %v7428_v3 = vpop.f32.mrb[186].mxu0 }
 0xd27   : > { %v7237_v52 = vpop.f32.mrb[171].mxu1  ;;  %v7430_v47 = vpop.f32.mrb[187].mxu0 }
 0xd28   : > { %9149 = vst [vmem:[%s14182_s19 + $0x230] sm:$0xff] %v10031_v19  ;;  %9150 = vst [vmem:[%s14182_s19 + $0x238] sm:$0xff] %v10032_v26  ;;  %v10039_v45 = vpack.c.bf16 %v7237_v52, %v7235_v59  ;;  %v10040_v34 = vpack.c.bf16 %v7430_v47, %v7428_v3 }
 0xd2a   : > { %9157 = vst [vmem:[%s14182_s19 + $0x270] sm:$0xff] %v10039_v45  ;;  %9158 = vst [vmem:[%s14182_s19 + $0x278] sm:$0xff] %v10040_v34 }
 0xd2c   : > { %v7241_v37 = vpop.f32.mrb[172].mxu1  ;;  %v7434_v23 = vpop.f32.mrb[188].mxu0 }
 0xd2d   : > { %v7243_v56 = vpop.f32.mrb[173].mxu1  ;;  %v7436_v2 = vpop.f32.mrb[189].mxu0 }
 0xd2e   : > { %v10047_v43 = vpack.c.bf16 %v7243_v56, %v7241_v37  ;;  %v10048_v0 = vpack.c.bf16 %v7436_v2, %v7434_v23  ;;  %v7245_v11 = vpop.f32.mrb[174].mxu1  ;;  %v7438_v44 = vpop.f32.mrb[190].mxu0 }
 0xd2f   : > { %v7247_v30 = vpop.f32.mrb[175].mxu1  ;;  %v7440_v58 = vpop.f32.mrb[191].mxu0 }
 0xd30   : > { %9165 = vst [vmem:[%s14182_s19 + $0x2b0] sm:$0xff] %v10047_v43  ;;  %9166 = vst [vmem:[%s14182_s19 + $0x2b8] sm:$0xff] %v10048_v0  ;;  %v10055_v32 = vpack.c.bf16 %v7247_v30, %v7245_v11  ;;  %v10056_v39 = vpack.c.bf16 %v7440_v58, %v7438_v44 }
 0xd32   : > { %9173 = vst [vmem:[%s14182_s19 + $0x2f0] sm:$0xff] %v10055_v32  ;;  %9174 = vst [vmem:[%s14182_s19 + $0x2f8] sm:$0xff] %v10056_v39 }
 0xd34   : > { %v7251_v41 = vpop.f32.mrb[176].mxu1  ;;  %v7444_v48 = vpop.f32.mrb[192].mxu0 }
 0xd35   : > { %v7253_v63 = vpop.f32.mrb[177].mxu1  ;;  %v7446_v57 = vpop.f32.mrb[193].mxu0 }
 0xd36   : > { %v10063_v25 = vpack.c.bf16 %v7253_v63, %v7251_v41  ;;  %v10064_v49 = vpack.c.bf16 %v7446_v57, %v7444_v48  ;;  %v7255_v17 = vpop.f32.mrb[178].mxu1  ;;  %v7448_v50 = vpop.f32.mrb[194].mxu0 }
 0xd37   : > { %v7257_v14 = vpop.f32.mrb[179].mxu1  ;;  %v7450_v54 = vpop.f32.mrb[195].mxu0 }
 0xd38   : > { %9181 = vst [vmem:[%s14182_s19 + $0x330] sm:$0xff] %v10063_v25  ;;  %9182 = vst [vmem:[%s14182_s19 + $0x338] sm:$0xff] %v10064_v49  ;;  %v10071_v29 = vpack.c.bf16 %v7257_v14, %v7255_v17  ;;  %v10072_v7 = vpack.c.bf16 %v7450_v54, %v7448_v50 }
 0xd3a   : > { %9189 = vst [vmem:[%s14182_s19 + $0x370] sm:$0xff] %v10071_v29  ;;  %9190 = vst [vmem:[%s14182_s19 + $0x378] sm:$0xff] %v10072_v7 }
 0xd3c   : > { %v7261_v33 = vpop.f32.mrb[180].mxu1  ;;  %v7454_v62 = vpop.f32.mrb[196].mxu0 }
 0xd3d   : > { %v7263_v36 = vpop.f32.mrb[181].mxu1  ;;  %v7456_v61 = vpop.f32.mrb[197].mxu0 }
 0xd3e   : > { %v10079_v18 = vpack.c.bf16 %v7263_v36, %v7261_v33  ;;  %v10080_v13 = vpack.c.bf16 %v7456_v61, %v7454_v62  ;;  %v7265_v22 = vpop.f32.mrb[182].mxu1  ;;  %v7458_v55 = vpop.f32.mrb[198].mxu0 }
 0xd3f   : > { %v7267_v28 = vpop.f32.mrb[183].mxu1  ;;  %v7460_v5 = vpop.f32.mrb[199].mxu0 }
 0xd40   : > { %9197 = vst [vmem:[%s14182_s19 + $0x3b0] sm:$0xff] %v10079_v18  ;;  %9198 = vst [vmem:[%s14182_s19 + $0x3b8] sm:$0xff] %v10080_v13  ;;  %v10087_v8 = vpack.c.bf16 %v7267_v28, %v7265_v22  ;;  %v10088_v40 = vpack.c.bf16 %v7460_v5, %v7458_v55 }
 0xd42   : > { %9205 = vst [vmem:[%s14182_s19 + $0x3f0] sm:$0xff] %v10087_v8  ;;  %9206 = vst [vmem:[%s14182_s19 + $0x3f8] sm:$0xff] %v10088_v40 }
 0xd44   : > { %v7271_v27 = vpop.f32.mrb[184].mxu1  ;;  %v7464_v10 = vpop.f32.mrb[200].mxu0 }
 0xd45   : > { %v7273_v38 = vpop.f32.mrb[185].mxu1  ;;  %v7466_v46 = vpop.f32.mrb[201].mxu0 }
 0xd46   : > { %v10095_v4 = vpack.c.bf16 %v7273_v38, %v7271_v27  ;;  %v10096_v21 = vpack.c.bf16 %v7466_v46, %v7464_v10  ;;  %v7275_v9 = vpop.f32.mrb[186].mxu1  ;;  %v7468_v60 = vpop.f32.mrb[202].mxu0 }
 0xd47   : > { %v7277_v24 = vpop.f32.mrb[187].mxu1  ;;  %v7470_v6 = vpop.f32.mrb[203].mxu0 }
 0xd48   : > { %9213 = vst [vmem:[%s14182_s19 + $0x430] sm:$0xff] %v10095_v4  ;;  %9214 = vst [vmem:[%s14182_s19 + $0x438] sm:$0xff] %v10096_v21  ;;  %v10103_v42 = vpack.c.bf16 %v7277_v24, %v7275_v9  ;;  %v10104_v15 = vpack.c.bf16 %v7470_v6, %v7468_v60 }
 0xd4a   : > { %9221 = vst [vmem:[%s14182_s19 + $0x470] sm:$0xff] %v10103_v42  ;;  %9222 = vst [vmem:[%s14182_s19 + $0x478] sm:$0xff] %v10104_v15 }
 0xd4c   : > { %v7281_v51 = vpop.f32.mrb[188].mxu1  ;;  %v7474_v53 = vpop.f32.mrb[204].mxu0 }
 0xd4d   : > { %v7283_v12 = vpop.f32.mrb[189].mxu1  ;;  %v7476_v31 = vpop.f32.mrb[205].mxu0 }
 0xd4e   : > { %v10111_v1 = vpack.c.bf16 %v7283_v12, %v7281_v51  ;;  %v10112_v35 = vpack.c.bf16 %v7476_v31, %v7474_v53  ;;  %v7285_v16 = vpop.f32.mrb[190].mxu1  ;;  %v7478_v20 = vpop.f32.mrb[206].mxu0 }
 0xd4f   : > { %v7287_v19 = vpop.f32.mrb[191].mxu1  ;;  %v7480_v26 = vpop.f32.mrb[207].mxu0 }
 0xd50   : > { %9229 = vst [vmem:[%s14182_s19 + $0x4b0] sm:$0xff] %v10111_v1  ;;  %9230 = vst [vmem:[%s14182_s19 + $0x4b8] sm:$0xff] %v10112_v35  ;;  %v10119_v59 = vpack.c.bf16 %v7287_v19, %v7285_v16  ;;  %v10120_v3 = vpack.c.bf16 %v7480_v26, %v7478_v20 }
 0xd52   : > { %9237 = vst [vmem:[%s14182_s19 + $0x4f0] sm:$0xff] %v10119_v59  ;;  %9238 = vst [vmem:[%s14182_s19 + $0x4f8] sm:$0xff] %v10120_v3 }
 0xd54   : > { %v7291_v52 = vpop.f32.mrb[192].mxu1  ;;  %v7484_v47 = vpop.f32.mrb[208].mxu0 }
 0xd55   : > { %v7293_v45 = vpop.f32.mrb[193].mxu1  ;;  %v7486_v34 = vpop.f32.mrb[209].mxu0 }
 0xd56   : > { %v10127_v37 = vpack.c.bf16 %v7293_v45, %v7291_v52  ;;  %v10128_v23 = vpack.c.bf16 %v7486_v34, %v7484_v47  ;;  %v7295_v56 = vpop.f32.mrb[194].mxu1  ;;  %v7488_v2 = vpop.f32.mrb[210].mxu0 }
 0xd57   : > { %v7297_v43 = vpop.f32.mrb[195].mxu1  ;;  %v7490_v0 = vpop.f32.mrb[211].mxu0 }
 0xd58   : > { %9245 = vst [vmem:[%s14182_s19 + $0x530] sm:$0xff] %v10127_v37  ;;  %9246 = vst [vmem:[%s14182_s19 + $0x538] sm:$0xff] %v10128_v23  ;;  %v10135_v11 = vpack.c.bf16 %v7297_v43, %v7295_v56  ;;  %v10136_v44 = vpack.c.bf16 %v7490_v0, %v7488_v2 }
 0xd5a   : > { %9253 = vst [vmem:[%s14182_s19 + $0x570] sm:$0xff] %v10135_v11  ;;  %9254 = vst [vmem:[%s14182_s19 + $0x578] sm:$0xff] %v10136_v44 }
 0xd5c   : > { %v7301_v30 = vpop.f32.mrb[196].mxu1  ;;  %v7494_v58 = vpop.f32.mrb[212].mxu0 }
 0xd5d   : > { %v7303_v32 = vpop.f32.mrb[197].mxu1  ;;  %v7496_v39 = vpop.f32.mrb[213].mxu0 }
 0xd5e   : > { %v10143_v41 = vpack.c.bf16 %v7303_v32, %v7301_v30  ;;  %v10144_v48 = vpack.c.bf16 %v7496_v39, %v7494_v58  ;;  %v7305_v63 = vpop.f32.mrb[198].mxu1  ;;  %v7498_v57 = vpop.f32.mrb[214].mxu0 }
 0xd5f   : > { %v7307_v25 = vpop.f32.mrb[199].mxu1  ;;  %v7500_v49 = vpop.f32.mrb[215].mxu0 }
 0xd60   : > { %9261 = vst [vmem:[%s14182_s19 + $0x5b0] sm:$0xff] %v10143_v41  ;;  %9262 = vst [vmem:[%s14182_s19 + $0x5b8] sm:$0xff] %v10144_v48  ;;  %v10151_v17 = vpack.c.bf16 %v7307_v25, %v7305_v63  ;;  %v10152_v50 = vpack.c.bf16 %v7500_v49, %v7498_v57 }
 0xd62   : > { %9269 = vst [vmem:[%s14182_s19 + $0x5f0] sm:$0xff] %v10151_v17  ;;  %9270 = vst [vmem:[%s14182_s19 + $0x5f8] sm:$0xff] %v10152_v50 }
 0xd64   : > { %v7311_v14 = vpop.f32.mrb[200].mxu1  ;;  %v7504_v54 = vpop.f32.mrb[216].mxu0 }
 0xd65   : > { %v7313_v29 = vpop.f32.mrb[201].mxu1  ;;  %v7506_v7 = vpop.f32.mrb[217].mxu0 }
 0xd66   : > { %v10159_v33 = vpack.c.bf16 %v7313_v29, %v7311_v14  ;;  %v10160_v62 = vpack.c.bf16 %v7506_v7, %v7504_v54  ;;  %v7315_v36 = vpop.f32.mrb[202].mxu1  ;;  %v7508_v61 = vpop.f32.mrb[218].mxu0 }
 0xd67   : > { %v7317_v18 = vpop.f32.mrb[203].mxu1  ;;  %v7510_v13 = vpop.f32.mrb[219].mxu0 }
 0xd68   : > { %9277 = vst [vmem:[%s14182_s19 + $0x630] sm:$0xff] %v10159_v33  ;;  %9278 = vst [vmem:[%s14182_s19 + $0x638] sm:$0xff] %v10160_v62  ;;  %v10167_v22 = vpack.c.bf16 %v7317_v18, %v7315_v36  ;;  %v10168_v55 = vpack.c.bf16 %v7510_v13, %v7508_v61 }
 0xd6a   : > { %9285 = vst [vmem:[%s14182_s19 + $0x670] sm:$0xff] %v10167_v22  ;;  %9286 = vst [vmem:[%s14182_s19 + $0x678] sm:$0xff] %v10168_v55 }
 0xd6c   : > { %v7321_v28 = vpop.f32.mrb[204].mxu1  ;;  %v7514_v5 = vpop.f32.mrb[220].mxu0 }
 0xd6d   : > { %v7323_v8 = vpop.f32.mrb[205].mxu1  ;;  %v7516_v40 = vpop.f32.mrb[221].mxu0 }
 0xd6e   : > { %v10175_v27 = vpack.c.bf16 %v7323_v8, %v7321_v28  ;;  %v10176_v10 = vpack.c.bf16 %v7516_v40, %v7514_v5  ;;  %v7325_v38 = vpop.f32.mrb[206].mxu1  ;;  %v7518_v46 = vpop.f32.mrb[222].mxu0 }
 0xd6f   : > { %v7327_v4 = vpop.f32.mrb[207].mxu1  ;;  %v7520_v21 = vpop.f32.mrb[223].mxu0 }
 0xd70   : > { %9293 = vst [vmem:[%s14182_s19 + $0x6b0] sm:$0xff] %v10175_v27  ;;  %9294 = vst [vmem:[%s14182_s19 + $0x6b8] sm:$0xff] %v10176_v10  ;;  %v10183_v9 = vpack.c.bf16 %v7327_v4, %v7325_v38  ;;  %v10184_v60 = vpack.c.bf16 %v7520_v21, %v7518_v46 }
 0xd72   : > { %9301 = vst [vmem:[%s14182_s19 + $0x6f0] sm:$0xff] %v10183_v9  ;;  %9302 = vst [vmem:[%s14182_s19 + $0x6f8] sm:$0xff] %v10184_v60 }
 0xd74   : > { %v7331_v24 = vpop.f32.mrb[208].mxu1  ;;  %v7524_v6 = vpop.f32.mrb[224].mxu0 }
 0xd75   : > { %v7333_v42 = vpop.f32.mrb[209].mxu1  ;;  %v7526_v15 = vpop.f32.mrb[225].mxu0 }
 0xd76   : > { %v10191_v51 = vpack.c.bf16 %v7333_v42, %v7331_v24  ;;  %v10192_v53 = vpack.c.bf16 %v7526_v15, %v7524_v6  ;;  %v7335_v12 = vpop.f32.mrb[210].mxu1  ;;  %v7528_v31 = vpop.f32.mrb[226].mxu0 }
 0xd77   : > { %v7337_v1 = vpop.f32.mrb[211].mxu1  ;;  %v7530_v35 = vpop.f32.mrb[227].mxu0 }
 0xd78   : > { %9309 = vst [vmem:[%s14182_s19 + $0x730] sm:$0xff] %v10191_v51  ;;  %9310 = vst [vmem:[%s14182_s19 + $0x738] sm:$0xff] %v10192_v53  ;;  %v10199_v16 = vpack.c.bf16 %v7337_v1, %v7335_v12  ;;  %v10200_v20 = vpack.c.bf16 %v7530_v35, %v7528_v31 }
 0xd7a   : > { %9317 = vst [vmem:[%s14182_s19 + $0x770] sm:$0xff] %v10199_v16  ;;  %9318 = vst [vmem:[%s14182_s19 + $0x778] sm:$0xff] %v10200_v20 }
 0xd7c   : > { %v7341_v19 = vpop.f32.mrb[212].mxu1  ;;  %v7534_v26 = vpop.f32.mrb[228].mxu0 }
 0xd7d   : > { %v7343_v59 = vpop.f32.mrb[213].mxu1  ;;  %v7536_v3 = vpop.f32.mrb[229].mxu0 }
 0xd7e   : > { %v10207_v52 = vpack.c.bf16 %v7343_v59, %v7341_v19  ;;  %v10208_v47 = vpack.c.bf16 %v7536_v3, %v7534_v26  ;;  %v7345_v45 = vpop.f32.mrb[214].mxu1  ;;  %v7538_v34 = vpop.f32.mrb[230].mxu0 }
 0xd7f   : > { %v7347_v37 = vpop.f32.mrb[215].mxu1  ;;  %v7540_v23 = vpop.f32.mrb[231].mxu0 }
 0xd80   : > { %9325 = vst [vmem:[%s14182_s19 + $0x7b0] sm:$0xff] %v10207_v52  ;;  %9326 = vst [vmem:[%s14182_s19 + $0x7b8] sm:$0xff] %v10208_v47  ;;  %v10215_v56 = vpack.c.bf16 %v7347_v37, %v7345_v45  ;;  %v10216_v2 = vpack.c.bf16 %v7540_v23, %v7538_v34 }
 0xd82   : > { %9333 = vst [vmem:[%s14182_s19 + $0x7f0] sm:$0xff] %v10215_v56  ;;  %9334 = vst [vmem:[%s14182_s19 + $0x7f8] sm:$0xff] %v10216_v2 }
 0xd83   : > { %11306 = shalt.err (!%p11303_p5)
}
 0xd84   : > { %s11307_s30 = scalar_lea.hbm %s14766_s21, 32768  ;;  %s11311_s20 = scalar_lea.hbm %s14838_s16, 65536 }
 0xd85   : > { %p11308_p6 = scmp.ne.s32.totalorder %s14766_s21, %s11307_s30  ;;  %p11312_p10 = scmp.lt.u32.totalorder %s14766_s21, %s14838_s16 }
 0xd86   : > { %p11313_p11 = scmp.lt.u32.totalorder %s11311_s20, %s11307_s30  ;;  %p11315_p13 = scmp.lt.u32.totalorder %s11307_s30, %s14766_s21 }
 0xd87   : > { %p11309_p7 = pnand %p11308_p6, %p11502_p4 }
 0xd88   : > { %p11314_p12 = por %p11313_p11, %p11312_p10 }
 0xd89   : > { %p11310_p9 = pneg %p11309_p7 }
 0xd8a   : > { %p11316_p0 = por %p11315_p13, %p11314_p12 }
 0xd8c   : > { %p11317_p1 = pnand %p11316_p0, %p11310_p9 }
 0xd8e   : > { %11320 = shalt.err (!%p11317_p1)
}
 0xd8f   : > { %s11375_s27 = smov 1024   ;;  %s11376_s23 = smov 64  }
 0xd90   : > { %10795 = dma.vmem_to_hbm [thread:$0]  (%p11502_p4), %s14768_s26, 32768, %s14766_s21, %s14776_s24, %s11375_s27, %s11375_s27, %s11376_s23  }
 0xd91 PF: > { %s14971_s25 = sld [smem:[#allocation9_spill]]  ;;  %s14972_s29 = sld [smem:[#allocation6_spill]] }
 0xd97   : > { %p10801_p2 = scmp.ge.s32.totalorder %s14971_s25, 2  ;;  %s9367_s18 = sand.u32 1, %s14972_s29  }
 0xd98   : > { %s9368_s30 = scalar_lea.sflag [#allocation4], %s9367_s18 }
 0xd99   : > { %p10798_p3 = pnand %p10801_p2, %p11509_p8 }
 0xd9b   : > { %11346 = dma.done.wait (!%p10798_p3), %s9368_s30, 32768  }
 0xd9c   : > { %11348 = vsyncadd (!%p10798_p3), %s9368_s30, 4294934528  ;;  %s29_s26 = sadd.s32 1, %s14971_s25   ;;  %s14974_s20 = sld [smem:[#allocation7_spill]] }
 0xd9d   : > { %p26_p5 = scmp.ge.s32.totalorder %s29_s26, 4   ;;  %s14975_s23 = sld [smem:[#allocation12_spill]] }
 0xd9e   : > { %s14976_s24 = sld [smem:[#allocation8_spill]]  ;;  %s14977_s25 = sld [smem:[#allocation10_spill]] }
 0xd9f   : > { %s14978_s21 = smov %s11355_s22  ;;  %28 = sbr.rel (!%p26_p5) target bundleno = 6 (0x6), region = 126 }
 0xda2   : > { %s14979_s22 = smov %s14974_s20 }
 0xda6   :  { %9373 = vsyncpa [#allocation4], 1 }
 0xda7   :  { %9375 = vsyncpa [#allocation4 + $0x1], 1 }

</bundles_post_ra>
